<compile_context>
chip_gen: v7x
topology: tpu7x:2x2x1
jax: 0.10.0
libtpu: 0.0.40
codegen_flags: <defaults>
</compile_context>

<pallas_src>
import functools

import jax
import jax.numpy as jnp
from jax.experimental import pallas as pl
from jax.experimental.pallas import tpu as pltpu

LANE = 128
SUBLANE = 8


def _round_up(x, m):
    return ((x + m - 1) // m) * m


def _pad2(a, rows, cols):
    return jnp.pad(a, ((0, rows - a.shape[0]), (0, cols - a.shape[1])))


# ----------------------------------------------------------------------------
# Kernel
# ----------------------------------------------------------------------------
def _mlp_cat_fused_kernel(*refs, num_layers: int):
    """Fused forward: cat(+swap) -> [Linear, ReLU]*(L-1) -> Linear -> average.

    refs = (xi, xj, w0a, w0b, b0, [w1, b1, ..., w_{L-1}, b_{L-1}], out, [acc])
    `acc` (scratch, (2*tm, Hp) f32) is only present when num_layers > 1.
    """
    xi_ref, xj_ref, w0a_ref, w0b_ref, b0_ref = refs[:5]
    tm = xi_ref.shape[0]

    # Cast is a no-op if the producer already supplies bf16 inputs.
    xi = xi_ref[...].astype(jnp.bfloat16)
    xj = xj_ref[...].astype(jnp.bfloat16)
    w0a = w0a_ref[...]          # bf16 (C, H0p): rows for the x_i half
    w0b = w0b_ref[...]          # bf16 (C, H0p): rows for the x_j half
    b0 = b0_ref[...]            # f32  (1, H0p)

    # Layer 0 on both orderings:  cat([a, b]) @ W0 == a @ W0a + b @ W0b,
    # so the concat never materializes.
    s1 = (jnp.dot(xi, w0a, preferred_element_type=jnp.float32)
          + jnp.dot(xj, w0b, preferred_element_type=jnp.float32))
    s2 = (jnp.dot(xj, w0a, preferred_element_type=jnp.float32)
          + jnp.dot(xi, w0b, preferred_element_type=jnp.float32))

    if num_layers == 1:
        out_ref = refs[5]
        # (s1 + b + s2 + b) / 2 == (s1 + s2) / 2 + b
        out_ref[...] = (0.5 * (s1 + s2) + b0).astype(out_ref.dtype)
        return

    layer_refs = refs[5:5 + 2 * (num_layers - 1)]
    out_ref = refs[5 + 2 * (num_layers - 1)]
    acc_ref = refs[6 + 2 * (num_layers - 1)]     # VMEM scratch (2*tm, Hp) f32

    # Both streams live row-stacked in persistent VMEM scratch so every hidden
    # layer is ONE (2*tm, H) x (H, H) MXU matmul with no concat/slice copies.
    acc_ref[:tm, :] = s1 + b0
    acc_ref[tm:, :] = s2 + b0

    for layer in range(1, num_layers - 1):
        w = layer_refs[2 * (layer - 1)][...]          # bf16 (Hp, Hp)
        b = layer_refs[2 * (layer - 1) + 1][...]      # f32  (1, Hp)
        # TODO(synk): dropout is identity here (eval mode / training=False).
        h = jnp.maximum(acc_ref[...], 0.0).astype(jnp.bfloat16)
        acc_ref[...] = jnp.dot(h, w, preferred_element_type=jnp.float32) + b

    # Final layer: each stream's half is read via a ref view (no value slice),
    # then averaged:  (x1 W + b + x2 W + b) / 2 == 0.5 * (x1 W + x2 W) + b.
    w_last = layer_refs[-2][...]                       # bf16 (Hp, out_dim)
    b_last = layer_refs[-1][...]                       # f32  (1, out_dim)
    h1 = jnp.maximum(acc_ref[:tm, :], 0.0).astype(jnp.bfloat16)
    h2 = jnp.maximum(acc_ref[tm:, :], 0.0).astype(jnp.bfloat16)
    r = (jnp.dot(h1, w_last, preferred_element_type=jnp.float32)
         + jnp.dot(h2, w_last, preferred_element_type=jnp.float32))
    out_ref[...] = (0.5 * r + b_last).astype(out_ref.dtype)


# ----------------------------------------------------------------------------
# Parameter preparation (hoisted out of the forward path; run once)
# ----------------------------------------------------------------------------
def prepare_params(params):
    """Pad / cast layer parameters once and split W0 into its two halves."""
    num_layers = len(params)
    w0, b0 = params[0]
    two_c, h0 = w0.shape
    assert two_c % 2 == 0, "first layer expects concatenated 2*C input"
    C = two_c // 2
    out_dim = params[-1][0].shape[1]

    # Hidden (non-final) widths padded to the 128-lane boundary (cheap, done
    # once). The FINAL output width stays unpadded -> 16x less HBM writeback
    # when out_dim is small; lane-dense stores only matter when stores bind.
    h0p = _round_up(h0, LANE) if num_layers > 1 else h0
    w0a = _pad2(w0[:C], C, h0p).astype(jnp.bfloat16)
    w0b = _pad2(w0[C:], C, h0p).astype(jnp.bfloat16)
    b0p = jnp.pad(b0, (0, h0p - h0)).reshape(1, h0p).astype(jnp.float32)

    layers = []
    for i in range(1, num_layers):
        w, b = params[i]
        kin, kout = w.shape
        kp = _round_up(kin, LANE)
        np_ = _round_up(kout, LANE) if i < num_layers - 1 else kout
        layers.append((_pad2(w, kp, np_).astype(jnp.bfloat16),
                       jnp.pad(b, (0, np_ - kout))
                       .reshape(1, np_).astype(jnp.float32)))

    return dict(C=C, out_dim=out_dim, hp=h0p, num_layers=num_layers,
                w0a=w0a, w0b=w0b, b0=b0p, layers=tuple(layers))


def _vmem_limit_bytes(tm, C, in_itemsize, out_dim, out_itemsize, hp,
                      weight_args, num_layers):
    """Footprint-based VMEM request, clamped to 75% of device capacity."""
    in_bytes = 2 * 2 * tm * C * in_itemsize          # x_i, x_j double-buffered
    out_bytes = 2 * tm * out_dim * out_itemsize      # output double-buffered
    w_bytes = sum(int(a.size) * a.dtype.itemsize for a in weight_args)
    acc_bytes = 2 * tm * hp * 4 if num_layers > 1 else 0
    work_bytes = 4 * 2 * tm * max(hp, LANE) * 4      # live-value headroom
    need = in_bytes + out_bytes + w_bytes + acc_bytes + work_bytes + (2 << 20)
    try:
        cap = pltpu.get_tpu_info().vmem_capacity_bytes
    except Exception:
        cap = 64 * 1024 * 1024                       # conservative: v7x per-TC
    return int(min(max(need, 32 * 1024 * 1024), int(cap * 0.75)))


# ----------------------------------------------------------------------------
# Forward wrapper
# ----------------------------------------------------------------------------
def mlp_cat_forward(x_i, x_j, prepared, *, tm_max: int = 512):
    """Eval-mode MLPCatPredictor.forward(x_i, x_j) via one fused Pallas call."""
    E, C = x_i.shape
    assert x_j.shape == (E, C) and C == prepared["C"]
    num_layers = prepared["num_layers"]
    out_dim = prepared["out_dim"]
    hp = prepared["hp"]

    # Row tile: large (grid-step overhead ~0.35us, features are tiny), but a
    # multiple of 8 and never larger than needed.  No row padding: the ragged
    # last tile is masked by Pallas (compute is row-independent, OOB output
    # rows are dropped).  For realistic E this keeps grid >= 2 so both v7x
    # TensorCores get work under dimension_semantics=("parallel",).
    tm = min(tm_max, _round_up(max(E, 1), SUBLANE))
    grid = (pl.cdiv(E, tm),)

    weight_args = [prepared["w0a"], prepared["w0b"], prepared["b0"]]
    for w, b in prepared["layers"]:
        weight_args.extend([w, b])

    vmem_limit = _vmem_limit_bytes(tm, C, x_i.dtype.itemsize, out_dim,
                                   x_i.dtype.itemsize, hp, weight_args,
                                   num_layers)

    def build(single_buffer_weights):
        def const_spec(shape):
            # Grid-invariant operands: single-buffer them (no point double
            # buffering a block that is never re-fetched).
            if single_buffer_weights:
                return pl.BlockSpec(shape, lambda *_: (0,) * len(shape),
                                    pipeline_mode=pl.Buffered(1))
            return pl.BlockSpec(shape, lambda *_: (0,) * len(shape))

        in_specs = [
            pl.BlockSpec((tm, C), lambda i: (i, 0)),   # x_i rows (unpadded)
            pl.BlockSpec((tm, C), lambda i: (i, 0)),   # x_j rows (unpadded)
        ] + [const_spec(a.shape) for a in weight_args]

        scratch_shapes = (
            [pltpu.VMEM((2 * tm, hp), jnp.float32)] if num_layers > 1 else [])

        return pl.pallas_call(
            functools.partial(_mlp_cat_fused_kernel, num_layers=num_layers),
            out_shape=jax.ShapeDtypeStruct((E, out_dim), x_i.dtype),
            grid_spec=pltpu.PrefetchScalarGridSpec(
                num_scalar_prefetch=0,
                grid=grid,
                in_specs=in_specs,
                out_specs=pl.BlockSpec((tm, out_dim), lambda i: (i, 0)),
                scratch_shapes=scratch_shapes,
            ),
            compiler_params=pltpu.CompilerParams(
                dimension_semantics=("parallel",),
                vmem_limit_bytes=vmem_limit,
            ),
        )

    args = (x_i, x_j, *weight_args)
    try:
        return build(True)(*args)
    except Exception:
        # Fallback for jax builds that reject Buffered(1) single-buffering.
        return build(False)(*args)


# ----------------------------------------------------------------------------
# Init + plain-JAX reference
# ----------------------------------------------------------------------------
def init_params(key, in_channels, hidden_channels, out_channels, num_layers,
                dtype=jnp.float32):
    """torch.nn.Linear-style init; the module doubles in_channels."""
    in_channels = 2 * in_channels
    params = []
    for i in range(num_layers):
        fan_in = in_channels if i == 0 else hidden_channels
        fan_out = out_channels if i == num_layers - 1 else hidden_channels
        key, kw, kb = jax.random.split(key, 3)
        bound = 1.0 / (fan_in ** 0.5)
        # PyTorch weight is (out, in); store transposed (in, out) for x @ W.
        w = jax.random.uniform(kw, (fan_in, fan_out), dtype, -bound, bound)
        b = jax.random.uniform(kb, (fan_out,), dtype, -bound, bound)
        params.append((w, b))
    return params


def ref_forward(x_i, x_j, params):
    """Plain-JAX reference following the PyTorch graph (eval mode), with the
    same bf16-matmul / f32-accumulate numerics as the kernel."""
    def mlp(x):
        h = x
        for layer, (w, b) in enumerate(params):
            h = jnp.dot(h.astype(jnp.bfloat16), w.astype(jnp.bfloat16),
                        preferred_element_type=jnp.float32) + b
            if layer < len(params) - 1:
                h = jnp.maximum(h, 0.0)
        return h
    x1 = jnp.concatenate([x_i, x_j], axis=-1)
    x2 = jnp.concatenate([x_j, x_i], axis=-1)
    return 0.5 * (mlp(x1) + mlp(x2))


if __name__ == "__main__":
    key = jax.random.PRNGKey(0)
    num_edges = 1000            # exercises a 2-step grid + ragged final tile
    in_channels, hidden_channels, out_channels = 16, 64, 8
    num_layers = 3
    dropout = 0.5               # identity in eval mode

    kxi, kxj, kp = jax.random.split(key, 3)
    x_i = jax.random.normal(kxi, (num_edges, in_channels), jnp.float32)
    x_j = jax.random.normal(kxj, (num_edges, in_channels), jnp.float32)
    params = init_params(kp, in_channels, hidden_channels, out_channels,
                         num_layers)

    prepared = prepare_params(params)   # weight pad/cast hoisted, done once
    out = mlp_cat_forward(x_i, x_j, prepared, tm_max=512)
    jax.block_until_ready(out)

    ref = ref_forward(x_i, x_j, params)
    assert out.shape == (num_edges, out_channels)
    max_err = float(jnp.max(jnp.abs(out - ref)))
    assert jnp.allclose(out, ref, atol=1e-3, rtol=1e-3), max_err

    print("KERNEL_OK")
</pallas_src>

<mosaic_0001>
module attributes {stable_mosaic.version = 11 : i64} {
  func.func @_mlp_cat_fused_kernel(%arg0: i32, %arg1: memref<512x16xf32, #tpu.memory_space<vmem>>, %arg2: memref<512x16xf32, #tpu.memory_space<vmem>>, %arg3: memref<16x128xbf16, #tpu.memory_space<vmem>>, %arg4: memref<16x128xbf16, #tpu.memory_space<vmem>>, %arg5: memref<1x128xf32, #tpu.memory_space<vmem>>, %arg6: memref<128x128xbf16, #tpu.memory_space<vmem>>, %arg7: memref<1x128xf32, #tpu.memory_space<vmem>>, %arg8: memref<128x8xbf16, #tpu.memory_space<vmem>>, %arg9: memref<1x8xf32, #tpu.memory_space<vmem>>, %arg10: memref<512x8xf32, #tpu.memory_space<vmem>>, %arg11: memref<1024x128xf32, #tpu.memory_space<vmem>>) attributes {dimension_semantics = [#tpu.dimension_semantics<parallel>], iteration_bounds = array<i64: 2>, scalar_prefetch = 0 : i64, scratch_operands = 1 : i64, tpu.core_type = #tpu.core_type<tc>, window_params = [{transform_indices = @transform_0, window_bounds = array<i64: 512, 16>}, {transform_indices = @transform_1, window_bounds = array<i64: 512, 16>}, {pipeline_mode = #tpu.pipeline_mode<synchronous>, transform_indices = @transform_2, window_bounds = array<i64: 16, 128>}, {pipeline_mode = #tpu.pipeline_mode<synchronous>, transform_indices = @transform_3, window_bounds = array<i64: 16, 128>}, {pipeline_mode = #tpu.pipeline_mode<synchronous>, transform_indices = @transform_4, window_bounds = array<i64: 1, 128>}, {pipeline_mode = #tpu.pipeline_mode<synchronous>, transform_indices = @transform_5, window_bounds = array<i64: 128, 128>}, {pipeline_mode = #tpu.pipeline_mode<synchronous>, transform_indices = @transform_6, window_bounds = array<i64: 1, 128>}, {pipeline_mode = #tpu.pipeline_mode<synchronous>, transform_indices = @transform_7, window_bounds = array<i64: 128, 8>}, {pipeline_mode = #tpu.pipeline_mode<synchronous>, transform_indices = @transform_8, window_bounds = array<i64: 1, 8>}, {transform_indices = @transform_9, window_bounds = array<i64: 512, 8>}]} {
    %c0 = arith.constant 0 : index
    %c0_0 = arith.constant 0 : index
    %0 = vector.load %arg1[%c0, %c0_0] : memref<512x16xf32, #tpu.memory_space<vmem>>, vector<512x16xf32>
    %1 = arith.truncf %0 : vector<512x16xf32> to vector<512x16xbf16>
    %c0_1 = arith.constant 0 : index
    %c0_2 = arith.constant 0 : index
    %2 = vector.load %arg2[%c0_1, %c0_2] : memref<512x16xf32, #tpu.memory_space<vmem>>, vector<512x16xf32>
    %3 = arith.truncf %2 : vector<512x16xf32> to vector<512x16xbf16>
    %c0_3 = arith.constant 0 : index
    %c0_4 = arith.constant 0 : index
    %4 = vector.load %arg3[%c0_3, %c0_4] : memref<16x128xbf16, #tpu.memory_space<vmem>>, vector<16x128xbf16>
    %c0_5 = arith.constant 0 : index
    %c0_6 = arith.constant 0 : index
    %5 = vector.load %arg4[%c0_5, %c0_6] : memref<16x128xbf16, #tpu.memory_space<vmem>>, vector<16x128xbf16>
    %c0_7 = arith.constant 0 : index
    %c0_8 = arith.constant 0 : index
    %6 = vector.load %arg5[%c0_7, %c0_8] : memref<1x128xf32, #tpu.memory_space<vmem>>, vector<1x128xf32>
    %cst = arith.constant dense<0.000000e+00> : vector<512x128xf32>
    %7 = tpu.matmul %1, %4, %cst {dimension_numbers = #tpu.dot_dimension_numbers<[1], [0], [0], [1], [0, 0, 1, 1], [], []>} : vector<512x16xbf16>, vector<16x128xbf16>, vector<512x128xf32> -> vector<512x128xf32>
    %cst_9 = arith.constant dense<0.000000e+00> : vector<512x128xf32>
    %8 = tpu.matmul %3, %5, %cst_9 {dimension_numbers = #tpu.dot_dimension_numbers<[1], [0], [0], [1], [0, 0, 1, 1], [], []>} : vector<512x16xbf16>, vector<16x128xbf16>, vector<512x128xf32> -> vector<512x128xf32>
    %9 = arith.addf %7, %8 : vector<512x128xf32>
    %cst_10 = arith.constant dense<0.000000e+00> : vector<512x128xf32>
    %10 = tpu.matmul %3, %4, %cst_10 {dimension_numbers = #tpu.dot_dimension_numbers<[1], [0], [0], [1], [0, 0, 1, 1], [], []>} : vector<512x16xbf16>, vector<16x128xbf16>, vector<512x128xf32> -> vector<512x128xf32>
    %cst_11 = arith.constant dense<0.000000e+00> : vector<512x128xf32>
    %11 = tpu.matmul %1, %5, %cst_11 {dimension_numbers = #tpu.dot_dimension_numbers<[1], [0], [0], [1], [0, 0, 1, 1], [], []>} : vector<512x16xbf16>, vector<16x128xbf16>, vector<512x128xf32> -> vector<512x128xf32>
    %12 = arith.addf %10, %11 : vector<512x128xf32>
    %13 = vector.broadcast %6 : vector<1x128xf32> to vector<512x128xf32>
    %14 = arith.addf %9, %13 : vector<512x128xf32>
    %c0_12 = arith.constant 0 : index
    %c0_13 = arith.constant 0 : index
    %15 = vector.load %arg11[%c0_12, %c0_13] : memref<1024x128xf32, #tpu.memory_space<vmem>>, vector<512x128xf32>
    tpu.vector_store %arg11[%c0_12, %c0_13], %14 {strides = array<i32>} : memref<1024x128xf32, #tpu.memory_space<vmem>>, vector<512x128xf32>,
    %16 = vector.broadcast %6 : vector<1x128xf32> to vector<512x128xf32>
    %17 = arith.addf %12, %16 : vector<512x128xf32>
    %c512 = arith.constant 512 : index
    %c0_14 = arith.constant 0 : index
    %18 = vector.load %arg11[%c512, %c0_14] : memref<1024x128xf32, #tpu.memory_space<vmem>>, vector<512x128xf32>
    tpu.vector_store %arg11[%c512, %c0_14], %17 {strides = array<i32>} : memref<1024x128xf32, #tpu.memory_space<vmem>>, vector<512x128xf32>,
    %c0_15 = arith.constant 0 : index
    %c0_16 = arith.constant 0 : index
    %19 = vector.load %arg6[%c0_15, %c0_16] : memref<128x128xbf16, #tpu.memory_space<vmem>>, vector<128x128xbf16>
    %c0_17 = arith.constant 0 : index
    %c0_18 = arith.constant 0 : index
    %20 = vector.load %arg7[%c0_17, %c0_18] : memref<1x128xf32, #tpu.memory_space<vmem>>, vector<1x128xf32>
    %c0_19 = arith.constant 0 : index
    %c0_20 = arith.constant 0 : index
    %21 = vector.load %arg11[%c0_19, %c0_20] : memref<1024x128xf32, #tpu.memory_space<vmem>>, vector<1024x128xf32>
    %cst_21 = arith.constant 0.000000e+00 : f32
    %22 = vector.broadcast %cst_21 : f32 to vector<1024x128xf32>
    %23 = arith.maximumf %21, %22 : vector<1024x128xf32>
    %24 = arith.truncf %23 : vector<1024x128xf32> to vector<1024x128xbf16>
    %cst_22 = arith.constant dense<0.000000e+00> : vector<1024x128xf32>
    %25 = tpu.matmul %24, %19, %cst_22 {dimension_numbers = #tpu.dot_dimension_numbers<[1], [0], [0], [1], [0, 0, 1, 1], [], []>} : vector<1024x128xbf16>, vector<128x128xbf16>, vector<1024x128xf32> -> vector<1024x128xf32>
    %26 = vector.broadcast %20 : vector<1x128xf32> to vector<1024x128xf32>
    %27 = arith.addf %25, %26 : vector<1024x128xf32>
    %c0_23 = arith.constant 0 : index
    %c0_24 = arith.constant 0 : index
    %28 = vector.load %arg11[%c0_23, %c0_24] : memref<1024x128xf32, #tpu.memory_space<vmem>>, vector<1024x128xf32>
    tpu.vector_store %arg11[%c0_23, %c0_24], %27 {strides = array<i32>} : memref<1024x128xf32, #tpu.memory_space<vmem>>, vector<1024x128xf32>,
    %c0_25 = arith.constant 0 : index
    %c0_26 = arith.constant 0 : index
    %29 = vector.load %arg8[%c0_25, %c0_26] : memref<128x8xbf16, #tpu.memory_space<vmem>>, vector<128x8xbf16>
    %c0_27 = arith.constant 0 : index
    %c0_28 = arith.constant 0 : index
    %30 = vector.load %arg9[%c0_27, %c0_28] : memref<1x8xf32, #tpu.memory_space<vmem>>, vector<1x8xf32>
    %c0_29 = arith.constant 0 : index
    %c0_30 = arith.constant 0 : index
    %31 = vector.load %arg11[%c0_29, %c0_30] : memref<1024x128xf32, #tpu.memory_space<vmem>>, vector<512x128xf32>
    %cst_31 = arith.constant 0.000000e+00 : f32
    %32 = vector.broadcast %cst_31 : f32 to vector<512x128xf32>
    %33 = arith.maximumf %31, %32 : vector<512x128xf32>
    %34 = arith.truncf %33 : vector<512x128xf32> to vector<512x128xbf16>
    %c512_32 = arith.constant 512 : index
    %c0_33 = arith.constant 0 : index
    %35 = vector.load %arg11[%c512_32, %c0_33] : memref<1024x128xf32, #tpu.memory_space<vmem>>, vector<512x128xf32>
    %cst_34 = arith.constant 0.000000e+00 : f32
    %36 = vector.broadcast %cst_34 : f32 to vector<512x128xf32>
    %37 = arith.maximumf %35, %36 : vector<512x128xf32>
    %38 = arith.truncf %37 : vector<512x128xf32> to vector<512x128xbf16>
    %cst_35 = arith.constant dense<0.000000e+00> : vector<512x8xf32>
    %39 = tpu.matmul %34, %29, %cst_35 {dimension_numbers = #tpu.dot_dimension_numbers<[1], [0], [0], [1], [0, 0, 1, 1], [], []>} : vector<512x128xbf16>, vector<128x8xbf16>, vector<512x8xf32> -> vector<512x8xf32>
    %cst_36 = arith.constant dense<0.000000e+00> : vector<512x8xf32>
    %40 = tpu.matmul %38, %29, %cst_36 {dimension_numbers = #tpu.dot_dimension_numbers<[1], [0], [0], [1], [0, 0, 1, 1], [], []>} : vector<512x128xbf16>, vector<128x8xbf16>, vector<512x8xf32> -> vector<512x8xf32>
    %41 = arith.addf %39, %40 : vector<512x8xf32>
    %cst_37 = arith.constant 5.000000e-01 : f32
    %42 = vector.broadcast %cst_37 : f32 to vector<512x8xf32>
    %43 = arith.mulf %42, %41 : vector<512x8xf32>
    %44 = vector.broadcast %30 : vector<1x8xf32> to vector<512x8xf32>
    %45 = arith.addf %43, %44 : vector<512x8xf32>
    %c0_38 = arith.constant 0 : index
    %c0_39 = arith.constant 0 : index
    %46 = vector.load %arg10[%c0_38, %c0_39] : memref<512x8xf32, #tpu.memory_space<vmem>>, vector<512x8xf32>
    tpu.vector_store %arg10[%c0_38, %c0_39], %45 {strides = array<i32>} : memref<512x8xf32, #tpu.memory_space<vmem>>, vector<512x8xf32>,
    return
  }
  func.func @transform_0(%arg0: i32) -> (i32, i32) {
    %c0_i32 = arith.constant 0 : i32
    %c0_i32_0 = arith.constant 0 : i32
    return %arg0, %c0_i32 : i32, i32
  }
  func.func @transform_1(%arg0: i32) -> (i32, i32) {
    %c0_i32 = arith.constant 0 : i32
    %c0_i32_0 = arith.constant 0 : i32
    return %arg0, %c0_i32 : i32, i32
  }
  func.func @transform_2(%arg0: i32) -> (i32, i32) {
    %c0_i32 = arith.constant 0 : i32
    %c0_i32_0 = arith.constant 0 : i32
    %c0_i32_1 = arith.constant 0 : i32
    return %c0_i32, %c0_i32_0 : i32, i32
  }
  func.func @transform_3(%arg0: i32) -> (i32, i32) {
    %c0_i32 = arith.constant 0 : i32
    %c0_i32_0 = arith.constant 0 : i32
    %c0_i32_1 = arith.constant 0 : i32
    return %c0_i32, %c0_i32_0 : i32, i32
  }
  func.func @transform_4(%arg0: i32) -> (i32, i32) {
    %c0_i32 = arith.constant 0 : i32
    %c0_i32_0 = arith.constant 0 : i32
    %c0_i32_1 = arith.constant 0 : i32
    return %c0_i32, %c0_i32_0 : i32, i32
  }
  func.func @transform_5(%arg0: i32) -> (i32, i32) {
    %c0_i32 = arith.constant 0 : i32
    %c0_i32_0 = arith.constant 0 : i32
    %c0_i32_1 = arith.constant 0 : i32
    return %c0_i32, %c0_i32_0 : i32, i32
  }
  func.func @transform_6(%arg0: i32) -> (i32, i32) {
    %c0_i32 = arith.constant 0 : i32
    %c0_i32_0 = arith.constant 0 : i32
    %c0_i32_1 = arith.constant 0 : i32
    return %c0_i32, %c0_i32_0 : i32, i32
  }
  func.func @transform_7(%arg0: i32) -> (i32, i32) {
    %c0_i32 = arith.constant 0 : i32
    %c0_i32_0 = arith.constant 0 : i32
    %c0_i32_1 = arith.constant 0 : i32
    return %c0_i32, %c0_i32_0 : i32, i32
  }
  func.func @transform_8(%arg0: i32) -> (i32, i32) {
    %c0_i32 = arith.constant 0 : i32
    %c0_i32_0 = arith.constant 0 : i32
    %c0_i32_1 = arith.constant 0 : i32
    return %c0_i32, %c0_i32_0 : i32, i32
  }
  func.func @transform_9(%arg0: i32) -> (i32, i32) {
    %c0_i32 = arith.constant 0 : i32
    %c0_i32_0 = arith.constant 0 : i32
    return %arg0, %c0_i32 : i32, i32
  }
}

module attributes {stable_mosaic.version = 11 : i64} {
  func.func @_mlp_cat_fused_kernel(%arg0: i32, %arg1: memref<512x16xf32, #tpu.memory_space<vmem>>, %arg2: memref<512x16xf32, #tpu.memory_space<vmem>>, %arg3: memref<16x128xbf16, #tpu.memory_space<vmem>>, %arg4: memref<16x128xbf16, #tpu.memory_space<vmem>>, %arg5: memref<1x128xf32, #tpu.memory_space<vmem>>, %arg6: memref<128x128xbf16, #tpu.memory_space<vmem>>, %arg7: memref<1x128xf32, #tpu.memory_space<vmem>>, %arg8: memref<128x8xbf16, #tpu.memory_space<vmem>>, %arg9: memref<1x8xf32, #tpu.memory_space<vmem>>, %arg10: memref<512x8xf32, #tpu.memory_space<vmem>>, %arg11: memref<1024x128xf32, #tpu.memory_space<vmem>>) attributes {dimension_semantics = [#tpu.dimension_semantics<parallel>], iteration_bounds = array<i64: 2>, scalar_prefetch = 0 : i64, scratch_operands = 1 : i64, tpu.core_type = #tpu.core_type<tc>, window_params = [{transform_indices = @transform_0, window_bounds = array<i64: 512, 16>}, {transform_indices = @transform_1, window_bounds = array<i64: 512, 16>}, {pipeline_mode = #tpu.pipeline_mode<synchronous>, transform_indices = @transform_2, window_bounds = array<i64: 16, 128>}, {pipeline_mode = #tpu.pipeline_mode<synchronous>, transform_indices = @transform_3, window_bounds = array<i64: 16, 128>}, {pipeline_mode = #tpu.pipeline_mode<synchronous>, transform_indices = @transform_4, window_bounds = array<i64: 1, 128>}, {pipeline_mode = #tpu.pipeline_mode<synchronous>, transform_indices = @transform_5, window_bounds = array<i64: 128, 128>}, {pipeline_mode = #tpu.pipeline_mode<synchronous>, transform_indices = @transform_6, window_bounds = array<i64: 1, 128>}, {pipeline_mode = #tpu.pipeline_mode<synchronous>, transform_indices = @transform_7, window_bounds = array<i64: 128, 8>}, {pipeline_mode = #tpu.pipeline_mode<synchronous>, transform_indices = @transform_8, window_bounds = array<i64: 1, 8>}, {transform_indices = @transform_9, window_bounds = array<i64: 512, 8>}]} {
    %c0 = arith.constant 0 : index
    %c0_0 = arith.constant 0 : index
    %0 = vector.load %arg1[%c0, %c0_0] : memref<512x16xf32, #tpu.memory_space<vmem>>, vector<512x16xf32>
    %1 = arith.truncf %0 : vector<512x16xf32> to vector<512x16xbf16>
    %c0_1 = arith.constant 0 : index
    %c0_2 = arith.constant 0 : index
    %2 = vector.load %arg2[%c0_1, %c0_2] : memref<512x16xf32, #tpu.memory_space<vmem>>, vector<512x16xf32>
    %3 = arith.truncf %2 : vector<512x16xf32> to vector<512x16xbf16>
    %c0_3 = arith.constant 0 : index
    %c0_4 = arith.constant 0 : index
    %4 = vector.load %arg3[%c0_3, %c0_4] : memref<16x128xbf16, #tpu.memory_space<vmem>>, vector<16x128xbf16>
    %c0_5 = arith.constant 0 : index
    %c0_6 = arith.constant 0 : index
    %5 = vector.load %arg4[%c0_5, %c0_6] : memref<16x128xbf16, #tpu.memory_space<vmem>>, vector<16x128xbf16>
    %c0_7 = arith.constant 0 : index
    %c0_8 = arith.constant 0 : index
    %6 = vector.load %arg5[%c0_7, %c0_8] : memref<1x128xf32, #tpu.memory_space<vmem>>, vector<1x128xf32>
    %cst = arith.constant dense<0.000000e+00> : vector<512x128xf32>
    %7 = tpu.matmul %1, %4, %cst {dimension_numbers = #tpu.dot_dimension_numbers<[1], [0], [0], [1], [0, 0, 1, 1], [], []>} : vector<512x16xbf16>, vector<16x128xbf16>, vector<512x128xf32> -> vector<512x128xf32>
    %cst_9 = arith.constant dense<0.000000e+00> : vector<512x128xf32>
    %8 = tpu.matmul %3, %5, %cst_9 {dimension_numbers = #tpu.dot_dimension_numbers<[1], [0], [0], [1], [0, 0, 1, 1], [], []>} : vector<512x16xbf16>, vector<16x128xbf16>, vector<512x128xf32> -> vector<512x128xf32>
    %9 = arith.addf %7, %8 : vector<512x128xf32>
    %cst_10 = arith.constant dense<0.000000e+00> : vector<512x128xf32>
    %10 = tpu.matmul %3, %4, %cst_10 {dimension_numbers = #tpu.dot_dimension_numbers<[1], [0], [0], [1], [0, 0, 1, 1], [], []>} : vector<512x16xbf16>, vector<16x128xbf16>, vector<512x128xf32> -> vector<512x128xf32>
    %cst_11 = arith.constant dense<0.000000e+00> : vector<512x128xf32>
    %11 = tpu.matmul %1, %5, %cst_11 {dimension_numbers = #tpu.dot_dimension_numbers<[1], [0], [0], [1], [0, 0, 1, 1], [], []>} : vector<512x16xbf16>, vector<16x128xbf16>, vector<512x128xf32> -> vector<512x128xf32>
    %12 = arith.addf %10, %11 : vector<512x128xf32>
    %13 = vector.broadcast %6 : vector<1x128xf32> to vector<512x128xf32>
    %14 = arith.addf %9, %13 : vector<512x128xf32>
    %c0_12 = arith.constant 0 : index
    %c0_13 = arith.constant 0 : index
    %15 = vector.load %arg11[%c0_12, %c0_13] : memref<1024x128xf32, #tpu.memory_space<vmem>>, vector<512x128xf32>
    tpu.vector_store %arg11[%c0_12, %c0_13], %14 {strides = array<i32>} : memref<1024x128xf32, #tpu.memory_space<vmem>>, vector<512x128xf32>,
    %16 = vector.broadcast %6 : vector<1x128xf32> to vector<512x128xf32>
    %17 = arith.addf %12, %16 : vector<512x128xf32>
    %c512 = arith.constant 512 : index
    %c0_14 = arith.constant 0 : index
    %18 = vector.load %arg11[%c512, %c0_14] : memref<1024x128xf32, #tpu.memory_space<vmem>>, vector<512x128xf32>
    tpu.vector_store %arg11[%c512, %c0_14], %17 {strides = array<i32>} : memref<1024x128xf32, #tpu.memory_space<vmem>>, vector<512x128xf32>,
    %c0_15 = arith.constant 0 : index
    %c0_16 = arith.constant 0 : index
    %19 = vector.load %arg6[%c0_15, %c0_16] : memref<128x128xbf16, #tpu.memory_space<vmem>>, vector<128x128xbf16>
    %c0_17 = arith.constant 0 : index
    %c0_18 = arith.constant 0 : index
    %20 = vector.load %arg7[%c0_17, %c0_18] : memref<1x128xf32, #tpu.memory_space<vmem>>, vector<1x128xf32>
    %c0_19 = arith.constant 0 : index
    %c0_20 = arith.constant 0 : index
    %21 = vector.load %arg11[%c0_19, %c0_20] : memref<1024x128xf32, #tpu.memory_space<vmem>>, vector<1024x128xf32>
    %cst_21 = arith.constant 0.000000e+00 : f32
    %22 = vector.broadcast %cst_21 : f32 to vector<1024x128xf32>
    %23 = arith.maximumf %21, %22 : vector<1024x128xf32>
    %24 = arith.truncf %23 : vector<1024x128xf32> to vector<1024x128xbf16>
    %cst_22 = arith.constant dense<0.000000e+00> : vector<1024x128xf32>
    %25 = tpu.matmul %24, %19, %cst_22 {dimension_numbers = #tpu.dot_dimension_numbers<[1], [0], [0], [1], [0, 0, 1, 1], [], []>} : vector<1024x128xbf16>, vector<128x128xbf16>, vector<1024x128xf32> -> vector<1024x128xf32>
    %26 = vector.broadcast %20 : vector<1x128xf32> to vector<1024x128xf32>
    %27 = arith.addf %25, %26 : vector<1024x128xf32>
    %c0_23 = arith.constant 0 : index
    %c0_24 = arith.constant 0 : index
    %28 = vector.load %arg11[%c0_23, %c0_24] : memref<1024x128xf32, #tpu.memory_space<vmem>>, vector<1024x128xf32>
    tpu.vector_store %arg11[%c0_23, %c0_24], %27 {strides = array<i32>} : memref<1024x128xf32, #tpu.memory_space<vmem>>, vector<1024x128xf32>,
    %c0_25 = arith.constant 0 : index
    %c0_26 = arith.constant 0 : index
    %29 = vector.load %arg8[%c0_25, %c0_26] : memref<128x8xbf16, #tpu.memory_space<vmem>>, vector<128x8xbf16>
    %c0_27 = arith.constant 0 : index
    %c0_28 = arith.constant 0 : index
    %30 = vector.load %arg9[%c0_27, %c0_28] : memref<1x8xf32, #tpu.memory_space<vmem>>, vector<1x8xf32>
    %c0_29 = arith.constant 0 : index
    %c0_30 = arith.constant 0 : index
    %31 = vector.load %arg11[%c0_29, %c0_30] : memref<1024x128xf32, #tpu.memory_space<vmem>>, vector<512x128xf32>
    %cst_31 = arith.constant 0.000000e+00 : f32
    %32 = vector.broadcast %cst_31 : f32 to vector<512x128xf32>
    %33 = arith.maximumf %31, %32 : vector<512x128xf32>
    %34 = arith.truncf %33 : vector<512x128xf32> to vector<512x128xbf16>
    %c512_32 = arith.constant 512 : index
    %c0_33 = arith.constant 0 : index
    %35 = vector.load %arg11[%c512_32, %c0_33] : memref<1024x128xf32, #tpu.memory_space<vmem>>, vector<512x128xf32>
    %cst_34 = arith.constant 0.000000e+00 : f32
    %36 = vector.broadcast %cst_34 : f32 to vector<512x128xf32>
    %37 = arith.maximumf %35, %36 : vector<512x128xf32>
    %38 = arith.truncf %37 : vector<512x128xf32> to vector<512x128xbf16>
    %cst_35 = arith.constant dense<0.000000e+00> : vector<512x8xf32>
    %39 = tpu.matmul %34, %29, %cst_35 {dimension_numbers = #tpu.dot_dimension_numbers<[1], [0], [0], [1], [0, 0, 1, 1], [], []>} : vector<512x128xbf16>, vector<128x8xbf16>, vector<512x8xf32> -> vector<512x8xf32>
    %cst_36 = arith.constant dense<0.000000e+00> : vector<512x8xf32>
    %40 = tpu.matmul %38, %29, %cst_36 {dimension_numbers = #tpu.dot_dimension_numbers<[1], [0], [0], [1], [0, 0, 1, 1], [], []>} : vector<512x128xbf16>, vector<128x8xbf16>, vector<512x8xf32> -> vector<512x8xf32>
    %41 = arith.addf %39, %40 : vector<512x8xf32>
    %cst_37 = arith.constant 5.000000e-01 : f32
    %42 = vector.broadcast %cst_37 : f32 to vector<512x8xf32>
    %43 = arith.mulf %42, %41 : vector<512x8xf32>
    %44 = vector.broadcast %30 : vector<1x8xf32> to vector<512x8xf32>
    %45 = arith.addf %43, %44 : vector<512x8xf32>
    %c0_38 = arith.constant 0 : index
    %c0_39 = arith.constant 0 : index
    %46 = vector.load %arg10[%c0_38, %c0_39] : memref<512x8xf32, #tpu.memory_space<vmem>>, vector<512x8xf32>
    tpu.vector_store %arg10[%c0_38, %c0_39], %45 {strides = array<i32>} : memref<512x8xf32, #tpu.memory_space<vmem>>, vector<512x8xf32>,
    return
  }
  func.func @transform_0(%arg0: i32) -> (i32, i32) {
    %c0_i32 = arith.constant 0 : i32
    %c0_i32_0 = arith.constant 0 : i32
    return %arg0, %c0_i32 : i32, i32
  }
  func.func @transform_1(%arg0: i32) -> (i32, i32) {
    %c0_i32 = arith.constant 0 : i32
    %c0_i32_0 = arith.constant 0 : i32
    return %arg0, %c0_i32 : i32, i32
  }
  func.func @transform_2(%arg0: i32) -> (i32, i32) {
    %c0_i32 = arith.constant 0 : i32
    %c0_i32_0 = arith.constant 0 : i32
    %c0_i32_1 = arith.constant 0 : i32
    return %c0_i32, %c0_i32_0 : i32, i32
  }
  func.func @transform_3(%arg0: i32) -> (i32, i32) {
    %c0_i32 = arith.constant 0 : i32
    %c0_i32_0 = arith.constant 0 : i32
    %c0_i32_1 = arith.constant 0 : i32
    return %c0_i32, %c0_i32_0 : i32, i32
  }
  func.func @transform_4(%arg0: i32) -> (i32, i32) {
    %c0_i32 = arith.constant 0 : i32
    %c0_i32_0 = arith.constant 0 : i32
    %c0_i32_1 = arith.constant 0 : i32
    return %c0_i32, %c0_i32_0 : i32, i32
  }
  func.func @transform_5(%arg0: i32) -> (i32, i32) {
    %c0_i32 = arith.constant 0 : i32
    %c0_i32_0 = arith.constant 0 : i32
    %c0_i32_1 = arith.constant 0 : i32
    return %c0_i32, %c0_i32_0 : i32, i32
  }
  func.func @transform_6(%arg0: i32) -> (i32, i32) {
    %c0_i32 = arith.constant 0 : i32
    %c0_i32_0 = arith.constant 0 : i32
    %c0_i32_1 = arith.constant 0 : i32
    return %c0_i32, %c0_i32_0 : i32, i32
  }
  func.func @transform_7(%arg0: i32) -> (i32, i32) {
    %c0_i32 = arith.constant 0 : i32
    %c0_i32_0 = arith.constant 0 : i32
    %c0_i32_1 = arith.constant 0 : i32
    return %c0_i32, %c0_i32_0 : i32, i32
  }
  func.func @transform_8(%arg0: i32) -> (i32, i32) {
    %c0_i32 = arith.constant 0 : i32
    %c0_i32_0 = arith.constant 0 : i32
    %c0_i32_1 = arith.constant 0 : i32
    return %c0_i32, %c0_i32_0 : i32, i32
  }
  func.func @transform_9(%arg0: i32) -> (i32, i32) {
    %c0_i32 = arith.constant 0 : i32
    %c0_i32_0 = arith.constant 0 : i32
    return %arg0, %c0_i32 : i32, i32
  }
}

</mosaic_0001>

<bundles_post_ra>
// kernel: tpu_custom_call.1
= control target key start
LH: loop header
LB: loop body
LE: loop exit
PB: predicated region body
PF: predicated region fallthrough
CT: control target
= control target key end

     0   :  { %s6388_s30 = smov 0   ;;  %s6390_s10 = smov 0   ;;  %s7914_s0 = inlined_call_operand.vmem [shape: f32[1000,16], index: 0, kind: input, shape index: {}]   ;;  %s7915_s1 = inlined_call_operand.vmem [shape: f32[1000,16], index: 1, kind: input, shape index: {}]   ;;  %s7916_s2 = inlined_call_operand.vmem [shape: bf16[16,128], index: 2, kind: input, shape index: {}]   ;;  %s7917_s3 = inlined_call_operand.vmem [shape: bf16[16,128], index: 3, kind: input, shape index: {}]   ;;  %s7918_s4 = inlined_call_operand.vmem [shape: f32[1,128], index: 4, kind: input, shape index: {}]   ;;  %s7919_s5 = inlined_call_operand.vmem [shape: bf16[128,128], index: 5, kind: input, shape index: {}]   ;;  %s7920_s6 = inlined_call_operand.vmem [shape: f32[1,128], index: 6, kind: input, shape index: {}]   ;;  %s7921_s7 = inlined_call_operand.vmem [shape: bf16[128,8], index: 7, kind: input, shape index: {}]   ;;  %s7922_s8 = inlined_call_operand.vmem [shape: f32[1,8], index: 8, kind: input, shape index: {}]   ;;  %s7923_s9 = inlined_call_operand.vmem [shape: f32[1000,8], index: 9, kind: output, shape index: {}]  }
   0x1   :  { %s6392_s11 = smov 0  }
   0x2 LB: > { %s6401_s12 = sadd.s32 4294967295, %s6304_s11   ;;  %s6403_s13 = sadd.s32 1, %s6304_s11   ;;  %s6304_s11 = sphi %s6392_s11, %s7959_s11   ;;  %s6300_s10 = sphi %s6390_s10, %s7958_s10   ;;  %s6296_s30 = sphi %s6388_s30, %s7957_s30  }
   0x3   : > { %s222_s14 = ssub.s32 %s6304_s11, %s6403_s13  ;;  %s225_s15 = sadd.s32 1, %s6300_s10 }
   0x4   : > { %p223_p0 = scmp.eq.s32.totalorder %s222_s14, 0  ;;  %p235_p1 = scmp.ne.s32.totalorder %s6300_s10, %s6296_s30 }
   0x5   : > { %p236_p2 = scmp.eq.s32.totalorder %s6401_s12, 1  ;;  %p4925_p3 = scmp.ge.s32.totalorder %s6304_s11, 1 }
   0x6   : > { %s6411_s16 = scalar_select %p223_p0, %s6300_s10, %s225_s15  }
   0x7   : > { %p6413_p4 = por %p236_p2, %p235_p1  ;;  %p315_p5 = scmp.lt.s32.totalorder %s6304_s11, 3 }
   0x9   : > { %p316_p6 = pnand %p4925_p3, %p315_p5 }
   0xb   : > { %319 = sbr.rel (%p316_p6) target bundleno = 1269 (0x4f5), region = 56 }
  0x12   : > { %v6232_v0 = vld [vmem:[%s7917_s3] sm:$0xff]   ;;  %s6421_s20 = sshll.u32 %s6401_s12, 6  ;;  %vm600_vm0 = vcmask 130048   ;;  %s360_s25 = sand.u32 1, %s6296_s30   ;;  %vm4378_vm1 = vcmask 64512  }
  0x13   : > { %p368_p7 = scmp.lt.s32.totalorder %s6421_s20, 124  ;;  %5384 = vmatprep.subr.bf16.mxu0 %v6232_v0  ;;  %5516 = vmatprep.subr.bf16.mxu1 %v6232_v0  ;;  %v6233_v1 = vld [vmem:[%s7916_s2] sm:$0xff]   ;;  %s4926_s26 = sshll.u32 %s360_s25, 9 }
  0x14   : > { %5385 = vmatpush3.bf16.msra.mxu0 %v6232_v0  ;;  %5517 = vmatpush3.bf16.msra.mxu1 %v6232_v0  ;;  %s7516_s30 = scalar_lea.vmem [#allocation3], %s4926_s26   ;;  %s4451_s29 = ssub.s32 (%p6413_p4), 125, %s6421_s20 }
  0x15   : > { %s369_s23 = scalar_select %p368_p7, %s6421_s20, 124  ;;  %5450 = vmatprep.subr.bf16.mxu0 %v6233_v1  ;;  %5582 = vmatprep.subr.bf16.mxu1 %v6233_v1 }
  0x16   : > { %p4452_p8 = scmp.lt.s32.totalorder (%p6413_p4), %s4451_s29, 64 }
  0x17   : > { %s4928_s24 = sshll.u32 %s369_s23, 3 }
  0x18   : > { %s6431_s27 = scalar_lea.vmem %s7915_s1, %s4928_s24  ;;  %s6436_s11 = scalar_lea.vmem %s7914_s0, %s4928_s24 }
  0x19   : > { %v493_v2 = vld [vmem:[%s6431_s27] sm:$0xff]  ;;  %v494_v3 = vld [vmem:[%s6431_s27 + $0x8] sm:$0xff]  ;;  %v495_v7 = vld [vmem:[%s6431_s27 + $0x10] sm:$0xff] }
  0x1a   : > { %v397_v4 = vld [vmem:[%s6436_s11] sm:$0xff]  ;;  %v6441_v5 = vpack.c.bf16 %v494_v3, %v493_v2  ;;  %v398_v6 = vld [vmem:[%s6436_s11 + $0x8] sm:$0xff]  ;;  %v496_v8 = vld [vmem:[%s6431_s27 + $0x18] sm:$0xff] }
  0x1b   : > { %v6446_v9 = vpack.c.bf16 %v398_v6, %v397_v4  ;;  %v6448_v10 = vpack.c.bf16 %v496_v8, %v495_v7  ;;  %v399_v11 = vld [vmem:[%s6436_s11 + $0x10] sm:$0xff]  ;;  %v400_v12 = vld [vmem:[%s6436_s11 + $0x18] sm:$0xff]  ;;  %v497_v13 = vld [vmem:[%s6431_s27 + $0x20] sm:$0xff] }
  0x1c   : > { %5386 = vmatprep.mubr.msk.bf16.mxu0 %vm600_vm0, %v6441_v5  ;;  %v6455_v14 = vpack.c.bf16 %v400_v12, %v399_v11  ;;  %v498_v15 = vld [vmem:[%s6431_s27 + $0x28] sm:$0xff]  ;;  %v401_v16 = vld [vmem:[%s6436_s11 + $0x20] sm:$0xff]  ;;  %v499_v20 = vld [vmem:[%s6431_s27 + $0x30] sm:$0xff] }
  0x1d   : > { %v402_v17 = vld [vmem:[%s6436_s11 + $0x28] sm:$0xff]  ;;  %5518 = vmatprep.mubr.msk.bf16.mxu1 %vm600_vm0, %v6446_v9  ;;  %5387 = vmatmul.mubr.msk.bf16.vlgmr.msra.gmra.mrb[0].mxu0 %vm600_vm0, %v6448_v10  ;;  %v6464_v18 = vpack.c.bf16 %v498_v15, %v497_v13  ;;  %v500_v21 = vld [vmem:[%s6431_s27 + $0x38] sm:$0xff]  ;;  %v403_v22 = vld [vmem:[%s6436_s11 + $0x30] sm:$0xff] }
  0x1e   : > { %v6466_v19 = vpack.c.bf16 %v402_v17, %v401_v16  ;;  %5451 = vmatpush3.bf16.msra.mxu0 %v6233_v1  ;;  %5519 = vmatmul.mubr.msk.bf16.vlgmr.msra.gmra.mrb[0].mxu1 %vm600_vm0, %v6455_v14  ;;  %v404_v23 = vld [vmem:[%s6436_s11 + $0x38] sm:$0xff]  ;;  %v501_v24 = vld [vmem:[%s6431_s27 + $0x40] sm:$0xff]  ;;  %v502_v25 = vld [vmem:[%s6431_s27 + $0x48] sm:$0xff]  ;;  %v6482_v28 = vpack.c.bf16 %v500_v21, %v499_v20 }
  0x1f   : > { %5390 = vmatprep.mubr.msk.bf16.mxu0 %vm600_vm0, %v6464_v18  ;;  %v405_v26 = vld [vmem:[%s6436_s11 + $0x40] sm:$0xff]  ;;  %v406_v27 = vld [vmem:[%s6436_s11 + $0x48] sm:$0xff]  ;;  %5583 = vmatpush3.bf16.msra.mxu1 %v6233_v1  ;;  %v6484_v29 = vpack.c.bf16 %v404_v23, %v403_v22  ;;  %v6486_v30 = vpack.c.bf16 %v502_v25, %v501_v24  ;;  %v503_v32 = vld [vmem:[%s6431_s27 + $0x50] sm:$0xff] }
  0x20   : > { %5522 = vmatprep.mubr.msk.bf16.mxu1 %vm600_vm0, %v6466_v19  ;;  %v6488_v31 = vpack.c.bf16 %v406_v27, %v405_v26  ;;  %v504_v33 = vld [vmem:[%s6431_s27 + $0x58] sm:$0xff]  ;;  %v407_v34 = vld [vmem:[%s6436_s11 + $0x50] sm:$0xff]  ;;  %v505_v36 = vld [vmem:[%s6431_s27 + $0x60] sm:$0xff] }
  0x21   : > { %v408_v35 = vld [vmem:[%s6436_s11 + $0x58] sm:$0xff]  ;;  %v506_v37 = vld [vmem:[%s6431_s27 + $0x68] sm:$0xff]  ;;  %v409_v38 = vld [vmem:[%s6436_s11 + $0x60] sm:$0xff]  ;;  %v6506_v40 = vpack.c.bf16 %v504_v33, %v503_v32 }
  0x22   : > { %v410_v39 = vld [vmem:[%s6436_s11 + $0x68] sm:$0xff]  ;;  %v6508_v41 = vpack.c.bf16 %v408_v35, %v407_v34  ;;  %v6510_v42 = vpack.c.bf16 %v506_v37, %v505_v36  ;;  %v507_v44 = vld [vmem:[%s6431_s27 + $0x70] sm:$0xff]  ;;  %v508_v45 = vld [vmem:[%s6431_s27 + $0x78] sm:$0xff] }
  0x23   : > { %v6512_v43 = vpack.c.bf16 %v410_v39, %v409_v38  ;;  %v411_v46 = vld [vmem:[%s6436_s11 + $0x70] sm:$0xff]  ;;  %v412_v47 = vld [vmem:[%s6436_s11 + $0x78] sm:$0xff]  ;;  %v509_v48 = vld [vmem:[%s6431_s27 + $0x80] sm:$0xff]  ;;  %v6530_v52 = vpack.c.bf16 %v508_v45, %v507_v44 }
  0x24   : > { %v510_v49 = vld [vmem:[%s6431_s27 + $0x88] sm:$0xff]  ;;  %v413_v50 = vld [vmem:[%s6436_s11 + $0x80] sm:$0xff]  ;;  %v6532_v53 = vpack.c.bf16 %v412_v47, %v411_v46  ;;  %v511_v56 = vld [vmem:[%s6431_s27 + $0x90] sm:$0xff] }
  0x25   : > { %5391 = vmatmul.mubr.msk.bf16.gmra.mrb[4].mxu0 %vm600_vm0, %v6482_v28  ;;  %v414_v51 = vld [vmem:[%s6436_s11 + $0x88] sm:$0xff]  ;;  %v6534_v54 = vpack.c.bf16 %v510_v49, %v509_v48  ;;  %v512_v57 = vld [vmem:[%s6431_s27 + $0x98] sm:$0xff]  ;;  %v415_v58 = vld [vmem:[%s6436_s11 + $0x90] sm:$0xff] }
  0x26   : > { %5523 = vmatmul.mubr.msk.bf16.gmra.mrb[4].mxu1 %vm600_vm0, %v6484_v29  ;;  %5394 = vmatprep.mubr.msk.bf16.mxu0 %vm600_vm0, %v6486_v30  ;;  %v6536_v55 = vpack.c.bf16 %v414_v51, %v413_v50  ;;  %v416_v59 = vld [vmem:[%s6436_s11 + $0x98] sm:$0xff]  ;;  %v513_v60 = vld [vmem:[%s6431_s27 + $0xa0] sm:$0xff]  ;;  %v514_v61 = vld [vmem:[%s6431_s27 + $0xa8] sm:$0xff]  ;;  %v6554_v0 = vpack.c.bf16 %v512_v57, %v511_v56 }
  0x27   : > { %5526 = vmatprep.mubr.msk.bf16.mxu1 %vm600_vm0, %v6488_v31  ;;  %v417_v62 = vld [vmem:[%s6436_s11 + $0xa0] sm:$0xff]  ;;  %v418_v63 = vld [vmem:[%s6436_s11 + $0xa8] sm:$0xff]  ;;  %v6556_v1 = vpack.c.bf16 %v416_v59, %v415_v58  ;;  %v6558_v2 = vpack.c.bf16 %v514_v61, %v513_v60  ;;  %v515_v4 = vld [vmem:[%s6431_s27 + $0xb0] sm:$0xff] }
  0x28   : > { %v6560_v3 = vpack.c.bf16 %v418_v63, %v417_v62  ;;  %v516_v6 = vld [vmem:[%s6431_s27 + $0xb8] sm:$0xff]  ;;  %v419_v7 = vld [vmem:[%s6436_s11 + $0xb0] sm:$0xff]  ;;  %v517_v11 = vld [vmem:[%s6431_s27 + $0xc0] sm:$0xff] }
  0x29   : > { %v420_v8 = vld [vmem:[%s6436_s11 + $0xb8] sm:$0xff]  ;;  %v518_v12 = vld [vmem:[%s6431_s27 + $0xc8] sm:$0xff]  ;;  %v421_v13 = vld [vmem:[%s6436_s11 + $0xc0] sm:$0xff]  ;;  %v6578_v16 = vpack.c.bf16 %v516_v6, %v515_v4 }
  0x2a   : > { %v422_v15 = vld [vmem:[%s6436_s11 + $0xc8] sm:$0xff]  ;;  %v6580_v17 = vpack.c.bf16 %v420_v8, %v419_v7  ;;  %v6582_v20 = vpack.c.bf16 %v518_v12, %v517_v11  ;;  %v519_v22 = vld [vmem:[%s6431_s27 + $0xd0] sm:$0xff]  ;;  %v520_v23 = vld [vmem:[%s6431_s27 + $0xd8] sm:$0xff] }
  0x2b   : > { %v6584_v21 = vpack.c.bf16 %v422_v15, %v421_v13  ;;  %v423_v24 = vld [vmem:[%s6436_s11 + $0xd0] sm:$0xff]  ;;  %v424_v25 = vld [vmem:[%s6436_s11 + $0xd8] sm:$0xff]  ;;  %v521_v26 = vld [vmem:[%s6431_s27 + $0xe0] sm:$0xff]  ;;  %v6602_v34 = vpack.c.bf16 %v520_v23, %v519_v22 }
  0x2c   : > { %v522_v27 = vld [vmem:[%s6431_s27 + $0xe8] sm:$0xff]  ;;  %v425_v32 = vld [vmem:[%s6436_s11 + $0xe0] sm:$0xff]  ;;  %v6604_v35 = vpack.c.bf16 %v424_v25, %v423_v24  ;;  %v523_v38 = vld [vmem:[%s6431_s27 + $0xf0] sm:$0xff] }
  0x2d   : > { %5395 = vmatmul.mubr.msk.bf16.gmra.mrb[8].mxu0 %vm600_vm0, %v6506_v40  ;;  %v426_v33 = vld [vmem:[%s6436_s11 + $0xe8] sm:$0xff]  ;;  %v6606_v36 = vpack.c.bf16 %v522_v27, %v521_v26  ;;  %v524_v39 = vld [vmem:[%s6431_s27 + $0xf8] sm:$0xff]  ;;  %v427_v44 = vld [vmem:[%s6436_s11 + $0xf0] sm:$0xff] }
  0x2e   : > { %5527 = vmatmul.mubr.msk.bf16.gmra.mrb[8].mxu1 %vm600_vm0, %v6508_v41  ;;  %5398 = vmatprep.mubr.msk.bf16.mxu0 %vm600_vm0, %v6510_v42  ;;  %v6608_v37 = vpack.c.bf16 %v426_v33, %v425_v32  ;;  %v428_v45 = vld [vmem:[%s6436_s11 + $0xf8] sm:$0xff]  ;;  %v525_v46 = vld [vmem:[%s6431_s27 + $0x100] sm:$0xff]  ;;  %v526_v47 = vld [vmem:[%s6431_s27 + $0x108] sm:$0xff]  ;;  %v6626_v50 = vpack.c.bf16 %v524_v39, %v523_v38 }
  0x2f   : > { %5530 = vmatprep.mubr.msk.bf16.mxu1 %vm600_vm0, %v6512_v43  ;;  %v429_v48 = vld [vmem:[%s6436_s11 + $0x100] sm:$0xff]  ;;  %v430_v49 = vld [vmem:[%s6436_s11 + $0x108] sm:$0xff]  ;;  %v6628_v51 = vpack.c.bf16 %v428_v45, %v427_v44  ;;  %v6630_v56 = vpack.c.bf16 %v526_v47, %v525_v46  ;;  %v527_v58 = vld [vmem:[%s6431_s27 + $0x110] sm:$0xff] }
  0x30   : > { %v6632_v57 = vpack.c.bf16 %v430_v49, %v429_v48  ;;  %v528_v59 = vld [vmem:[%s6431_s27 + $0x118] sm:$0xff]  ;;  %v431_v60 = vld [vmem:[%s6436_s11 + $0x110] sm:$0xff]  ;;  %v529_v62 = vld [vmem:[%s6431_s27 + $0x120] sm:$0xff] }
  0x31   : > { %v432_v61 = vld [vmem:[%s6436_s11 + $0x118] sm:$0xff]  ;;  %v530_v63 = vld [vmem:[%s6431_s27 + $0x128] sm:$0xff]  ;;  %v433_v4 = vld [vmem:[%s6436_s11 + $0x120] sm:$0xff]  ;;  %v6650_v7 = vpack.c.bf16 %v528_v59, %v527_v58 }
  0x32   : > { %v434_v6 = vld [vmem:[%s6436_s11 + $0x128] sm:$0xff]  ;;  %v6652_v8 = vpack.c.bf16 %v432_v61, %v431_v60  ;;  %v6654_v11 = vpack.c.bf16 %v530_v63, %v529_v62  ;;  %v531_v13 = vld [vmem:[%s6431_s27 + $0x130] sm:$0xff]  ;;  %v532_v15 = vld [vmem:[%s6431_s27 + $0x138] sm:$0xff] }
  0x33   : > { %v6656_v12 = vpack.c.bf16 %v434_v6, %v433_v4  ;;  %v435_v22 = vld [vmem:[%s6436_s11 + $0x130] sm:$0xff]  ;;  %v436_v23 = vld [vmem:[%s6436_s11 + $0x138] sm:$0xff]  ;;  %v533_v24 = vld [vmem:[%s6431_s27 + $0x140] sm:$0xff]  ;;  %v6674_v32 = vpack.c.bf16 %v532_v15, %v531_v13 }
  0x34   : > { %v534_v25 = vld [vmem:[%s6431_s27 + $0x148] sm:$0xff]  ;;  %v437_v26 = vld [vmem:[%s6436_s11 + $0x140] sm:$0xff]  ;;  %v6676_v33 = vpack.c.bf16 %v436_v23, %v435_v22  ;;  %v535_v44 = vld [vmem:[%s6431_s27 + $0x150] sm:$0xff] }
  0x35   : > { %5399 = vmatmul.mubr.msk.bf16.gmra.mrb[12].mxu0 %vm600_vm0, %v6530_v52  ;;  %v438_v27 = vld [vmem:[%s6436_s11 + $0x148] sm:$0xff]  ;;  %v6678_v38 = vpack.c.bf16 %v534_v25, %v533_v24  ;;  %v536_v45 = vld [vmem:[%s6431_s27 + $0x158] sm:$0xff]  ;;  %v439_v46 = vld [vmem:[%s6436_s11 + $0x150] sm:$0xff] }
  0x36   : > { %5531 = vmatmul.mubr.msk.bf16.gmra.mrb[12].mxu1 %vm600_vm0, %v6532_v53  ;;  %5402 = vmatprep.mubr.msk.bf16.mxu0 %vm600_vm0, %v6534_v54  ;;  %v6680_v39 = vpack.c.bf16 %v438_v27, %v437_v26  ;;  %v440_v47 = vld [vmem:[%s6436_s11 + $0x158] sm:$0xff]  ;;  %v537_v48 = vld [vmem:[%s6431_s27 + $0x160] sm:$0xff]  ;;  %v538_v49 = vld [vmem:[%s6431_s27 + $0x168] sm:$0xff]  ;;  %v6698_v60 = vpack.c.bf16 %v536_v45, %v535_v44 }
  0x37   : > { %5534 = vmatprep.mubr.msk.bf16.mxu1 %vm600_vm0, %v6536_v55  ;;  %v441_v58 = vld [vmem:[%s6436_s11 + $0x160] sm:$0xff]  ;;  %v442_v59 = vld [vmem:[%s6436_s11 + $0x168] sm:$0xff]  ;;  %v6700_v61 = vpack.c.bf16 %v440_v47, %v439_v46  ;;  %v6702_v62 = vpack.c.bf16 %v538_v49, %v537_v48  ;;  %v539_v4 = vld [vmem:[%s6431_s27 + $0x170] sm:$0xff] }
  0x38   : > { %v6704_v63 = vpack.c.bf16 %v442_v59, %v441_v58  ;;  %v540_v6 = vld [vmem:[%s6431_s27 + $0x178] sm:$0xff]  ;;  %v443_v13 = vld [vmem:[%s6436_s11 + $0x170] sm:$0xff]  ;;  %v541_v22 = vld [vmem:[%s6431_s27 + $0x180] sm:$0xff] }
  0x39   : > { %v444_v15 = vld [vmem:[%s6436_s11 + $0x178] sm:$0xff]  ;;  %v542_v23 = vld [vmem:[%s6431_s27 + $0x188] sm:$0xff]  ;;  %v445_v24 = vld [vmem:[%s6436_s11 + $0x180] sm:$0xff]  ;;  %v6722_v26 = vpack.c.bf16 %v540_v6, %v539_v4 }
  0x3a   : > { %v446_v25 = vld [vmem:[%s6436_s11 + $0x188] sm:$0xff]  ;;  %v6724_v27 = vpack.c.bf16 %v444_v15, %v443_v13  ;;  %v6726_v44 = vpack.c.bf16 %v542_v23, %v541_v22  ;;  %v543_v46 = vld [vmem:[%s6431_s27 + $0x190] sm:$0xff]  ;;  %v544_v47 = vld [vmem:[%s6431_s27 + $0x198] sm:$0xff] }
  0x3b   : > { %v6728_v45 = vpack.c.bf16 %v446_v25, %v445_v24  ;;  %v447_v48 = vld [vmem:[%s6436_s11 + $0x190] sm:$0xff]  ;;  %v6742_v49 = vld [vmem:[%s7919_s5] sm:$0xff]   ;;  %v448_v58 = vld [vmem:[%s6436_s11 + $0x198] sm:$0xff]  ;;  %v6752_v15 = vpack.c.bf16 %v544_v47, %v543_v46 }
  0x3c   : > { %7934 = vst [vmem:[#allocation4_spill] sm:$0xff] %v6726_v44  ;;  %v545_v59 = vld [vmem:[%s6431_s27 + $0x1a0] sm:$0xff]  ;;  %v546_v4 = vld [vmem:[%s6431_s27 + $0x1a8] sm:$0xff]  ;;  %5648 = vmatprep.subr.bf16.mxu0 %v6742_v49  ;;  %v6754_v22 = vpack.c.bf16 %v448_v58, %v447_v48  ;;  %v547_v25 = vld [vmem:[%s6431_s27 + $0x1b0] sm:$0xff] }
  0x3d   : > { %5403 = vmatmul.mubr.msk.bf16.gmra.mrb[16].mxu0 %vm600_vm0, %v6554_v0  ;;  %v449_v6 = vld [vmem:[%s6436_s11 + $0x1a0] sm:$0xff]  ;;  %v450_v13 = vld [vmem:[%s6436_s11 + $0x1a8] sm:$0xff]  ;;  %7935 = vst [vmem:[#allocation5_spill] sm:$0xff] %v6752_v15  ;;  %v6756_v23 = vpack.c.bf16 %v546_v4, %v545_v59  ;;  %v451_v46 = vld [vmem:[%s6436_s11 + $0x1b0] sm:$0xff] }
  0x3e   : > { %5535 = vmatmul.mubr.msk.bf16.gmra.mrb[16].mxu1 %vm600_vm0, %v6556_v1  ;;  %5406 = vmatprep.mubr.msk.bf16.mxu0 %vm600_vm0, %v6558_v2  ;;  %7936 = vst [vmem:[#allocation6_spill] sm:$0xff] %v6754_v22  ;;  %v6758_v24 = vpack.c.bf16 %v450_v13, %v449_v6  ;;  %v452_v47 = vld [vmem:[%s6436_s11 + $0x1b8] sm:$0xff]  ;;  %v549_v48 = vld [vmem:[%s6431_s27 + $0x1c0] sm:$0xff]  ;;  %v550_v58 = vld [vmem:[%s6431_s27 + $0x1c8] sm:$0xff] }
  0x3f   : > { %5538 = vmatprep.mubr.msk.bf16.mxu1 %vm600_vm0, %v6560_v3  ;;  %7937 = vst [vmem:[#allocation7_spill] sm:$0xff] %v6756_v23  ;;  %v453_v59 = vld [vmem:[%s6436_s11 + $0x1c0] sm:$0xff]  ;;  %v454_v4 = vld [vmem:[%s6436_s11 + $0x1c8] sm:$0xff]  ;;  %v6778_v13 = vpack.c.bf16 %v452_v47, %v451_v46 }
  0x40   : > { %7938 = vst [vmem:[#allocation8_spill] sm:$0xff] %v6758_v24  ;;  %v553_v46 = vld [vmem:[%s6431_s27 + $0x1e0] sm:$0xff]  ;;  %v554_v47 = vld [vmem:[%s6431_s27 + $0x1e8] sm:$0xff] }
  0x41   : > { %7940 = vst [vmem:[#allocation10_spill] sm:$0xff] %v6778_v13 }
  0x45   : > { %5407 = vmatmul.mubr.msk.bf16.gmra.mrb[20].mxu0 %vm600_vm0, %v6578_v16 }
  0x46   : > { %5539 = vmatmul.mubr.msk.bf16.gmra.mrb[20].mxu1 %vm600_vm0, %v6580_v17  ;;  %5410 = vmatprep.mubr.msk.bf16.mxu0 %vm600_vm0, %v6582_v20 }
  0x47   : > { %5542 = vmatprep.mubr.msk.bf16.mxu1 %vm600_vm0, %v6584_v21 }
  0x4d   : > { %5411 = vmatmul.mubr.msk.bf16.gmra.mrb[24].mxu0 %vm600_vm0, %v6602_v34 }
  0x4e   : > { %5543 = vmatmul.mubr.msk.bf16.gmra.mrb[24].mxu1 %vm600_vm0, %v6604_v35  ;;  %5414 = vmatprep.mubr.msk.bf16.mxu0 %vm600_vm0, %v6606_v36 }
  0x4f   : > { %5546 = vmatprep.mubr.msk.bf16.mxu1 %vm600_vm0, %v6608_v37 }
  0x55   : > { %5415 = vmatmul.mubr.msk.bf16.gmra.mrb[28].mxu0 %vm600_vm0, %v6626_v50 }
  0x56   : > { %5547 = vmatmul.mubr.msk.bf16.gmra.mrb[28].mxu1 %vm600_vm0, %v6628_v51  ;;  %5418 = vmatprep.mubr.msk.bf16.mxu0 %vm600_vm0, %v6630_v56 }
  0x57   : > { %5550 = vmatprep.mubr.msk.bf16.mxu1 %vm600_vm0, %v6632_v57 }
  0x5d   : > { %5419 = vmatmul.mubr.msk.bf16.gmra.mrb[32].mxu0 %vm600_vm0, %v6650_v7 }
  0x5e   : > { %5551 = vmatmul.mubr.msk.bf16.gmra.mrb[32].mxu1 %vm600_vm0, %v6652_v8  ;;  %5422 = vmatprep.mubr.msk.bf16.mxu0 %vm600_vm0, %v6654_v11 }
  0x5f   : > { %5554 = vmatprep.mubr.msk.bf16.mxu1 %vm600_vm0, %v6656_v12 }
  0x65   : > { %5423 = vmatmul.mubr.msk.bf16.gmra.mrb[36].mxu0 %vm600_vm0, %v6674_v32 }
  0x66   : > { %5555 = vmatmul.mubr.msk.bf16.gmra.mrb[36].mxu1 %vm600_vm0, %v6676_v33  ;;  %5426 = vmatprep.mubr.msk.bf16.mxu0 %vm600_vm0, %v6678_v38 }
  0x67   : > { %5558 = vmatprep.mubr.msk.bf16.mxu1 %vm600_vm0, %v6680_v39 }
  0x6d   : > { %5427 = vmatmul.mubr.msk.bf16.gmra.mrb[40].mxu0 %vm600_vm0, %v6698_v60 }
  0x6e   : > { %5559 = vmatmul.mubr.msk.bf16.gmra.mrb[40].mxu1 %vm600_vm0, %v6700_v61  ;;  %5430 = vmatprep.mubr.msk.bf16.mxu0 %vm600_vm0, %v6702_v62 }
  0x6f   : > { %5562 = vmatprep.mubr.msk.bf16.mxu1 %vm600_vm0, %v6704_v63 }
  0x75   : > { %5431 = vmatmul.mubr.msk.bf16.gmra.mrb[44].mxu0 %vm600_vm0, %v6722_v26 }
  0x76   : > { %5563 = vmatmul.mubr.msk.bf16.gmra.mrb[44].mxu1 %vm600_vm0, %v6724_v27  ;;  %5434 = vmatprep.mubr.msk.bf16.mxu0 %vm600_vm0, %v6726_v44  ;;  %v548_v44 = vld [vmem:[%s6431_s27 + $0x1b8] sm:$0xff] }
  0x77   : > { %5566 = vmatprep.mubr.msk.bf16.mxu1 %vm600_vm0, %v6728_v45  ;;  %v6776_v6 = vpack.c.bf16 %v548_v44, %v547_v25  ;;  %v455_v44 = vld [vmem:[%s6436_s11 + $0x1d0] sm:$0xff]  ;;  %v456_v25 = vld [vmem:[%s6436_s11 + $0x1d8] sm:$0xff] }
  0x79   : > { %7939 = vst [vmem:[#allocation9_spill] sm:$0xff] %v6776_v6 }
  0x7d   : > { %5435 = vmatmul.mubr.msk.bf16.gmra.mrb[48].mxu0 %vm600_vm0, %v6752_v15  ;;  %v6782_v15 = vpack.c.bf16 %v454_v4, %v453_v59  ;;  %v6802_v4 = vpack.c.bf16 %v456_v25, %v455_v44 }
  0x7e   : > { %5567 = vmatmul.mubr.msk.bf16.gmra.mrb[48].mxu1 %vm600_vm0, %v6754_v22  ;;  %5438 = vmatprep.mubr.msk.bf16.mxu0 %vm600_vm0, %v6756_v23  ;;  %v6780_v23 = vpack.c.bf16 %v550_v58, %v549_v48  ;;  %v552_v22 = vld [vmem:[%s6431_s27 + $0x1d8] sm:$0xff]  ;;  %v457_v48 = vld [vmem:[%s6436_s11 + $0x1e0] sm:$0xff]  ;;  %v458_v58 = vld [vmem:[%s6436_s11 + $0x1e8] sm:$0xff] }
  0x7f   : > { %5570 = vmatprep.mubr.msk.bf16.mxu1 %vm600_vm0, %v6758_v24  ;;  %7942 = vst [vmem:[#allocation12_spill] sm:$0xff] %v6782_v15  ;;  %v551_v24 = vld [vmem:[%s6431_s27 + $0x1d0] sm:$0xff] }
  0x80   : > { %7941 = vst [vmem:[#allocation11_spill] sm:$0xff] %v6780_v23  ;;  %v6800_v59 = vpack.c.bf16 %v552_v22, %v551_v24  ;;  %v459_v22 = vld [vmem:[%s6436_s11 + $0x1f0] sm:$0xff]  ;;  %v460_v24 = vld [vmem:[%s6436_s11 + $0x1f8] sm:$0xff]  ;;  %s5097_s11 = sshll.u32 (%p6413_p4), %s6401_s12, 9 }
  0x81   : > { %v6822_v25 = vpack.c.bf16 %v460_v24, %v459_v22  ;;  %s7715_s18 = scalar_lea.vmem (%p6413_p4), %s7923_s9, %s5097_s11  }
  0x85   : > { %5439 = vmatmul.mubr.msk.bf16.gmra.mrb[52].mxu0 %vm600_vm0, %v6776_v6  ;;  %v6806_v6 = vpack.c.bf16 %v458_v58, %v457_v48 }
  0x86   : > { %5571 = vmatmul.mubr.msk.bf16.gmra.mrb[52].mxu1 %vm600_vm0, %v6778_v13  ;;  %5442 = vmatprep.mubr.msk.bf16.mxu0 %vm600_vm0, %v6780_v23  ;;  %v6804_v23 = vpack.c.bf16 %v554_v47, %v553_v46  ;;  %v556_v13 = vld [vmem:[%s6431_s27 + $0x1f8] sm:$0xff]  ;;  %v6235_v46 = vld [vmem:[%s7919_s5 + $0x8] sm:$0xff]  }
  0x87   : > { %5574 = vmatprep.mubr.msk.bf16.mxu1 %vm600_vm0, %v6782_v15  ;;  %v555_v15 = vld [vmem:[%s6431_s27 + $0x1f0] sm:$0xff] }
  0x88   : > { %v6820_v44 = vpack.c.bf16 %v556_v13, %v555_v15 }
  0x8d   : > { %5443 = vmatmul.mubr.msk.bf16.gmra.mrb[56].mxu0 %vm600_vm0, %v6800_v59 }
  0x8e   : > { %5575 = vmatmul.mubr.msk.bf16.gmra.mrb[56].mxu1 %vm600_vm0, %v6802_v4  ;;  %5446 = vmatprep.mubr.msk.bf16.mxu0 %vm600_vm0, %v6804_v23 }
  0x8f   : > { %5578 = vmatprep.mubr.msk.bf16.mxu1 %vm600_vm0, %v6806_v6 }
  0x95   : > { %5447 = vmatmul.mubr.msk.bf16.gmra.mrb[60].mxu0 %vm600_vm0, %v6820_v44 }
  0x96   : > { %5579 = vmatmul.mubr.msk.bf16.gmra.mrb[60].mxu1 %vm600_vm0, %v6822_v25  ;;  %5452 = vmatprep.mubr.msk.bf16.mxu0 %vm600_vm0, %v6446_v9  ;;  %v6237_v9 = vld [vmem:[%s7919_s5 + $0x18] sm:$0xff]  }
  0x97   : > { %5584 = vmatprep.mubr.msk.bf16.mxu1 %vm600_vm0, %v6441_v5  ;;  %v6236_v5 = vld [vmem:[%s7919_s5 + $0x10] sm:$0xff]  }
  0x9d   : > { %5453 = vmatmul.mubr.msk.bf16.vlgmr.msra.gmra.mrb[0].mxu0 %vm600_vm0, %v6455_v14  ;;  %v6239_v14 = vld [vmem:[%s7919_s5 + $0x28] sm:$0xff]  }
  0x9e   : > { %5585 = vmatmul.mubr.msk.bf16.vlgmr.msra.gmra.mrb[0].mxu1 %vm600_vm0, %v6448_v10  ;;  %5456 = vmatprep.mubr.msk.bf16.mxu0 %vm600_vm0, %v6466_v19  ;;  %v6238_v10 = vld [vmem:[%s7919_s5 + $0x20] sm:$0xff]   ;;  %v6241_v19 = vld [vmem:[%s7919_s5 + $0x38] sm:$0xff]  }
  0x9f   : > { %5588 = vmatprep.mubr.msk.bf16.mxu1 %vm600_vm0, %v6464_v18  ;;  %5649 = vmatpush3.bf16.msra.mxu0 %v6742_v49  ;;  %v6240_v18 = vld [vmem:[%s7919_s5 + $0x30] sm:$0xff]  }
  0xa0   : > { %5650 = vmatprep.subr.bf16.mxu0 %v6235_v46 }
  0xa3   : > { %5651 = vmatpush3.bf16.msra.mxu0 %v6235_v46 }
  0xa4   : > { %5652 = vmatprep.subr.bf16.mxu0 %v6236_v5 }
  0xa5   : > { %5457 = vmatmul.mubr.msk.bf16.gmra.mrb[4].mxu0 %vm600_vm0, %v6484_v29  ;;  %v7944_v29 = vld [vmem:[#allocation6_spill] sm:$0xff] }
  0xa6   : > { %5589 = vmatmul.mubr.msk.bf16.gmra.mrb[4].mxu1 %vm600_vm0, %v6482_v28  ;;  %5460 = vmatprep.mubr.msk.bf16.mxu0 %vm600_vm0, %v6488_v31  ;;  %v7943_v28 = vld [vmem:[#allocation4_spill] sm:$0xff] }
  0xa7   : > { %5592 = vmatprep.mubr.msk.bf16.mxu1 %vm600_vm0, %v6486_v30  ;;  %5653 = vmatpush3.bf16.msra.mxu0 %v6236_v5  ;;  %v7945_v30 = vld [vmem:[#allocation5_spill] sm:$0xff]  ;;  %v7946_v31 = vld [vmem:[#allocation8_spill] sm:$0xff] }
  0xa8   : > { %5654 = vmatprep.subr.bf16.mxu0 %v6237_v9 }
  0xab   : > { %5655 = vmatpush3.bf16.msra.mxu0 %v6237_v9 }
  0xac   : > { %5656 = vmatprep.subr.bf16.mxu0 %v6238_v10 }
  0xad   : > { %5461 = vmatmul.mubr.msk.bf16.gmra.mrb[8].mxu0 %vm600_vm0, %v6508_v41  ;;  %v7948_v41 = vld [vmem:[#allocation10_spill] sm:$0xff] }
  0xae   : > { %5593 = vmatmul.mubr.msk.bf16.gmra.mrb[8].mxu1 %vm600_vm0, %v6506_v40  ;;  %5464 = vmatprep.mubr.msk.bf16.mxu0 %vm600_vm0, %v6512_v43  ;;  %v7947_v40 = vld [vmem:[#allocation7_spill] sm:$0xff]  ;;  %v7950_v43 = vld [vmem:[#allocation12_spill] sm:$0xff] }
  0xaf   : > { %5596 = vmatprep.mubr.msk.bf16.mxu1 %vm600_vm0, %v6510_v42  ;;  %5657 = vmatpush3.bf16.msra.mxu0 %v6238_v10  ;;  %v7949_v42 = vld [vmem:[#allocation9_spill] sm:$0xff] }
  0xb0   : > { %5658 = vmatprep.subr.bf16.mxu0 %v6239_v14 }
  0xb3   : > { %5659 = vmatpush3.bf16.msra.mxu0 %v6239_v14 }
  0xb4   : > { %5660 = vmatprep.subr.bf16.mxu0 %v6240_v18 }
  0xb5   : > { %5465 = vmatmul.mubr.msk.bf16.gmra.mrb[12].mxu0 %vm600_vm0, %v6532_v53  ;;  %v6981_v53 = vld [vmem:[%s7918_s4] ss:$0 sm:$0xff] }
  0xb6   : > { %5597 = vmatmul.mubr.msk.bf16.gmra.mrb[12].mxu1 %vm600_vm0, %v6530_v52  ;;  %5468 = vmatprep.mubr.msk.bf16.mxu0 %vm600_vm0, %v6536_v55  ;;  %v7951_v52 = vld [vmem:[#allocation11_spill] sm:$0xff] }
  0xb7   : > { %5600 = vmatprep.mubr.msk.bf16.mxu1 %vm600_vm0, %v6534_v54  ;;  %5661 = vmatpush3.bf16.msra.mxu0 %v6240_v18 }
  0xb8   : > { %5662 = vmatprep.subr.bf16.mxu0 %v6241_v19 }
  0xbb   : > { %5663 = vmatpush3.bf16.msra.mxu0 %v6241_v19 }
  0xbd   : > { %5469 = vmatmul.mubr.msk.bf16.gmra.mrb[16].mxu0 %vm600_vm0, %v6556_v1 }
  0xbe   : > { %5601 = vmatmul.mubr.msk.bf16.gmra.mrb[16].mxu1 %vm600_vm0, %v6554_v0  ;;  %5472 = vmatprep.mubr.msk.bf16.mxu0 %vm600_vm0, %v6560_v3 }
  0xbf   : > { %5604 = vmatprep.mubr.msk.bf16.mxu1 %vm600_vm0, %v6558_v2 }
  0xc5   : > { %5473 = vmatmul.mubr.msk.bf16.gmra.mrb[20].mxu0 %vm600_vm0, %v6580_v17 }
  0xc6   : > { %5605 = vmatmul.mubr.msk.bf16.gmra.mrb[20].mxu1 %vm600_vm0, %v6578_v16  ;;  %5476 = vmatprep.mubr.msk.bf16.mxu0 %vm600_vm0, %v6584_v21 }
  0xc7   : > { %5608 = vmatprep.mubr.msk.bf16.mxu1 %vm600_vm0, %v6582_v20 }
  0xcd   : > { %5477 = vmatmul.mubr.msk.bf16.gmra.mrb[24].mxu0 %vm600_vm0, %v6604_v35 }
  0xce   : > { %5609 = vmatmul.mubr.msk.bf16.gmra.mrb[24].mxu1 %vm600_vm0, %v6602_v34  ;;  %5480 = vmatprep.mubr.msk.bf16.mxu0 %vm600_vm0, %v6608_v37 }
  0xcf   : > { %5612 = vmatprep.mubr.msk.bf16.mxu1 %vm600_vm0, %v6606_v36 }
  0xd5   : > { %5481 = vmatmul.mubr.msk.bf16.gmra.mrb[28].mxu0 %vm600_vm0, %v6628_v51 }
  0xd6   : > { %5613 = vmatmul.mubr.msk.bf16.gmra.mrb[28].mxu1 %vm600_vm0, %v6626_v50  ;;  %5484 = vmatprep.mubr.msk.bf16.mxu0 %vm600_vm0, %v6632_v57 }
  0xd7   : > { %5616 = vmatprep.mubr.msk.bf16.mxu1 %vm600_vm0, %v6630_v56 }
  0xdd   : > { %5485 = vmatmul.mubr.msk.bf16.gmra.mrb[32].mxu0 %vm600_vm0, %v6652_v8 }
  0xde   : > { %5617 = vmatmul.mubr.msk.bf16.gmra.mrb[32].mxu1 %vm600_vm0, %v6650_v7  ;;  %5488 = vmatprep.mubr.msk.bf16.mxu0 %vm600_vm0, %v6656_v12 }
  0xdf   : > { %5620 = vmatprep.mubr.msk.bf16.mxu1 %vm600_vm0, %v6654_v11 }
  0xe5   : > { %5489 = vmatmul.mubr.msk.bf16.gmra.mrb[36].mxu0 %vm600_vm0, %v6676_v33 }
  0xe6   : > { %5621 = vmatmul.mubr.msk.bf16.gmra.mrb[36].mxu1 %vm600_vm0, %v6674_v32  ;;  %5492 = vmatprep.mubr.msk.bf16.mxu0 %vm600_vm0, %v6680_v39 }
  0xe7   : > { %5624 = vmatprep.mubr.msk.bf16.mxu1 %vm600_vm0, %v6678_v38 }
  0xed   : > { %5493 = vmatmul.mubr.msk.bf16.gmra.mrb[40].mxu0 %vm600_vm0, %v6700_v61 }
  0xee   : > { %5625 = vmatmul.mubr.msk.bf16.gmra.mrb[40].mxu1 %vm600_vm0, %v6698_v60  ;;  %5496 = vmatprep.mubr.msk.bf16.mxu0 %vm600_vm0, %v6704_v63 }
  0xef   : > { %5628 = vmatprep.mubr.msk.bf16.mxu1 %vm600_vm0, %v6702_v62 }
  0xf5   : > { %5497 = vmatmul.mubr.msk.bf16.gmra.mrb[44].mxu0 %vm600_vm0, %v6724_v27 }
  0xf6   : > { %5629 = vmatmul.mubr.msk.bf16.gmra.mrb[44].mxu1 %vm600_vm0, %v6722_v26  ;;  %5500 = vmatprep.mubr.msk.bf16.mxu0 %vm600_vm0, %v6728_v45 }
  0xf7   : > { %5632 = vmatprep.mubr.msk.bf16.mxu1 %vm600_vm0, %v7943_v28 }
  0xfd   : > { %5501 = vmatmul.mubr.msk.bf16.gmra.mrb[48].mxu0 %vm600_vm0, %v7944_v29 }
  0xfe   : > { %5633 = vmatmul.mubr.msk.bf16.gmra.mrb[48].mxu1 %vm600_vm0, %v7945_v30  ;;  %5504 = vmatprep.mubr.msk.bf16.mxu0 %vm600_vm0, %v7946_v31 }
  0xff   : > { %5636 = vmatprep.mubr.msk.bf16.mxu1 %vm600_vm0, %v7947_v40 }
 0x105   : > { %5505 = vmatmul.mubr.msk.bf16.gmra.mrb[52].mxu0 %vm600_vm0, %v7948_v41 }
 0x106   : > { %5637 = vmatmul.mubr.msk.bf16.gmra.mrb[52].mxu1 %vm600_vm0, %v7949_v42  ;;  %5508 = vmatprep.mubr.msk.bf16.mxu0 %vm600_vm0, %v7950_v43 }
 0x107   : > { %5640 = vmatprep.mubr.msk.bf16.mxu1 %vm600_vm0, %v7951_v52 }
 0x10d   : > { %5509 = vmatmul.mubr.msk.bf16.gmra.mrb[56].mxu0 %vm600_vm0, %v6802_v4 }
 0x10e   : > { %5641 = vmatmul.mubr.msk.bf16.gmra.mrb[56].mxu1 %vm600_vm0, %v6800_v59  ;;  %5512 = vmatprep.mubr.msk.bf16.mxu0 %vm600_vm0, %v6806_v6 }
 0x10f   : > { %5644 = vmatprep.mubr.msk.bf16.mxu1 %vm600_vm0, %v6804_v23 }
 0x115   : > { %5513 = vmatmul.mubr.msk.bf16.gmra.mrb[60].mxu0 %vm600_vm0, %v6822_v25 }
 0x116   : > { %5645 = vmatmul.mubr.msk.bf16.gmra.mrb[60].mxu1 %vm600_vm0, %v6820_v44 }
 0x170   : > { %v5454_v54 = vpop.f32.mrb[0].mxu0 }
 0x171   : > { %v1963_v55 = vadd.f32 %v5454_v54, %v6981_v53  ;;  %v5586_v0 = vpop.f32.mrb[0].mxu1  ;;  %v1122_v1 = vpop.f32.mrb[1].mxu0 }
 0x172   : > { %v2091_v2 = vadd.f32 %v5586_v0, %v6981_v53  ;;  %v1961_v3 = vadd.f32 %v6981_v53, %v1122_v1  ;;  %v1700_v16 = vpop.f32.mrb[1].mxu1  ;;  %v5455_v17 = vpop.f32.mrb[2].mxu0 }
 0x173   : > { %v2089_v20 = vadd.f32 %v6981_v53, %v1700_v16  ;;  %v1964_v21 = vadd.f32 %v5455_v17, %v6981_v53  ;;  %v5587_v34 = vpop.f32.mrb[2].mxu1  ;;  %v1125_v35 = vpop.f32.mrb[3].mxu0  ;;  %v2364_v51 = vmax.f32 %v1963_v55, 0.0 }
 0x174   : > { %v2092_v36 = vadd.f32 %v5587_v34, %v6981_v53  ;;  %v1962_v37 = vadd.f32 %v6981_v53, %v1125_v35  ;;  %v1703_v50 = vpop.f32.mrb[3].mxu1  ;;  %v2428_v7 = vmax.f32 %v2091_v2, 0.0  ;;  %v2362_v8 = vmax.f32 %v1961_v3, 0.0 }
 0x175   : > { %v2365_v56 = vmax.f32 %v1964_v21, 0.0  ;;  %v2090_v57 = vadd.f32 %v6981_v53, %v1703_v50  ;;  %v2426_v32 = vmax.f32 %v2089_v20, 0.0 }
 0x176   : > { %v2429_v11 = vmax.f32 %v2092_v36, 0.0  ;;  %v2363_v12 = vmax.f32 %v1962_v37, 0.0 }
 0x177   : > { %v2491_v33 = vpack.c.bf16 %v2365_v56, %v2364_v51  ;;  %v2427_v38 = vmax.f32 %v2090_v57, 0.0 }
 0x178   : > { %v6991_v39 = vpack.c.bf16 %v2429_v11, %v2428_v7  ;;  %v2490_v60 = vpack.c.bf16 %v2363_v12, %v2362_v8  ;;  %v5458_v61 = vpop.f32.mrb[4].mxu0 }
 0x179   : > { %v6993_v62 = vpack.c.bf16 %v2427_v38, %v2426_v32  ;;  %v1967_v63 = vadd.f32 %v5458_v61, %v6981_v53  ;;  %v5590_v26 = vpop.f32.mrb[4].mxu1  ;;  %v1138_v27 = vpop.f32.mrb[5].mxu0 }
 0x17a   : > { %v2095_v45 = vadd.f32 %v5590_v26, %v6981_v53  ;;  %v1965_v49 = vadd.f32 %v6981_v53, %v1138_v27  ;;  %v1716_v15 = vpop.f32.mrb[5].mxu1  ;;  %v5459_v23 = vpop.f32.mrb[6].mxu0  ;;  %5664 = vmatprep.mubr.bf16.mxu0 %v2490_v60 }
 0x17b   : > { %v2093_v6 = vadd.f32 %v6981_v53, %v1716_v15  ;;  %v1968_v13 = vadd.f32 %v5459_v23, %v6981_v53  ;;  %v5591_v47 = vpop.f32.mrb[6].mxu1  ;;  %v1141_v48 = vpop.f32.mrb[7].mxu0  ;;  %5665 = vmatmul.mubr.bf16.vlgmr.msra.gmra.mrb[64].mxu0 %v2491_v33  ;;  %v2368_v22 = vmax.f32 %v1967_v63, 0.0 }
 0x17c   : > { %v2096_v58 = vadd.f32 %v5591_v47, %v6981_v53  ;;  %v1966_v59 = vadd.f32 %v6981_v53, %v1141_v48  ;;  %v1719_v4 = vpop.f32.mrb[7].mxu1  ;;  %v2432_v25 = vmax.f32 %v2095_v45, 0.0  ;;  %v2366_v46 = vmax.f32 %v1965_v49, 0.0 }
 0x17d   : > { %v2369_v24 = vmax.f32 %v1968_v13, 0.0  ;;  %v2094_v44 = vadd.f32 %v6981_v53, %v1719_v4  ;;  %v2430_v10 = vmax.f32 %v2093_v6, 0.0 }
 0x17e   : > { %v2433_v5 = vmax.f32 %v2096_v58, 0.0  ;;  %v2367_v9 = vmax.f32 %v1966_v59, 0.0 }
 0x17f   : > { %v2493_v14 = vpack.c.bf16 %v2369_v24, %v2368_v22  ;;  %v2431_v18 = vmax.f32 %v2094_v44, 0.0 }
 0x180   : > { %v7003_v19 = vpack.c.bf16 %v2433_v5, %v2432_v25  ;;  %v2492_v28 = vpack.c.bf16 %v2367_v9, %v2366_v46  ;;  %v5462_v29 = vpop.f32.mrb[8].mxu0 }
 0x181   : > { %v7005_v30 = vpack.c.bf16 %v2431_v18, %v2430_v10  ;;  %v1971_v31 = vadd.f32 %v5462_v29, %v6981_v53  ;;  %v5594_v40 = vpop.f32.mrb[8].mxu1  ;;  %v1154_v41 = vpop.f32.mrb[9].mxu0 }
 0x182   : > { %v2099_v42 = vadd.f32 %v5594_v40, %v6981_v53  ;;  %v1969_v43 = vadd.f32 %v6981_v53, %v1154_v41  ;;  %v1732_v52 = vpop.f32.mrb[9].mxu1  ;;  %v5463_v54 = vpop.f32.mrb[10].mxu0  ;;  %5668 = vmatprep.mubr.bf16.mxu0 %v2492_v28 }
 0x183   : > { %v2097_v55 = vadd.f32 %v6981_v53, %v1732_v52  ;;  %v1972_v0 = vadd.f32 %v5463_v54, %v6981_v53  ;;  %v5595_v1 = vpop.f32.mrb[10].mxu1  ;;  %v1157_v2 = vpop.f32.mrb[11].mxu0  ;;  %5669 = vmatmul.mubr.bf16.gmra.mrb[68].mxu0 %v2493_v14  ;;  %v2372_v20 = vmax.f32 %v1971_v31, 0.0 }
 0x184   : > { %v2100_v3 = vadd.f32 %v5595_v1, %v6981_v53  ;;  %v1970_v16 = vadd.f32 %v6981_v53, %v1157_v2  ;;  %v1735_v17 = vpop.f32.mrb[11].mxu1  ;;  %v2436_v35 = vmax.f32 %v2099_v42, 0.0  ;;  %v2370_v36 = vmax.f32 %v1969_v43, 0.0 }
 0x185   : > { %v2373_v21 = vmax.f32 %v1972_v0, 0.0  ;;  %v2098_v34 = vadd.f32 %v6981_v53, %v1735_v17  ;;  %v2434_v51 = vmax.f32 %v2097_v55, 0.0 }
 0x186   : > { %v2437_v37 = vmax.f32 %v2100_v3, 0.0  ;;  %v2371_v50 = vmax.f32 %v1970_v16, 0.0 }
 0x187   : > { %v2495_v56 = vpack.c.bf16 %v2373_v21, %v2372_v20  ;;  %v2435_v57 = vmax.f32 %v2098_v34, 0.0 }
 0x188   : > { %v7015_v7 = vpack.c.bf16 %v2437_v37, %v2436_v35  ;;  %v2494_v8 = vpack.c.bf16 %v2371_v50, %v2370_v36  ;;  %v5466_v11 = vpop.f32.mrb[12].mxu0 }
 0x189   : > { %v7017_v12 = vpack.c.bf16 %v2435_v57, %v2434_v51  ;;  %v1975_v32 = vadd.f32 %v5466_v11, %v6981_v53  ;;  %v5598_v33 = vpop.f32.mrb[12].mxu1  ;;  %v1170_v38 = vpop.f32.mrb[13].mxu0 }
 0x18a   : > { %v2103_v60 = vadd.f32 %v5598_v33, %v6981_v53  ;;  %v1973_v61 = vadd.f32 %v6981_v53, %v1170_v38  ;;  %v1748_v63 = vpop.f32.mrb[13].mxu1  ;;  %v5467_v26 = vpop.f32.mrb[14].mxu0  ;;  %5672 = vmatprep.mubr.bf16.mxu0 %v2494_v8 }
 0x18b   : > { %v2101_v27 = vadd.f32 %v6981_v53, %v1748_v63  ;;  %v1976_v45 = vadd.f32 %v5467_v26, %v6981_v53  ;;  %v5599_v49 = vpop.f32.mrb[14].mxu1  ;;  %v1173_v15 = vpop.f32.mrb[15].mxu0  ;;  %5673 = vmatmul.mubr.bf16.gmra.mrb[72].mxu0 %v2495_v56  ;;  %v2376_v47 = vmax.f32 %v1975_v32, 0.0 }
 0x18c   : > { %v2104_v23 = vadd.f32 %v5599_v49, %v6981_v53  ;;  %v1974_v6 = vadd.f32 %v6981_v53, %v1173_v15  ;;  %v1751_v13 = vpop.f32.mrb[15].mxu1  ;;  %v2440_v59 = vmax.f32 %v2103_v60, 0.0  ;;  %v2374_v4 = vmax.f32 %v1973_v61, 0.0 }
 0x18d   : > { %v2377_v48 = vmax.f32 %v1976_v45, 0.0  ;;  %v2102_v58 = vadd.f32 %v6981_v53, %v1751_v13  ;;  %v2438_v44 = vmax.f32 %v2101_v27, 0.0 }
 0x18e   : > { %v2441_v22 = vmax.f32 %v2104_v23, 0.0  ;;  %v2375_v24 = vmax.f32 %v1974_v6, 0.0 }
 0x18f   : > { %v2497_v25 = vpack.c.bf16 %v2377_v48, %v2376_v47  ;;  %v2439_v46 = vmax.f32 %v2102_v58, 0.0 }
 0x190   : > { %v7027_v5 = vpack.c.bf16 %v2441_v22, %v2440_v59  ;;  %v2496_v9 = vpack.c.bf16 %v2375_v24, %v2374_v4  ;;  %v5470_v10 = vpop.f32.mrb[16].mxu0 }
 0x191   : > { %v7029_v14 = vpack.c.bf16 %v2439_v46, %v2438_v44  ;;  %v1979_v18 = vadd.f32 %v5470_v10, %v6981_v53  ;;  %v5602_v28 = vpop.f32.mrb[16].mxu1  ;;  %v1186_v29 = vpop.f32.mrb[17].mxu0 }
 0x192   : > { %v2107_v31 = vadd.f32 %v5602_v28, %v6981_v53  ;;  %v1977_v40 = vadd.f32 %v6981_v53, %v1186_v29  ;;  %v1764_v41 = vpop.f32.mrb[17].mxu1  ;;  %v5471_v42 = vpop.f32.mrb[18].mxu0  ;;  %5676 = vmatprep.mubr.bf16.mxu0 %v2496_v9 }
 0x193   : > { %v2105_v43 = vadd.f32 %v6981_v53, %v1764_v41  ;;  %v1980_v52 = vadd.f32 %v5471_v42, %v6981_v53  ;;  %v5603_v54 = vpop.f32.mrb[18].mxu1  ;;  %v1189_v55 = vpop.f32.mrb[19].mxu0  ;;  %5677 = vmatmul.mubr.bf16.gmra.mrb[76].mxu0 %v2497_v25  ;;  %v2380_v3 = vmax.f32 %v1979_v18, 0.0 }
 0x194   : > { %v2108_v0 = vadd.f32 %v5603_v54, %v6981_v53  ;;  %v1978_v1 = vadd.f32 %v6981_v53, %v1189_v55  ;;  %v1767_v2 = vpop.f32.mrb[19].mxu1  ;;  %v2444_v20 = vmax.f32 %v2107_v31, 0.0  ;;  %v2378_v21 = vmax.f32 %v1977_v40, 0.0 }
 0x195   : > { %v2381_v16 = vmax.f32 %v1980_v52, 0.0  ;;  %v2106_v17 = vadd.f32 %v6981_v53, %v1767_v2  ;;  %v2442_v36 = vmax.f32 %v2105_v43, 0.0 }
 0x196   : > { %v2445_v34 = vmax.f32 %v2108_v0, 0.0  ;;  %v2379_v35 = vmax.f32 %v1978_v1, 0.0 }
 0x197   : > { %v2499_v37 = vpack.c.bf16 %v2381_v16, %v2380_v3  ;;  %v2443_v50 = vmax.f32 %v2106_v17, 0.0 }
 0x198   : > { %v7039_v51 = vpack.c.bf16 %v2445_v34, %v2444_v20  ;;  %v2498_v56 = vpack.c.bf16 %v2379_v35, %v2378_v21  ;;  %v5474_v57 = vpop.f32.mrb[20].mxu0 }
 0x199   : > { %v7041_v8 = vpack.c.bf16 %v2443_v50, %v2442_v36  ;;  %v1983_v11 = vadd.f32 %v5474_v57, %v6981_v53  ;;  %v5606_v32 = vpop.f32.mrb[20].mxu1  ;;  %v1202_v33 = vpop.f32.mrb[21].mxu0 }
 0x19a   : > { %v2111_v38 = vadd.f32 %v5606_v32, %v6981_v53  ;;  %v1981_v60 = vadd.f32 %v6981_v53, %v1202_v33  ;;  %v1780_v61 = vpop.f32.mrb[21].mxu1  ;;  %v5475_v63 = vpop.f32.mrb[22].mxu0  ;;  %5680 = vmatprep.mubr.bf16.mxu0 %v2498_v56 }
 0x19b   : > { %v2109_v26 = vadd.f32 %v6981_v53, %v1780_v61  ;;  %v1984_v27 = vadd.f32 %v5475_v63, %v6981_v53  ;;  %v5607_v45 = vpop.f32.mrb[22].mxu1  ;;  %v1205_v49 = vpop.f32.mrb[23].mxu0  ;;  %5681 = vmatmul.mubr.bf16.gmra.mrb[80].mxu0 %v2499_v37  ;;  %v2384_v13 = vmax.f32 %v1983_v11, 0.0 }
 0x19c   : > { %v2112_v15 = vadd.f32 %v5607_v45, %v6981_v53  ;;  %v1982_v23 = vadd.f32 %v6981_v53, %v1205_v49  ;;  %v1783_v6 = vpop.f32.mrb[23].mxu1  ;;  %v2448_v58 = vmax.f32 %v2111_v38, 0.0  ;;  %v2382_v59 = vmax.f32 %v1981_v60, 0.0 }
 0x19d   : > { %v2385_v47 = vmax.f32 %v1984_v27, 0.0  ;;  %v2110_v48 = vadd.f32 %v6981_v53, %v1783_v6  ;;  %v2446_v24 = vmax.f32 %v2109_v26, 0.0 }
 0x19e   : > { %v2449_v4 = vmax.f32 %v2112_v15, 0.0  ;;  %v2383_v22 = vmax.f32 %v1982_v23, 0.0 }
 0x19f   : > { %v2501_v44 = vpack.c.bf16 %v2385_v47, %v2384_v13  ;;  %v2447_v25 = vmax.f32 %v2110_v48, 0.0 }
 0x1a0   : > { %v7051_v46 = vpack.c.bf16 %v2449_v4, %v2448_v58  ;;  %v2500_v9 = vpack.c.bf16 %v2383_v22, %v2382_v59  ;;  %v5478_v10 = vpop.f32.mrb[24].mxu0 }
 0x1a1   : > { %v7053_v18 = vpack.c.bf16 %v2447_v25, %v2446_v24  ;;  %v1987_v28 = vadd.f32 %v5478_v10, %v6981_v53  ;;  %v5610_v29 = vpop.f32.mrb[24].mxu1  ;;  %v1218_v31 = vpop.f32.mrb[25].mxu0 }
 0x1a2   : > { %v2115_v40 = vadd.f32 %v5610_v29, %v6981_v53  ;;  %v1985_v41 = vadd.f32 %v6981_v53, %v1218_v31  ;;  %v1796_v42 = vpop.f32.mrb[25].mxu1  ;;  %v5479_v43 = vpop.f32.mrb[26].mxu0  ;;  %5684 = vmatprep.mubr.bf16.mxu0 %v2500_v9 }
 0x1a3   : > { %v2113_v52 = vadd.f32 %v6981_v53, %v1796_v42  ;;  %v1988_v54 = vadd.f32 %v5479_v43, %v6981_v53  ;;  %v5611_v55 = vpop.f32.mrb[26].mxu1  ;;  %v1221_v0 = vpop.f32.mrb[27].mxu0  ;;  %5685 = vmatmul.mubr.bf16.gmra.mrb[84].mxu0 %v2501_v44  ;;  %v2388_v16 = vmax.f32 %v1987_v28, 0.0 }
 0x1a4   : > { %v2116_v1 = vadd.f32 %v5611_v55, %v6981_v53  ;;  %v1986_v2 = vadd.f32 %v6981_v53, %v1221_v0  ;;  %v1799_v3 = vpop.f32.mrb[27].mxu1  ;;  %v2452_v21 = vmax.f32 %v2115_v40, 0.0  ;;  %v2386_v34 = vmax.f32 %v1985_v41, 0.0 }
 0x1a5   : > { %v2389_v17 = vmax.f32 %v1988_v54, 0.0  ;;  %v2114_v20 = vadd.f32 %v6981_v53, %v1799_v3  ;;  %v2450_v37 = vmax.f32 %v2113_v52, 0.0 }
 0x1a6   : > { %v2453_v35 = vmax.f32 %v2116_v1, 0.0  ;;  %v2387_v36 = vmax.f32 %v1986_v2, 0.0 }
 0x1a7   : > { %v2503_v50 = vpack.c.bf16 %v2389_v17, %v2388_v16  ;;  %v2451_v56 = vmax.f32 %v2114_v20, 0.0 }
 0x1a8   : > { %v7063_v57 = vpack.c.bf16 %v2453_v35, %v2452_v21  ;;  %v2502_v11 = vpack.c.bf16 %v2387_v36, %v2386_v34  ;;  %v5482_v32 = vpop.f32.mrb[28].mxu0 }
 0x1a9   : > { %v7065_v33 = vpack.c.bf16 %v2451_v56, %v2450_v37  ;;  %v1991_v38 = vadd.f32 %v5482_v32, %v6981_v53  ;;  %v5614_v60 = vpop.f32.mrb[28].mxu1  ;;  %v1234_v61 = vpop.f32.mrb[29].mxu0 }
 0x1aa   : > { %v2119_v63 = vadd.f32 %v5614_v60, %v6981_v53  ;;  %v1989_v26 = vadd.f32 %v6981_v53, %v1234_v61  ;;  %v1812_v27 = vpop.f32.mrb[29].mxu1  ;;  %v5483_v45 = vpop.f32.mrb[30].mxu0  ;;  %5688 = vmatprep.mubr.bf16.mxu0 %v2502_v11 }
 0x1ab   : > { %v2117_v49 = vadd.f32 %v6981_v53, %v1812_v27  ;;  %v1992_v15 = vadd.f32 %v5483_v45, %v6981_v53  ;;  %v5615_v23 = vpop.f32.mrb[30].mxu1  ;;  %v1237_v6 = vpop.f32.mrb[31].mxu0  ;;  %5689 = vmatmul.mubr.bf16.gmra.mrb[88].mxu0 %v2503_v50  ;;  %v2392_v58 = vmax.f32 %v1991_v38, 0.0 }
 0x1ac   : > { %v2120_v13 = vadd.f32 %v5615_v23, %v6981_v53  ;;  %v1990_v47 = vadd.f32 %v6981_v53, %v1237_v6  ;;  %v1815_v48 = vpop.f32.mrb[31].mxu1  ;;  %v2456_v22 = vmax.f32 %v2119_v63, 0.0  ;;  %v2390_v24 = vmax.f32 %v1989_v26, 0.0 }
 0x1ad   : > { %v2393_v59 = vmax.f32 %v1992_v15, 0.0  ;;  %v2118_v4 = vadd.f32 %v6981_v53, %v1815_v48  ;;  %v2454_v9 = vmax.f32 %v2117_v49, 0.0 }
 0x1ae   : > { %v2457_v44 = vmax.f32 %v2120_v13, 0.0  ;;  %v2391_v25 = vmax.f32 %v1990_v47, 0.0 }
 0x1af   : > { %v2505_v10 = vpack.c.bf16 %v2393_v59, %v2392_v58  ;;  %v2455_v28 = vmax.f32 %v2118_v4, 0.0 }
 0x1b0   : > { %v7075_v29 = vpack.c.bf16 %v2457_v44, %v2456_v22  ;;  %v2504_v31 = vpack.c.bf16 %v2391_v25, %v2390_v24  ;;  %v5486_v40 = vpop.f32.mrb[32].mxu0 }
 0x1b1   : > { %v7077_v41 = vpack.c.bf16 %v2455_v28, %v2454_v9  ;;  %v1995_v42 = vadd.f32 %v5486_v40, %v6981_v53  ;;  %v5618_v43 = vpop.f32.mrb[32].mxu1  ;;  %v1250_v52 = vpop.f32.mrb[33].mxu0 }
 0x1b2   : > { %v2123_v54 = vadd.f32 %v5618_v43, %v6981_v53  ;;  %v1993_v55 = vadd.f32 %v6981_v53, %v1250_v52  ;;  %v1828_v0 = vpop.f32.mrb[33].mxu1  ;;  %v5487_v1 = vpop.f32.mrb[34].mxu0  ;;  %5692 = vmatprep.mubr.bf16.mxu0 %v2504_v31 }
 0x1b3   : > { %v2121_v2 = vadd.f32 %v6981_v53, %v1828_v0  ;;  %v1996_v3 = vadd.f32 %v5487_v1, %v6981_v53  ;;  %v5619_v16 = vpop.f32.mrb[34].mxu1  ;;  %v1253_v17 = vpop.f32.mrb[35].mxu0  ;;  %5693 = vmatmul.mubr.bf16.gmra.mrb[92].mxu0 %v2505_v10  ;;  %v2396_v35 = vmax.f32 %v1995_v42, 0.0 }
 0x1b4   : > { %v2124_v20 = vadd.f32 %v5619_v16, %v6981_v53  ;;  %v1994_v21 = vadd.f32 %v6981_v53, %v1253_v17  ;;  %v1831_v34 = vpop.f32.mrb[35].mxu1  ;;  %v2460_v50 = vmax.f32 %v2123_v54, 0.0  ;;  %v2394_v56 = vmax.f32 %v1993_v55, 0.0 }
 0x1b5   : > { %v2397_v36 = vmax.f32 %v1996_v3, 0.0  ;;  %v2122_v37 = vadd.f32 %v6981_v53, %v1831_v34  ;;  %v2458_v38 = vmax.f32 %v2121_v2, 0.0 }
 0x1b6   : > { %v2461_v11 = vmax.f32 %v2124_v20, 0.0  ;;  %v2395_v32 = vmax.f32 %v1994_v21, 0.0 }
 0x1b7   : > { %v2507_v60 = vpack.c.bf16 %v2397_v36, %v2396_v35  ;;  %v2459_v61 = vmax.f32 %v2122_v37, 0.0 }
 0x1b8   : > { %v7087_v63 = vpack.c.bf16 %v2461_v11, %v2460_v50  ;;  %v2506_v26 = vpack.c.bf16 %v2395_v32, %v2394_v56  ;;  %v5490_v27 = vpop.f32.mrb[36].mxu0 }
 0x1b9   : > { %v7089_v45 = vpack.c.bf16 %v2459_v61, %v2458_v38  ;;  %v1999_v49 = vadd.f32 %v5490_v27, %v6981_v53  ;;  %v5622_v15 = vpop.f32.mrb[36].mxu1  ;;  %v1266_v23 = vpop.f32.mrb[37].mxu0 }
 0x1ba   : > { %v2127_v6 = vadd.f32 %v5622_v15, %v6981_v53  ;;  %v1997_v13 = vadd.f32 %v6981_v53, %v1266_v23  ;;  %v1844_v47 = vpop.f32.mrb[37].mxu1  ;;  %v5491_v48 = vpop.f32.mrb[38].mxu0  ;;  %5696 = vmatprep.mubr.bf16.mxu0 %v2506_v26 }
 0x1bb   : > { %v2125_v58 = vadd.f32 %v6981_v53, %v1844_v47  ;;  %v2000_v59 = vadd.f32 %v5491_v48, %v6981_v53  ;;  %v5623_v4 = vpop.f32.mrb[38].mxu1  ;;  %v1269_v22 = vpop.f32.mrb[39].mxu0  ;;  %5697 = vmatmul.mubr.bf16.gmra.mrb[96].mxu0 %v2507_v60  ;;  %v2400_v9 = vmax.f32 %v1999_v49, 0.0 }
 0x1bc   : > { %v2128_v24 = vadd.f32 %v5623_v4, %v6981_v53  ;;  %v1998_v44 = vadd.f32 %v6981_v53, %v1269_v22  ;;  %v1847_v25 = vpop.f32.mrb[39].mxu1  ;;  %v2464_v31 = vmax.f32 %v2127_v6, 0.0  ;;  %v2398_v40 = vmax.f32 %v1997_v13, 0.0 }
 0x1bd   : > { %v2401_v10 = vmax.f32 %v2000_v59, 0.0  ;;  %v2126_v28 = vadd.f32 %v6981_v53, %v1847_v25  ;;  %v2462_v52 = vmax.f32 %v2125_v58, 0.0 }
 0x1be   : > { %v2465_v42 = vmax.f32 %v2128_v24, 0.0  ;;  %v2399_v43 = vmax.f32 %v1998_v44, 0.0 }
 0x1bf   : > { %v2509_v54 = vpack.c.bf16 %v2401_v10, %v2400_v9  ;;  %v2463_v55 = vmax.f32 %v2126_v28, 0.0 }
 0x1c0   : > { %v7099_v0 = vpack.c.bf16 %v2465_v42, %v2464_v31  ;;  %v2508_v1 = vpack.c.bf16 %v2399_v43, %v2398_v40  ;;  %v5494_v2 = vpop.f32.mrb[40].mxu0 }
 0x1c1   : > { %v7101_v3 = vpack.c.bf16 %v2463_v55, %v2462_v52  ;;  %v2003_v16 = vadd.f32 %v5494_v2, %v6981_v53  ;;  %v5626_v17 = vpop.f32.mrb[40].mxu1  ;;  %v1282_v20 = vpop.f32.mrb[41].mxu0 }
 0x1c2   : > { %v2131_v21 = vadd.f32 %v5626_v17, %v6981_v53  ;;  %v2001_v34 = vadd.f32 %v6981_v53, %v1282_v20  ;;  %v1860_v35 = vpop.f32.mrb[41].mxu1  ;;  %v5495_v36 = vpop.f32.mrb[42].mxu0  ;;  %5700 = vmatprep.mubr.bf16.mxu0 %v2508_v1 }
 0x1c3   : > { %v2129_v37 = vadd.f32 %v6981_v53, %v1860_v35  ;;  %v2004_v50 = vadd.f32 %v5495_v36, %v6981_v53  ;;  %v5627_v56 = vpop.f32.mrb[42].mxu1  ;;  %v1285_v11 = vpop.f32.mrb[43].mxu0  ;;  %5701 = vmatmul.mubr.bf16.gmra.mrb[100].mxu0 %v2509_v54  ;;  %v2404_v61 = vmax.f32 %v2003_v16, 0.0 }
 0x1c4   : > { %v2132_v32 = vadd.f32 %v5627_v56, %v6981_v53  ;;  %v2002_v38 = vadd.f32 %v6981_v53, %v1285_v11  ;;  %v1863_v60 = vpop.f32.mrb[43].mxu1  ;;  %v2468_v49 = vmax.f32 %v2131_v21, 0.0  ;;  %v2402_v15 = vmax.f32 %v2001_v34, 0.0 }
 0x1c5   : > { %v2405_v26 = vmax.f32 %v2004_v50, 0.0  ;;  %v2130_v27 = vadd.f32 %v6981_v53, %v1863_v60  ;;  %v2466_v13 = vmax.f32 %v2129_v37, 0.0 }
 0x1c6   : > { %v2469_v23 = vmax.f32 %v2132_v32, 0.0  ;;  %v2403_v6 = vmax.f32 %v2002_v38, 0.0 }
 0x1c7   : > { %v2511_v47 = vpack.c.bf16 %v2405_v26, %v2404_v61  ;;  %v2467_v48 = vmax.f32 %v2130_v27, 0.0 }
 0x1c8   : > { %v7111_v58 = vpack.c.bf16 %v2469_v23, %v2468_v49  ;;  %v2510_v59 = vpack.c.bf16 %v2403_v6, %v2402_v15  ;;  %v5498_v4 = vpop.f32.mrb[44].mxu0 }
 0x1c9   : > { %v7113_v22 = vpack.c.bf16 %v2467_v48, %v2466_v13  ;;  %v2007_v24 = vadd.f32 %v5498_v4, %v6981_v53  ;;  %v5630_v44 = vpop.f32.mrb[44].mxu1  ;;  %v1298_v25 = vpop.f32.mrb[45].mxu0 }
 0x1ca   : > { %v2135_v9 = vadd.f32 %v5630_v44, %v6981_v53  ;;  %v2005_v10 = vadd.f32 %v6981_v53, %v1298_v25  ;;  %v1876_v28 = vpop.f32.mrb[45].mxu1  ;;  %v5499_v31 = vpop.f32.mrb[46].mxu0  ;;  %5704 = vmatprep.mubr.bf16.mxu0 %v2510_v59 }
 0x1cb   : > { %v2133_v40 = vadd.f32 %v6981_v53, %v1876_v28  ;;  %v2008_v42 = vadd.f32 %v5499_v31, %v6981_v53  ;;  %v5631_v43 = vpop.f32.mrb[46].mxu1  ;;  %v1301_v52 = vpop.f32.mrb[47].mxu0  ;;  %5705 = vmatmul.mubr.bf16.gmra.mrb[104].mxu0 %v2511_v47  ;;  %v2408_v2 = vmax.f32 %v2007_v24, 0.0 }
 0x1cc   : > { %v2136_v54 = vadd.f32 %v5631_v43, %v6981_v53  ;;  %v2006_v55 = vadd.f32 %v6981_v53, %v1301_v52  ;;  %v1879_v1 = vpop.f32.mrb[47].mxu1  ;;  %v2472_v20 = vmax.f32 %v2135_v9, 0.0  ;;  %v2406_v21 = vmax.f32 %v2005_v10, 0.0 }
 0x1cd   : > { %v2409_v16 = vmax.f32 %v2008_v42, 0.0  ;;  %v2134_v17 = vadd.f32 %v6981_v53, %v1879_v1  ;;  %v2470_v36 = vmax.f32 %v2133_v40, 0.0 }
 0x1ce   : > { %v2473_v34 = vmax.f32 %v2136_v54, 0.0  ;;  %v2407_v35 = vmax.f32 %v2006_v55, 0.0 }
 0x1cf   : > { %v2513_v37 = vpack.c.bf16 %v2409_v16, %v2408_v2  ;;  %v2471_v50 = vmax.f32 %v2134_v17, 0.0 }
 0x1d0   : > { %v7123_v56 = vpack.c.bf16 %v2473_v34, %v2472_v20  ;;  %v2512_v11 = vpack.c.bf16 %v2407_v35, %v2406_v21  ;;  %v5502_v32 = vpop.f32.mrb[48].mxu0 }
 0x1d1   : > { %v7125_v38 = vpack.c.bf16 %v2471_v50, %v2470_v36  ;;  %v2011_v60 = vadd.f32 %v5502_v32, %v6981_v53  ;;  %v5634_v61 = vpop.f32.mrb[48].mxu1  ;;  %v1314_v26 = vpop.f32.mrb[49].mxu0 }
 0x1d2   : > { %v2139_v27 = vadd.f32 %v5634_v61, %v6981_v53  ;;  %v2009_v49 = vadd.f32 %v6981_v53, %v1314_v26  ;;  %v1892_v15 = vpop.f32.mrb[49].mxu1  ;;  %v5503_v23 = vpop.f32.mrb[50].mxu0  ;;  %5708 = vmatprep.mubr.bf16.mxu0 %v2512_v11 }
 0x1d3   : > { %v2137_v6 = vadd.f32 %v6981_v53, %v1892_v15  ;;  %v2012_v13 = vadd.f32 %v5503_v23, %v6981_v53  ;;  %v5635_v47 = vpop.f32.mrb[50].mxu1  ;;  %v1317_v48 = vpop.f32.mrb[51].mxu0  ;;  %5709 = vmatmul.mubr.bf16.gmra.mrb[108].mxu0 %v2513_v37  ;;  %v2412_v44 = vmax.f32 %v2011_v60, 0.0  ;;  %v7150_v23 = vld [vmem:[%s7921_s7] sm:$0xff]  }
 0x1d4   : > { %v2140_v59 = vadd.f32 %v5635_v47, %v6981_v53  ;;  %v2010_v4 = vadd.f32 %v6981_v53, %v1317_v48  ;;  %v1895_v24 = vpop.f32.mrb[51].mxu1  ;;  %v2476_v10 = vmax.f32 %v2139_v27, 0.0  ;;  %v2410_v28 = vmax.f32 %v2009_v49, 0.0  ;;  %5792 = vmatprep.subr.bf16.mxu1 %v7150_v23 }
 0x1d5   : > { %v2413_v25 = vmax.f32 %v2012_v13, 0.0  ;;  %v2138_v9 = vadd.f32 %v6981_v53, %v1895_v24  ;;  %v2474_v42 = vmax.f32 %v2137_v6, 0.0  ;;  %5793 = vmatpush3.bf16.msra.mxu1 %v7150_v23 }
 0x1d6   : > { %v2477_v31 = vmax.f32 %v2140_v59, 0.0  ;;  %v2411_v40 = vmax.f32 %v2010_v4, 0.0 }
 0x1d7   : > { %v2515_v43 = vpack.c.bf16 %v2413_v25, %v2412_v44  ;;  %v2475_v52 = vmax.f32 %v2138_v9, 0.0 }
 0x1d8   : > { %v7135_v54 = vpack.c.bf16 %v2477_v31, %v2476_v10  ;;  %v2514_v55 = vpack.c.bf16 %v2411_v40, %v2410_v28  ;;  %v5506_v1 = vpop.f32.mrb[52].mxu0 }
 0x1d9   : > { %v7137_v2 = vpack.c.bf16 %v2475_v52, %v2474_v42  ;;  %v2015_v16 = vadd.f32 %v5506_v1, %v6981_v53  ;;  %v5638_v17 = vpop.f32.mrb[52].mxu1  ;;  %v1330_v20 = vpop.f32.mrb[53].mxu0 }
 0x1da   : > { %v2143_v21 = vadd.f32 %v5638_v17, %v6981_v53  ;;  %v2013_v34 = vadd.f32 %v6981_v53, %v1330_v20  ;;  %v1908_v35 = vpop.f32.mrb[53].mxu1  ;;  %v5507_v36 = vpop.f32.mrb[54].mxu0  ;;  %5712 = vmatprep.mubr.bf16.mxu0 %v2514_v55 }
 0x1db   : > { %v2141_v37 = vadd.f32 %v6981_v53, %v1908_v35  ;;  %v2016_v50 = vadd.f32 %v5507_v36, %v6981_v53  ;;  %v5639_v11 = vpop.f32.mrb[54].mxu1  ;;  %v1333_v32 = vpop.f32.mrb[55].mxu0  ;;  %5713 = vmatmul.mubr.bf16.gmra.mrb[112].mxu0 %v2515_v43  ;;  %v2416_v27 = vmax.f32 %v2015_v16, 0.0 }
 0x1dc   : > { %v2144_v60 = vadd.f32 %v5639_v11, %v6981_v53  ;;  %v2014_v61 = vadd.f32 %v6981_v53, %v1333_v32  ;;  %v1911_v26 = vpop.f32.mrb[55].mxu1  ;;  %v2480_v6 = vmax.f32 %v2143_v21, 0.0  ;;  %v2414_v13 = vmax.f32 %v2013_v34, 0.0 }
 0x1dd   : > { %v2417_v49 = vmax.f32 %v2016_v50, 0.0  ;;  %v2142_v15 = vadd.f32 %v6981_v53, %v1911_v26  ;;  %v2478_v59 = vmax.f32 %v2141_v37, 0.0 }
 0x1de   : > { %v2481_v47 = vmax.f32 %v2144_v60, 0.0  ;;  %v2415_v48 = vmax.f32 %v2014_v61, 0.0 }
 0x1df   : > { %v2517_v4 = vpack.c.bf16 %v2417_v49, %v2416_v27  ;;  %v2479_v24 = vmax.f32 %v2142_v15, 0.0 }
 0x1e0   : > { %v7153_v44 = vpack.c.bf16 %v2481_v47, %v2480_v6  ;;  %v2516_v25 = vpack.c.bf16 %v2415_v48, %v2414_v13  ;;  %v5510_v9 = vpop.f32.mrb[56].mxu0 }
 0x1e1   : > { %v7156_v10 = vpack.c.bf16 %v2479_v24, %v2478_v59  ;;  %v2019_v28 = vadd.f32 %v5510_v9, %v6981_v53  ;;  %v5642_v31 = vpop.f32.mrb[56].mxu1  ;;  %v1346_v40 = vpop.f32.mrb[57].mxu0 }
 0x1e2   : > { %v2147_v42 = vadd.f32 %v5642_v31, %v6981_v53  ;;  %v2017_v43 = vadd.f32 %v6981_v53, %v1346_v40  ;;  %v1924_v52 = vpop.f32.mrb[57].mxu1  ;;  %v5511_v55 = vpop.f32.mrb[58].mxu0  ;;  %5716 = vmatprep.mubr.bf16.mxu0 %v2516_v25 }
 0x1e3   : > { %v2145_v1 = vadd.f32 %v6981_v53, %v1924_v52  ;;  %v2020_v16 = vadd.f32 %v5511_v55, %v6981_v53  ;;  %v5643_v17 = vpop.f32.mrb[58].mxu1  ;;  %v1349_v20 = vpop.f32.mrb[59].mxu0  ;;  %5717 = vmatmul.mubr.bf16.gmra.mrb[116].mxu0 %v2517_v4  ;;  %v2420_v36 = vmax.f32 %v2019_v28, 0.0 }
 0x1e4   : > { %v2148_v21 = vadd.f32 %v5643_v17, %v6981_v53  ;;  %v2018_v34 = vadd.f32 %v6981_v53, %v1349_v20  ;;  %v1927_v35 = vpop.f32.mrb[59].mxu1  ;;  %v2484_v11 = vmax.f32 %v2147_v42, 0.0  ;;  %v2418_v32 = vmax.f32 %v2017_v43, 0.0 }
 0x1e5   : > { %v2421_v37 = vmax.f32 %v2020_v16, 0.0  ;;  %v2146_v50 = vadd.f32 %v6981_v53, %v1927_v35  ;;  %v2482_v26 = vmax.f32 %v2145_v1, 0.0 }
 0x1e6   : > { %v2485_v60 = vmax.f32 %v2148_v21, 0.0  ;;  %v2419_v61 = vmax.f32 %v2018_v34, 0.0  ;;  %v7181_v21 = vld [vmem:[%s7921_s7 + $0x8] sm:$0xff]  }
 0x1e7   : > { %v2519_v27 = vpack.c.bf16 %v2421_v37, %v2420_v36  ;;  %v2483_v49 = vmax.f32 %v2146_v50, 0.0  ;;  %5794 = vmatprep.subr.bf16.mxu1 %v7181_v21 }
 0x1e8   : > { %v7166_v15 = vpack.c.bf16 %v2485_v60, %v2484_v11  ;;  %v2518_v6 = vpack.c.bf16 %v2419_v61, %v2418_v32  ;;  %v5514_v13 = vpop.f32.mrb[60].mxu0  ;;  %5795 = vmatpush3.bf16.msra.mxu1 %v7181_v21 }
 0x1e9   : > { %v7168_v47 = vpack.c.bf16 %v2483_v49, %v2482_v26  ;;  %v2023_v48 = vadd.f32 %v5514_v13, %v6981_v53  ;;  %v5646_v59 = vpop.f32.mrb[60].mxu1  ;;  %v1362_v4 = vpop.f32.mrb[61].mxu0  ;;  %v7195_v26 = vld [vmem:[%s7921_s7 + $0x10] sm:$0xff]  }
 0x1ea   : > { %v2151_v24 = vadd.f32 %v5646_v59, %v6981_v53  ;;  %v2021_v25 = vadd.f32 %v6981_v53, %v1362_v4  ;;  %v1940_v9 = vpop.f32.mrb[61].mxu1  ;;  %v5515_v28 = vpop.f32.mrb[62].mxu0  ;;  %5720 = vmatprep.mubr.bf16.mxu0 %v2518_v6  ;;  %5796 = vmatprep.subr.bf16.mxu1 %v7195_v26 }
 0x1eb   : > { %v2149_v31 = vadd.f32 %v6981_v53, %v1940_v9  ;;  %v2024_v40 = vadd.f32 %v5515_v28, %v6981_v53  ;;  %v5647_v42 = vpop.f32.mrb[62].mxu1  ;;  %v1365_v43 = vpop.f32.mrb[63].mxu0  ;;  %5721 = vmatmul.mubr.bf16.gmra.mrb[120].mxu0 %v2519_v27  ;;  %v2424_v16 = vmax.f32 %v2023_v48, 0.0 }
 0x1ec   : > { %v2152_v52 = vadd.f32 %v5647_v42, %v6981_v53  ;;  %v2022_v55 = vadd.f32 %v6981_v53, %v1365_v43  ;;  %v1943_v1 = vpop.f32.mrb[63].mxu1  ;;  %v2488_v34 = vmax.f32 %v2151_v24, 0.0  ;;  %v2422_v35 = vmax.f32 %v2021_v25, 0.0  ;;  %5797 = vmatpush3.bf16.msra.mxu1 %v7195_v26 }
 0x1ed   : > { %v2425_v17 = vmax.f32 %v2024_v40, 0.0  ;;  %v2150_v20 = vadd.f32 %v6981_v53, %v1943_v1  ;;  %v2486_v50 = vmax.f32 %v2149_v31, 0.0 }
 0x1ee   : > { %v2489_v36 = vmax.f32 %v2152_v52, 0.0  ;;  %v2423_v37 = vmax.f32 %v2022_v55, 0.0 }
 0x1ef   : > { %v2521_v11 = vpack.c.bf16 %v2425_v17, %v2424_v16  ;;  %v2487_v32 = vmax.f32 %v2150_v20, 0.0 }
 0x1f0   : > { %v7184_v60 = vpack.c.bf16 %v2489_v36, %v2488_v34  ;;  %v2520_v61 = vpack.c.bf16 %v2423_v37, %v2422_v35 }
 0x1f1   : > { %v7187_v53 = vpack.c.bf16 %v2487_v32, %v2486_v50 }
 0x1f2   : > { %5724 = vmatprep.mubr.bf16.mxu0 %v2520_v61 }
 0x1f3   : > { %5725 = vmatmul.mubr.bf16.gmra.mrb[124].mxu0 %v2521_v11 }
 0x1f4   : > { %5728 = vmatprep.mubr.bf16.mxu0 %v6993_v62  ;;  %v7217_v62 = vld [vmem:[%s7921_s7 + $0x20] sm:$0xff]  }
 0x1fb   : > { %5729 = vmatmul.mubr.bf16.gmra.mrb[128].mxu0 %v6991_v39  ;;  %v7206_v39 = vld [vmem:[%s7921_s7 + $0x18] sm:$0xff]  }
 0x1fc   : > { %5732 = vmatprep.mubr.bf16.mxu0 %v7005_v30  ;;  %5798 = vmatprep.subr.bf16.mxu1 %v7206_v39  ;;  %v7239_v30 = vld [vmem:[%s7921_s7 + $0x30] sm:$0xff]  }
 0x1fd   : > { %5799 = vmatpush3.bf16.msra.mxu1 %v7206_v39 }
 0x1fe   : > { %5800 = vmatprep.subr.bf16.mxu1 %v7217_v62 }
 0x201   : > { %5801 = vmatpush3.bf16.msra.mxu1 %v7217_v62 }
 0x203   : > { %5733 = vmatmul.mubr.bf16.gmra.mrb[132].mxu0 %v7003_v19  ;;  %v7228_v19 = vld [vmem:[%s7921_s7 + $0x28] sm:$0xff]  }
 0x204   : > { %5736 = vmatprep.mubr.bf16.mxu0 %v7017_v12  ;;  %5802 = vmatprep.subr.bf16.mxu1 %v7228_v19  ;;  %v7255_v12 = vld [vmem:[%s7921_s7 + $0x38] sm:$0xff]  }
 0x205   : > { %5803 = vmatpush3.bf16.msra.mxu1 %v7228_v19 }
 0x206   : > { %5804 = vmatprep.subr.bf16.mxu1 %v7239_v30 }
 0x209   : > { %5805 = vmatpush3.bf16.msra.mxu1 %v7239_v30 }
 0x20a   : > { %5806 = vmatprep.subr.bf16.mxu1 %v7255_v12 }
 0x20b   : > { %5737 = vmatmul.mubr.bf16.gmra.mrb[136].mxu0 %v7015_v7  ;;  %v7250_v7 = vld [vmem:[%s7920_s6] ss:$0 sm:$0xff] }
 0x20c   : > { %5740 = vmatprep.mubr.bf16.mxu0 %v7029_v14 }
 0x20d   : > { %5807 = vmatpush3.bf16.msra.mxu1 %v7255_v12 }
 0x20e   : > { %5872 = vmatprep.subr.bf16.mxu1 %v7150_v23 }
 0x213   : > { %5741 = vmatmul.mubr.bf16.gmra.mrb[140].mxu0 %v7027_v5 }
 0x214   : > { %5744 = vmatprep.mubr.bf16.mxu0 %v7041_v8 }
 0x21b   : > { %5745 = vmatmul.mubr.bf16.gmra.mrb[144].mxu0 %v7039_v51 }
 0x21c   : > { %5748 = vmatprep.mubr.bf16.mxu0 %v7053_v18 }
 0x223   : > { %5749 = vmatmul.mubr.bf16.gmra.mrb[148].mxu0 %v7051_v46 }
 0x224   : > { %5752 = vmatprep.mubr.bf16.mxu0 %v7065_v33 }
 0x22b   : > { %5753 = vmatmul.mubr.bf16.gmra.mrb[152].mxu0 %v7063_v57 }
 0x22c   : > { %5756 = vmatprep.mubr.bf16.mxu0 %v7077_v41 }
 0x233   : > { %5757 = vmatmul.mubr.bf16.gmra.mrb[156].mxu0 %v7075_v29 }
 0x234   : > { %5760 = vmatprep.mubr.bf16.mxu0 %v7089_v45 }
 0x23b   : > { %5761 = vmatmul.mubr.bf16.gmra.mrb[160].mxu0 %v7087_v63 }
 0x23c   : > { %5764 = vmatprep.mubr.bf16.mxu0 %v7101_v3 }
 0x243   : > { %5765 = vmatmul.mubr.bf16.gmra.mrb[164].mxu0 %v7099_v0 }
 0x244   : > { %5768 = vmatprep.mubr.bf16.mxu0 %v7113_v22 }
 0x24b   : > { %5769 = vmatmul.mubr.bf16.gmra.mrb[168].mxu0 %v7111_v58 }
 0x24c   : > { %5772 = vmatprep.mubr.bf16.mxu0 %v7125_v38 }
 0x24e   : > { %v5666_v5 = vpop.f32.mrb[64].mxu0 }
 0x24f   : > { %v2651_v14 = vadd.f32 %v5666_v5, %v7250_v7  ;;  %v2642_v51 = vpop.f32.mrb[65].mxu0 }
 0x250   : > { %v2643_v8 = vadd.f32 %v7250_v7, %v2642_v51  ;;  %v5667_v46 = vpop.f32.mrb[66].mxu0 }
 0x251   : > { %v2654_v18 = vadd.f32 %v5667_v46, %v7250_v7  ;;  %v2645_v57 = vpop.f32.mrb[67].mxu0  ;;  %v3364_v29 = vmax.f32 %v2651_v14, 0.0 }
 0x252   : > { %v2646_v33 = vadd.f32 %v7250_v7, %v2645_v57  ;;  %v3362_v63 = vmax.f32 %v2643_v8, 0.0 }
 0x253   : > { %v3365_v41 = vmax.f32 %v2654_v18, 0.0  ;;  %5773 = vmatmul.mubr.bf16.gmra.mrb[172].mxu0 %v7123_v56 }
 0x254   : > { %v3363_v45 = vmax.f32 %v2646_v33, 0.0  ;;  %5776 = vmatprep.mubr.bf16.mxu0 %v7137_v2 }
 0x255   : > { %v7266_v0 = vpack.c.bf16 %v3365_v41, %v3364_v29 }
 0x256   : > { %v7268_v3 = vpack.c.bf16 %v3363_v45, %v3362_v63  ;;  %v5670_v58 = vpop.f32.mrb[68].mxu0 }
 0x257   : > { %v2667_v22 = vadd.f32 %v5670_v58, %v7250_v7  ;;  %v2658_v38 = vpop.f32.mrb[69].mxu0 }
 0x258   : > { %v2659_v27 = vadd.f32 %v7250_v7, %v2658_v38  ;;  %v5671_v49 = vpop.f32.mrb[70].mxu0 }
 0x259   : > { %v2670_v6 = vadd.f32 %v5671_v49, %v7250_v7  ;;  %v2661_v13 = vpop.f32.mrb[71].mxu0  ;;  %v3368_v48 = vmax.f32 %v2667_v22, 0.0 }
 0x25a   : > { %v2662_v56 = vadd.f32 %v7250_v7, %v2661_v13  ;;  %v3366_v2 = vmax.f32 %v2659_v27, 0.0 }
 0x25b   : > { %v3369_v59 = vmax.f32 %v2670_v6, 0.0  ;;  %5777 = vmatmul.mubr.bf16.gmra.mrb[176].mxu0 %v7135_v54 }
 0x25c   : > { %v3367_v4 = vmax.f32 %v2662_v56, 0.0  ;;  %5780 = vmatprep.mubr.bf16.mxu0 %v7156_v10 }
 0x25d   : > { %v7276_v24 = vpack.c.bf16 %v3369_v59, %v3368_v48 }
 0x25e   : > { %v7278_v25 = vpack.c.bf16 %v3367_v4, %v3366_v2  ;;  %v5674_v9 = vpop.f32.mrb[72].mxu0 }
 0x25f   : > { %v2683_v28 = vadd.f32 %v5674_v9, %v7250_v7  ;;  %v2674_v31 = vpop.f32.mrb[73].mxu0 }
 0x260   : > { %v2675_v40 = vadd.f32 %v7250_v7, %v2674_v31  ;;  %v5675_v42 = vpop.f32.mrb[74].mxu0 }
 0x261   : > { %v2686_v43 = vadd.f32 %v5675_v42, %v7250_v7  ;;  %v2677_v52 = vpop.f32.mrb[75].mxu0  ;;  %v3372_v55 = vmax.f32 %v2683_v28, 0.0 }
 0x262   : > { %v2678_v54 = vadd.f32 %v7250_v7, %v2677_v52  ;;  %v3370_v10 = vmax.f32 %v2675_v40, 0.0 }
 0x263   : > { %v3373_v1 = vmax.f32 %v2686_v43, 0.0  ;;  %5781 = vmatmul.mubr.bf16.gmra.mrb[180].mxu0 %v7153_v44 }
 0x264   : > { %v3371_v16 = vmax.f32 %v2678_v54, 0.0  ;;  %5784 = vmatprep.mubr.bf16.mxu0 %v7168_v47 }
 0x265   : > { %v7286_v17 = vpack.c.bf16 %v3373_v1, %v3372_v55 }
 0x266   : > { %v7288_v20 = vpack.c.bf16 %v3371_v16, %v3370_v10  ;;  %v5678_v34 = vpop.f32.mrb[76].mxu0 }
 0x267   : > { %v2699_v35 = vadd.f32 %v5678_v34, %v7250_v7  ;;  %v2690_v36 = vpop.f32.mrb[77].mxu0 }
 0x268   : > { %v2691_v37 = vadd.f32 %v7250_v7, %v2690_v36  ;;  %v5679_v50 = vpop.f32.mrb[78].mxu0 }
 0x269   : > { %v2702_v11 = vadd.f32 %v5679_v50, %v7250_v7  ;;  %v2693_v32 = vpop.f32.mrb[79].mxu0  ;;  %v3376_v61 = vmax.f32 %v2699_v35, 0.0 }
 0x26a   : > { %v2694_v44 = vadd.f32 %v7250_v7, %v2693_v32  ;;  %v3374_v47 = vmax.f32 %v2691_v37, 0.0 }
 0x26b   : > { %v3377_v5 = vmax.f32 %v2702_v11, 0.0  ;;  %5785 = vmatmul.mubr.bf16.gmra.mrb[184].mxu0 %v7166_v15 }
 0x26c   : > { %v3375_v14 = vmax.f32 %v2694_v44, 0.0  ;;  %5788 = vmatprep.mubr.bf16.mxu0 %v7187_v53 }
 0x26d   : > { %v7296_v51 = vpack.c.bf16 %v3377_v5, %v3376_v61 }
 0x26e   : > { %v7298_v8 = vpack.c.bf16 %v3375_v14, %v3374_v47  ;;  %v5682_v46 = vpop.f32.mrb[80].mxu0 }
 0x26f   : > { %v2715_v18 = vadd.f32 %v5682_v46, %v7250_v7  ;;  %v2706_v57 = vpop.f32.mrb[81].mxu0 }
 0x270   : > { %v2707_v33 = vadd.f32 %v7250_v7, %v2706_v57  ;;  %v5683_v29 = vpop.f32.mrb[82].mxu0 }
 0x271   : > { %v2718_v41 = vadd.f32 %v5683_v29, %v7250_v7  ;;  %v2709_v63 = vpop.f32.mrb[83].mxu0  ;;  %v3380_v45 = vmax.f32 %v2715_v18, 0.0 }
 0x272   : > { %v2710_v15 = vadd.f32 %v7250_v7, %v2709_v63  ;;  %v3378_v53 = vmax.f32 %v2707_v33, 0.0 }
 0x273   : > { %v3381_v58 = vmax.f32 %v2718_v41, 0.0  ;;  %5789 = vmatmul.mubr.bf16.gmra.mrb[188].mxu0 %v7184_v60 }
 0x274   : > { %v3379_v22 = vmax.f32 %v2710_v15, 0.0 }
 0x275   : > { %v7305_v38 = vpack.c.bf16 %v3381_v58, %v3380_v45 }
 0x276   : > { %v7307_v27 = vpack.c.bf16 %v3379_v22, %v3378_v53  ;;  %v5686_v49 = vpop.f32.mrb[84].mxu0 }
 0x277   : > { %v2731_v6 = vadd.f32 %v5686_v49, %v7250_v7  ;;  %v2722_v13 = vpop.f32.mrb[85].mxu0 }
 0x278   : > { %v2723_v56 = vadd.f32 %v7250_v7, %v2722_v13  ;;  %v5687_v48 = vpop.f32.mrb[86].mxu0 }
 0x279   : > { %v2734_v59 = vadd.f32 %v5687_v48, %v7250_v7  ;;  %v2725_v2 = vpop.f32.mrb[87].mxu0  ;;  %v3384_v9 = vmax.f32 %v2731_v6, 0.0 }
 0x27a   : > { %v2726_v4 = vadd.f32 %v7250_v7, %v2725_v2  ;;  %v3382_v28 = vmax.f32 %v2723_v56, 0.0 }
 0x27b   : > { %v3385_v60 = vmax.f32 %v2734_v59, 0.0 }
 0x27c   : > { %v3383_v31 = vmax.f32 %v2726_v4, 0.0 }
 0x27d   : > { %v7313_v40 = vpack.c.bf16 %v3385_v60, %v3384_v9 }
 0x27e   : > { %v7315_v42 = vpack.c.bf16 %v3383_v31, %v3382_v28  ;;  %v5690_v43 = vpop.f32.mrb[88].mxu0 }
 0x27f   : > { %v2747_v52 = vadd.f32 %v5690_v43, %v7250_v7  ;;  %v2738_v54 = vpop.f32.mrb[89].mxu0 }
 0x280   : > { %v2739_v55 = vadd.f32 %v7250_v7, %v2738_v54  ;;  %v5691_v1 = vpop.f32.mrb[90].mxu0 }
 0x281   : > { %v2750_v10 = vadd.f32 %v5691_v1, %v7250_v7  ;;  %v2741_v16 = vpop.f32.mrb[91].mxu0  ;;  %v3388_v35 = vmax.f32 %v2747_v52, 0.0 }
 0x282   : > { %v2742_v34 = vadd.f32 %v7250_v7, %v2741_v16  ;;  %v3386_v37 = vmax.f32 %v2739_v55, 0.0 }
 0x283   : > { %v3389_v36 = vmax.f32 %v2750_v10, 0.0 }
 0x284   : > { %v3387_v50 = vmax.f32 %v2742_v34, 0.0 }
 0x285   : > { %v7321_v11 = vpack.c.bf16 %v3389_v36, %v3388_v35 }
 0x286   : > { %v7323_v32 = vpack.c.bf16 %v3387_v50, %v3386_v37  ;;  %v5694_v44 = vpop.f32.mrb[92].mxu0 }
 0x287   : > { %v2763_v61 = vadd.f32 %v5694_v44, %v7250_v7  ;;  %v2754_v5 = vpop.f32.mrb[93].mxu0 }
 0x288   : > { %v2755_v47 = vadd.f32 %v7250_v7, %v2754_v5  ;;  %v5695_v14 = vpop.f32.mrb[94].mxu0 }
 0x289   : > { %v2766_v46 = vadd.f32 %v5695_v14, %v7250_v7  ;;  %v2757_v18 = vpop.f32.mrb[95].mxu0  ;;  %v3392_v33 = vmax.f32 %v2763_v61, 0.0 }
 0x28a   : > { %v2758_v57 = vadd.f32 %v7250_v7, %v2757_v18  ;;  %v3390_v41 = vmax.f32 %v2755_v47, 0.0 }
 0x28b   : > { %v3393_v29 = vmax.f32 %v2766_v46, 0.0 }
 0x28c   : > { %v3391_v63 = vmax.f32 %v2758_v57, 0.0 }
 0x28d   : > { %v7329_v15 = vpack.c.bf16 %v3393_v29, %v3392_v33 }
 0x28e   : > { %v7331_v45 = vpack.c.bf16 %v3391_v63, %v3390_v41  ;;  %v5698_v58 = vpop.f32.mrb[96].mxu0 }
 0x28f   : > { %v2779_v53 = vadd.f32 %v5698_v58, %v7250_v7  ;;  %v2770_v22 = vpop.f32.mrb[97].mxu0 }
 0x290   : > { %v2771_v49 = vadd.f32 %v7250_v7, %v2770_v22  ;;  %v5699_v6 = vpop.f32.mrb[98].mxu0 }
 0x291   : > { %v2782_v13 = vadd.f32 %v5699_v6, %v7250_v7  ;;  %v2773_v56 = vpop.f32.mrb[99].mxu0  ;;  %v3396_v59 = vmax.f32 %v2779_v53, 0.0 }
 0x292   : > { %v2774_v48 = vadd.f32 %v7250_v7, %v2773_v56  ;;  %v3394_v4 = vmax.f32 %v2771_v49, 0.0 }
 0x293   : > { %v3397_v2 = vmax.f32 %v2782_v13, 0.0 }
 0x294   : > { %v3395_v9 = vmax.f32 %v2774_v48, 0.0 }
 0x295   : > { %v7337_v60 = vpack.c.bf16 %v3397_v2, %v3396_v59 }
 0x296   : > { %v7339_v28 = vpack.c.bf16 %v3395_v9, %v3394_v4  ;;  %v5702_v31 = vpop.f32.mrb[100].mxu0 }
 0x297   : > { %v2795_v43 = vadd.f32 %v5702_v31, %v7250_v7  ;;  %v2786_v52 = vpop.f32.mrb[101].mxu0 }
 0x298   : > { %v2787_v54 = vadd.f32 %v7250_v7, %v2786_v52  ;;  %v5703_v55 = vpop.f32.mrb[102].mxu0 }
 0x299   : > { %v2798_v1 = vadd.f32 %v5703_v55, %v7250_v7  ;;  %v2789_v10 = vpop.f32.mrb[103].mxu0  ;;  %v3400_v34 = vmax.f32 %v2795_v43, 0.0 }
 0x29a   : > { %v2790_v16 = vadd.f32 %v7250_v7, %v2789_v10  ;;  %v3398_v36 = vmax.f32 %v2787_v54, 0.0 }
 0x29b   : > { %v3401_v35 = vmax.f32 %v2798_v1, 0.0 }
 0x29c   : > { %v3399_v37 = vmax.f32 %v2790_v16, 0.0 }
 0x29d   : > { %v7345_v50 = vpack.c.bf16 %v3401_v35, %v3400_v34 }
 0x29e   : > { %v7347_v44 = vpack.c.bf16 %v3399_v37, %v3398_v36  ;;  %v5706_v61 = vpop.f32.mrb[104].mxu0 }
 0x29f   : > { %v2811_v5 = vadd.f32 %v5706_v61, %v7250_v7  ;;  %v2802_v47 = vpop.f32.mrb[105].mxu0 }
 0x2a0   : > { %v2803_v14 = vadd.f32 %v7250_v7, %v2802_v47  ;;  %v5707_v46 = vpop.f32.mrb[106].mxu0 }
 0x2a1   : > { %v2814_v18 = vadd.f32 %v5707_v46, %v7250_v7  ;;  %v2805_v57 = vpop.f32.mrb[107].mxu0  ;;  %v3404_v29 = vmax.f32 %v2811_v5, 0.0 }
 0x2a2   : > { %v2806_v33 = vadd.f32 %v7250_v7, %v2805_v57  ;;  %v3402_v63 = vmax.f32 %v2803_v14, 0.0 }
 0x2a3   : > { %v3405_v41 = vmax.f32 %v2814_v18, 0.0 }
 0x2a4   : > { %v3403_v58 = vmax.f32 %v2806_v33, 0.0 }
 0x2a5   : > { %v7353_v53 = vpack.c.bf16 %v3405_v41, %v3404_v29 }
 0x2a6   : > { %v7355_v22 = vpack.c.bf16 %v3403_v58, %v3402_v63  ;;  %v5710_v49 = vpop.f32.mrb[108].mxu0 }
 0x2a7   : > { %v2827_v6 = vadd.f32 %v5710_v49, %v7250_v7  ;;  %v2818_v13 = vpop.f32.mrb[109].mxu0 }
 0x2a8   : > { %v2819_v56 = vadd.f32 %v7250_v7, %v2818_v13  ;;  %v5711_v48 = vpop.f32.mrb[110].mxu0 }
 0x2a9   : > { %v2830_v59 = vadd.f32 %v5711_v48, %v7250_v7  ;;  %v2821_v2 = vpop.f32.mrb[111].mxu0  ;;  %v3408_v9 = vmax.f32 %v2827_v6, 0.0 }
 0x2aa   : > { %v2822_v4 = vadd.f32 %v7250_v7, %v2821_v2  ;;  %v3406_v43 = vmax.f32 %v2819_v56, 0.0 }
 0x2ab   : > { %v3409_v31 = vmax.f32 %v2830_v59, 0.0 }
 0x2ac   : > { %v3407_v52 = vmax.f32 %v2822_v4, 0.0 }
 0x2ad   : > { %v7361_v54 = vpack.c.bf16 %v3409_v31, %v3408_v9 }
 0x2ae   : > { %v7363_v55 = vpack.c.bf16 %v3407_v52, %v3406_v43  ;;  %v5714_v1 = vpop.f32.mrb[112].mxu0 }
 0x2af   : > { %v2843_v10 = vadd.f32 %v5714_v1, %v7250_v7  ;;  %v2834_v16 = vpop.f32.mrb[113].mxu0 }
 0x2b0   : > { %v2835_v34 = vadd.f32 %v7250_v7, %v2834_v16  ;;  %v5715_v35 = vpop.f32.mrb[114].mxu0 }
 0x2b1   : > { %v2846_v36 = vadd.f32 %v5715_v35, %v7250_v7  ;;  %v2837_v37 = vpop.f32.mrb[115].mxu0  ;;  %v3412_v5 = vmax.f32 %v2843_v10, 0.0 }
 0x2b2   : > { %v2838_v61 = vadd.f32 %v7250_v7, %v2837_v37  ;;  %v3410_v14 = vmax.f32 %v2835_v34, 0.0 }
 0x2b3   : > { %v3413_v47 = vmax.f32 %v2846_v36, 0.0 }
 0x2b4   : > { %v3411_v46 = vmax.f32 %v2838_v61, 0.0 }
 0x2b5   : > { %v7369_v18 = vpack.c.bf16 %v3413_v47, %v3412_v5 }
 0x2b6   : > { %v7371_v57 = vpack.c.bf16 %v3411_v46, %v3410_v14  ;;  %v5718_v33 = vpop.f32.mrb[116].mxu0 }
 0x2b7   : > { %v2859_v29 = vadd.f32 %v5718_v33, %v7250_v7  ;;  %v2850_v41 = vpop.f32.mrb[117].mxu0 }
 0x2b8   : > { %v2851_v63 = vadd.f32 %v7250_v7, %v2850_v41  ;;  %v5719_v58 = vpop.f32.mrb[118].mxu0 }
 0x2b9   : > { %v2862_v49 = vadd.f32 %v5719_v58, %v7250_v7  ;;  %v2853_v6 = vpop.f32.mrb[119].mxu0  ;;  %v3416_v56 = vmax.f32 %v2859_v29, 0.0 }
 0x2ba   : > { %v2854_v13 = vadd.f32 %v7250_v7, %v2853_v6  ;;  %v3414_v59 = vmax.f32 %v2851_v63, 0.0 }
 0x2bb   : > { %v3417_v48 = vmax.f32 %v2862_v49, 0.0 }
 0x2bc   : > { %v3415_v2 = vmax.f32 %v2854_v13, 0.0 }
 0x2bd   : > { %v7377_v4 = vpack.c.bf16 %v3417_v48, %v3416_v56 }
 0x2be   : > { %v7379_v9 = vpack.c.bf16 %v3415_v2, %v3414_v59  ;;  %v5722_v31 = vpop.f32.mrb[120].mxu0 }
 0x2bf   : > { %v2875_v43 = vadd.f32 %v5722_v31, %v7250_v7  ;;  %v2866_v52 = vpop.f32.mrb[121].mxu0 }
 0x2c0   : > { %v2867_v1 = vadd.f32 %v7250_v7, %v2866_v52  ;;  %v5723_v10 = vpop.f32.mrb[122].mxu0 }
 0x2c1   : > { %v2878_v16 = vadd.f32 %v5723_v10, %v7250_v7  ;;  %v2869_v34 = vpop.f32.mrb[123].mxu0  ;;  %v3420_v36 = vmax.f32 %v2875_v43, 0.0 }
 0x2c2   : > { %v2870_v35 = vadd.f32 %v7250_v7, %v2869_v34  ;;  %v3418_v61 = vmax.f32 %v2867_v1, 0.0 }
 0x2c3   : > { %v3421_v37 = vmax.f32 %v2878_v16, 0.0 }
 0x2c4   : > { %v3419_v5 = vmax.f32 %v2870_v35, 0.0 }
 0x2c5   : > { %v7385_v47 = vpack.c.bf16 %v3421_v37, %v3420_v36 }
 0x2c6   : > { %v7387_v14 = vpack.c.bf16 %v3419_v5, %v3418_v61  ;;  %v5726_v46 = vpop.f32.mrb[124].mxu0 }
 0x2c7   : > { %v2891_v33 = vadd.f32 %v5726_v46, %v7250_v7  ;;  %v2882_v29 = vpop.f32.mrb[125].mxu0 }
 0x2c8   : > { %v2883_v41 = vadd.f32 %v7250_v7, %v2882_v29  ;;  %v5727_v63 = vpop.f32.mrb[126].mxu0 }
 0x2c9   : > { %v2894_v58 = vadd.f32 %v5727_v63, %v7250_v7  ;;  %v2885_v49 = vpop.f32.mrb[127].mxu0  ;;  %v3424_v13 = vmax.f32 %v2891_v33, 0.0 }
 0x2ca   : > { %v2886_v6 = vadd.f32 %v7250_v7, %v2885_v49  ;;  %v3422_v48 = vmax.f32 %v2883_v41, 0.0 }
 0x2cb   : > { %v3425_v56 = vmax.f32 %v2894_v58, 0.0 }
 0x2cc   : > { %v3423_v59 = vmax.f32 %v2886_v6, 0.0 }
 0x2cd   : > { %v7393_v2 = vpack.c.bf16 %v3425_v56, %v3424_v13 }
 0x2ce   : > { %v7395_v31 = vpack.c.bf16 %v3423_v59, %v3422_v48  ;;  %v5730_v43 = vpop.f32.mrb[128].mxu0 }
 0x2cf   : > { %v2907_v52 = vadd.f32 %v5730_v43, %v7250_v7  ;;  %v2898_v1 = vpop.f32.mrb[129].mxu0 }
 0x2d0   : > { %v2899_v10 = vadd.f32 %v7250_v7, %v2898_v1  ;;  %v5731_v16 = vpop.f32.mrb[130].mxu0 }
 0x2d1   : > { %v2910_v34 = vadd.f32 %v5731_v16, %v7250_v7  ;;  %v2901_v35 = vpop.f32.mrb[131].mxu0  ;;  %v3524_v37 = vmax.f32 %v2907_v52, 0.0 }
 0x2d2   : > { %v2902_v36 = vadd.f32 %v7250_v7, %v2901_v35  ;;  %v3522_v5 = vmax.f32 %v2899_v10, 0.0 }
 0x2d3   : > { %v3525_v61 = vmax.f32 %v2910_v34, 0.0 }
 0x2d4   : > { %v3523_v46 = vmax.f32 %v2902_v36, 0.0 }
 0x2d5   : > { %v3587_v33 = vpack.c.bf16 %v3525_v61, %v3524_v37 }
 0x2d6   : > { %v3586_v29 = vpack.c.bf16 %v3523_v46, %v3522_v5  ;;  %v5734_v41 = vpop.f32.mrb[132].mxu0 }
 0x2d7   : > { %v2923_v63 = vadd.f32 %v5734_v41, %v7250_v7  ;;  %v2914_v58 = vpop.f32.mrb[133].mxu0 }
 0x2d8   : > { %v2915_v49 = vadd.f32 %v7250_v7, %v2914_v58  ;;  %v5735_v6 = vpop.f32.mrb[134].mxu0  ;;  %5808 = vmatprep.mubr.bf16.mxu1 %v3586_v29 }
 0x2d9   : > { %v2926_v13 = vadd.f32 %v5735_v6, %v7250_v7  ;;  %v2917_v56 = vpop.f32.mrb[135].mxu0  ;;  %5809 = vmatmul.mubr.bf16.vlgmr.msra.gmra.mrb[64].mxu1 %v3587_v33  ;;  %v3528_v59 = vmax.f32 %v2923_v63, 0.0 }
 0x2da   : > { %v2918_v48 = vadd.f32 %v7250_v7, %v2917_v56  ;;  %5873 = vmatpush3.bf16.msra.mxu1 %v7150_v23  ;;  %v3526_v52 = vmax.f32 %v2915_v49, 0.0 }
 0x2db   : > { %v3529_v43 = vmax.f32 %v2926_v13, 0.0  ;;  %5874 = vmatprep.subr.bf16.mxu1 %v7181_v21 }
 0x2dc   : > { %v3527_v1 = vmax.f32 %v2918_v48, 0.0 }
 0x2dd   : > { %v3589_v10 = vpack.c.bf16 %v3529_v43, %v3528_v59 }
 0x2de   : > { %v3588_v16 = vpack.c.bf16 %v3527_v1, %v3526_v52  ;;  %v5738_v34 = vpop.f32.mrb[136].mxu0  ;;  %5875 = vmatpush3.bf16.msra.mxu1 %v7181_v21 }
 0x2df   : > { %v2939_v35 = vadd.f32 %v5738_v34, %v7250_v7  ;;  %v2930_v36 = vpop.f32.mrb[137].mxu0  ;;  %5876 = vmatprep.subr.bf16.mxu1 %v7195_v26 }
 0x2e0   : > { %v2931_v37 = vadd.f32 %v7250_v7, %v2930_v36  ;;  %v5739_v61 = vpop.f32.mrb[138].mxu0  ;;  %5812 = vmatprep.mubr.bf16.mxu1 %v3588_v16 }
 0x2e1   : > { %v2942_v23 = vadd.f32 %v5739_v61, %v7250_v7  ;;  %v2933_v5 = vpop.f32.mrb[139].mxu0  ;;  %5813 = vmatmul.mubr.bf16.gmra.mrb[68].mxu1 %v3589_v10  ;;  %v3532_v33 = vmax.f32 %v2939_v35, 0.0 }
 0x2e2   : > { %v2934_v46 = vadd.f32 %v7250_v7, %v2933_v5  ;;  %5877 = vmatpush3.bf16.msra.mxu1 %v7195_v26  ;;  %v3530_v21 = vmax.f32 %v2931_v37, 0.0 }
 0x2e3   : > { %v3533_v29 = vmax.f32 %v2942_v23, 0.0  ;;  %5878 = vmatprep.subr.bf16.mxu1 %v7206_v39 }
 0x2e4   : > { %v3531_v41 = vmax.f32 %v2934_v46, 0.0 }
 0x2e5   : > { %v3591_v63 = vpack.c.bf16 %v3533_v29, %v3532_v33 }
 0x2e6   : > { %v3590_v58 = vpack.c.bf16 %v3531_v41, %v3530_v21  ;;  %v5742_v49 = vpop.f32.mrb[140].mxu0  ;;  %5879 = vmatpush3.bf16.msra.mxu1 %v7206_v39 }
 0x2e7   : > { %v2955_v6 = vadd.f32 %v5742_v49, %v7250_v7  ;;  %v2946_v13 = vpop.f32.mrb[141].mxu0  ;;  %5880 = vmatprep.subr.bf16.mxu1 %v7217_v62 }
 0x2e8   : > { %v2947_v56 = vadd.f32 %v7250_v7, %v2946_v13  ;;  %v5743_v48 = vpop.f32.mrb[142].mxu0  ;;  %5816 = vmatprep.mubr.bf16.mxu1 %v3590_v58 }
 0x2e9   : > { %v2958_v26 = vadd.f32 %v5743_v48, %v7250_v7  ;;  %v2949_v59 = vpop.f32.mrb[143].mxu0  ;;  %5817 = vmatmul.mubr.bf16.gmra.mrb[72].mxu1 %v3591_v63  ;;  %v3536_v52 = vmax.f32 %v2955_v6, 0.0 }
 0x2ea   : > { %v2950_v43 = vadd.f32 %v7250_v7, %v2949_v59  ;;  %5881 = vmatpush3.bf16.msra.mxu1 %v7217_v62  ;;  %v3534_v39 = vmax.f32 %v2947_v56, 0.0 }
 0x2eb   : > { %v3537_v1 = vmax.f32 %v2958_v26, 0.0  ;;  %5882 = vmatprep.subr.bf16.mxu1 %v7228_v19 }
 0x2ec   : > { %v3535_v10 = vmax.f32 %v2950_v43, 0.0 }
 0x2ed   : > { %v3593_v16 = vpack.c.bf16 %v3537_v1, %v3536_v52 }
 0x2ee   : > { %v3592_v34 = vpack.c.bf16 %v3535_v10, %v3534_v39  ;;  %v5746_v35 = vpop.f32.mrb[144].mxu0  ;;  %5883 = vmatpush3.bf16.msra.mxu1 %v7228_v19 }
 0x2ef   : > { %v2971_v36 = vadd.f32 %v5746_v35, %v7250_v7  ;;  %v2962_v37 = vpop.f32.mrb[145].mxu0  ;;  %5884 = vmatprep.subr.bf16.mxu1 %v7239_v30 }
 0x2f0   : > { %v2963_v61 = vadd.f32 %v7250_v7, %v2962_v37  ;;  %v5747_v23 = vpop.f32.mrb[146].mxu0  ;;  %5820 = vmatprep.mubr.bf16.mxu1 %v3592_v34 }
 0x2f1   : > { %v2974_v62 = vadd.f32 %v5747_v23, %v7250_v7  ;;  %v2965_v5 = vpop.f32.mrb[147].mxu0  ;;  %5821 = vmatmul.mubr.bf16.gmra.mrb[76].mxu1 %v3593_v16  ;;  %v3540_v33 = vmax.f32 %v2971_v36, 0.0 }
 0x2f2   : > { %v2966_v46 = vadd.f32 %v7250_v7, %v2965_v5  ;;  %5885 = vmatpush3.bf16.msra.mxu1 %v7239_v30  ;;  %v3538_v19 = vmax.f32 %v2963_v61, 0.0 }
 0x2f3   : > { %v3541_v29 = vmax.f32 %v2974_v62, 0.0  ;;  %5886 = vmatprep.subr.bf16.mxu1 %v7255_v12 }
 0x2f4   : > { %v3539_v21 = vmax.f32 %v2966_v46, 0.0 }
 0x2f5   : > { %v3595_v41 = vpack.c.bf16 %v3541_v29, %v3540_v33 }
 0x2f6   : > { %v3594_v63 = vpack.c.bf16 %v3539_v21, %v3538_v19  ;;  %v5750_v58 = vpop.f32.mrb[148].mxu0  ;;  %5887 = vmatpush3.bf16.msra.mxu1 %v7255_v12 }
 0x2f7   : > { %v2987_v49 = vadd.f32 %v5750_v58, %v7250_v7  ;;  %v2978_v6 = vpop.f32.mrb[149].mxu0 }
 0x2f8   : > { %v2979_v13 = vadd.f32 %v7250_v7, %v2978_v6  ;;  %v5751_v56 = vpop.f32.mrb[150].mxu0  ;;  %5824 = vmatprep.mubr.bf16.mxu1 %v3594_v63 }
 0x2f9   : > { %v2990_v30 = vadd.f32 %v5751_v56, %v7250_v7  ;;  %v2981_v48 = vpop.f32.mrb[151].mxu0  ;;  %5825 = vmatmul.mubr.bf16.gmra.mrb[80].mxu1 %v3595_v41  ;;  %v3544_v59 = vmax.f32 %v2987_v49, 0.0 }
 0x2fa   : > { %v2982_v26 = vadd.f32 %v7250_v7, %v2981_v48  ;;  %v3542_v52 = vmax.f32 %v2979_v13, 0.0 }
 0x2fb   : > { %v3545_v43 = vmax.f32 %v2990_v30, 0.0 }
 0x2fc   : > { %v3543_v1 = vmax.f32 %v2982_v26, 0.0 }
 0x2fd   : > { %v3597_v39 = vpack.c.bf16 %v3545_v43, %v3544_v59 }
 0x2fe   : > { %v3596_v10 = vpack.c.bf16 %v3543_v1, %v3542_v52  ;;  %v5754_v12 = vpop.f32.mrb[152].mxu0 }
 0x2ff   : > { %v3003_v16 = vadd.f32 %v5754_v12, %v7250_v7  ;;  %v2994_v34 = vpop.f32.mrb[153].mxu0 }
 0x300   : > { %v2995_v35 = vadd.f32 %v7250_v7, %v2994_v34  ;;  %v5755_v36 = vpop.f32.mrb[154].mxu0  ;;  %5828 = vmatprep.mubr.bf16.mxu1 %v3596_v10 }
 0x301   : > { %v3006_v37 = vadd.f32 %v5755_v36, %v7250_v7  ;;  %v2997_v61 = vpop.f32.mrb[155].mxu0  ;;  %5829 = vmatmul.mubr.bf16.gmra.mrb[84].mxu1 %v3597_v39  ;;  %v3548_v62 = vmax.f32 %v3003_v16, 0.0 }
 0x302   : > { %v2998_v23 = vadd.f32 %v7250_v7, %v2997_v61  ;;  %v3546_v46 = vmax.f32 %v2995_v35, 0.0 }
 0x303   : > { %v3549_v5 = vmax.f32 %v3006_v37, 0.0 }
 0x304   : > { %v3547_v33 = vmax.f32 %v2998_v23, 0.0 }
 0x305   : > { %v3599_v29 = vpack.c.bf16 %v3549_v5, %v3548_v62 }
 0x306   : > { %v3598_v19 = vpack.c.bf16 %v3547_v33, %v3546_v46  ;;  %v5758_v21 = vpop.f32.mrb[156].mxu0 }
 0x307   : > { %v3019_v41 = vadd.f32 %v5758_v21, %v7250_v7  ;;  %v3010_v63 = vpop.f32.mrb[157].mxu0 }
 0x308   : > { %v3011_v58 = vadd.f32 %v7250_v7, %v3010_v63  ;;  %v5759_v49 = vpop.f32.mrb[158].mxu0  ;;  %5832 = vmatprep.mubr.bf16.mxu1 %v3598_v19 }
 0x309   : > { %v3022_v6 = vadd.f32 %v5759_v49, %v7250_v7  ;;  %v3013_v13 = vpop.f32.mrb[159].mxu0  ;;  %5833 = vmatmul.mubr.bf16.gmra.mrb[88].mxu1 %v3599_v29  ;;  %v3552_v30 = vmax.f32 %v3019_v41, 0.0 }
 0x30a   : > { %v3014_v56 = vadd.f32 %v7250_v7, %v3013_v13  ;;  %v3550_v26 = vmax.f32 %v3011_v58, 0.0 }
 0x30b   : > { %v3553_v48 = vmax.f32 %v3022_v6, 0.0 }
 0x30c   : > { %v3551_v59 = vmax.f32 %v3014_v56, 0.0 }
 0x30d   : > { %v3601_v43 = vpack.c.bf16 %v3553_v48, %v3552_v30 }
 0x30e   : > { %v3600_v52 = vpack.c.bf16 %v3551_v59, %v3550_v26  ;;  %v5762_v1 = vpop.f32.mrb[160].mxu0 }
 0x30f   : > { %v3035_v39 = vadd.f32 %v5762_v1, %v7250_v7  ;;  %v3026_v10 = vpop.f32.mrb[161].mxu0 }
 0x310   : > { %v3027_v12 = vadd.f32 %v7250_v7, %v3026_v10  ;;  %v5763_v16 = vpop.f32.mrb[162].mxu0  ;;  %5836 = vmatprep.mubr.bf16.mxu1 %v3600_v52 }
 0x311   : > { %v3038_v34 = vadd.f32 %v5763_v16, %v7250_v7  ;;  %v3029_v35 = vpop.f32.mrb[163].mxu0  ;;  %5837 = vmatmul.mubr.bf16.gmra.mrb[92].mxu1 %v3601_v43  ;;  %v3556_v37 = vmax.f32 %v3035_v39, 0.0 }
 0x312   : > { %v3030_v36 = vadd.f32 %v7250_v7, %v3029_v35  ;;  %v3554_v23 = vmax.f32 %v3027_v12, 0.0 }
 0x313   : > { %v3557_v61 = vmax.f32 %v3038_v34, 0.0 }
 0x314   : > { %v3555_v62 = vmax.f32 %v3030_v36, 0.0 }
 0x315   : > { %v3603_v5 = vpack.c.bf16 %v3557_v61, %v3556_v37 }
 0x316   : > { %v3602_v46 = vpack.c.bf16 %v3555_v62, %v3554_v23  ;;  %v5766_v33 = vpop.f32.mrb[164].mxu0 }
 0x317   : > { %v3051_v29 = vadd.f32 %v5766_v33, %v7250_v7  ;;  %v3042_v19 = vpop.f32.mrb[165].mxu0 }
 0x318   : > { %v3043_v21 = vadd.f32 %v7250_v7, %v3042_v19  ;;  %v5767_v41 = vpop.f32.mrb[166].mxu0  ;;  %5840 = vmatprep.mubr.bf16.mxu1 %v3602_v46 }
 0x319   : > { %v3054_v63 = vadd.f32 %v5767_v41, %v7250_v7  ;;  %v3045_v58 = vpop.f32.mrb[167].mxu0  ;;  %5841 = vmatmul.mubr.bf16.gmra.mrb[96].mxu1 %v3603_v5  ;;  %v3560_v6 = vmax.f32 %v3051_v29, 0.0 }
 0x31a   : > { %v3046_v49 = vadd.f32 %v7250_v7, %v3045_v58  ;;  %v3558_v56 = vmax.f32 %v3043_v21, 0.0 }
 0x31b   : > { %v3561_v13 = vmax.f32 %v3054_v63, 0.0 }
 0x31c   : > { %v3559_v30 = vmax.f32 %v3046_v49, 0.0 }
 0x31d   : > { %v3605_v48 = vpack.c.bf16 %v3561_v13, %v3560_v6 }
 0x31e   : > { %v3604_v26 = vpack.c.bf16 %v3559_v30, %v3558_v56  ;;  %v5770_v59 = vpop.f32.mrb[168].mxu0 }
 0x31f   : > { %v3067_v43 = vadd.f32 %v5770_v59, %v7250_v7  ;;  %v3058_v52 = vpop.f32.mrb[169].mxu0 }
 0x320   : > { %v3059_v1 = vadd.f32 %v7250_v7, %v3058_v52  ;;  %v5771_v39 = vpop.f32.mrb[170].mxu0  ;;  %5844 = vmatprep.mubr.bf16.mxu1 %v3604_v26 }
 0x321   : > { %v3070_v10 = vadd.f32 %v5771_v39, %v7250_v7  ;;  %v3061_v12 = vpop.f32.mrb[171].mxu0  ;;  %5845 = vmatmul.mubr.bf16.gmra.mrb[100].mxu1 %v3605_v48  ;;  %v3564_v34 = vmax.f32 %v3067_v43, 0.0 }
 0x322   : > { %v3062_v16 = vadd.f32 %v7250_v7, %v3061_v12  ;;  %v3562_v36 = vmax.f32 %v3059_v1, 0.0 }
 0x323   : > { %v3565_v35 = vmax.f32 %v3070_v10, 0.0 }
 0x324   : > { %v3563_v37 = vmax.f32 %v3062_v16, 0.0 }
 0x325   : > { %v3607_v61 = vpack.c.bf16 %v3565_v35, %v3564_v34 }
 0x326   : > { %v3606_v23 = vpack.c.bf16 %v3563_v37, %v3562_v36  ;;  %v5774_v62 = vpop.f32.mrb[172].mxu0 }
 0x327   : > { %v3083_v5 = vadd.f32 %v5774_v62, %v7250_v7  ;;  %v3074_v46 = vpop.f32.mrb[173].mxu0 }
 0x328   : > { %v3075_v33 = vadd.f32 %v7250_v7, %v3074_v46  ;;  %v5775_v29 = vpop.f32.mrb[174].mxu0  ;;  %5848 = vmatprep.mubr.bf16.mxu1 %v3606_v23 }
 0x329   : > { %v3086_v19 = vadd.f32 %v5775_v29, %v7250_v7  ;;  %v3077_v21 = vpop.f32.mrb[175].mxu0  ;;  %5849 = vmatmul.mubr.bf16.gmra.mrb[104].mxu1 %v3607_v61  ;;  %v3568_v63 = vmax.f32 %v3083_v5, 0.0 }
 0x32a   : > { %v3078_v41 = vadd.f32 %v7250_v7, %v3077_v21  ;;  %v3566_v49 = vmax.f32 %v3075_v33, 0.0 }
 0x32b   : > { %v3569_v58 = vmax.f32 %v3086_v19, 0.0 }
 0x32c   : > { %v3567_v6 = vmax.f32 %v3078_v41, 0.0 }
 0x32d   : > { %v3609_v13 = vpack.c.bf16 %v3569_v58, %v3568_v63 }
 0x32e   : > { %v3608_v56 = vpack.c.bf16 %v3567_v6, %v3566_v49  ;;  %v5778_v30 = vpop.f32.mrb[176].mxu0 }
 0x32f   : > { %v3099_v48 = vadd.f32 %v5778_v30, %v7250_v7  ;;  %v3090_v26 = vpop.f32.mrb[177].mxu0 }
 0x330   : > { %v3091_v59 = vadd.f32 %v7250_v7, %v3090_v26  ;;  %v5779_v43 = vpop.f32.mrb[178].mxu0  ;;  %5852 = vmatprep.mubr.bf16.mxu1 %v3608_v56 }
 0x331   : > { %v3102_v52 = vadd.f32 %v5779_v43, %v7250_v7  ;;  %v3093_v1 = vpop.f32.mrb[179].mxu0  ;;  %5853 = vmatmul.mubr.bf16.gmra.mrb[108].mxu1 %v3609_v13  ;;  %v3572_v10 = vmax.f32 %v3099_v48, 0.0 }
 0x332   : > { %v3094_v39 = vadd.f32 %v7250_v7, %v3093_v1  ;;  %v3570_v16 = vmax.f32 %v3091_v59, 0.0 }
 0x333   : > { %v3573_v12 = vmax.f32 %v3102_v52, 0.0 }
 0x334   : > { %v3571_v34 = vmax.f32 %v3094_v39, 0.0 }
 0x335   : > { %v3611_v35 = vpack.c.bf16 %v3573_v12, %v3572_v10 }
 0x336   : > { %v3610_v36 = vpack.c.bf16 %v3571_v34, %v3570_v16  ;;  %v5782_v37 = vpop.f32.mrb[180].mxu0 }
 0x337   : > { %v3115_v61 = vadd.f32 %v5782_v37, %v7250_v7  ;;  %v3106_v23 = vpop.f32.mrb[181].mxu0 }
 0x338   : > { %v3107_v62 = vadd.f32 %v7250_v7, %v3106_v23  ;;  %v5783_v5 = vpop.f32.mrb[182].mxu0  ;;  %5856 = vmatprep.mubr.bf16.mxu1 %v3610_v36 }
 0x339   : > { %v3118_v46 = vadd.f32 %v5783_v5, %v7250_v7  ;;  %v3109_v33 = vpop.f32.mrb[183].mxu0  ;;  %5857 = vmatmul.mubr.bf16.gmra.mrb[112].mxu1 %v3611_v35  ;;  %v3576_v19 = vmax.f32 %v3115_v61, 0.0 }
 0x33a   : > { %v3110_v29 = vadd.f32 %v7250_v7, %v3109_v33  ;;  %v3574_v41 = vmax.f32 %v3107_v62, 0.0 }
 0x33b   : > { %v3577_v21 = vmax.f32 %v3118_v46, 0.0 }
 0x33c   : > { %v3575_v63 = vmax.f32 %v3110_v29, 0.0 }
 0x33d   : > { %v3613_v58 = vpack.c.bf16 %v3577_v21, %v3576_v19 }
 0x33e   : > { %v3612_v49 = vpack.c.bf16 %v3575_v63, %v3574_v41  ;;  %v5786_v6 = vpop.f32.mrb[184].mxu0 }
 0x33f   : > { %v3131_v13 = vadd.f32 %v5786_v6, %v7250_v7  ;;  %v3122_v56 = vpop.f32.mrb[185].mxu0 }
 0x340   : > { %v3123_v30 = vadd.f32 %v7250_v7, %v3122_v56  ;;  %v5787_v48 = vpop.f32.mrb[186].mxu0  ;;  %5860 = vmatprep.mubr.bf16.mxu1 %v3612_v49 }
 0x341   : > { %v3134_v26 = vadd.f32 %v5787_v48, %v7250_v7  ;;  %v3125_v59 = vpop.f32.mrb[187].mxu0  ;;  %5861 = vmatmul.mubr.bf16.gmra.mrb[116].mxu1 %v3613_v58  ;;  %v3580_v52 = vmax.f32 %v3131_v13, 0.0 }
 0x342   : > { %v3126_v43 = vadd.f32 %v7250_v7, %v3125_v59  ;;  %v3578_v39 = vmax.f32 %v3123_v30, 0.0 }
 0x343   : > { %v3581_v1 = vmax.f32 %v3134_v26, 0.0 }
 0x344   : > { %v3579_v10 = vmax.f32 %v3126_v43, 0.0 }
 0x345   : > { %v3615_v12 = vpack.c.bf16 %v3581_v1, %v3580_v52 }
 0x346   : > { %v3614_v16 = vpack.c.bf16 %v3579_v10, %v3578_v39  ;;  %v5790_v34 = vpop.f32.mrb[188].mxu0 }
 0x347   : > { %v3147_v35 = vadd.f32 %v5790_v34, %v7250_v7  ;;  %v3138_v36 = vpop.f32.mrb[189].mxu0 }
 0x348   : > { %v3139_v37 = vadd.f32 %v7250_v7, %v3138_v36  ;;  %v5791_v61 = vpop.f32.mrb[190].mxu0  ;;  %5864 = vmatprep.mubr.bf16.mxu1 %v3614_v16 }
 0x349   : > { %v3150_v23 = vadd.f32 %v5791_v61, %v7250_v7  ;;  %v3141_v62 = vpop.f32.mrb[191].mxu0  ;;  %5865 = vmatmul.mubr.bf16.gmra.mrb[120].mxu1 %v3615_v12  ;;  %v3584_v46 = vmax.f32 %v3147_v35, 0.0 }
 0x34a   : > { %v3142_v5 = vadd.f32 %v7250_v7, %v3141_v62  ;;  %v3582_v29 = vmax.f32 %v3139_v37, 0.0  ;;  %v7512_v7 = vld [vmem:[%s7922_s8] ss:$0 sm:$0xff] }
 0x34b   : > { %v3585_v33 = vmax.f32 %v3150_v23, 0.0 }
 0x34c   : > { %v3583_v19 = vmax.f32 %v3142_v5, 0.0 }
 0x34d   : > { %v3617_v21 = vpack.c.bf16 %v3585_v33, %v3584_v46 }
 0x34e   : > { %v3616_v41 = vpack.c.bf16 %v3583_v19, %v3582_v29 }
 0x350   : > { %5868 = vmatprep.mubr.bf16.mxu1 %v3616_v41 }
 0x351   : > { %5869 = vmatmul.mubr.bf16.gmra.mrb[124].mxu1 %v3617_v21 }
 0x352   : > { %5888 = vmatprep.mubr.bf16.mxu1 %v7268_v3 }
 0x359   : > { %5889 = vmatmul.mubr.bf16.vlgmr.msra.gmra.mrb[64].mxu1 %v7266_v0 }
 0x35a   : > { %5892 = vmatprep.mubr.bf16.mxu1 %v7278_v25 }
 0x361   : > { %5893 = vmatmul.mubr.bf16.gmra.mrb[68].mxu1 %v7276_v24 }
 0x362   : > { %5896 = vmatprep.mubr.bf16.mxu1 %v7288_v20 }
 0x369   : > { %5897 = vmatmul.mubr.bf16.gmra.mrb[72].mxu1 %v7286_v17 }
 0x36a   : > { %5900 = vmatprep.mubr.bf16.mxu1 %v7298_v8 }
 0x371   : > { %5901 = vmatmul.mubr.bf16.gmra.mrb[76].mxu1 %v7296_v51 }
 0x372   : > { %5904 = vmatprep.mubr.bf16.mxu1 %v7307_v27 }
 0x379   : > { %5905 = vmatmul.mubr.bf16.gmra.mrb[80].mxu1 %v7305_v38 }
 0x37a   : > { %5908 = vmatprep.mubr.bf16.mxu1 %v7315_v42 }
 0x381   : > { %5909 = vmatmul.mubr.bf16.gmra.mrb[84].mxu1 %v7313_v40 }
 0x382   : > { %5912 = vmatprep.mubr.bf16.mxu1 %v7323_v32 }
 0x389   : > { %5913 = vmatmul.mubr.bf16.gmra.mrb[88].mxu1 %v7321_v11 }
 0x38a   : > { %5916 = vmatprep.mubr.bf16.mxu1 %v7331_v45 }
 0x391   : > { %5917 = vmatmul.mubr.bf16.gmra.mrb[92].mxu1 %v7329_v15 }
 0x392   : > { %5920 = vmatprep.mubr.bf16.mxu1 %v7339_v28 }
 0x399   : > { %5921 = vmatmul.mubr.bf16.gmra.mrb[96].mxu1 %v7337_v60 }
 0x39a   : > { %5924 = vmatprep.mubr.bf16.mxu1 %v7347_v44 }
 0x3a1   : > { %5925 = vmatmul.mubr.bf16.gmra.mrb[100].mxu1 %v7345_v50 }
 0x3a2   : > { %5928 = vmatprep.mubr.bf16.mxu1 %v7355_v22 }
 0x3a9   : > { %5929 = vmatmul.mubr.bf16.gmra.mrb[104].mxu1 %v7353_v53 }
 0x3aa   : > { %5932 = vmatprep.mubr.bf16.mxu1 %v7363_v55 }
 0x3b1   : > { %5933 = vmatmul.mubr.bf16.gmra.mrb[108].mxu1 %v7361_v54 }
 0x3b2   : > { %5936 = vmatprep.mubr.bf16.mxu1 %v7371_v57 }
 0x3b9   : > { %5937 = vmatmul.mubr.bf16.gmra.mrb[112].mxu1 %v7369_v18 }
 0x3ba   : > { %5940 = vmatprep.mubr.bf16.mxu1 %v7379_v9 }
 0x3c1   : > { %5941 = vmatmul.mubr.bf16.gmra.mrb[116].mxu1 %v7377_v4 }
 0x3c2   : > { %5944 = vmatprep.mubr.bf16.mxu1 %v7387_v14 }
 0x3c9   : > { %5945 = vmatmul.mubr.bf16.gmra.mrb[120].mxu1 %v7385_v47 }
 0x3ca   : > { %5948 = vmatprep.mubr.bf16.mxu1 %v7395_v31 }
 0x3d1   : > { %5949 = vmatmul.mubr.bf16.gmra.mrb[124].mxu1 %v7393_v2 }
 0x42c   : > { %v5890_v0 = vpop.f32.mrb[64].mxu1 }
 0x42d   : > { %v4246_v3 = vmul.f32 0.5, %v5890_v0  ;;  %v3989_v24 = vpop.f32.mrb[65].mxu1 }
 0x42e   : > { %v4244_v25 = vmul.f32 0.5, %v3989_v24  ;;  %v5891_v17 = vpop.f32.mrb[66].mxu1 }
 0x42f   : > { %v4316_v20 = vadd.f32 %v7512_v7, %v4246_v3  ;;  %v4247_v51 = vmul.f32 0.5, %v5891_v17  ;;  %v3992_v8 = vpop.f32.mrb[67].mxu1 }
 0x430   : > { %v4314_v38 = vadd.f32 %v7512_v7, %v4244_v25  ;;  %v4245_v27 = vmul.f32 0.5, %v3992_v8 }
 0x431   : > { %4381 = vst.msk [vmem:[%s7516_s30 + $0x10] sm:$0xff] %vm4378_vm1, %v4316_v20  ;;  %v4317_v40 = vadd.f32 %v7512_v7, %v4247_v51 }
 0x432   : > { %4379 = vst.msk [vmem:[%s7516_s30] sm:$0xff] %vm4378_vm1, %v4314_v38  ;;  %v4315_v42 = vadd.f32 %v7512_v7, %v4245_v27 }
 0x433   : > { %4382 = vst.msk [vmem:[%s7516_s30 + $0x18] sm:$0xff] %vm4378_vm1, %v4317_v40 }
 0x434   : > { %4380 = vst.msk [vmem:[%s7516_s30 + $0x8] sm:$0xff] %vm4378_vm1, %v4315_v42  ;;  %v5894_v11 = vpop.f32.mrb[68].mxu1 }
 0x435   : > { %v4250_v32 = vmul.f32 0.5, %v5894_v11  ;;  %v4005_v15 = vpop.f32.mrb[69].mxu1 }
 0x436   : > { %v4248_v45 = vmul.f32 0.5, %v4005_v15  ;;  %v5895_v60 = vpop.f32.mrb[70].mxu1 }
 0x437   : > { %v4320_v28 = vadd.f32 %v7512_v7, %v4250_v32  ;;  %v4251_v50 = vmul.f32 0.5, %v5895_v60  ;;  %v4008_v44 = vpop.f32.mrb[71].mxu1 }
 0x438   : > { %v4318_v53 = vadd.f32 %v7512_v7, %v4248_v45  ;;  %v4249_v22 = vmul.f32 0.5, %v4008_v44 }
 0x439   : > { %4385 = vst.msk [vmem:[%s7516_s30 + $0x30] sm:$0xff] %vm4378_vm1, %v4320_v28  ;;  %v4321_v54 = vadd.f32 %v7512_v7, %v4251_v50 }
 0x43a   : > { %4383 = vst.msk [vmem:[%s7516_s30 + $0x20] sm:$0xff] %vm4378_vm1, %v4318_v53  ;;  %v4319_v55 = vadd.f32 %v7512_v7, %v4249_v22 }
 0x43b   : > { %4386 = vst.msk [vmem:[%s7516_s30 + $0x38] sm:$0xff] %vm4378_vm1, %v4321_v54 }
 0x43c   : > { %4384 = vst.msk [vmem:[%s7516_s30 + $0x28] sm:$0xff] %vm4378_vm1, %v4319_v55  ;;  %v5898_v18 = vpop.f32.mrb[72].mxu1 }
 0x43d   : > { %v4254_v57 = vmul.f32 0.5, %v5898_v18  ;;  %v4021_v4 = vpop.f32.mrb[73].mxu1 }
 0x43e   : > { %v4252_v9 = vmul.f32 0.5, %v4021_v4  ;;  %v5899_v47 = vpop.f32.mrb[74].mxu1 }
 0x43f   : > { %v4324_v14 = vadd.f32 %v7512_v7, %v4254_v57  ;;  %v4255_v2 = vmul.f32 0.5, %v5899_v47  ;;  %v4024_v31 = vpop.f32.mrb[75].mxu1 }
 0x440   : > { %v4322_v63 = vadd.f32 %v7512_v7, %v4252_v9  ;;  %v4253_v58 = vmul.f32 0.5, %v4024_v31 }
 0x441   : > { %4389 = vst.msk [vmem:[%s7516_s30 + $0x50] sm:$0xff] %vm4378_vm1, %v4324_v14  ;;  %v4325_v49 = vadd.f32 %v7512_v7, %v4255_v2 }
 0x442   : > { %4387 = vst.msk [vmem:[%s7516_s30 + $0x40] sm:$0xff] %vm4378_vm1, %v4322_v63  ;;  %v4323_v6 = vadd.f32 %v7512_v7, %v4253_v58 }
 0x443   : > { %4390 = vst.msk [vmem:[%s7516_s30 + $0x58] sm:$0xff] %vm4378_vm1, %v4325_v49 }
 0x444   : > { %4388 = vst.msk [vmem:[%s7516_s30 + $0x48] sm:$0xff] %vm4378_vm1, %v4323_v6  ;;  %v5902_v13 = vpop.f32.mrb[76].mxu1 }
 0x445   : > { %v4258_v56 = vmul.f32 0.5, %v5902_v13  ;;  %v4037_v30 = vpop.f32.mrb[77].mxu1 }
 0x446   : > { %v4256_v48 = vmul.f32 0.5, %v4037_v30  ;;  %v5903_v26 = vpop.f32.mrb[78].mxu1 }
 0x447   : > { %v4328_v59 = vadd.f32 %v7512_v7, %v4258_v56  ;;  %v4259_v43 = vmul.f32 0.5, %v5903_v26  ;;  %v4040_v52 = vpop.f32.mrb[79].mxu1 }
 0x448   : > { %v4326_v1 = vadd.f32 %v7512_v7, %v4256_v48  ;;  %v4257_v39 = vmul.f32 0.5, %v4040_v52 }
 0x449   : > { %4393 = vst.msk [vmem:[%s7516_s30 + $0x70] sm:$0xff] %vm4378_vm1, %v4328_v59  ;;  %v4329_v10 = vadd.f32 %v7512_v7, %v4259_v43 }
 0x44a   : > { %4391 = vst.msk [vmem:[%s7516_s30 + $0x60] sm:$0xff] %vm4378_vm1, %v4326_v1  ;;  %v4327_v12 = vadd.f32 %v7512_v7, %v4257_v39 }
 0x44b   : > { %4394 = vst.msk [vmem:[%s7516_s30 + $0x78] sm:$0xff] %vm4378_vm1, %v4329_v10 }
 0x44c   : > { %4392 = vst.msk [vmem:[%s7516_s30 + $0x68] sm:$0xff] %vm4378_vm1, %v4327_v12  ;;  %v5906_v16 = vpop.f32.mrb[80].mxu1 }
 0x44d   : > { %v4262_v34 = vmul.f32 0.5, %v5906_v16  ;;  %v4053_v35 = vpop.f32.mrb[81].mxu1 }
 0x44e   : > { %v4260_v36 = vmul.f32 0.5, %v4053_v35  ;;  %v5907_v37 = vpop.f32.mrb[82].mxu1 }
 0x44f   : > { %v4332_v61 = vadd.f32 %v7512_v7, %v4262_v34  ;;  %v4263_v23 = vmul.f32 0.5, %v5907_v37  ;;  %v4056_v62 = vpop.f32.mrb[83].mxu1 }
 0x450   : > { %v4330_v5 = vadd.f32 %v7512_v7, %v4260_v36  ;;  %v4261_v46 = vmul.f32 0.5, %v4056_v62 }
 0x451   : > { %4397 = vst.msk [vmem:[%s7516_s30 + $0x90] sm:$0xff] %vm4378_vm1, %v4332_v61  ;;  %v4333_v33 = vadd.f32 %v7512_v7, %v4263_v23 }
 0x452   : > { %4395 = vst.msk [vmem:[%s7516_s30 + $0x80] sm:$0xff] %vm4378_vm1, %v4330_v5  ;;  %v4331_v29 = vadd.f32 %v7512_v7, %v4261_v46 }
 0x453   : > { %4398 = vst.msk [vmem:[%s7516_s30 + $0x98] sm:$0xff] %vm4378_vm1, %v4333_v33 }
 0x454   : > { %4396 = vst.msk [vmem:[%s7516_s30 + $0x88] sm:$0xff] %vm4378_vm1, %v4331_v29  ;;  %v5910_v19 = vpop.f32.mrb[84].mxu1 }
 0x455   : > { %v4266_v21 = vmul.f32 0.5, %v5910_v19  ;;  %v4069_v41 = vpop.f32.mrb[85].mxu1 }
 0x456   : > { %v4264_v0 = vmul.f32 0.5, %v4069_v41  ;;  %v5911_v3 = vpop.f32.mrb[86].mxu1 }
 0x457   : > { %v4336_v24 = vadd.f32 %v7512_v7, %v4266_v21  ;;  %v4267_v25 = vmul.f32 0.5, %v5911_v3  ;;  %v4072_v17 = vpop.f32.mrb[87].mxu1 }
 0x458   : > { %v4334_v20 = vadd.f32 %v7512_v7, %v4264_v0  ;;  %v4265_v51 = vmul.f32 0.5, %v4072_v17 }
 0x459   : > { %4401 = vst.msk [vmem:[%s7516_s30 + $0xb0] sm:$0xff] %vm4378_vm1, %v4336_v24  ;;  %v4337_v8 = vadd.f32 %v7512_v7, %v4267_v25 }
 0x45a   : > { %4399 = vst.msk [vmem:[%s7516_s30 + $0xa0] sm:$0xff] %vm4378_vm1, %v4334_v20  ;;  %v4335_v38 = vadd.f32 %v7512_v7, %v4265_v51 }
 0x45b   : > { %4402 = vst.msk [vmem:[%s7516_s30 + $0xb8] sm:$0xff] %vm4378_vm1, %v4337_v8 }
 0x45c   : > { %4400 = vst.msk [vmem:[%s7516_s30 + $0xa8] sm:$0xff] %vm4378_vm1, %v4335_v38  ;;  %v5914_v27 = vpop.f32.mrb[88].mxu1 }
 0x45d   : > { %v4270_v40 = vmul.f32 0.5, %v5914_v27  ;;  %v4085_v42 = vpop.f32.mrb[89].mxu1 }
 0x45e   : > { %v4268_v11 = vmul.f32 0.5, %v4085_v42  ;;  %v5915_v32 = vpop.f32.mrb[90].mxu1 }
 0x45f   : > { %v4340_v15 = vadd.f32 %v7512_v7, %v4270_v40  ;;  %v4271_v45 = vmul.f32 0.5, %v5915_v32  ;;  %v4088_v60 = vpop.f32.mrb[91].mxu1 }
 0x460   : > { %v4338_v28 = vadd.f32 %v7512_v7, %v4268_v11  ;;  %v4269_v50 = vmul.f32 0.5, %v4088_v60 }
 0x461   : > { %4405 = vst.msk [vmem:[%s7516_s30 + $0xd0] sm:$0xff] %vm4378_vm1, %v4340_v15  ;;  %v4341_v44 = vadd.f32 %v7512_v7, %v4271_v45 }
 0x462   : > { %4403 = vst.msk [vmem:[%s7516_s30 + $0xc0] sm:$0xff] %vm4378_vm1, %v4338_v28  ;;  %v4339_v53 = vadd.f32 %v7512_v7, %v4269_v50 }
 0x463   : > { %4406 = vst.msk [vmem:[%s7516_s30 + $0xd8] sm:$0xff] %vm4378_vm1, %v4341_v44 }
 0x464   : > { %4404 = vst.msk [vmem:[%s7516_s30 + $0xc8] sm:$0xff] %vm4378_vm1, %v4339_v53  ;;  %v5918_v22 = vpop.f32.mrb[92].mxu1 }
 0x465   : > { %v4274_v54 = vmul.f32 0.5, %v5918_v22  ;;  %v4101_v55 = vpop.f32.mrb[93].mxu1 }
 0x466   : > { %v4272_v18 = vmul.f32 0.5, %v4101_v55  ;;  %v5919_v57 = vpop.f32.mrb[94].mxu1 }
 0x467   : > { %v4344_v4 = vadd.f32 %v7512_v7, %v4274_v54  ;;  %v4275_v9 = vmul.f32 0.5, %v5919_v57  ;;  %v4104_v47 = vpop.f32.mrb[95].mxu1 }
 0x468   : > { %v4342_v14 = vadd.f32 %v7512_v7, %v4272_v18  ;;  %v4273_v2 = vmul.f32 0.5, %v4104_v47 }
 0x469   : > { %4409 = vst.msk [vmem:[%s7516_s30 + $0xf0] sm:$0xff] %vm4378_vm1, %v4344_v4  ;;  %v4345_v31 = vadd.f32 %v7512_v7, %v4275_v9 }
 0x46a   : > { %4407 = vst.msk [vmem:[%s7516_s30 + $0xe0] sm:$0xff] %vm4378_vm1, %v4342_v14  ;;  %v4343_v63 = vadd.f32 %v7512_v7, %v4273_v2 }
 0x46b   : > { %4410 = vst.msk [vmem:[%s7516_s30 + $0xf8] sm:$0xff] %vm4378_vm1, %v4345_v31 }
 0x46c   : > { %4408 = vst.msk [vmem:[%s7516_s30 + $0xe8] sm:$0xff] %vm4378_vm1, %v4343_v63  ;;  %v5922_v58 = vpop.f32.mrb[96].mxu1 }
 0x46d   : > { %v4278_v49 = vmul.f32 0.5, %v5922_v58  ;;  %v4117_v6 = vpop.f32.mrb[97].mxu1 }
 0x46e   : > { %v4276_v13 = vmul.f32 0.5, %v4117_v6  ;;  %v5923_v56 = vpop.f32.mrb[98].mxu1 }
 0x46f   : > { %v4348_v30 = vadd.f32 %v7512_v7, %v4278_v49  ;;  %v4279_v48 = vmul.f32 0.5, %v5923_v56  ;;  %v4120_v26 = vpop.f32.mrb[99].mxu1 }
 0x470   : > { %v4346_v59 = vadd.f32 %v7512_v7, %v4276_v13  ;;  %v4277_v43 = vmul.f32 0.5, %v4120_v26 }
 0x471   : > { %4413 = vst.msk [vmem:[%s7516_s30 + $0x110] sm:$0xff] %vm4378_vm1, %v4348_v30  ;;  %v4349_v52 = vadd.f32 %v7512_v7, %v4279_v48 }
 0x472   : > { %4411 = vst.msk [vmem:[%s7516_s30 + $0x100] sm:$0xff] %vm4378_vm1, %v4346_v59  ;;  %v4347_v1 = vadd.f32 %v7512_v7, %v4277_v43 }
 0x473   : > { %4414 = vst.msk [vmem:[%s7516_s30 + $0x118] sm:$0xff] %vm4378_vm1, %v4349_v52 }
 0x474   : > { %4412 = vst.msk [vmem:[%s7516_s30 + $0x108] sm:$0xff] %vm4378_vm1, %v4347_v1  ;;  %v5926_v39 = vpop.f32.mrb[100].mxu1 }
 0x475   : > { %v4282_v10 = vmul.f32 0.5, %v5926_v39  ;;  %v4133_v12 = vpop.f32.mrb[101].mxu1 }
 0x476   : > { %v4280_v16 = vmul.f32 0.5, %v4133_v12  ;;  %v5927_v34 = vpop.f32.mrb[102].mxu1 }
 0x477   : > { %v4352_v35 = vadd.f32 %v7512_v7, %v4282_v10  ;;  %v4283_v36 = vmul.f32 0.5, %v5927_v34  ;;  %v4136_v37 = vpop.f32.mrb[103].mxu1 }
 0x478   : > { %v4350_v61 = vadd.f32 %v7512_v7, %v4280_v16  ;;  %v4281_v23 = vmul.f32 0.5, %v4136_v37 }
 0x479   : > { %4417 = vst.msk [vmem:[%s7516_s30 + $0x130] sm:$0xff] %vm4378_vm1, %v4352_v35  ;;  %v4353_v62 = vadd.f32 %v7512_v7, %v4283_v36 }
 0x47a   : > { %4415 = vst.msk [vmem:[%s7516_s30 + $0x120] sm:$0xff] %vm4378_vm1, %v4350_v61  ;;  %v4351_v5 = vadd.f32 %v7512_v7, %v4281_v23 }
 0x47b   : > { %4418 = vst.msk [vmem:[%s7516_s30 + $0x138] sm:$0xff] %vm4378_vm1, %v4353_v62 }
 0x47c   : > { %4416 = vst.msk [vmem:[%s7516_s30 + $0x128] sm:$0xff] %vm4378_vm1, %v4351_v5  ;;  %v5930_v46 = vpop.f32.mrb[104].mxu1 }
 0x47d   : > { %v4286_v33 = vmul.f32 0.5, %v5930_v46  ;;  %v4149_v29 = vpop.f32.mrb[105].mxu1 }
 0x47e   : > { %v4284_v19 = vmul.f32 0.5, %v4149_v29  ;;  %v5931_v21 = vpop.f32.mrb[106].mxu1 }
 0x47f   : > { %v4356_v41 = vadd.f32 %v7512_v7, %v4286_v33  ;;  %v4287_v0 = vmul.f32 0.5, %v5931_v21  ;;  %v4152_v3 = vpop.f32.mrb[107].mxu1 }
 0x480   : > { %v4354_v24 = vadd.f32 %v7512_v7, %v4284_v19  ;;  %v4285_v25 = vmul.f32 0.5, %v4152_v3 }
 0x481   : > { %4421 = vst.msk [vmem:[%s7516_s30 + $0x150] sm:$0xff] %vm4378_vm1, %v4356_v41  ;;  %v4357_v17 = vadd.f32 %v7512_v7, %v4287_v0 }
 0x482   : > { %4419 = vst.msk [vmem:[%s7516_s30 + $0x140] sm:$0xff] %vm4378_vm1, %v4354_v24  ;;  %v4355_v20 = vadd.f32 %v7512_v7, %v4285_v25 }
 0x483   : > { %4422 = vst.msk [vmem:[%s7516_s30 + $0x158] sm:$0xff] %vm4378_vm1, %v4357_v17 }
 0x484   : > { %4420 = vst.msk [vmem:[%s7516_s30 + $0x148] sm:$0xff] %vm4378_vm1, %v4355_v20  ;;  %v5934_v51 = vpop.f32.mrb[108].mxu1 }
 0x485   : > { %v4290_v8 = vmul.f32 0.5, %v5934_v51  ;;  %v4165_v38 = vpop.f32.mrb[109].mxu1 }
 0x486   : > { %v4288_v27 = vmul.f32 0.5, %v4165_v38  ;;  %v5935_v40 = vpop.f32.mrb[110].mxu1 }
 0x487   : > { %v4360_v42 = vadd.f32 %v7512_v7, %v4290_v8  ;;  %v4291_v11 = vmul.f32 0.5, %v5935_v40  ;;  %v4168_v32 = vpop.f32.mrb[111].mxu1 }
 0x488   : > { %v4358_v15 = vadd.f32 %v7512_v7, %v4288_v27  ;;  %v4289_v45 = vmul.f32 0.5, %v4168_v32 }
 0x489   : > { %4425 = vst.msk [vmem:[%s7516_s30 + $0x170] sm:$0xff] %vm4378_vm1, %v4360_v42  ;;  %v4361_v60 = vadd.f32 %v7512_v7, %v4291_v11 }
 0x48a   : > { %4423 = vst.msk [vmem:[%s7516_s30 + $0x160] sm:$0xff] %vm4378_vm1, %v4358_v15  ;;  %v4359_v28 = vadd.f32 %v7512_v7, %v4289_v45 }
 0x48b   : > { %4426 = vst.msk [vmem:[%s7516_s30 + $0x178] sm:$0xff] %vm4378_vm1, %v4361_v60 }
 0x48c   : > { %4424 = vst.msk [vmem:[%s7516_s30 + $0x168] sm:$0xff] %vm4378_vm1, %v4359_v28  ;;  %v5938_v50 = vpop.f32.mrb[112].mxu1 }
 0x48d   : > { %v4294_v44 = vmul.f32 0.5, %v5938_v50  ;;  %v4181_v53 = vpop.f32.mrb[113].mxu1 }
 0x48e   : > { %v4292_v22 = vmul.f32 0.5, %v4181_v53  ;;  %v5939_v54 = vpop.f32.mrb[114].mxu1 }
 0x48f   : > { %v4364_v55 = vadd.f32 %v7512_v7, %v4294_v44  ;;  %v4295_v18 = vmul.f32 0.5, %v5939_v54  ;;  %v4184_v57 = vpop.f32.mrb[115].mxu1 }
 0x490   : > { %v4362_v4 = vadd.f32 %v7512_v7, %v4292_v22  ;;  %v4293_v9 = vmul.f32 0.5, %v4184_v57 }
 0x491   : > { %4429 = vst.msk [vmem:[%s7516_s30 + $0x190] sm:$0xff] %vm4378_vm1, %v4364_v55  ;;  %v4365_v47 = vadd.f32 %v7512_v7, %v4295_v18 }
 0x492   : > { %4427 = vst.msk [vmem:[%s7516_s30 + $0x180] sm:$0xff] %vm4378_vm1, %v4362_v4  ;;  %v4363_v14 = vadd.f32 %v7512_v7, %v4293_v9 }
 0x493   : > { %4430 = vst.msk [vmem:[%s7516_s30 + $0x198] sm:$0xff] %vm4378_vm1, %v4365_v47 }
 0x494   : > { %4428 = vst.msk [vmem:[%s7516_s30 + $0x188] sm:$0xff] %vm4378_vm1, %v4363_v14  ;;  %v5942_v2 = vpop.f32.mrb[116].mxu1 }
 0x495   : > { %v4298_v31 = vmul.f32 0.5, %v5942_v2  ;;  %v4197_v63 = vpop.f32.mrb[117].mxu1 }
 0x496   : > { %v4296_v58 = vmul.f32 0.5, %v4197_v63  ;;  %v5943_v49 = vpop.f32.mrb[118].mxu1 }
 0x497   : > { %v4368_v6 = vadd.f32 %v7512_v7, %v4298_v31  ;;  %v4299_v13 = vmul.f32 0.5, %v5943_v49  ;;  %v4200_v56 = vpop.f32.mrb[119].mxu1 }
 0x498   : > { %v4366_v30 = vadd.f32 %v7512_v7, %v4296_v58  ;;  %v4297_v48 = vmul.f32 0.5, %v4200_v56 }
 0x499   : > { %4433 = vst.msk [vmem:[%s7516_s30 + $0x1b0] sm:$0xff] %vm4378_vm1, %v4368_v6  ;;  %v4369_v26 = vadd.f32 %v7512_v7, %v4299_v13 }
 0x49a   : > { %4431 = vst.msk [vmem:[%s7516_s30 + $0x1a0] sm:$0xff] %vm4378_vm1, %v4366_v30  ;;  %v4367_v59 = vadd.f32 %v7512_v7, %v4297_v48 }
 0x49b   : > { %4434 = vst.msk [vmem:[%s7516_s30 + $0x1b8] sm:$0xff] %vm4378_vm1, %v4369_v26 }
 0x49c   : > { %4432 = vst.msk [vmem:[%s7516_s30 + $0x1a8] sm:$0xff] %vm4378_vm1, %v4367_v59  ;;  %v5946_v43 = vpop.f32.mrb[120].mxu1 }
 0x49d   : > { %v4302_v52 = vmul.f32 0.5, %v5946_v43  ;;  %v4213_v1 = vpop.f32.mrb[121].mxu1 }
 0x49e   : > { %v4300_v39 = vmul.f32 0.5, %v4213_v1  ;;  %v5947_v10 = vpop.f32.mrb[122].mxu1 }
 0x49f   : > { %v4372_v12 = vadd.f32 %v7512_v7, %v4302_v52  ;;  %v4303_v16 = vmul.f32 0.5, %v5947_v10  ;;  %v4216_v34 = vpop.f32.mrb[123].mxu1 }
 0x4a0   : > { %v4370_v35 = vadd.f32 %v7512_v7, %v4300_v39  ;;  %v4301_v36 = vmul.f32 0.5, %v4216_v34 }
 0x4a1   : > { %4437 = vst.msk [vmem:[%s7516_s30 + $0x1d0] sm:$0xff] %vm4378_vm1, %v4372_v12  ;;  %v4373_v37 = vadd.f32 %v7512_v7, %v4303_v16 }
 0x4a2   : > { %4435 = vst.msk [vmem:[%s7516_s30 + $0x1c0] sm:$0xff] %vm4378_vm1, %v4370_v35  ;;  %v4371_v61 = vadd.f32 %v7512_v7, %v4301_v36 }
 0x4a3   : > { %4438 = vst.msk [vmem:[%s7516_s30 + $0x1d8] sm:$0xff] %vm4378_vm1, %v4373_v37 }
 0x4a4   : > { %4436 = vst.msk [vmem:[%s7516_s30 + $0x1c8] sm:$0xff] %vm4378_vm1, %v4371_v61  ;;  %v5950_v23 = vpop.f32.mrb[124].mxu1 }
 0x4a5   : > { %v4306_v62 = vmul.f32 0.5, %v5950_v23  ;;  %v4229_v5 = vpop.f32.mrb[125].mxu1 }
 0x4a6   : > { %v4304_v46 = vmul.f32 0.5, %v4229_v5  ;;  %v5951_v33 = vpop.f32.mrb[126].mxu1  ;;  %4449 = sbr.rel (!%p6413_p4) target bundleno = 1269 (0x4f5), region = 60 }
 0x4a7   : > { %v4376_v29 = vadd.f32 %v7512_v7, %v4306_v62  ;;  %v4307_v19 = vmul.f32 0.5, %v5951_v33  ;;  %v4232_v21 = vpop.f32.mrb[127].mxu1 }
 0x4a8   : > { %v4374_v41 = vadd.f32 %v7512_v7, %v4304_v46  ;;  %v4305_v0 = vmul.f32 0.5, %v4232_v21 }
 0x4a9   : > { %4441 = vst.msk [vmem:[%s7516_s30 + $0x1f0] sm:$0xff] %vm4378_vm1, %v4376_v29  ;;  %v4377_v3 = vadd.f32 %v7512_v7, %v4307_v19 }
 0x4aa   : > { %4439 = vst.msk [vmem:[%s7516_s30 + $0x1e0] sm:$0xff] %vm4378_vm1, %v4374_v41  ;;  %v4375_v24 = vadd.f32 %v7512_v7, %v4305_v0 }
 0x4ab   : > { %4442 = vst.msk [vmem:[%s7516_s30 + $0x1f8] sm:$0xff] %vm4378_vm1, %v4377_v3 }
 0x4ac   : > { %4440 = vst.msk [vmem:[%s7516_s30 + $0x1e8] sm:$0xff] %vm4378_vm1, %v4375_v24 }
 0x4ad   : > { %s7961_s29 = smov (!%p4452_p8, %s4451_s29), 64 }
 0x4ae   : > { %s5082_s19 = sshll.u32 %s7961_s29, 7 }
 0x4af   : > { %p5085_p9 = scmp.eq.s32.totalorder %s5082_s19, 0 }
 0x4b0   : > { %s7721_s21 = sshrl.u32 (!%p5085_p9), %s7961_s29, 6 }
 0x4b1   : > { %4460 = sbr.rel (%p5085_p9) target bundleno = 1269 (0x4f5), region = 64  ;;  %p5086_p10 = scmp.le.s32.totalorder (!%p5085_p9), %s7721_s21, 0 }
 0x4b8   : > { %4872 = sbr.rel (%p5086_p10) target bundleno = 1248 (0x4e0), region = 143  ;;  %s7952_s12 = smov (!%p5086_p10), %s7715_s18 }
 0x4b9   : > { %s7953_s17 = smov (!%p5086_p10), %s7516_s30  ;;  %s7730_s20 = smov (!%p5086_p10), 0  }
 0x4ba   : > { %s7732_s22 = smov (!%p5086_p10), 0  }
 0x4bf LB: >> { %v4648_v7 = vld [vmem:[%s6312_s17] sm:$0xff]  ;;  %v4650_v25 = vld [vmem:[%s6312_s17 + $0x8] sm:$0xff]  ;;  %v4652_v17 = vld [vmem:[%s6312_s17 + $0x10] sm:$0xff]  ;;  %s4776_s23 = sadd.s32 1, %s6316_s20  ;;  %s4642_s22 = sadd.s32 1, %s6320_s22   ;;  %s6320_s22 = sphi %s7732_s22, %s4642_s22   ;;  %s6316_s20 = sphi %s7730_s20, %s7956_s20   ;;  %s6312_s17 = sphi %s7953_s17, %s7955_s17   ;;  %s6308_s12 = sphi %s7952_s12, %s7954_s12  }
 0x4c0   : >> { %4649 = vst [vmem:[%s6308_s12] sm:$0xff] %v4648_v7  ;;  %4651 = vst [vmem:[%s6308_s12 + $0x8] sm:$0xff] %v4650_v25  ;;  %v4654_v20 = vld [vmem:[%s6312_s17 + $0x18] sm:$0xff]  ;;  %v4656_v51 = vld [vmem:[%s6312_s17 + $0x20] sm:$0xff]  ;;  %p4777_p11 = scmp.ge.s32.totalorder %s4776_s23, %s7721_s21  ;;  %p4641_p12 = scmp.ge.s32.totalorder %s4642_s22, %s7721_s21 }
 0x4c1   : >> { %4653 = vst [vmem:[%s6308_s12 + $0x10] sm:$0xff] %v4652_v17  ;;  %v4658_v8 = vld [vmem:[%s6312_s17 + $0x28] sm:$0xff]  ;;  %4655 = vst [vmem:[%s6308_s12 + $0x18] sm:$0xff] %v4654_v20  ;;  %v4660_v38 = vld [vmem:[%s6312_s17 + $0x30] sm:$0xff] }
 0x4c2   : >> { %4657 = vst [vmem:[%s6308_s12 + $0x20] sm:$0xff] %v4656_v51  ;;  %4659 = vst [vmem:[%s6308_s12 + $0x28] sm:$0xff] %v4658_v8  ;;  %v4662_v27 = vld [vmem:[%s6312_s17 + $0x38] sm:$0xff]  ;;  %v4664_v40 = vld [vmem:[%s6312_s17 + $0x40] sm:$0xff]  ;;  %s7963_s23 = smov (%p4777_p11, %s4776_s23), 0 }
 0x4c3   : >> { %4661 = vst [vmem:[%s6308_s12 + $0x30] sm:$0xff] %v4660_v38  ;;  %4663 = vst [vmem:[%s6308_s12 + $0x38] sm:$0xff] %v4662_v27  ;;  %v4666_v42 = vld [vmem:[%s6312_s17 + $0x48] sm:$0xff]  ;;  %v4668_v11 = vld [vmem:[%s6312_s17 + $0x50] sm:$0xff]  ;;  %s5087_s24 = sshll.u32 %s7963_s23, 9  ;;  %s7956_s20 = smov %s7963_s23 }
 0x4c4   : >> { %4665 = vst [vmem:[%s6308_s12 + $0x40] sm:$0xff] %v4664_v40  ;;  %v4670_v32 = vld [vmem:[%s6312_s17 + $0x58] sm:$0xff]  ;;  %4667 = vst [vmem:[%s6308_s12 + $0x48] sm:$0xff] %v4666_v42  ;;  %v4672_v15 = vld [vmem:[%s6312_s17 + $0x60] sm:$0xff]  ;;  %s7788_s25 = scalar_lea.vmem %s7516_s30, %s5087_s24 [#allocation3]   ;;  %s7791_s26 = scalar_lea.vmem %s7715_s18, %s5087_s24  }
 0x4c5   : >> { %4669 = vst [vmem:[%s6308_s12 + $0x50] sm:$0xff] %v4668_v11  ;;  %4671 = vst [vmem:[%s6308_s12 + $0x58] sm:$0xff] %v4670_v32  ;;  %v4674_v45 = vld [vmem:[%s6312_s17 + $0x68] sm:$0xff]  ;;  %v4676_v60 = vld [vmem:[%s6312_s17 + $0x70] sm:$0xff] }
 0x4c6   : >> { %4673 = vst [vmem:[%s6308_s12 + $0x60] sm:$0xff] %v4672_v15  ;;  %4675 = vst [vmem:[%s6308_s12 + $0x68] sm:$0xff] %v4674_v45  ;;  %v4678_v28 = vld [vmem:[%s6312_s17 + $0x78] sm:$0xff]  ;;  %v4680_v50 = vld [vmem:[%s6312_s17 + $0x80] sm:$0xff] }
 0x4c7   : >> { %4677 = vst [vmem:[%s6308_s12 + $0x70] sm:$0xff] %v4676_v60  ;;  %v4682_v44 = vld [vmem:[%s6312_s17 + $0x88] sm:$0xff]  ;;  %4679 = vst [vmem:[%s6308_s12 + $0x78] sm:$0xff] %v4678_v28  ;;  %v4684_v53 = vld [vmem:[%s6312_s17 + $0x90] sm:$0xff] }
 0x4c8   : >> { %4681 = vst [vmem:[%s6308_s12 + $0x80] sm:$0xff] %v4680_v50  ;;  %4683 = vst [vmem:[%s6308_s12 + $0x88] sm:$0xff] %v4682_v44  ;;  %v4686_v22 = vld [vmem:[%s6312_s17 + $0x98] sm:$0xff]  ;;  %v4688_v54 = vld [vmem:[%s6312_s17 + $0xa0] sm:$0xff] }
 0x4c9   : >> { %4685 = vst [vmem:[%s6308_s12 + $0x90] sm:$0xff] %v4684_v53  ;;  %4687 = vst [vmem:[%s6308_s12 + $0x98] sm:$0xff] %v4686_v22  ;;  %v4690_v55 = vld [vmem:[%s6312_s17 + $0xa8] sm:$0xff]  ;;  %v4692_v18 = vld [vmem:[%s6312_s17 + $0xb0] sm:$0xff] }
 0x4ca   : >> { %4689 = vst [vmem:[%s6308_s12 + $0xa0] sm:$0xff] %v4688_v54  ;;  %v4694_v57 = vld [vmem:[%s6312_s17 + $0xb8] sm:$0xff]  ;;  %4691 = vst [vmem:[%s6308_s12 + $0xa8] sm:$0xff] %v4690_v55  ;;  %v4696_v4 = vld [vmem:[%s6312_s17 + $0xc0] sm:$0xff] }
 0x4cb   : >> { %4693 = vst [vmem:[%s6308_s12 + $0xb0] sm:$0xff] %v4692_v18  ;;  %4695 = vst [vmem:[%s6308_s12 + $0xb8] sm:$0xff] %v4694_v57  ;;  %v4698_v9 = vld [vmem:[%s6312_s17 + $0xc8] sm:$0xff]  ;;  %v4700_v47 = vld [vmem:[%s6312_s17 + $0xd0] sm:$0xff] }
 0x4cc   : >> { %4697 = vst [vmem:[%s6308_s12 + $0xc0] sm:$0xff] %v4696_v4  ;;  %4699 = vst [vmem:[%s6308_s12 + $0xc8] sm:$0xff] %v4698_v9  ;;  %v4702_v14 = vld [vmem:[%s6312_s17 + $0xd8] sm:$0xff]  ;;  %v4704_v2 = vld [vmem:[%s6312_s17 + $0xe0] sm:$0xff] }
 0x4cd   : >> { %4701 = vst [vmem:[%s6308_s12 + $0xd0] sm:$0xff] %v4700_v47  ;;  %v4706_v31 = vld [vmem:[%s6312_s17 + $0xe8] sm:$0xff]  ;;  %4703 = vst [vmem:[%s6308_s12 + $0xd8] sm:$0xff] %v4702_v14  ;;  %v4708_v63 = vld [vmem:[%s6312_s17 + $0xf0] sm:$0xff] }
 0x4ce   : >> { %4705 = vst [vmem:[%s6308_s12 + $0xe0] sm:$0xff] %v4704_v2  ;;  %4707 = vst [vmem:[%s6308_s12 + $0xe8] sm:$0xff] %v4706_v31  ;;  %v4710_v58 = vld [vmem:[%s6312_s17 + $0xf8] sm:$0xff]  ;;  %v4712_v49 = vld [vmem:[%s6312_s17 + $0x100] sm:$0xff] }
 0x4cf   : >> { %4709 = vst [vmem:[%s6308_s12 + $0xf0] sm:$0xff] %v4708_v63  ;;  %4711 = vst [vmem:[%s6308_s12 + $0xf8] sm:$0xff] %v4710_v58  ;;  %v4714_v6 = vld [vmem:[%s6312_s17 + $0x108] sm:$0xff]  ;;  %v4716_v13 = vld [vmem:[%s6312_s17 + $0x110] sm:$0xff] }
 0x4d0   : >> { %4713 = vst [vmem:[%s6308_s12 + $0x100] sm:$0xff] %v4712_v49  ;;  %v4718_v56 = vld [vmem:[%s6312_s17 + $0x118] sm:$0xff]  ;;  %4715 = vst [vmem:[%s6308_s12 + $0x108] sm:$0xff] %v4714_v6  ;;  %v4720_v30 = vld [vmem:[%s6312_s17 + $0x120] sm:$0xff] }
 0x4d1   : >> { %4717 = vst [vmem:[%s6308_s12 + $0x110] sm:$0xff] %v4716_v13  ;;  %4719 = vst [vmem:[%s6308_s12 + $0x118] sm:$0xff] %v4718_v56  ;;  %v4722_v48 = vld [vmem:[%s6312_s17 + $0x128] sm:$0xff]  ;;  %v4724_v26 = vld [vmem:[%s6312_s17 + $0x130] sm:$0xff] }
 0x4d2   : >> { %4721 = vst [vmem:[%s6308_s12 + $0x120] sm:$0xff] %v4720_v30  ;;  %4723 = vst [vmem:[%s6308_s12 + $0x128] sm:$0xff] %v4722_v48  ;;  %v4726_v59 = vld [vmem:[%s6312_s17 + $0x138] sm:$0xff]  ;;  %v4728_v43 = vld [vmem:[%s6312_s17 + $0x140] sm:$0xff] }
 0x4d3   : >> { %4725 = vst [vmem:[%s6308_s12 + $0x130] sm:$0xff] %v4724_v26  ;;  %v4730_v52 = vld [vmem:[%s6312_s17 + $0x148] sm:$0xff]  ;;  %4727 = vst [vmem:[%s6308_s12 + $0x138] sm:$0xff] %v4726_v59  ;;  %v4732_v1 = vld [vmem:[%s6312_s17 + $0x150] sm:$0xff] }
 0x4d4   : >> { %4729 = vst [vmem:[%s6308_s12 + $0x140] sm:$0xff] %v4728_v43  ;;  %4731 = vst [vmem:[%s6308_s12 + $0x148] sm:$0xff] %v4730_v52  ;;  %v4734_v39 = vld [vmem:[%s6312_s17 + $0x158] sm:$0xff]  ;;  %v4736_v10 = vld [vmem:[%s6312_s17 + $0x160] sm:$0xff] }
 0x4d5   : >> { %4733 = vst [vmem:[%s6308_s12 + $0x150] sm:$0xff] %v4732_v1  ;;  %4735 = vst [vmem:[%s6308_s12 + $0x158] sm:$0xff] %v4734_v39  ;;  %v4738_v12 = vld [vmem:[%s6312_s17 + $0x168] sm:$0xff]  ;;  %v4740_v16 = vld [vmem:[%s6312_s17 + $0x170] sm:$0xff] }
 0x4d6   : >> { %4737 = vst [vmem:[%s6308_s12 + $0x160] sm:$0xff] %v4736_v10  ;;  %v4742_v34 = vld [vmem:[%s6312_s17 + $0x178] sm:$0xff]  ;;  %4739 = vst [vmem:[%s6308_s12 + $0x168] sm:$0xff] %v4738_v12  ;;  %v4744_v35 = vld [vmem:[%s6312_s17 + $0x180] sm:$0xff] }
 0x4d7   : >> { %4741 = vst [vmem:[%s6308_s12 + $0x170] sm:$0xff] %v4740_v16  ;;  %4743 = vst [vmem:[%s6308_s12 + $0x178] sm:$0xff] %v4742_v34  ;;  %v4746_v36 = vld [vmem:[%s6312_s17 + $0x188] sm:$0xff]  ;;  %v4748_v37 = vld [vmem:[%s6312_s17 + $0x190] sm:$0xff] }
 0x4d8   : >> { %4745 = vst [vmem:[%s6308_s12 + $0x180] sm:$0xff] %v4744_v35  ;;  %4747 = vst [vmem:[%s6308_s12 + $0x188] sm:$0xff] %v4746_v36  ;;  %v4750_v61 = vld [vmem:[%s6312_s17 + $0x198] sm:$0xff]  ;;  %v4752_v23 = vld [vmem:[%s6312_s17 + $0x1a0] sm:$0xff] }
 0x4d9   : >> { %4749 = vst [vmem:[%s6308_s12 + $0x190] sm:$0xff] %v4748_v37  ;;  %v4754_v62 = vld [vmem:[%s6312_s17 + $0x1a8] sm:$0xff]  ;;  %4751 = vst [vmem:[%s6308_s12 + $0x198] sm:$0xff] %v4750_v61  ;;  %v4756_v5 = vld [vmem:[%s6312_s17 + $0x1b0] sm:$0xff]  ;;  %4644 = sbr.rel (!%p4641_p12) target bundleno = 1215 (0x4bf), region = 149 }
 0x4da   : >> { %4753 = vst [vmem:[%s6308_s12 + $0x1a0] sm:$0xff] %v4752_v23  ;;  %4755 = vst [vmem:[%s6308_s12 + $0x1a8] sm:$0xff] %v4754_v62  ;;  %v4758_v46 = vld [vmem:[%s6312_s17 + $0x1b8] sm:$0xff]  ;;  %v4760_v33 = vld [vmem:[%s6312_s17 + $0x1c0] sm:$0xff] }
 0x4db   : >> { %4757 = vst [vmem:[%s6308_s12 + $0x1b0] sm:$0xff] %v4756_v5  ;;  %4759 = vst [vmem:[%s6308_s12 + $0x1b8] sm:$0xff] %v4758_v46  ;;  %v4762_v29 = vld [vmem:[%s6312_s17 + $0x1c8] sm:$0xff]  ;;  %v4764_v19 = vld [vmem:[%s6312_s17 + $0x1d0] sm:$0xff] }
 0x4dc   : >> { %4761 = vst [vmem:[%s6308_s12 + $0x1c0] sm:$0xff] %v4760_v33  ;;  %v4766_v21 = vld [vmem:[%s6312_s17 + $0x1d8] sm:$0xff]  ;;  %4763 = vst [vmem:[%s6308_s12 + $0x1c8] sm:$0xff] %v4762_v29  ;;  %v4768_v41 = vld [vmem:[%s6312_s17 + $0x1e0] sm:$0xff] }
 0x4dd   : >> { %4765 = vst [vmem:[%s6308_s12 + $0x1d0] sm:$0xff] %v4764_v19  ;;  %4767 = vst [vmem:[%s6308_s12 + $0x1d8] sm:$0xff] %v4766_v21  ;;  %v4770_v0 = vld [vmem:[%s6312_s17 + $0x1e8] sm:$0xff]  ;;  %v4772_v3 = vld [vmem:[%s6312_s17 + $0x1f0] sm:$0xff] }
 0x4de   : >> { %4769 = vst [vmem:[%s6308_s12 + $0x1e0] sm:$0xff] %v4768_v41  ;;  %4771 = vst [vmem:[%s6308_s12 + $0x1e8] sm:$0xff] %v4770_v0  ;;  %v4774_v24 = vld [vmem:[%s6312_s17 + $0x1f8] sm:$0xff]  ;;  %s7955_s17 = smov %s7788_s25 }
 0x4df   : >> { %4773 = vst [vmem:[%s6308_s12 + $0x1f0] sm:$0xff] %v4772_v3  ;;  %4775 = vst [vmem:[%s6308_s12 + $0x1f8] sm:$0xff] %v4774_v24  ;;  %s7954_s12 = smov %s7791_s26 }
 0x4e0 PF: > { %s7896_s27 = sand.u32 63, %s7961_s29   ;;  %s5098_s28 = sshll.u32 %s7721_s21, 9 }
 0x4e1   : > { %s4787_s11 = scalar_lea.vmem %s7516_s30, %s5098_s28 [#allocation3]   ;;  %s4789_s14 = scalar_lea.vmem %s7715_s18, %s5098_s28  }
 0x4e2   : > { %p5092_p13 = scmp.le.s32.totalorder %s7896_s27, 0 }
 0x4e3   : > { %s6322_s15 = smov (!%p5092_p13), %s4789_s14   ;;  %s6326_s19 = smov (!%p5092_p13), %s4787_s11  }
 0x4e4   : > { %4886 = sbr.rel (%p5092_p13) target bundleno = 1269 (0x4f5), region = 154  ;;  %s6330_s24 = smov (!%p5092_p13), 0  }
 0x4e5   : > { %s6334_s23 = smov (!%p5092_p13), 0  }
 0x4eb LB: >> { %v4799_v7 = vld [vmem:[%s6328_s19] sm:$0xff]  ;;  %s4801_s29 = sadd.s32 1, %s6332_s24  ;;  %s4793_s23 = sadd.s32 1, %s6336_s23   ;;  %s6336_s23 = sphi %s6334_s23, %s4793_s23   ;;  %s6332_s24 = sphi %s6330_s24, %s6331_s24   ;;  %s6328_s19 = sphi %s6326_s19, %s4806_s19   ;;  %s6324_s15 = sphi %s6322_s15, %s4807_s15  }
 0x4ec   : >> { %4800 = vst [vmem:[%s6324_s15] sm:$0xff] %v4799_v7  ;;  %p4802_p0 = scmp.ge.s32.totalorder %s4801_s29, %s7896_s27  ;;  %p4792_p1 = scmp.ge.s32.totalorder %s4793_s23, %s7896_s27 }
 0x4ee   : >> { %s7965_s29 = smov (%p4802_p0, %s4801_s29), 0  ;;  %4795 = sbr.rel (!%p4792_p1) target bundleno = 1259 (0x4eb), region = 160 }
 0x4ef   : >> { %s5093_s30 = sshll.u32 %s7965_s29, 3  ;;  %s6331_s24 = smov %s7965_s29  }
 0x4f0   : >> { %s4806_s19 = scalar_lea.vmem %s4787_s11, %s5093_s30 [#allocation3]   ;;  %s4807_s15 = scalar_lea.vmem %s4789_s14, %s5093_s30  }
 0x4f5 PF: > { %p16_p2 = scmp.ge.s32.totalorder %s6403_s13, 4   ;;  %s7957_s30 = smov %s6300_s10 }
 0x4f6   : > { %s7958_s10 = smov %s6411_s16  ;;  %s7959_s11 = smov %s6403_s13 }
 0x4f7   :  { %18 = sbr.rel (!%p16_p2) target bundleno = 2 (0x2), region = 171 }

// kernel: tpu_custom_call.1
= control target key start
LH: loop header
LB: loop body
LE: loop exit
PB: predicated region body
PF: predicated region fallthrough
CT: control target
= control target key end

     0   :  { %s6388_s30 = smov 0   ;;  %s6390_s10 = smov 0   ;;  %s7914_s0 = inlined_call_operand.vmem [shape: f32[1000,16], index: 0, kind: input, shape index: {}]   ;;  %s7915_s1 = inlined_call_operand.vmem [shape: f32[1000,16], index: 1, kind: input, shape index: {}]   ;;  %s7916_s2 = inlined_call_operand.vmem [shape: bf16[16,128], index: 2, kind: input, shape index: {}]   ;;  %s7917_s3 = inlined_call_operand.vmem [shape: bf16[16,128], index: 3, kind: input, shape index: {}]   ;;  %s7918_s4 = inlined_call_operand.vmem [shape: f32[1,128], index: 4, kind: input, shape index: {}]   ;;  %s7919_s5 = inlined_call_operand.vmem [shape: bf16[128,128], index: 5, kind: input, shape index: {}]   ;;  %s7920_s6 = inlined_call_operand.vmem [shape: f32[1,128], index: 6, kind: input, shape index: {}]   ;;  %s7921_s7 = inlined_call_operand.vmem [shape: bf16[128,8], index: 7, kind: input, shape index: {}]   ;;  %s7922_s8 = inlined_call_operand.vmem [shape: f32[1,8], index: 8, kind: input, shape index: {}]   ;;  %s7923_s9 = inlined_call_operand.vmem [shape: f32[1000,8], index: 9, kind: output, shape index: {}]  }
   0x1   :  { %s6392_s11 = smov 0  }
   0x2 LB: > { %s6401_s12 = sadd.s32 4294967295, %s6304_s11   ;;  %s6403_s13 = sadd.s32 1, %s6304_s11   ;;  %s6304_s11 = sphi %s6392_s11, %s7959_s11   ;;  %s6300_s10 = sphi %s6390_s10, %s7958_s10   ;;  %s6296_s30 = sphi %s6388_s30, %s7957_s30  }
   0x3   : > { %s222_s14 = ssub.s32 %s6304_s11, %s6403_s13  ;;  %s225_s15 = sadd.s32 1, %s6300_s10 }
   0x4   : > { %p223_p0 = scmp.eq.s32.totalorder %s222_s14, 0  ;;  %p235_p1 = scmp.ne.s32.totalorder %s6300_s10, %s6296_s30 }
   0x5   : > { %p236_p2 = scmp.eq.s32.totalorder %s6401_s12, 1  ;;  %p4925_p3 = scmp.ge.s32.totalorder %s6304_s11, 1 }
   0x6   : > { %s6411_s16 = scalar_select %p223_p0, %s6300_s10, %s225_s15  }
   0x7   : > { %p6413_p4 = por %p236_p2, %p235_p1  ;;  %p315_p5 = scmp.lt.s32.totalorder %s6304_s11, 3 }
   0x9   : > { %p316_p6 = pnand %p4925_p3, %p315_p5 }
   0xb   : > { %319 = sbr.rel (%p316_p6) target bundleno = 1269 (0x4f5), region = 56 }
  0x12   : > { %v6232_v0 = vld [vmem:[%s7917_s3] sm:$0xff]   ;;  %s6421_s20 = sshll.u32 %s6401_s12, 6  ;;  %vm600_vm0 = vcmask 130048   ;;  %s360_s25 = sand.u32 1, %s6296_s30   ;;  %vm4378_vm1 = vcmask 64512  }
  0x13   : > { %p368_p7 = scmp.lt.s32.totalorder %s6421_s20, 124  ;;  %5384 = vmatprep.subr.bf16.mxu0 %v6232_v0  ;;  %5516 = vmatprep.subr.bf16.mxu1 %v6232_v0  ;;  %v6233_v1 = vld [vmem:[%s7916_s2] sm:$0xff]   ;;  %s4926_s26 = sshll.u32 %s360_s25, 9 }
  0x14   : > { %5385 = vmatpush3.bf16.msra.mxu0 %v6232_v0  ;;  %5517 = vmatpush3.bf16.msra.mxu1 %v6232_v0  ;;  %s7516_s30 = scalar_lea.vmem [#allocation3], %s4926_s26   ;;  %s4451_s29 = ssub.s32 (%p6413_p4), 125, %s6421_s20 }
  0x15   : > { %s369_s23 = scalar_select %p368_p7, %s6421_s20, 124  ;;  %5450 = vmatprep.subr.bf16.mxu0 %v6233_v1  ;;  %5582 = vmatprep.subr.bf16.mxu1 %v6233_v1 }
  0x16   : > { %p4452_p8 = scmp.lt.s32.totalorder (%p6413_p4), %s4451_s29, 64 }
  0x17   : > { %s4928_s24 = sshll.u32 %s369_s23, 3 }
  0x18   : > { %s6431_s27 = scalar_lea.vmem %s7915_s1, %s4928_s24  ;;  %s6436_s11 = scalar_lea.vmem %s7914_s0, %s4928_s24 }
  0x19   : > { %v493_v2 = vld [vmem:[%s6431_s27] sm:$0xff]  ;;  %v494_v3 = vld [vmem:[%s6431_s27 + $0x8] sm:$0xff]  ;;  %v495_v7 = vld [vmem:[%s6431_s27 + $0x10] sm:$0xff] }
  0x1a   : > { %v397_v4 = vld [vmem:[%s6436_s11] sm:$0xff]  ;;  %v6441_v5 = vpack.c.bf16 %v494_v3, %v493_v2  ;;  %v398_v6 = vld [vmem:[%s6436_s11 + $0x8] sm:$0xff]  ;;  %v496_v8 = vld [vmem:[%s6431_s27 + $0x18] sm:$0xff] }
  0x1b   : > { %v6446_v9 = vpack.c.bf16 %v398_v6, %v397_v4  ;;  %v6448_v10 = vpack.c.bf16 %v496_v8, %v495_v7  ;;  %v399_v11 = vld [vmem:[%s6436_s11 + $0x10] sm:$0xff]  ;;  %v400_v12 = vld [vmem:[%s6436_s11 + $0x18] sm:$0xff]  ;;  %v497_v13 = vld [vmem:[%s6431_s27 + $0x20] sm:$0xff] }
  0x1c   : > { %5386 = vmatprep.mubr.msk.bf16.mxu0 %vm600_vm0, %v6441_v5  ;;  %v6455_v14 = vpack.c.bf16 %v400_v12, %v399_v11  ;;  %v498_v15 = vld [vmem:[%s6431_s27 + $0x28] sm:$0xff]  ;;  %v401_v16 = vld [vmem:[%s6436_s11 + $0x20] sm:$0xff]  ;;  %v499_v20 = vld [vmem:[%s6431_s27 + $0x30] sm:$0xff] }
  0x1d   : > { %v402_v17 = vld [vmem:[%s6436_s11 + $0x28] sm:$0xff]  ;;  %5518 = vmatprep.mubr.msk.bf16.mxu1 %vm600_vm0, %v6446_v9  ;;  %5387 = vmatmul.mubr.msk.bf16.vlgmr.msra.gmra.mrb[0].mxu0 %vm600_vm0, %v6448_v10  ;;  %v6464_v18 = vpack.c.bf16 %v498_v15, %v497_v13  ;;  %v500_v21 = vld [vmem:[%s6431_s27 + $0x38] sm:$0xff]  ;;  %v403_v22 = vld [vmem:[%s6436_s11 + $0x30] sm:$0xff] }
  0x1e   : > { %v6466_v19 = vpack.c.bf16 %v402_v17, %v401_v16  ;;  %5451 = vmatpush3.bf16.msra.mxu0 %v6233_v1  ;;  %5519 = vmatmul.mubr.msk.bf16.vlgmr.msra.gmra.mrb[0].mxu1 %vm600_vm0, %v6455_v14  ;;  %v404_v23 = vld [vmem:[%s6436_s11 + $0x38] sm:$0xff]  ;;  %v501_v24 = vld [vmem:[%s6431_s27 + $0x40] sm:$0xff]  ;;  %v502_v25 = vld [vmem:[%s6431_s27 + $0x48] sm:$0xff]  ;;  %v6482_v28 = vpack.c.bf16 %v500_v21, %v499_v20 }
  0x1f   : > { %5390 = vmatprep.mubr.msk.bf16.mxu0 %vm600_vm0, %v6464_v18  ;;  %v405_v26 = vld [vmem:[%s6436_s11 + $0x40] sm:$0xff]  ;;  %v406_v27 = vld [vmem:[%s6436_s11 + $0x48] sm:$0xff]  ;;  %5583 = vmatpush3.bf16.msra.mxu1 %v6233_v1  ;;  %v6484_v29 = vpack.c.bf16 %v404_v23, %v403_v22  ;;  %v6486_v30 = vpack.c.bf16 %v502_v25, %v501_v24  ;;  %v503_v32 = vld [vmem:[%s6431_s27 + $0x50] sm:$0xff] }
  0x20   : > { %5522 = vmatprep.mubr.msk.bf16.mxu1 %vm600_vm0, %v6466_v19  ;;  %v6488_v31 = vpack.c.bf16 %v406_v27, %v405_v26  ;;  %v504_v33 = vld [vmem:[%s6431_s27 + $0x58] sm:$0xff]  ;;  %v407_v34 = vld [vmem:[%s6436_s11 + $0x50] sm:$0xff]  ;;  %v505_v36 = vld [vmem:[%s6431_s27 + $0x60] sm:$0xff] }
  0x21   : > { %v408_v35 = vld [vmem:[%s6436_s11 + $0x58] sm:$0xff]  ;;  %v506_v37 = vld [vmem:[%s6431_s27 + $0x68] sm:$0xff]  ;;  %v409_v38 = vld [vmem:[%s6436_s11 + $0x60] sm:$0xff]  ;;  %v6506_v40 = vpack.c.bf16 %v504_v33, %v503_v32 }
  0x22   : > { %v410_v39 = vld [vmem:[%s6436_s11 + $0x68] sm:$0xff]  ;;  %v6508_v41 = vpack.c.bf16 %v408_v35, %v407_v34  ;;  %v6510_v42 = vpack.c.bf16 %v506_v37, %v505_v36  ;;  %v507_v44 = vld [vmem:[%s6431_s27 + $0x70] sm:$0xff]  ;;  %v508_v45 = vld [vmem:[%s6431_s27 + $0x78] sm:$0xff] }
  0x23   : > { %v6512_v43 = vpack.c.bf16 %v410_v39, %v409_v38  ;;  %v411_v46 = vld [vmem:[%s6436_s11 + $0x70] sm:$0xff]  ;;  %v412_v47 = vld [vmem:[%s6436_s11 + $0x78] sm:$0xff]  ;;  %v509_v48 = vld [vmem:[%s6431_s27 + $0x80] sm:$0xff]  ;;  %v6530_v52 = vpack.c.bf16 %v508_v45, %v507_v44 }
  0x24   : > { %v510_v49 = vld [vmem:[%s6431_s27 + $0x88] sm:$0xff]  ;;  %v413_v50 = vld [vmem:[%s6436_s11 + $0x80] sm:$0xff]  ;;  %v6532_v53 = vpack.c.bf16 %v412_v47, %v411_v46  ;;  %v511_v56 = vld [vmem:[%s6431_s27 + $0x90] sm:$0xff] }
  0x25   : > { %5391 = vmatmul.mubr.msk.bf16.gmra.mrb[4].mxu0 %vm600_vm0, %v6482_v28  ;;  %v414_v51 = vld [vmem:[%s6436_s11 + $0x88] sm:$0xff]  ;;  %v6534_v54 = vpack.c.bf16 %v510_v49, %v509_v48  ;;  %v512_v57 = vld [vmem:[%s6431_s27 + $0x98] sm:$0xff]  ;;  %v415_v58 = vld [vmem:[%s6436_s11 + $0x90] sm:$0xff] }
  0x26   : > { %5523 = vmatmul.mubr.msk.bf16.gmra.mrb[4].mxu1 %vm600_vm0, %v6484_v29  ;;  %5394 = vmatprep.mubr.msk.bf16.mxu0 %vm600_vm0, %v6486_v30  ;;  %v6536_v55 = vpack.c.bf16 %v414_v51, %v413_v50  ;;  %v416_v59 = vld [vmem:[%s6436_s11 + $0x98] sm:$0xff]  ;;  %v513_v60 = vld [vmem:[%s6431_s27 + $0xa0] sm:$0xff]  ;;  %v514_v61 = vld [vmem:[%s6431_s27 + $0xa8] sm:$0xff]  ;;  %v6554_v0 = vpack.c.bf16 %v512_v57, %v511_v56 }
  0x27   : > { %5526 = vmatprep.mubr.msk.bf16.mxu1 %vm600_vm0, %v6488_v31  ;;  %v417_v62 = vld [vmem:[%s6436_s11 + $0xa0] sm:$0xff]  ;;  %v418_v63 = vld [vmem:[%s6436_s11 + $0xa8] sm:$0xff]  ;;  %v6556_v1 = vpack.c.bf16 %v416_v59, %v415_v58  ;;  %v6558_v2 = vpack.c.bf16 %v514_v61, %v513_v60  ;;  %v515_v4 = vld [vmem:[%s6431_s27 + $0xb0] sm:$0xff] }
  0x28   : > { %v6560_v3 = vpack.c.bf16 %v418_v63, %v417_v62  ;;  %v516_v6 = vld [vmem:[%s6431_s27 + $0xb8] sm:$0xff]  ;;  %v419_v7 = vld [vmem:[%s6436_s11 + $0xb0] sm:$0xff]  ;;  %v517_v11 = vld [vmem:[%s6431_s27 + $0xc0] sm:$0xff] }
  0x29   : > { %v420_v8 = vld [vmem:[%s6436_s11 + $0xb8] sm:$0xff]  ;;  %v518_v12 = vld [vmem:[%s6431_s27 + $0xc8] sm:$0xff]  ;;  %v421_v13 = vld [vmem:[%s6436_s11 + $0xc0] sm:$0xff]  ;;  %v6578_v16 = vpack.c.bf16 %v516_v6, %v515_v4 }
  0x2a   : > { %v422_v15 = vld [vmem:[%s6436_s11 + $0xc8] sm:$0xff]  ;;  %v6580_v17 = vpack.c.bf16 %v420_v8, %v419_v7  ;;  %v6582_v20 = vpack.c.bf16 %v518_v12, %v517_v11  ;;  %v519_v22 = vld [vmem:[%s6431_s27 + $0xd0] sm:$0xff]  ;;  %v520_v23 = vld [vmem:[%s6431_s27 + $0xd8] sm:$0xff] }
  0x2b   : > { %v6584_v21 = vpack.c.bf16 %v422_v15, %v421_v13  ;;  %v423_v24 = vld [vmem:[%s6436_s11 + $0xd0] sm:$0xff]  ;;  %v424_v25 = vld [vmem:[%s6436_s11 + $0xd8] sm:$0xff]  ;;  %v521_v26 = vld [vmem:[%s6431_s27 + $0xe0] sm:$0xff]  ;;  %v6602_v34 = vpack.c.bf16 %v520_v23, %v519_v22 }
  0x2c   : > { %v522_v27 = vld [vmem:[%s6431_s27 + $0xe8] sm:$0xff]  ;;  %v425_v32 = vld [vmem:[%s6436_s11 + $0xe0] sm:$0xff]  ;;  %v6604_v35 = vpack.c.bf16 %v424_v25, %v423_v24  ;;  %v523_v38 = vld [vmem:[%s6431_s27 + $0xf0] sm:$0xff] }
  0x2d   : > { %5395 = vmatmul.mubr.msk.bf16.gmra.mrb[8].mxu0 %vm600_vm0, %v6506_v40  ;;  %v426_v33 = vld [vmem:[%s6436_s11 + $0xe8] sm:$0xff]  ;;  %v6606_v36 = vpack.c.bf16 %v522_v27, %v521_v26  ;;  %v524_v39 = vld [vmem:[%s6431_s27 + $0xf8] sm:$0xff]  ;;  %v427_v44 = vld [vmem:[%s6436_s11 + $0xf0] sm:$0xff] }
  0x2e   : > { %5527 = vmatmul.mubr.msk.bf16.gmra.mrb[8].mxu1 %vm600_vm0, %v6508_v41  ;;  %5398 = vmatprep.mubr.msk.bf16.mxu0 %vm600_vm0, %v6510_v42  ;;  %v6608_v37 = vpack.c.bf16 %v426_v33, %v425_v32  ;;  %v428_v45 = vld [vmem:[%s6436_s11 + $0xf8] sm:$0xff]  ;;  %v525_v46 = vld [vmem:[%s6431_s27 + $0x100] sm:$0xff]  ;;  %v526_v47 = vld [vmem:[%s6431_s27 + $0x108] sm:$0xff]  ;;  %v6626_v50 = vpack.c.bf16 %v524_v39, %v523_v38 }
  0x2f   : > { %5530 = vmatprep.mubr.msk.bf16.mxu1 %vm600_vm0, %v6512_v43  ;;  %v429_v48 = vld [vmem:[%s6436_s11 + $0x100] sm:$0xff]  ;;  %v430_v49 = vld [vmem:[%s6436_s11 + $0x108] sm:$0xff]  ;;  %v6628_v51 = vpack.c.bf16 %v428_v45, %v427_v44  ;;  %v6630_v56 = vpack.c.bf16 %v526_v47, %v525_v46  ;;  %v527_v58 = vld [vmem:[%s6431_s27 + $0x110] sm:$0xff] }
  0x30   : > { %v6632_v57 = vpack.c.bf16 %v430_v49, %v429_v48  ;;  %v528_v59 = vld [vmem:[%s6431_s27 + $0x118] sm:$0xff]  ;;  %v431_v60 = vld [vmem:[%s6436_s11 + $0x110] sm:$0xff]  ;;  %v529_v62 = vld [vmem:[%s6431_s27 + $0x120] sm:$0xff] }
  0x31   : > { %v432_v61 = vld [vmem:[%s6436_s11 + $0x118] sm:$0xff]  ;;  %v530_v63 = vld [vmem:[%s6431_s27 + $0x128] sm:$0xff]  ;;  %v433_v4 = vld [vmem:[%s6436_s11 + $0x120] sm:$0xff]  ;;  %v6650_v7 = vpack.c.bf16 %v528_v59, %v527_v58 }
  0x32   : > { %v434_v6 = vld [vmem:[%s6436_s11 + $0x128] sm:$0xff]  ;;  %v6652_v8 = vpack.c.bf16 %v432_v61, %v431_v60  ;;  %v6654_v11 = vpack.c.bf16 %v530_v63, %v529_v62  ;;  %v531_v13 = vld [vmem:[%s6431_s27 + $0x130] sm:$0xff]  ;;  %v532_v15 = vld [vmem:[%s6431_s27 + $0x138] sm:$0xff] }
  0x33   : > { %v6656_v12 = vpack.c.bf16 %v434_v6, %v433_v4  ;;  %v435_v22 = vld [vmem:[%s6436_s11 + $0x130] sm:$0xff]  ;;  %v436_v23 = vld [vmem:[%s6436_s11 + $0x138] sm:$0xff]  ;;  %v533_v24 = vld [vmem:[%s6431_s27 + $0x140] sm:$0xff]  ;;  %v6674_v32 = vpack.c.bf16 %v532_v15, %v531_v13 }
  0x34   : > { %v534_v25 = vld [vmem:[%s6431_s27 + $0x148] sm:$0xff]  ;;  %v437_v26 = vld [vmem:[%s6436_s11 + $0x140] sm:$0xff]  ;;  %v6676_v33 = vpack.c.bf16 %v436_v23, %v435_v22  ;;  %v535_v44 = vld [vmem:[%s6431_s27 + $0x150] sm:$0xff] }
  0x35   : > { %5399 = vmatmul.mubr.msk.bf16.gmra.mrb[12].mxu0 %vm600_vm0, %v6530_v52  ;;  %v438_v27 = vld [vmem:[%s6436_s11 + $0x148] sm:$0xff]  ;;  %v6678_v38 = vpack.c.bf16 %v534_v25, %v533_v24  ;;  %v536_v45 = vld [vmem:[%s6431_s27 + $0x158] sm:$0xff]  ;;  %v439_v46 = vld [vmem:[%s6436_s11 + $0x150] sm:$0xff] }
  0x36   : > { %5531 = vmatmul.mubr.msk.bf16.gmra.mrb[12].mxu1 %vm600_vm0, %v6532_v53  ;;  %5402 = vmatprep.mubr.msk.bf16.mxu0 %vm600_vm0, %v6534_v54  ;;  %v6680_v39 = vpack.c.bf16 %v438_v27, %v437_v26  ;;  %v440_v47 = vld [vmem:[%s6436_s11 + $0x158] sm:$0xff]  ;;  %v537_v48 = vld [vmem:[%s6431_s27 + $0x160] sm:$0xff]  ;;  %v538_v49 = vld [vmem:[%s6431_s27 + $0x168] sm:$0xff]  ;;  %v6698_v60 = vpack.c.bf16 %v536_v45, %v535_v44 }
  0x37   : > { %5534 = vmatprep.mubr.msk.bf16.mxu1 %vm600_vm0, %v6536_v55  ;;  %v441_v58 = vld [vmem:[%s6436_s11 + $0x160] sm:$0xff]  ;;  %v442_v59 = vld [vmem:[%s6436_s11 + $0x168] sm:$0xff]  ;;  %v6700_v61 = vpack.c.bf16 %v440_v47, %v439_v46  ;;  %v6702_v62 = vpack.c.bf16 %v538_v49, %v537_v48  ;;  %v539_v4 = vld [vmem:[%s6431_s27 + $0x170] sm:$0xff] }
  0x38   : > { %v6704_v63 = vpack.c.bf16 %v442_v59, %v441_v58  ;;  %v540_v6 = vld [vmem:[%s6431_s27 + $0x178] sm:$0xff]  ;;  %v443_v13 = vld [vmem:[%s6436_s11 + $0x170] sm:$0xff]  ;;  %v541_v22 = vld [vmem:[%s6431_s27 + $0x180] sm:$0xff] }
  0x39   : > { %v444_v15 = vld [vmem:[%s6436_s11 + $0x178] sm:$0xff]  ;;  %v542_v23 = vld [vmem:[%s6431_s27 + $0x188] sm:$0xff]  ;;  %v445_v24 = vld [vmem:[%s6436_s11 + $0x180] sm:$0xff]  ;;  %v6722_v26 = vpack.c.bf16 %v540_v6, %v539_v4 }
  0x3a   : > { %v446_v25 = vld [vmem:[%s6436_s11 + $0x188] sm:$0xff]  ;;  %v6724_v27 = vpack.c.bf16 %v444_v15, %v443_v13  ;;  %v6726_v44 = vpack.c.bf16 %v542_v23, %v541_v22  ;;  %v543_v46 = vld [vmem:[%s6431_s27 + $0x190] sm:$0xff]  ;;  %v544_v47 = vld [vmem:[%s6431_s27 + $0x198] sm:$0xff] }
  0x3b   : > { %v6728_v45 = vpack.c.bf16 %v446_v25, %v445_v24  ;;  %v447_v48 = vld [vmem:[%s6436_s11 + $0x190] sm:$0xff]  ;;  %v6742_v49 = vld [vmem:[%s7919_s5] sm:$0xff]   ;;  %v448_v58 = vld [vmem:[%s6436_s11 + $0x198] sm:$0xff]  ;;  %v6752_v15 = vpack.c.bf16 %v544_v47, %v543_v46 }
  0x3c   : > { %7934 = vst [vmem:[#allocation4_spill] sm:$0xff] %v6726_v44  ;;  %v545_v59 = vld [vmem:[%s6431_s27 + $0x1a0] sm:$0xff]  ;;  %v546_v4 = vld [vmem:[%s6431_s27 + $0x1a8] sm:$0xff]  ;;  %5648 = vmatprep.subr.bf16.mxu0 %v6742_v49  ;;  %v6754_v22 = vpack.c.bf16 %v448_v58, %v447_v48  ;;  %v547_v25 = vld [vmem:[%s6431_s27 + $0x1b0] sm:$0xff] }
  0x3d   : > { %5403 = vmatmul.mubr.msk.bf16.gmra.mrb[16].mxu0 %vm600_vm0, %v6554_v0  ;;  %v449_v6 = vld [vmem:[%s6436_s11 + $0x1a0] sm:$0xff]  ;;  %v450_v13 = vld [vmem:[%s6436_s11 + $0x1a8] sm:$0xff]  ;;  %7935 = vst [vmem:[#allocation5_spill] sm:$0xff] %v6752_v15  ;;  %v6756_v23 = vpack.c.bf16 %v546_v4, %v545_v59  ;;  %v451_v46 = vld [vmem:[%s6436_s11 + $0x1b0] sm:$0xff] }
  0x3e   : > { %5535 = vmatmul.mubr.msk.bf16.gmra.mrb[16].mxu1 %vm600_vm0, %v6556_v1  ;;  %5406 = vmatprep.mubr.msk.bf16.mxu0 %vm600_vm0, %v6558_v2  ;;  %7936 = vst [vmem:[#allocation6_spill] sm:$0xff] %v6754_v22  ;;  %v6758_v24 = vpack.c.bf16 %v450_v13, %v449_v6  ;;  %v452_v47 = vld [vmem:[%s6436_s11 + $0x1b8] sm:$0xff]  ;;  %v549_v48 = vld [vmem:[%s6431_s27 + $0x1c0] sm:$0xff]  ;;  %v550_v58 = vld [vmem:[%s6431_s27 + $0x1c8] sm:$0xff] }
  0x3f   : > { %5538 = vmatprep.mubr.msk.bf16.mxu1 %vm600_vm0, %v6560_v3  ;;  %7937 = vst [vmem:[#allocation7_spill] sm:$0xff] %v6756_v23  ;;  %v453_v59 = vld [vmem:[%s6436_s11 + $0x1c0] sm:$0xff]  ;;  %v454_v4 = vld [vmem:[%s6436_s11 + $0x1c8] sm:$0xff]  ;;  %v6778_v13 = vpack.c.bf16 %v452_v47, %v451_v46 }
  0x40   : > { %7938 = vst [vmem:[#allocation8_spill] sm:$0xff] %v6758_v24  ;;  %v553_v46 = vld [vmem:[%s6431_s27 + $0x1e0] sm:$0xff]  ;;  %v554_v47 = vld [vmem:[%s6431_s27 + $0x1e8] sm:$0xff] }
  0x41   : > { %7940 = vst [vmem:[#allocation10_spill] sm:$0xff] %v6778_v13 }
  0x45   : > { %5407 = vmatmul.mubr.msk.bf16.gmra.mrb[20].mxu0 %vm600_vm0, %v6578_v16 }
  0x46   : > { %5539 = vmatmul.mubr.msk.bf16.gmra.mrb[20].mxu1 %vm600_vm0, %v6580_v17  ;;  %5410 = vmatprep.mubr.msk.bf16.mxu0 %vm600_vm0, %v6582_v20 }
  0x47   : > { %5542 = vmatprep.mubr.msk.bf16.mxu1 %vm600_vm0, %v6584_v21 }
  0x4d   : > { %5411 = vmatmul.mubr.msk.bf16.gmra.mrb[24].mxu0 %vm600_vm0, %v6602_v34 }
  0x4e   : > { %5543 = vmatmul.mubr.msk.bf16.gmra.mrb[24].mxu1 %vm600_vm0, %v6604_v35  ;;  %5414 = vmatprep.mubr.msk.bf16.mxu0 %vm600_vm0, %v6606_v36 }
  0x4f   : > { %5546 = vmatprep.mubr.msk.bf16.mxu1 %vm600_vm0, %v6608_v37 }
  0x55   : > { %5415 = vmatmul.mubr.msk.bf16.gmra.mrb[28].mxu0 %vm600_vm0, %v6626_v50 }
  0x56   : > { %5547 = vmatmul.mubr.msk.bf16.gmra.mrb[28].mxu1 %vm600_vm0, %v6628_v51  ;;  %5418 = vmatprep.mubr.msk.bf16.mxu0 %vm600_vm0, %v6630_v56 }
  0x57   : > { %5550 = vmatprep.mubr.msk.bf16.mxu1 %vm600_vm0, %v6632_v57 }
  0x5d   : > { %5419 = vmatmul.mubr.msk.bf16.gmra.mrb[32].mxu0 %vm600_vm0, %v6650_v7 }
  0x5e   : > { %5551 = vmatmul.mubr.msk.bf16.gmra.mrb[32].mxu1 %vm600_vm0, %v6652_v8  ;;  %5422 = vmatprep.mubr.msk.bf16.mxu0 %vm600_vm0, %v6654_v11 }
  0x5f   : > { %5554 = vmatprep.mubr.msk.bf16.mxu1 %vm600_vm0, %v6656_v12 }
  0x65   : > { %5423 = vmatmul.mubr.msk.bf16.gmra.mrb[36].mxu0 %vm600_vm0, %v6674_v32 }
  0x66   : > { %5555 = vmatmul.mubr.msk.bf16.gmra.mrb[36].mxu1 %vm600_vm0, %v6676_v33  ;;  %5426 = vmatprep.mubr.msk.bf16.mxu0 %vm600_vm0, %v6678_v38 }
  0x67   : > { %5558 = vmatprep.mubr.msk.bf16.mxu1 %vm600_vm0, %v6680_v39 }
  0x6d   : > { %5427 = vmatmul.mubr.msk.bf16.gmra.mrb[40].mxu0 %vm600_vm0, %v6698_v60 }
  0x6e   : > { %5559 = vmatmul.mubr.msk.bf16.gmra.mrb[40].mxu1 %vm600_vm0, %v6700_v61  ;;  %5430 = vmatprep.mubr.msk.bf16.mxu0 %vm600_vm0, %v6702_v62 }
  0x6f   : > { %5562 = vmatprep.mubr.msk.bf16.mxu1 %vm600_vm0, %v6704_v63 }
  0x75   : > { %5431 = vmatmul.mubr.msk.bf16.gmra.mrb[44].mxu0 %vm600_vm0, %v6722_v26 }
  0x76   : > { %5563 = vmatmul.mubr.msk.bf16.gmra.mrb[44].mxu1 %vm600_vm0, %v6724_v27  ;;  %5434 = vmatprep.mubr.msk.bf16.mxu0 %vm600_vm0, %v6726_v44  ;;  %v548_v44 = vld [vmem:[%s6431_s27 + $0x1b8] sm:$0xff] }
  0x77   : > { %5566 = vmatprep.mubr.msk.bf16.mxu1 %vm600_vm0, %v6728_v45  ;;  %v6776_v6 = vpack.c.bf16 %v548_v44, %v547_v25  ;;  %v455_v44 = vld [vmem:[%s6436_s11 + $0x1d0] sm:$0xff]  ;;  %v456_v25 = vld [vmem:[%s6436_s11 + $0x1d8] sm:$0xff] }
  0x79   : > { %7939 = vst [vmem:[#allocation9_spill] sm:$0xff] %v6776_v6 }
  0x7d   : > { %5435 = vmatmul.mubr.msk.bf16.gmra.mrb[48].mxu0 %vm600_vm0, %v6752_v15  ;;  %v6782_v15 = vpack.c.bf16 %v454_v4, %v453_v59  ;;  %v6802_v4 = vpack.c.bf16 %v456_v25, %v455_v44 }
  0x7e   : > { %5567 = vmatmul.mubr.msk.bf16.gmra.mrb[48].mxu1 %vm600_vm0, %v6754_v22  ;;  %5438 = vmatprep.mubr.msk.bf16.mxu0 %vm600_vm0, %v6756_v23  ;;  %v6780_v23 = vpack.c.bf16 %v550_v58, %v549_v48  ;;  %v552_v22 = vld [vmem:[%s6431_s27 + $0x1d8] sm:$0xff]  ;;  %v457_v48 = vld [vmem:[%s6436_s11 + $0x1e0] sm:$0xff]  ;;  %v458_v58 = vld [vmem:[%s6436_s11 + $0x1e8] sm:$0xff] }
  0x7f   : > { %5570 = vmatprep.mubr.msk.bf16.mxu1 %vm600_vm0, %v6758_v24  ;;  %7942 = vst [vmem:[#allocation12_spill] sm:$0xff] %v6782_v15  ;;  %v551_v24 = vld [vmem:[%s6431_s27 + $0x1d0] sm:$0xff] }
  0x80   : > { %7941 = vst [vmem:[#allocation11_spill] sm:$0xff] %v6780_v23  ;;  %v6800_v59 = vpack.c.bf16 %v552_v22, %v551_v24  ;;  %v459_v22 = vld [vmem:[%s6436_s11 + $0x1f0] sm:$0xff]  ;;  %v460_v24 = vld [vmem:[%s6436_s11 + $0x1f8] sm:$0xff]  ;;  %s5097_s11 = sshll.u32 (%p6413_p4), %s6401_s12, 9 }
  0x81   : > { %v6822_v25 = vpack.c.bf16 %v460_v24, %v459_v22  ;;  %s7715_s18 = scalar_lea.vmem (%p6413_p4), %s7923_s9, %s5097_s11  }
  0x85   : > { %5439 = vmatmul.mubr.msk.bf16.gmra.mrb[52].mxu0 %vm600_vm0, %v6776_v6  ;;  %v6806_v6 = vpack.c.bf16 %v458_v58, %v457_v48 }
  0x86   : > { %5571 = vmatmul.mubr.msk.bf16.gmra.mrb[52].mxu1 %vm600_vm0, %v6778_v13  ;;  %5442 = vmatprep.mubr.msk.bf16.mxu0 %vm600_vm0, %v6780_v23  ;;  %v6804_v23 = vpack.c.bf16 %v554_v47, %v553_v46  ;;  %v556_v13 = vld [vmem:[%s6431_s27 + $0x1f8] sm:$0xff]  ;;  %v6235_v46 = vld [vmem:[%s7919_s5 + $0x8] sm:$0xff]  }
  0x87   : > { %5574 = vmatprep.mubr.msk.bf16.mxu1 %vm600_vm0, %v6782_v15  ;;  %v555_v15 = vld [vmem:[%s6431_s27 + $0x1f0] sm:$0xff] }
  0x88   : > { %v6820_v44 = vpack.c.bf16 %v556_v13, %v555_v15 }
  0x8d   : > { %5443 = vmatmul.mubr.msk.bf16.gmra.mrb[56].mxu0 %vm600_vm0, %v6800_v59 }
  0x8e   : > { %5575 = vmatmul.mubr.msk.bf16.gmra.mrb[56].mxu1 %vm600_vm0, %v6802_v4  ;;  %5446 = vmatprep.mubr.msk.bf16.mxu0 %vm600_vm0, %v6804_v23 }
  0x8f   : > { %5578 = vmatprep.mubr.msk.bf16.mxu1 %vm600_vm0, %v6806_v6 }
  0x95   : > { %5447 = vmatmul.mubr.msk.bf16.gmra.mrb[60].mxu0 %vm600_vm0, %v6820_v44 }
  0x96   : > { %5579 = vmatmul.mubr.msk.bf16.gmra.mrb[60].mxu1 %vm600_vm0, %v6822_v25  ;;  %5452 = vmatprep.mubr.msk.bf16.mxu0 %vm600_vm0, %v6446_v9  ;;  %v6237_v9 = vld [vmem:[%s7919_s5 + $0x18] sm:$0xff]  }
  0x97   : > { %5584 = vmatprep.mubr.msk.bf16.mxu1 %vm600_vm0, %v6441_v5  ;;  %v6236_v5 = vld [vmem:[%s7919_s5 + $0x10] sm:$0xff]  }
  0x9d   : > { %5453 = vmatmul.mubr.msk.bf16.vlgmr.msra.gmra.mrb[0].mxu0 %vm600_vm0, %v6455_v14  ;;  %v6239_v14 = vld [vmem:[%s7919_s5 + $0x28] sm:$0xff]  }
  0x9e   : > { %5585 = vmatmul.mubr.msk.bf16.vlgmr.msra.gmra.mrb[0].mxu1 %vm600_vm0, %v6448_v10  ;;  %5456 = vmatprep.mubr.msk.bf16.mxu0 %vm600_vm0, %v6466_v19  ;;  %v6238_v10 = vld [vmem:[%s7919_s5 + $0x20] sm:$0xff]   ;;  %v6241_v19 = vld [vmem:[%s7919_s5 + $0x38] sm:$0xff]  }
  0x9f   : > { %5588 = vmatprep.mubr.msk.bf16.mxu1 %vm600_vm0, %v6464_v18  ;;  %5649 = vmatpush3.bf16.msra.mxu0 %v6742_v49  ;;  %v6240_v18 = vld [vmem:[%s7919_s5 + $0x30] sm:$0xff]  }
  0xa0   : > { %5650 = vmatprep.subr.bf16.mxu0 %v6235_v46 }
  0xa3   : > { %5651 = vmatpush3.bf16.msra.mxu0 %v6235_v46 }
  0xa4   : > { %5652 = vmatprep.subr.bf16.mxu0 %v6236_v5 }
  0xa5   : > { %5457 = vmatmul.mubr.msk.bf16.gmra.mrb[4].mxu0 %vm600_vm0, %v6484_v29  ;;  %v7944_v29 = vld [vmem:[#allocation6_spill] sm:$0xff] }
  0xa6   : > { %5589 = vmatmul.mubr.msk.bf16.gmra.mrb[4].mxu1 %vm600_vm0, %v6482_v28  ;;  %5460 = vmatprep.mubr.msk.bf16.mxu0 %vm600_vm0, %v6488_v31  ;;  %v7943_v28 = vld [vmem:[#allocation4_spill] sm:$0xff] }
  0xa7   : > { %5592 = vmatprep.mubr.msk.bf16.mxu1 %vm600_vm0, %v6486_v30  ;;  %5653 = vmatpush3.bf16.msra.mxu0 %v6236_v5  ;;  %v7945_v30 = vld [vmem:[#allocation5_spill] sm:$0xff]  ;;  %v7946_v31 = vld [vmem:[#allocation8_spill] sm:$0xff] }
  0xa8   : > { %5654 = vmatprep.subr.bf16.mxu0 %v6237_v9 }
  0xab   : > { %5655 = vmatpush3.bf16.msra.mxu0 %v6237_v9 }
  0xac   : > { %5656 = vmatprep.subr.bf16.mxu0 %v6238_v10 }
  0xad   : > { %5461 = vmatmul.mubr.msk.bf16.gmra.mrb[8].mxu0 %vm600_vm0, %v6508_v41  ;;  %v7948_v41 = vld [vmem:[#allocation10_spill] sm:$0xff] }
  0xae   : > { %5593 = vmatmul.mubr.msk.bf16.gmra.mrb[8].mxu1 %vm600_vm0, %v6506_v40  ;;  %5464 = vmatprep.mubr.msk.bf16.mxu0 %vm600_vm0, %v6512_v43  ;;  %v7947_v40 = vld [vmem:[#allocation7_spill] sm:$0xff]  ;;  %v7950_v43 = vld [vmem:[#allocation12_spill] sm:$0xff] }
  0xaf   : > { %5596 = vmatprep.mubr.msk.bf16.mxu1 %vm600_vm0, %v6510_v42  ;;  %5657 = vmatpush3.bf16.msra.mxu0 %v6238_v10  ;;  %v7949_v42 = vld [vmem:[#allocation9_spill] sm:$0xff] }
  0xb0   : > { %5658 = vmatprep.subr.bf16.mxu0 %v6239_v14 }
  0xb3   : > { %5659 = vmatpush3.bf16.msra.mxu0 %v6239_v14 }
  0xb4   : > { %5660 = vmatprep.subr.bf16.mxu0 %v6240_v18 }
  0xb5   : > { %5465 = vmatmul.mubr.msk.bf16.gmra.mrb[12].mxu0 %vm600_vm0, %v6532_v53  ;;  %v6981_v53 = vld [vmem:[%s7918_s4] ss:$0 sm:$0xff] }
  0xb6   : > { %5597 = vmatmul.mubr.msk.bf16.gmra.mrb[12].mxu1 %vm600_vm0, %v6530_v52  ;;  %5468 = vmatprep.mubr.msk.bf16.mxu0 %vm600_vm0, %v6536_v55  ;;  %v7951_v52 = vld [vmem:[#allocation11_spill] sm:$0xff] }
  0xb7   : > { %5600 = vmatprep.mubr.msk.bf16.mxu1 %vm600_vm0, %v6534_v54  ;;  %5661 = vmatpush3.bf16.msra.mxu0 %v6240_v18 }
  0xb8   : > { %5662 = vmatprep.subr.bf16.mxu0 %v6241_v19 }
  0xbb   : > { %5663 = vmatpush3.bf16.msra.mxu0 %v6241_v19 }
  0xbd   : > { %5469 = vmatmul.mubr.msk.bf16.gmra.mrb[16].mxu0 %vm600_vm0, %v6556_v1 }
  0xbe   : > { %5601 = vmatmul.mubr.msk.bf16.gmra.mrb[16].mxu1 %vm600_vm0, %v6554_v0  ;;  %5472 = vmatprep.mubr.msk.bf16.mxu0 %vm600_vm0, %v6560_v3 }
  0xbf   : > { %5604 = vmatprep.mubr.msk.bf16.mxu1 %vm600_vm0, %v6558_v2 }
  0xc5   : > { %5473 = vmatmul.mubr.msk.bf16.gmra.mrb[20].mxu0 %vm600_vm0, %v6580_v17 }
  0xc6   : > { %5605 = vmatmul.mubr.msk.bf16.gmra.mrb[20].mxu1 %vm600_vm0, %v6578_v16  ;;  %5476 = vmatprep.mubr.msk.bf16.mxu0 %vm600_vm0, %v6584_v21 }
  0xc7   : > { %5608 = vmatprep.mubr.msk.bf16.mxu1 %vm600_vm0, %v6582_v20 }
  0xcd   : > { %5477 = vmatmul.mubr.msk.bf16.gmra.mrb[24].mxu0 %vm600_vm0, %v6604_v35 }
  0xce   : > { %5609 = vmatmul.mubr.msk.bf16.gmra.mrb[24].mxu1 %vm600_vm0, %v6602_v34  ;;  %5480 = vmatprep.mubr.msk.bf16.mxu0 %vm600_vm0, %v6608_v37 }
  0xcf   : > { %5612 = vmatprep.mubr.msk.bf16.mxu1 %vm600_vm0, %v6606_v36 }
  0xd5   : > { %5481 = vmatmul.mubr.msk.bf16.gmra.mrb[28].mxu0 %vm600_vm0, %v6628_v51 }
  0xd6   : > { %5613 = vmatmul.mubr.msk.bf16.gmra.mrb[28].mxu1 %vm600_vm0, %v6626_v50  ;;  %5484 = vmatprep.mubr.msk.bf16.mxu0 %vm600_vm0, %v6632_v57 }
  0xd7   : > { %5616 = vmatprep.mubr.msk.bf16.mxu1 %vm600_vm0, %v6630_v56 }
  0xdd   : > { %5485 = vmatmul.mubr.msk.bf16.gmra.mrb[32].mxu0 %vm600_vm0, %v6652_v8 }
  0xde   : > { %5617 = vmatmul.mubr.msk.bf16.gmra.mrb[32].mxu1 %vm600_vm0, %v6650_v7  ;;  %5488 = vmatprep.mubr.msk.bf16.mxu0 %vm600_vm0, %v6656_v12 }
  0xdf   : > { %5620 = vmatprep.mubr.msk.bf16.mxu1 %vm600_vm0, %v6654_v11 }
  0xe5   : > { %5489 = vmatmul.mubr.msk.bf16.gmra.mrb[36].mxu0 %vm600_vm0, %v6676_v33 }
  0xe6   : > { %5621 = vmatmul.mubr.msk.bf16.gmra.mrb[36].mxu1 %vm600_vm0, %v6674_v32  ;;  %5492 = vmatprep.mubr.msk.bf16.mxu0 %vm600_vm0, %v6680_v39 }
  0xe7   : > { %5624 = vmatprep.mubr.msk.bf16.mxu1 %vm600_vm0, %v6678_v38 }
  0xed   : > { %5493 = vmatmul.mubr.msk.bf16.gmra.mrb[40].mxu0 %vm600_vm0, %v6700_v61 }
  0xee   : > { %5625 = vmatmul.mubr.msk.bf16.gmra.mrb[40].mxu1 %vm600_vm0, %v6698_v60  ;;  %5496 = vmatprep.mubr.msk.bf16.mxu0 %vm600_vm0, %v6704_v63 }
  0xef   : > { %5628 = vmatprep.mubr.msk.bf16.mxu1 %vm600_vm0, %v6702_v62 }
  0xf5   : > { %5497 = vmatmul.mubr.msk.bf16.gmra.mrb[44].mxu0 %vm600_vm0, %v6724_v27 }
  0xf6   : > { %5629 = vmatmul.mubr.msk.bf16.gmra.mrb[44].mxu1 %vm600_vm0, %v6722_v26  ;;  %5500 = vmatprep.mubr.msk.bf16.mxu0 %vm600_vm0, %v6728_v45 }
  0xf7   : > { %5632 = vmatprep.mubr.msk.bf16.mxu1 %vm600_vm0, %v7943_v28 }
  0xfd   : > { %5501 = vmatmul.mubr.msk.bf16.gmra.mrb[48].mxu0 %vm600_vm0, %v7944_v29 }
  0xfe   : > { %5633 = vmatmul.mubr.msk.bf16.gmra.mrb[48].mxu1 %vm600_vm0, %v7945_v30  ;;  %5504 = vmatprep.mubr.msk.bf16.mxu0 %vm600_vm0, %v7946_v31 }
  0xff   : > { %5636 = vmatprep.mubr.msk.bf16.mxu1 %vm600_vm0, %v7947_v40 }
 0x105   : > { %5505 = vmatmul.mubr.msk.bf16.gmra.mrb[52].mxu0 %vm600_vm0, %v7948_v41 }
 0x106   : > { %5637 = vmatmul.mubr.msk.bf16.gmra.mrb[52].mxu1 %vm600_vm0, %v7949_v42  ;;  %5508 = vmatprep.mubr.msk.bf16.mxu0 %vm600_vm0, %v7950_v43 }
 0x107   : > { %5640 = vmatprep.mubr.msk.bf16.mxu1 %vm600_vm0, %v7951_v52 }
 0x10d   : > { %5509 = vmatmul.mubr.msk.bf16.gmra.mrb[56].mxu0 %vm600_vm0, %v6802_v4 }
 0x10e   : > { %5641 = vmatmul.mubr.msk.bf16.gmra.mrb[56].mxu1 %vm600_vm0, %v6800_v59  ;;  %5512 = vmatprep.mubr.msk.bf16.mxu0 %vm600_vm0, %v6806_v6 }
 0x10f   : > { %5644 = vmatprep.mubr.msk.bf16.mxu1 %vm600_vm0, %v6804_v23 }
 0x115   : > { %5513 = vmatmul.mubr.msk.bf16.gmra.mrb[60].mxu0 %vm600_vm0, %v6822_v25 }
 0x116   : > { %5645 = vmatmul.mubr.msk.bf16.gmra.mrb[60].mxu1 %vm600_vm0, %v6820_v44 }
 0x170   : > { %v5454_v54 = vpop.f32.mrb[0].mxu0 }
 0x171   : > { %v1963_v55 = vadd.f32 %v5454_v54, %v6981_v53  ;;  %v5586_v0 = vpop.f32.mrb[0].mxu1  ;;  %v1122_v1 = vpop.f32.mrb[1].mxu0 }
 0x172   : > { %v2091_v2 = vadd.f32 %v5586_v0, %v6981_v53  ;;  %v1961_v3 = vadd.f32 %v6981_v53, %v1122_v1  ;;  %v1700_v16 = vpop.f32.mrb[1].mxu1  ;;  %v5455_v17 = vpop.f32.mrb[2].mxu0 }
 0x173   : > { %v2089_v20 = vadd.f32 %v6981_v53, %v1700_v16  ;;  %v1964_v21 = vadd.f32 %v5455_v17, %v6981_v53  ;;  %v5587_v34 = vpop.f32.mrb[2].mxu1  ;;  %v1125_v35 = vpop.f32.mrb[3].mxu0  ;;  %v2364_v51 = vmax.f32 %v1963_v55, 0.0 }
 0x174   : > { %v2092_v36 = vadd.f32 %v5587_v34, %v6981_v53  ;;  %v1962_v37 = vadd.f32 %v6981_v53, %v1125_v35  ;;  %v1703_v50 = vpop.f32.mrb[3].mxu1  ;;  %v2428_v7 = vmax.f32 %v2091_v2, 0.0  ;;  %v2362_v8 = vmax.f32 %v1961_v3, 0.0 }
 0x175   : > { %v2365_v56 = vmax.f32 %v1964_v21, 0.0  ;;  %v2090_v57 = vadd.f32 %v6981_v53, %v1703_v50  ;;  %v2426_v32 = vmax.f32 %v2089_v20, 0.0 }
 0x176   : > { %v2429_v11 = vmax.f32 %v2092_v36, 0.0  ;;  %v2363_v12 = vmax.f32 %v1962_v37, 0.0 }
 0x177   : > { %v2491_v33 = vpack.c.bf16 %v2365_v56, %v2364_v51  ;;  %v2427_v38 = vmax.f32 %v2090_v57, 0.0 }
 0x178   : > { %v6991_v39 = vpack.c.bf16 %v2429_v11, %v2428_v7  ;;  %v2490_v60 = vpack.c.bf16 %v2363_v12, %v2362_v8  ;;  %v5458_v61 = vpop.f32.mrb[4].mxu0 }
 0x179   : > { %v6993_v62 = vpack.c.bf16 %v2427_v38, %v2426_v32  ;;  %v1967_v63 = vadd.f32 %v5458_v61, %v6981_v53  ;;  %v5590_v26 = vpop.f32.mrb[4].mxu1  ;;  %v1138_v27 = vpop.f32.mrb[5].mxu0 }
 0x17a   : > { %v2095_v45 = vadd.f32 %v5590_v26, %v6981_v53  ;;  %v1965_v49 = vadd.f32 %v6981_v53, %v1138_v27  ;;  %v1716_v15 = vpop.f32.mrb[5].mxu1  ;;  %v5459_v23 = vpop.f32.mrb[6].mxu0  ;;  %5664 = vmatprep.mubr.bf16.mxu0 %v2490_v60 }
 0x17b   : > { %v2093_v6 = vadd.f32 %v6981_v53, %v1716_v15  ;;  %v1968_v13 = vadd.f32 %v5459_v23, %v6981_v53  ;;  %v5591_v47 = vpop.f32.mrb[6].mxu1  ;;  %v1141_v48 = vpop.f32.mrb[7].mxu0  ;;  %5665 = vmatmul.mubr.bf16.vlgmr.msra.gmra.mrb[64].mxu0 %v2491_v33  ;;  %v2368_v22 = vmax.f32 %v1967_v63, 0.0 }
 0x17c   : > { %v2096_v58 = vadd.f32 %v5591_v47, %v6981_v53  ;;  %v1966_v59 = vadd.f32 %v6981_v53, %v1141_v48  ;;  %v1719_v4 = vpop.f32.mrb[7].mxu1  ;;  %v2432_v25 = vmax.f32 %v2095_v45, 0.0  ;;  %v2366_v46 = vmax.f32 %v1965_v49, 0.0 }
 0x17d   : > { %v2369_v24 = vmax.f32 %v1968_v13, 0.0  ;;  %v2094_v44 = vadd.f32 %v6981_v53, %v1719_v4  ;;  %v2430_v10 = vmax.f32 %v2093_v6, 0.0 }
 0x17e   : > { %v2433_v5 = vmax.f32 %v2096_v58, 0.0  ;;  %v2367_v9 = vmax.f32 %v1966_v59, 0.0 }
 0x17f   : > { %v2493_v14 = vpack.c.bf16 %v2369_v24, %v2368_v22  ;;  %v2431_v18 = vmax.f32 %v2094_v44, 0.0 }
 0x180   : > { %v7003_v19 = vpack.c.bf16 %v2433_v5, %v2432_v25  ;;  %v2492_v28 = vpack.c.bf16 %v2367_v9, %v2366_v46  ;;  %v5462_v29 = vpop.f32.mrb[8].mxu0 }
 0x181   : > { %v7005_v30 = vpack.c.bf16 %v2431_v18, %v2430_v10  ;;  %v1971_v31 = vadd.f32 %v5462_v29, %v6981_v53  ;;  %v5594_v40 = vpop.f32.mrb[8].mxu1  ;;  %v1154_v41 = vpop.f32.mrb[9].mxu0 }
 0x182   : > { %v2099_v42 = vadd.f32 %v5594_v40, %v6981_v53  ;;  %v1969_v43 = vadd.f32 %v6981_v53, %v1154_v41  ;;  %v1732_v52 = vpop.f32.mrb[9].mxu1  ;;  %v5463_v54 = vpop.f32.mrb[10].mxu0  ;;  %5668 = vmatprep.mubr.bf16.mxu0 %v2492_v28 }
 0x183   : > { %v2097_v55 = vadd.f32 %v6981_v53, %v1732_v52  ;;  %v1972_v0 = vadd.f32 %v5463_v54, %v6981_v53  ;;  %v5595_v1 = vpop.f32.mrb[10].mxu1  ;;  %v1157_v2 = vpop.f32.mrb[11].mxu0  ;;  %5669 = vmatmul.mubr.bf16.gmra.mrb[68].mxu0 %v2493_v14  ;;  %v2372_v20 = vmax.f32 %v1971_v31, 0.0 }
 0x184   : > { %v2100_v3 = vadd.f32 %v5595_v1, %v6981_v53  ;;  %v1970_v16 = vadd.f32 %v6981_v53, %v1157_v2  ;;  %v1735_v17 = vpop.f32.mrb[11].mxu1  ;;  %v2436_v35 = vmax.f32 %v2099_v42, 0.0  ;;  %v2370_v36 = vmax.f32 %v1969_v43, 0.0 }
 0x185   : > { %v2373_v21 = vmax.f32 %v1972_v0, 0.0  ;;  %v2098_v34 = vadd.f32 %v6981_v53, %v1735_v17  ;;  %v2434_v51 = vmax.f32 %v2097_v55, 0.0 }
 0x186   : > { %v2437_v37 = vmax.f32 %v2100_v3, 0.0  ;;  %v2371_v50 = vmax.f32 %v1970_v16, 0.0 }
 0x187   : > { %v2495_v56 = vpack.c.bf16 %v2373_v21, %v2372_v20  ;;  %v2435_v57 = vmax.f32 %v2098_v34, 0.0 }
 0x188   : > { %v7015_v7 = vpack.c.bf16 %v2437_v37, %v2436_v35  ;;  %v2494_v8 = vpack.c.bf16 %v2371_v50, %v2370_v36  ;;  %v5466_v11 = vpop.f32.mrb[12].mxu0 }
 0x189   : > { %v7017_v12 = vpack.c.bf16 %v2435_v57, %v2434_v51  ;;  %v1975_v32 = vadd.f32 %v5466_v11, %v6981_v53  ;;  %v5598_v33 = vpop.f32.mrb[12].mxu1  ;;  %v1170_v38 = vpop.f32.mrb[13].mxu0 }
 0x18a   : > { %v2103_v60 = vadd.f32 %v5598_v33, %v6981_v53  ;;  %v1973_v61 = vadd.f32 %v6981_v53, %v1170_v38  ;;  %v1748_v63 = vpop.f32.mrb[13].mxu1  ;;  %v5467_v26 = vpop.f32.mrb[14].mxu0  ;;  %5672 = vmatprep.mubr.bf16.mxu0 %v2494_v8 }
 0x18b   : > { %v2101_v27 = vadd.f32 %v6981_v53, %v1748_v63  ;;  %v1976_v45 = vadd.f32 %v5467_v26, %v6981_v53  ;;  %v5599_v49 = vpop.f32.mrb[14].mxu1  ;;  %v1173_v15 = vpop.f32.mrb[15].mxu0  ;;  %5673 = vmatmul.mubr.bf16.gmra.mrb[72].mxu0 %v2495_v56  ;;  %v2376_v47 = vmax.f32 %v1975_v32, 0.0 }
 0x18c   : > { %v2104_v23 = vadd.f32 %v5599_v49, %v6981_v53  ;;  %v1974_v6 = vadd.f32 %v6981_v53, %v1173_v15  ;;  %v1751_v13 = vpop.f32.mrb[15].mxu1  ;;  %v2440_v59 = vmax.f32 %v2103_v60, 0.0  ;;  %v2374_v4 = vmax.f32 %v1973_v61, 0.0 }
 0x18d   : > { %v2377_v48 = vmax.f32 %v1976_v45, 0.0  ;;  %v2102_v58 = vadd.f32 %v6981_v53, %v1751_v13  ;;  %v2438_v44 = vmax.f32 %v2101_v27, 0.0 }
 0x18e   : > { %v2441_v22 = vmax.f32 %v2104_v23, 0.0  ;;  %v2375_v24 = vmax.f32 %v1974_v6, 0.0 }
 0x18f   : > { %v2497_v25 = vpack.c.bf16 %v2377_v48, %v2376_v47  ;;  %v2439_v46 = vmax.f32 %v2102_v58, 0.0 }
 0x190   : > { %v7027_v5 = vpack.c.bf16 %v2441_v22, %v2440_v59  ;;  %v2496_v9 = vpack.c.bf16 %v2375_v24, %v2374_v4  ;;  %v5470_v10 = vpop.f32.mrb[16].mxu0 }
 0x191   : > { %v7029_v14 = vpack.c.bf16 %v2439_v46, %v2438_v44  ;;  %v1979_v18 = vadd.f32 %v5470_v10, %v6981_v53  ;;  %v5602_v28 = vpop.f32.mrb[16].mxu1  ;;  %v1186_v29 = vpop.f32.mrb[17].mxu0 }
 0x192   : > { %v2107_v31 = vadd.f32 %v5602_v28, %v6981_v53  ;;  %v1977_v40 = vadd.f32 %v6981_v53, %v1186_v29  ;;  %v1764_v41 = vpop.f32.mrb[17].mxu1  ;;  %v5471_v42 = vpop.f32.mrb[18].mxu0  ;;  %5676 = vmatprep.mubr.bf16.mxu0 %v2496_v9 }
 0x193   : > { %v2105_v43 = vadd.f32 %v6981_v53, %v1764_v41  ;;  %v1980_v52 = vadd.f32 %v5471_v42, %v6981_v53  ;;  %v5603_v54 = vpop.f32.mrb[18].mxu1  ;;  %v1189_v55 = vpop.f32.mrb[19].mxu0  ;;  %5677 = vmatmul.mubr.bf16.gmra.mrb[76].mxu0 %v2497_v25  ;;  %v2380_v3 = vmax.f32 %v1979_v18, 0.0 }
 0x194   : > { %v2108_v0 = vadd.f32 %v5603_v54, %v6981_v53  ;;  %v1978_v1 = vadd.f32 %v6981_v53, %v1189_v55  ;;  %v1767_v2 = vpop.f32.mrb[19].mxu1  ;;  %v2444_v20 = vmax.f32 %v2107_v31, 0.0  ;;  %v2378_v21 = vmax.f32 %v1977_v40, 0.0 }
 0x195   : > { %v2381_v16 = vmax.f32 %v1980_v52, 0.0  ;;  %v2106_v17 = vadd.f32 %v6981_v53, %v1767_v2  ;;  %v2442_v36 = vmax.f32 %v2105_v43, 0.0 }
 0x196   : > { %v2445_v34 = vmax.f32 %v2108_v0, 0.0  ;;  %v2379_v35 = vmax.f32 %v1978_v1, 0.0 }
 0x197   : > { %v2499_v37 = vpack.c.bf16 %v2381_v16, %v2380_v3  ;;  %v2443_v50 = vmax.f32 %v2106_v17, 0.0 }
 0x198   : > { %v7039_v51 = vpack.c.bf16 %v2445_v34, %v2444_v20  ;;  %v2498_v56 = vpack.c.bf16 %v2379_v35, %v2378_v21  ;;  %v5474_v57 = vpop.f32.mrb[20].mxu0 }
 0x199   : > { %v7041_v8 = vpack.c.bf16 %v2443_v50, %v2442_v36  ;;  %v1983_v11 = vadd.f32 %v5474_v57, %v6981_v53  ;;  %v5606_v32 = vpop.f32.mrb[20].mxu1  ;;  %v1202_v33 = vpop.f32.mrb[21].mxu0 }
 0x19a   : > { %v2111_v38 = vadd.f32 %v5606_v32, %v6981_v53  ;;  %v1981_v60 = vadd.f32 %v6981_v53, %v1202_v33  ;;  %v1780_v61 = vpop.f32.mrb[21].mxu1  ;;  %v5475_v63 = vpop.f32.mrb[22].mxu0  ;;  %5680 = vmatprep.mubr.bf16.mxu0 %v2498_v56 }
 0x19b   : > { %v2109_v26 = vadd.f32 %v6981_v53, %v1780_v61  ;;  %v1984_v27 = vadd.f32 %v5475_v63, %v6981_v53  ;;  %v5607_v45 = vpop.f32.mrb[22].mxu1  ;;  %v1205_v49 = vpop.f32.mrb[23].mxu0  ;;  %5681 = vmatmul.mubr.bf16.gmra.mrb[80].mxu0 %v2499_v37  ;;  %v2384_v13 = vmax.f32 %v1983_v11, 0.0 }
 0x19c   : > { %v2112_v15 = vadd.f32 %v5607_v45, %v6981_v53  ;;  %v1982_v23 = vadd.f32 %v6981_v53, %v1205_v49  ;;  %v1783_v6 = vpop.f32.mrb[23].mxu1  ;;  %v2448_v58 = vmax.f32 %v2111_v38, 0.0  ;;  %v2382_v59 = vmax.f32 %v1981_v60, 0.0 }
 0x19d   : > { %v2385_v47 = vmax.f32 %v1984_v27, 0.0  ;;  %v2110_v48 = vadd.f32 %v6981_v53, %v1783_v6  ;;  %v2446_v24 = vmax.f32 %v2109_v26, 0.0 }
 0x19e   : > { %v2449_v4 = vmax.f32 %v2112_v15, 0.0  ;;  %v2383_v22 = vmax.f32 %v1982_v23, 0.0 }
 0x19f   : > { %v2501_v44 = vpack.c.bf16 %v2385_v47, %v2384_v13  ;;  %v2447_v25 = vmax.f32 %v2110_v48, 0.0 }
 0x1a0   : > { %v7051_v46 = vpack.c.bf16 %v2449_v4, %v2448_v58  ;;  %v2500_v9 = vpack.c.bf16 %v2383_v22, %v2382_v59  ;;  %v5478_v10 = vpop.f32.mrb[24].mxu0 }
 0x1a1   : > { %v7053_v18 = vpack.c.bf16 %v2447_v25, %v2446_v24  ;;  %v1987_v28 = vadd.f32 %v5478_v10, %v6981_v53  ;;  %v5610_v29 = vpop.f32.mrb[24].mxu1  ;;  %v1218_v31 = vpop.f32.mrb[25].mxu0 }
 0x1a2   : > { %v2115_v40 = vadd.f32 %v5610_v29, %v6981_v53  ;;  %v1985_v41 = vadd.f32 %v6981_v53, %v1218_v31  ;;  %v1796_v42 = vpop.f32.mrb[25].mxu1  ;;  %v5479_v43 = vpop.f32.mrb[26].mxu0  ;;  %5684 = vmatprep.mubr.bf16.mxu0 %v2500_v9 }
 0x1a3   : > { %v2113_v52 = vadd.f32 %v6981_v53, %v1796_v42  ;;  %v1988_v54 = vadd.f32 %v5479_v43, %v6981_v53  ;;  %v5611_v55 = vpop.f32.mrb[26].mxu1  ;;  %v1221_v0 = vpop.f32.mrb[27].mxu0  ;;  %5685 = vmatmul.mubr.bf16.gmra.mrb[84].mxu0 %v2501_v44  ;;  %v2388_v16 = vmax.f32 %v1987_v28, 0.0 }
 0x1a4   : > { %v2116_v1 = vadd.f32 %v5611_v55, %v6981_v53  ;;  %v1986_v2 = vadd.f32 %v6981_v53, %v1221_v0  ;;  %v1799_v3 = vpop.f32.mrb[27].mxu1  ;;  %v2452_v21 = vmax.f32 %v2115_v40, 0.0  ;;  %v2386_v34 = vmax.f32 %v1985_v41, 0.0 }
 0x1a5   : > { %v2389_v17 = vmax.f32 %v1988_v54, 0.0  ;;  %v2114_v20 = vadd.f32 %v6981_v53, %v1799_v3  ;;  %v2450_v37 = vmax.f32 %v2113_v52, 0.0 }
 0x1a6   : > { %v2453_v35 = vmax.f32 %v2116_v1, 0.0  ;;  %v2387_v36 = vmax.f32 %v1986_v2, 0.0 }
 0x1a7   : > { %v2503_v50 = vpack.c.bf16 %v2389_v17, %v2388_v16  ;;  %v2451_v56 = vmax.f32 %v2114_v20, 0.0 }
 0x1a8   : > { %v7063_v57 = vpack.c.bf16 %v2453_v35, %v2452_v21  ;;  %v2502_v11 = vpack.c.bf16 %v2387_v36, %v2386_v34  ;;  %v5482_v32 = vpop.f32.mrb[28].mxu0 }
 0x1a9   : > { %v7065_v33 = vpack.c.bf16 %v2451_v56, %v2450_v37  ;;  %v1991_v38 = vadd.f32 %v5482_v32, %v6981_v53  ;;  %v5614_v60 = vpop.f32.mrb[28].mxu1  ;;  %v1234_v61 = vpop.f32.mrb[29].mxu0 }
 0x1aa   : > { %v2119_v63 = vadd.f32 %v5614_v60, %v6981_v53  ;;  %v1989_v26 = vadd.f32 %v6981_v53, %v1234_v61  ;;  %v1812_v27 = vpop.f32.mrb[29].mxu1  ;;  %v5483_v45 = vpop.f32.mrb[30].mxu0  ;;  %5688 = vmatprep.mubr.bf16.mxu0 %v2502_v11 }
 0x1ab   : > { %v2117_v49 = vadd.f32 %v6981_v53, %v1812_v27  ;;  %v1992_v15 = vadd.f32 %v5483_v45, %v6981_v53  ;;  %v5615_v23 = vpop.f32.mrb[30].mxu1  ;;  %v1237_v6 = vpop.f32.mrb[31].mxu0  ;;  %5689 = vmatmul.mubr.bf16.gmra.mrb[88].mxu0 %v2503_v50  ;;  %v2392_v58 = vmax.f32 %v1991_v38, 0.0 }
 0x1ac   : > { %v2120_v13 = vadd.f32 %v5615_v23, %v6981_v53  ;;  %v1990_v47 = vadd.f32 %v6981_v53, %v1237_v6  ;;  %v1815_v48 = vpop.f32.mrb[31].mxu1  ;;  %v2456_v22 = vmax.f32 %v2119_v63, 0.0  ;;  %v2390_v24 = vmax.f32 %v1989_v26, 0.0 }
 0x1ad   : > { %v2393_v59 = vmax.f32 %v1992_v15, 0.0  ;;  %v2118_v4 = vadd.f32 %v6981_v53, %v1815_v48  ;;  %v2454_v9 = vmax.f32 %v2117_v49, 0.0 }
 0x1ae   : > { %v2457_v44 = vmax.f32 %v2120_v13, 0.0  ;;  %v2391_v25 = vmax.f32 %v1990_v47, 0.0 }
 0x1af   : > { %v2505_v10 = vpack.c.bf16 %v2393_v59, %v2392_v58  ;;  %v2455_v28 = vmax.f32 %v2118_v4, 0.0 }
 0x1b0   : > { %v7075_v29 = vpack.c.bf16 %v2457_v44, %v2456_v22  ;;  %v2504_v31 = vpack.c.bf16 %v2391_v25, %v2390_v24  ;;  %v5486_v40 = vpop.f32.mrb[32].mxu0 }
 0x1b1   : > { %v7077_v41 = vpack.c.bf16 %v2455_v28, %v2454_v9  ;;  %v1995_v42 = vadd.f32 %v5486_v40, %v6981_v53  ;;  %v5618_v43 = vpop.f32.mrb[32].mxu1  ;;  %v1250_v52 = vpop.f32.mrb[33].mxu0 }
 0x1b2   : > { %v2123_v54 = vadd.f32 %v5618_v43, %v6981_v53  ;;  %v1993_v55 = vadd.f32 %v6981_v53, %v1250_v52  ;;  %v1828_v0 = vpop.f32.mrb[33].mxu1  ;;  %v5487_v1 = vpop.f32.mrb[34].mxu0  ;;  %5692 = vmatprep.mubr.bf16.mxu0 %v2504_v31 }
 0x1b3   : > { %v2121_v2 = vadd.f32 %v6981_v53, %v1828_v0  ;;  %v1996_v3 = vadd.f32 %v5487_v1, %v6981_v53  ;;  %v5619_v16 = vpop.f32.mrb[34].mxu1  ;;  %v1253_v17 = vpop.f32.mrb[35].mxu0  ;;  %5693 = vmatmul.mubr.bf16.gmra.mrb[92].mxu0 %v2505_v10  ;;  %v2396_v35 = vmax.f32 %v1995_v42, 0.0 }
 0x1b4   : > { %v2124_v20 = vadd.f32 %v5619_v16, %v6981_v53  ;;  %v1994_v21 = vadd.f32 %v6981_v53, %v1253_v17  ;;  %v1831_v34 = vpop.f32.mrb[35].mxu1  ;;  %v2460_v50 = vmax.f32 %v2123_v54, 0.0  ;;  %v2394_v56 = vmax.f32 %v1993_v55, 0.0 }
 0x1b5   : > { %v2397_v36 = vmax.f32 %v1996_v3, 0.0  ;;  %v2122_v37 = vadd.f32 %v6981_v53, %v1831_v34  ;;  %v2458_v38 = vmax.f32 %v2121_v2, 0.0 }
 0x1b6   : > { %v2461_v11 = vmax.f32 %v2124_v20, 0.0  ;;  %v2395_v32 = vmax.f32 %v1994_v21, 0.0 }
 0x1b7   : > { %v2507_v60 = vpack.c.bf16 %v2397_v36, %v2396_v35  ;;  %v2459_v61 = vmax.f32 %v2122_v37, 0.0 }
 0x1b8   : > { %v7087_v63 = vpack.c.bf16 %v2461_v11, %v2460_v50  ;;  %v2506_v26 = vpack.c.bf16 %v2395_v32, %v2394_v56  ;;  %v5490_v27 = vpop.f32.mrb[36].mxu0 }
 0x1b9   : > { %v7089_v45 = vpack.c.bf16 %v2459_v61, %v2458_v38  ;;  %v1999_v49 = vadd.f32 %v5490_v27, %v6981_v53  ;;  %v5622_v15 = vpop.f32.mrb[36].mxu1  ;;  %v1266_v23 = vpop.f32.mrb[37].mxu0 }
 0x1ba   : > { %v2127_v6 = vadd.f32 %v5622_v15, %v6981_v53  ;;  %v1997_v13 = vadd.f32 %v6981_v53, %v1266_v23  ;;  %v1844_v47 = vpop.f32.mrb[37].mxu1  ;;  %v5491_v48 = vpop.f32.mrb[38].mxu0  ;;  %5696 = vmatprep.mubr.bf16.mxu0 %v2506_v26 }
 0x1bb   : > { %v2125_v58 = vadd.f32 %v6981_v53, %v1844_v47  ;;  %v2000_v59 = vadd.f32 %v5491_v48, %v6981_v53  ;;  %v5623_v4 = vpop.f32.mrb[38].mxu1  ;;  %v1269_v22 = vpop.f32.mrb[39].mxu0  ;;  %5697 = vmatmul.mubr.bf16.gmra.mrb[96].mxu0 %v2507_v60  ;;  %v2400_v9 = vmax.f32 %v1999_v49, 0.0 }
 0x1bc   : > { %v2128_v24 = vadd.f32 %v5623_v4, %v6981_v53  ;;  %v1998_v44 = vadd.f32 %v6981_v53, %v1269_v22  ;;  %v1847_v25 = vpop.f32.mrb[39].mxu1  ;;  %v2464_v31 = vmax.f32 %v2127_v6, 0.0  ;;  %v2398_v40 = vmax.f32 %v1997_v13, 0.0 }
 0x1bd   : > { %v2401_v10 = vmax.f32 %v2000_v59, 0.0  ;;  %v2126_v28 = vadd.f32 %v6981_v53, %v1847_v25  ;;  %v2462_v52 = vmax.f32 %v2125_v58, 0.0 }
 0x1be   : > { %v2465_v42 = vmax.f32 %v2128_v24, 0.0  ;;  %v2399_v43 = vmax.f32 %v1998_v44, 0.0 }
 0x1bf   : > { %v2509_v54 = vpack.c.bf16 %v2401_v10, %v2400_v9  ;;  %v2463_v55 = vmax.f32 %v2126_v28, 0.0 }
 0x1c0   : > { %v7099_v0 = vpack.c.bf16 %v2465_v42, %v2464_v31  ;;  %v2508_v1 = vpack.c.bf16 %v2399_v43, %v2398_v40  ;;  %v5494_v2 = vpop.f32.mrb[40].mxu0 }
 0x1c1   : > { %v7101_v3 = vpack.c.bf16 %v2463_v55, %v2462_v52  ;;  %v2003_v16 = vadd.f32 %v5494_v2, %v6981_v53  ;;  %v5626_v17 = vpop.f32.mrb[40].mxu1  ;;  %v1282_v20 = vpop.f32.mrb[41].mxu0 }
 0x1c2   : > { %v2131_v21 = vadd.f32 %v5626_v17, %v6981_v53  ;;  %v2001_v34 = vadd.f32 %v6981_v53, %v1282_v20  ;;  %v1860_v35 = vpop.f32.mrb[41].mxu1  ;;  %v5495_v36 = vpop.f32.mrb[42].mxu0  ;;  %5700 = vmatprep.mubr.bf16.mxu0 %v2508_v1 }
 0x1c3   : > { %v2129_v37 = vadd.f32 %v6981_v53, %v1860_v35  ;;  %v2004_v50 = vadd.f32 %v5495_v36, %v6981_v53  ;;  %v5627_v56 = vpop.f32.mrb[42].mxu1  ;;  %v1285_v11 = vpop.f32.mrb[43].mxu0  ;;  %5701 = vmatmul.mubr.bf16.gmra.mrb[100].mxu0 %v2509_v54  ;;  %v2404_v61 = vmax.f32 %v2003_v16, 0.0 }
 0x1c4   : > { %v2132_v32 = vadd.f32 %v5627_v56, %v6981_v53  ;;  %v2002_v38 = vadd.f32 %v6981_v53, %v1285_v11  ;;  %v1863_v60 = vpop.f32.mrb[43].mxu1  ;;  %v2468_v49 = vmax.f32 %v2131_v21, 0.0  ;;  %v2402_v15 = vmax.f32 %v2001_v34, 0.0 }
 0x1c5   : > { %v2405_v26 = vmax.f32 %v2004_v50, 0.0  ;;  %v2130_v27 = vadd.f32 %v6981_v53, %v1863_v60  ;;  %v2466_v13 = vmax.f32 %v2129_v37, 0.0 }
 0x1c6   : > { %v2469_v23 = vmax.f32 %v2132_v32, 0.0  ;;  %v2403_v6 = vmax.f32 %v2002_v38, 0.0 }
 0x1c7   : > { %v2511_v47 = vpack.c.bf16 %v2405_v26, %v2404_v61  ;;  %v2467_v48 = vmax.f32 %v2130_v27, 0.0 }
 0x1c8   : > { %v7111_v58 = vpack.c.bf16 %v2469_v23, %v2468_v49  ;;  %v2510_v59 = vpack.c.bf16 %v2403_v6, %v2402_v15  ;;  %v5498_v4 = vpop.f32.mrb[44].mxu0 }
 0x1c9   : > { %v7113_v22 = vpack.c.bf16 %v2467_v48, %v2466_v13  ;;  %v2007_v24 = vadd.f32 %v5498_v4, %v6981_v53  ;;  %v5630_v44 = vpop.f32.mrb[44].mxu1  ;;  %v1298_v25 = vpop.f32.mrb[45].mxu0 }
 0x1ca   : > { %v2135_v9 = vadd.f32 %v5630_v44, %v6981_v53  ;;  %v2005_v10 = vadd.f32 %v6981_v53, %v1298_v25  ;;  %v1876_v28 = vpop.f32.mrb[45].mxu1  ;;  %v5499_v31 = vpop.f32.mrb[46].mxu0  ;;  %5704 = vmatprep.mubr.bf16.mxu0 %v2510_v59 }
 0x1cb   : > { %v2133_v40 = vadd.f32 %v6981_v53, %v1876_v28  ;;  %v2008_v42 = vadd.f32 %v5499_v31, %v6981_v53  ;;  %v5631_v43 = vpop.f32.mrb[46].mxu1  ;;  %v1301_v52 = vpop.f32.mrb[47].mxu0  ;;  %5705 = vmatmul.mubr.bf16.gmra.mrb[104].mxu0 %v2511_v47  ;;  %v2408_v2 = vmax.f32 %v2007_v24, 0.0 }
 0x1cc   : > { %v2136_v54 = vadd.f32 %v5631_v43, %v6981_v53  ;;  %v2006_v55 = vadd.f32 %v6981_v53, %v1301_v52  ;;  %v1879_v1 = vpop.f32.mrb[47].mxu1  ;;  %v2472_v20 = vmax.f32 %v2135_v9, 0.0  ;;  %v2406_v21 = vmax.f32 %v2005_v10, 0.0 }
 0x1cd   : > { %v2409_v16 = vmax.f32 %v2008_v42, 0.0  ;;  %v2134_v17 = vadd.f32 %v6981_v53, %v1879_v1  ;;  %v2470_v36 = vmax.f32 %v2133_v40, 0.0 }
 0x1ce   : > { %v2473_v34 = vmax.f32 %v2136_v54, 0.0  ;;  %v2407_v35 = vmax.f32 %v2006_v55, 0.0 }
 0x1cf   : > { %v2513_v37 = vpack.c.bf16 %v2409_v16, %v2408_v2  ;;  %v2471_v50 = vmax.f32 %v2134_v17, 0.0 }
 0x1d0   : > { %v7123_v56 = vpack.c.bf16 %v2473_v34, %v2472_v20  ;;  %v2512_v11 = vpack.c.bf16 %v2407_v35, %v2406_v21  ;;  %v5502_v32 = vpop.f32.mrb[48].mxu0 }
 0x1d1   : > { %v7125_v38 = vpack.c.bf16 %v2471_v50, %v2470_v36  ;;  %v2011_v60 = vadd.f32 %v5502_v32, %v6981_v53  ;;  %v5634_v61 = vpop.f32.mrb[48].mxu1  ;;  %v1314_v26 = vpop.f32.mrb[49].mxu0 }
 0x1d2   : > { %v2139_v27 = vadd.f32 %v5634_v61, %v6981_v53  ;;  %v2009_v49 = vadd.f32 %v6981_v53, %v1314_v26  ;;  %v1892_v15 = vpop.f32.mrb[49].mxu1  ;;  %v5503_v23 = vpop.f32.mrb[50].mxu0  ;;  %5708 = vmatprep.mubr.bf16.mxu0 %v2512_v11 }
 0x1d3   : > { %v2137_v6 = vadd.f32 %v6981_v53, %v1892_v15  ;;  %v2012_v13 = vadd.f32 %v5503_v23, %v6981_v53  ;;  %v5635_v47 = vpop.f32.mrb[50].mxu1  ;;  %v1317_v48 = vpop.f32.mrb[51].mxu0  ;;  %5709 = vmatmul.mubr.bf16.gmra.mrb[108].mxu0 %v2513_v37  ;;  %v2412_v44 = vmax.f32 %v2011_v60, 0.0  ;;  %v7150_v23 = vld [vmem:[%s7921_s7] sm:$0xff]  }
 0x1d4   : > { %v2140_v59 = vadd.f32 %v5635_v47, %v6981_v53  ;;  %v2010_v4 = vadd.f32 %v6981_v53, %v1317_v48  ;;  %v1895_v24 = vpop.f32.mrb[51].mxu1  ;;  %v2476_v10 = vmax.f32 %v2139_v27, 0.0  ;;  %v2410_v28 = vmax.f32 %v2009_v49, 0.0  ;;  %5792 = vmatprep.subr.bf16.mxu1 %v7150_v23 }
 0x1d5   : > { %v2413_v25 = vmax.f32 %v2012_v13, 0.0  ;;  %v2138_v9 = vadd.f32 %v6981_v53, %v1895_v24  ;;  %v2474_v42 = vmax.f32 %v2137_v6, 0.0  ;;  %5793 = vmatpush3.bf16.msra.mxu1 %v7150_v23 }
 0x1d6   : > { %v2477_v31 = vmax.f32 %v2140_v59, 0.0  ;;  %v2411_v40 = vmax.f32 %v2010_v4, 0.0 }
 0x1d7   : > { %v2515_v43 = vpack.c.bf16 %v2413_v25, %v2412_v44  ;;  %v2475_v52 = vmax.f32 %v2138_v9, 0.0 }
 0x1d8   : > { %v7135_v54 = vpack.c.bf16 %v2477_v31, %v2476_v10  ;;  %v2514_v55 = vpack.c.bf16 %v2411_v40, %v2410_v28  ;;  %v5506_v1 = vpop.f32.mrb[52].mxu0 }
 0x1d9   : > { %v7137_v2 = vpack.c.bf16 %v2475_v52, %v2474_v42  ;;  %v2015_v16 = vadd.f32 %v5506_v1, %v6981_v53  ;;  %v5638_v17 = vpop.f32.mrb[52].mxu1  ;;  %v1330_v20 = vpop.f32.mrb[53].mxu0 }
 0x1da   : > { %v2143_v21 = vadd.f32 %v5638_v17, %v6981_v53  ;;  %v2013_v34 = vadd.f32 %v6981_v53, %v1330_v20  ;;  %v1908_v35 = vpop.f32.mrb[53].mxu1  ;;  %v5507_v36 = vpop.f32.mrb[54].mxu0  ;;  %5712 = vmatprep.mubr.bf16.mxu0 %v2514_v55 }
 0x1db   : > { %v2141_v37 = vadd.f32 %v6981_v53, %v1908_v35  ;;  %v2016_v50 = vadd.f32 %v5507_v36, %v6981_v53  ;;  %v5639_v11 = vpop.f32.mrb[54].mxu1  ;;  %v1333_v32 = vpop.f32.mrb[55].mxu0  ;;  %5713 = vmatmul.mubr.bf16.gmra.mrb[112].mxu0 %v2515_v43  ;;  %v2416_v27 = vmax.f32 %v2015_v16, 0.0 }
 0x1dc   : > { %v2144_v60 = vadd.f32 %v5639_v11, %v6981_v53  ;;  %v2014_v61 = vadd.f32 %v6981_v53, %v1333_v32  ;;  %v1911_v26 = vpop.f32.mrb[55].mxu1  ;;  %v2480_v6 = vmax.f32 %v2143_v21, 0.0  ;;  %v2414_v13 = vmax.f32 %v2013_v34, 0.0 }
 0x1dd   : > { %v2417_v49 = vmax.f32 %v2016_v50, 0.0  ;;  %v2142_v15 = vadd.f32 %v6981_v53, %v1911_v26  ;;  %v2478_v59 = vmax.f32 %v2141_v37, 0.0 }
 0x1de   : > { %v2481_v47 = vmax.f32 %v2144_v60, 0.0  ;;  %v2415_v48 = vmax.f32 %v2014_v61, 0.0 }
 0x1df   : > { %v2517_v4 = vpack.c.bf16 %v2417_v49, %v2416_v27  ;;  %v2479_v24 = vmax.f32 %v2142_v15, 0.0 }
 0x1e0   : > { %v7153_v44 = vpack.c.bf16 %v2481_v47, %v2480_v6  ;;  %v2516_v25 = vpack.c.bf16 %v2415_v48, %v2414_v13  ;;  %v5510_v9 = vpop.f32.mrb[56].mxu0 }
 0x1e1   : > { %v7156_v10 = vpack.c.bf16 %v2479_v24, %v2478_v59  ;;  %v2019_v28 = vadd.f32 %v5510_v9, %v6981_v53  ;;  %v5642_v31 = vpop.f32.mrb[56].mxu1  ;;  %v1346_v40 = vpop.f32.mrb[57].mxu0 }
 0x1e2   : > { %v2147_v42 = vadd.f32 %v5642_v31, %v6981_v53  ;;  %v2017_v43 = vadd.f32 %v6981_v53, %v1346_v40  ;;  %v1924_v52 = vpop.f32.mrb[57].mxu1  ;;  %v5511_v55 = vpop.f32.mrb[58].mxu0  ;;  %5716 = vmatprep.mubr.bf16.mxu0 %v2516_v25 }
 0x1e3   : > { %v2145_v1 = vadd.f32 %v6981_v53, %v1924_v52  ;;  %v2020_v16 = vadd.f32 %v5511_v55, %v6981_v53  ;;  %v5643_v17 = vpop.f32.mrb[58].mxu1  ;;  %v1349_v20 = vpop.f32.mrb[59].mxu0  ;;  %5717 = vmatmul.mubr.bf16.gmra.mrb[116].mxu0 %v2517_v4  ;;  %v2420_v36 = vmax.f32 %v2019_v28, 0.0 }
 0x1e4   : > { %v2148_v21 = vadd.f32 %v5643_v17, %v6981_v53  ;;  %v2018_v34 = vadd.f32 %v6981_v53, %v1349_v20  ;;  %v1927_v35 = vpop.f32.mrb[59].mxu1  ;;  %v2484_v11 = vmax.f32 %v2147_v42, 0.0  ;;  %v2418_v32 = vmax.f32 %v2017_v43, 0.0 }
 0x1e5   : > { %v2421_v37 = vmax.f32 %v2020_v16, 0.0  ;;  %v2146_v50 = vadd.f32 %v6981_v53, %v1927_v35  ;;  %v2482_v26 = vmax.f32 %v2145_v1, 0.0 }
 0x1e6   : > { %v2485_v60 = vmax.f32 %v2148_v21, 0.0  ;;  %v2419_v61 = vmax.f32 %v2018_v34, 0.0  ;;  %v7181_v21 = vld [vmem:[%s7921_s7 + $0x8] sm:$0xff]  }
 0x1e7   : > { %v2519_v27 = vpack.c.bf16 %v2421_v37, %v2420_v36  ;;  %v2483_v49 = vmax.f32 %v2146_v50, 0.0  ;;  %5794 = vmatprep.subr.bf16.mxu1 %v7181_v21 }
 0x1e8   : > { %v7166_v15 = vpack.c.bf16 %v2485_v60, %v2484_v11  ;;  %v2518_v6 = vpack.c.bf16 %v2419_v61, %v2418_v32  ;;  %v5514_v13 = vpop.f32.mrb[60].mxu0  ;;  %5795 = vmatpush3.bf16.msra.mxu1 %v7181_v21 }
 0x1e9   : > { %v7168_v47 = vpack.c.bf16 %v2483_v49, %v2482_v26  ;;  %v2023_v48 = vadd.f32 %v5514_v13, %v6981_v53  ;;  %v5646_v59 = vpop.f32.mrb[60].mxu1  ;;  %v1362_v4 = vpop.f32.mrb[61].mxu0  ;;  %v7195_v26 = vld [vmem:[%s7921_s7 + $0x10] sm:$0xff]  }
 0x1ea   : > { %v2151_v24 = vadd.f32 %v5646_v59, %v6981_v53  ;;  %v2021_v25 = vadd.f32 %v6981_v53, %v1362_v4  ;;  %v1940_v9 = vpop.f32.mrb[61].mxu1  ;;  %v5515_v28 = vpop.f32.mrb[62].mxu0  ;;  %5720 = vmatprep.mubr.bf16.mxu0 %v2518_v6  ;;  %5796 = vmatprep.subr.bf16.mxu1 %v7195_v26 }
 0x1eb   : > { %v2149_v31 = vadd.f32 %v6981_v53, %v1940_v9  ;;  %v2024_v40 = vadd.f32 %v5515_v28, %v6981_v53  ;;  %v5647_v42 = vpop.f32.mrb[62].mxu1  ;;  %v1365_v43 = vpop.f32.mrb[63].mxu0  ;;  %5721 = vmatmul.mubr.bf16.gmra.mrb[120].mxu0 %v2519_v27  ;;  %v2424_v16 = vmax.f32 %v2023_v48, 0.0 }
 0x1ec   : > { %v2152_v52 = vadd.f32 %v5647_v42, %v6981_v53  ;;  %v2022_v55 = vadd.f32 %v6981_v53, %v1365_v43  ;;  %v1943_v1 = vpop.f32.mrb[63].mxu1  ;;  %v2488_v34 = vmax.f32 %v2151_v24, 0.0  ;;  %v2422_v35 = vmax.f32 %v2021_v25, 0.0  ;;  %5797 = vmatpush3.bf16.msra.mxu1 %v7195_v26 }
 0x1ed   : > { %v2425_v17 = vmax.f32 %v2024_v40, 0.0  ;;  %v2150_v20 = vadd.f32 %v6981_v53, %v1943_v1  ;;  %v2486_v50 = vmax.f32 %v2149_v31, 0.0 }
 0x1ee   : > { %v2489_v36 = vmax.f32 %v2152_v52, 0.0  ;;  %v2423_v37 = vmax.f32 %v2022_v55, 0.0 }
 0x1ef   : > { %v2521_v11 = vpack.c.bf16 %v2425_v17, %v2424_v16  ;;  %v2487_v32 = vmax.f32 %v2150_v20, 0.0 }
 0x1f0   : > { %v7184_v60 = vpack.c.bf16 %v2489_v36, %v2488_v34  ;;  %v2520_v61 = vpack.c.bf16 %v2423_v37, %v2422_v35 }
 0x1f1   : > { %v7187_v53 = vpack.c.bf16 %v2487_v32, %v2486_v50 }
 0x1f2   : > { %5724 = vmatprep.mubr.bf16.mxu0 %v2520_v61 }
 0x1f3   : > { %5725 = vmatmul.mubr.bf16.gmra.mrb[124].mxu0 %v2521_v11 }
 0x1f4   : > { %5728 = vmatprep.mubr.bf16.mxu0 %v6993_v62  ;;  %v7217_v62 = vld [vmem:[%s7921_s7 + $0x20] sm:$0xff]  }
 0x1fb   : > { %5729 = vmatmul.mubr.bf16.gmra.mrb[128].mxu0 %v6991_v39  ;;  %v7206_v39 = vld [vmem:[%s7921_s7 + $0x18] sm:$0xff]  }
 0x1fc   : > { %5732 = vmatprep.mubr.bf16.mxu0 %v7005_v30  ;;  %5798 = vmatprep.subr.bf16.mxu1 %v7206_v39  ;;  %v7239_v30 = vld [vmem:[%s7921_s7 + $0x30] sm:$0xff]  }
 0x1fd   : > { %5799 = vmatpush3.bf16.msra.mxu1 %v7206_v39 }
 0x1fe   : > { %5800 = vmatprep.subr.bf16.mxu1 %v7217_v62 }
 0x201   : > { %5801 = vmatpush3.bf16.msra.mxu1 %v7217_v62 }
 0x203   : > { %5733 = vmatmul.mubr.bf16.gmra.mrb[132].mxu0 %v7003_v19  ;;  %v7228_v19 = vld [vmem:[%s7921_s7 + $0x28] sm:$0xff]  }
 0x204   : > { %5736 = vmatprep.mubr.bf16.mxu0 %v7017_v12  ;;  %5802 = vmatprep.subr.bf16.mxu1 %v7228_v19  ;;  %v7255_v12 = vld [vmem:[%s7921_s7 + $0x38] sm:$0xff]  }
 0x205   : > { %5803 = vmatpush3.bf16.msra.mxu1 %v7228_v19 }
 0x206   : > { %5804 = vmatprep.subr.bf16.mxu1 %v7239_v30 }
 0x209   : > { %5805 = vmatpush3.bf16.msra.mxu1 %v7239_v30 }
 0x20a   : > { %5806 = vmatprep.subr.bf16.mxu1 %v7255_v12 }
 0x20b   : > { %5737 = vmatmul.mubr.bf16.gmra.mrb[136].mxu0 %v7015_v7  ;;  %v7250_v7 = vld [vmem:[%s7920_s6] ss:$0 sm:$0xff] }
 0x20c   : > { %5740 = vmatprep.mubr.bf16.mxu0 %v7029_v14 }
 0x20d   : > { %5807 = vmatpush3.bf16.msra.mxu1 %v7255_v12 }
 0x20e   : > { %5872 = vmatprep.subr.bf16.mxu1 %v7150_v23 }
 0x213   : > { %5741 = vmatmul.mubr.bf16.gmra.mrb[140].mxu0 %v7027_v5 }
 0x214   : > { %5744 = vmatprep.mubr.bf16.mxu0 %v7041_v8 }
 0x21b   : > { %5745 = vmatmul.mubr.bf16.gmra.mrb[144].mxu0 %v7039_v51 }
 0x21c   : > { %5748 = vmatprep.mubr.bf16.mxu0 %v7053_v18 }
 0x223   : > { %5749 = vmatmul.mubr.bf16.gmra.mrb[148].mxu0 %v7051_v46 }
 0x224   : > { %5752 = vmatprep.mubr.bf16.mxu0 %v7065_v33 }
 0x22b   : > { %5753 = vmatmul.mubr.bf16.gmra.mrb[152].mxu0 %v7063_v57 }
 0x22c   : > { %5756 = vmatprep.mubr.bf16.mxu0 %v7077_v41 }
 0x233   : > { %5757 = vmatmul.mubr.bf16.gmra.mrb[156].mxu0 %v7075_v29 }
 0x234   : > { %5760 = vmatprep.mubr.bf16.mxu0 %v7089_v45 }
 0x23b   : > { %5761 = vmatmul.mubr.bf16.gmra.mrb[160].mxu0 %v7087_v63 }
 0x23c   : > { %5764 = vmatprep.mubr.bf16.mxu0 %v7101_v3 }
 0x243   : > { %5765 = vmatmul.mubr.bf16.gmra.mrb[164].mxu0 %v7099_v0 }
 0x244   : > { %5768 = vmatprep.mubr.bf16.mxu0 %v7113_v22 }
 0x24b   : > { %5769 = vmatmul.mubr.bf16.gmra.mrb[168].mxu0 %v7111_v58 }
 0x24c   : > { %5772 = vmatprep.mubr.bf16.mxu0 %v7125_v38 }
 0x24e   : > { %v5666_v5 = vpop.f32.mrb[64].mxu0 }
 0x24f   : > { %v2651_v14 = vadd.f32 %v5666_v5, %v7250_v7  ;;  %v2642_v51 = vpop.f32.mrb[65].mxu0 }
 0x250   : > { %v2643_v8 = vadd.f32 %v7250_v7, %v2642_v51  ;;  %v5667_v46 = vpop.f32.mrb[66].mxu0 }
 0x251   : > { %v2654_v18 = vadd.f32 %v5667_v46, %v7250_v7  ;;  %v2645_v57 = vpop.f32.mrb[67].mxu0  ;;  %v3364_v29 = vmax.f32 %v2651_v14, 0.0 }
 0x252   : > { %v2646_v33 = vadd.f32 %v7250_v7, %v2645_v57  ;;  %v3362_v63 = vmax.f32 %v2643_v8, 0.0 }
 0x253   : > { %v3365_v41 = vmax.f32 %v2654_v18, 0.0  ;;  %5773 = vmatmul.mubr.bf16.gmra.mrb[172].mxu0 %v7123_v56 }
 0x254   : > { %v3363_v45 = vmax.f32 %v2646_v33, 0.0  ;;  %5776 = vmatprep.mubr.bf16.mxu0 %v7137_v2 }
 0x255   : > { %v7266_v0 = vpack.c.bf16 %v3365_v41, %v3364_v29 }
 0x256   : > { %v7268_v3 = vpack.c.bf16 %v3363_v45, %v3362_v63  ;;  %v5670_v58 = vpop.f32.mrb[68].mxu0 }
 0x257   : > { %v2667_v22 = vadd.f32 %v5670_v58, %v7250_v7  ;;  %v2658_v38 = vpop.f32.mrb[69].mxu0 }
 0x258   : > { %v2659_v27 = vadd.f32 %v7250_v7, %v2658_v38  ;;  %v5671_v49 = vpop.f32.mrb[70].mxu0 }
 0x259   : > { %v2670_v6 = vadd.f32 %v5671_v49, %v7250_v7  ;;  %v2661_v13 = vpop.f32.mrb[71].mxu0  ;;  %v3368_v48 = vmax.f32 %v2667_v22, 0.0 }
 0x25a   : > { %v2662_v56 = vadd.f32 %v7250_v7, %v2661_v13  ;;  %v3366_v2 = vmax.f32 %v2659_v27, 0.0 }
 0x25b   : > { %v3369_v59 = vmax.f32 %v2670_v6, 0.0  ;;  %5777 = vmatmul.mubr.bf16.gmra.mrb[176].mxu0 %v7135_v54 }
 0x25c   : > { %v3367_v4 = vmax.f32 %v2662_v56, 0.0  ;;  %5780 = vmatprep.mubr.bf16.mxu0 %v7156_v10 }
 0x25d   : > { %v7276_v24 = vpack.c.bf16 %v3369_v59, %v3368_v48 }
 0x25e   : > { %v7278_v25 = vpack.c.bf16 %v3367_v4, %v3366_v2  ;;  %v5674_v9 = vpop.f32.mrb[72].mxu0 }
 0x25f   : > { %v2683_v28 = vadd.f32 %v5674_v9, %v7250_v7  ;;  %v2674_v31 = vpop.f32.mrb[73].mxu0 }
 0x260   : > { %v2675_v40 = vadd.f32 %v7250_v7, %v2674_v31  ;;  %v5675_v42 = vpop.f32.mrb[74].mxu0 }
 0x261   : > { %v2686_v43 = vadd.f32 %v5675_v42, %v7250_v7  ;;  %v2677_v52 = vpop.f32.mrb[75].mxu0  ;;  %v3372_v55 = vmax.f32 %v2683_v28, 0.0 }
 0x262   : > { %v2678_v54 = vadd.f32 %v7250_v7, %v2677_v52  ;;  %v3370_v10 = vmax.f32 %v2675_v40, 0.0 }
 0x263   : > { %v3373_v1 = vmax.f32 %v2686_v43, 0.0  ;;  %5781 = vmatmul.mubr.bf16.gmra.mrb[180].mxu0 %v7153_v44 }
 0x264   : > { %v3371_v16 = vmax.f32 %v2678_v54, 0.0  ;;  %5784 = vmatprep.mubr.bf16.mxu0 %v7168_v47 }
 0x265   : > { %v7286_v17 = vpack.c.bf16 %v3373_v1, %v3372_v55 }
 0x266   : > { %v7288_v20 = vpack.c.bf16 %v3371_v16, %v3370_v10  ;;  %v5678_v34 = vpop.f32.mrb[76].mxu0 }
 0x267   : > { %v2699_v35 = vadd.f32 %v5678_v34, %v7250_v7  ;;  %v2690_v36 = vpop.f32.mrb[77].mxu0 }
 0x268   : > { %v2691_v37 = vadd.f32 %v7250_v7, %v2690_v36  ;;  %v5679_v50 = vpop.f32.mrb[78].mxu0 }
 0x269   : > { %v2702_v11 = vadd.f32 %v5679_v50, %v7250_v7  ;;  %v2693_v32 = vpop.f32.mrb[79].mxu0  ;;  %v3376_v61 = vmax.f32 %v2699_v35, 0.0 }
 0x26a   : > { %v2694_v44 = vadd.f32 %v7250_v7, %v2693_v32  ;;  %v3374_v47 = vmax.f32 %v2691_v37, 0.0 }
 0x26b   : > { %v3377_v5 = vmax.f32 %v2702_v11, 0.0  ;;  %5785 = vmatmul.mubr.bf16.gmra.mrb[184].mxu0 %v7166_v15 }
 0x26c   : > { %v3375_v14 = vmax.f32 %v2694_v44, 0.0  ;;  %5788 = vmatprep.mubr.bf16.mxu0 %v7187_v53 }
 0x26d   : > { %v7296_v51 = vpack.c.bf16 %v3377_v5, %v3376_v61 }
 0x26e   : > { %v7298_v8 = vpack.c.bf16 %v3375_v14, %v3374_v47  ;;  %v5682_v46 = vpop.f32.mrb[80].mxu0 }
 0x26f   : > { %v2715_v18 = vadd.f32 %v5682_v46, %v7250_v7  ;;  %v2706_v57 = vpop.f32.mrb[81].mxu0 }
 0x270   : > { %v2707_v33 = vadd.f32 %v7250_v7, %v2706_v57  ;;  %v5683_v29 = vpop.f32.mrb[82].mxu0 }
 0x271   : > { %v2718_v41 = vadd.f32 %v5683_v29, %v7250_v7  ;;  %v2709_v63 = vpop.f32.mrb[83].mxu0  ;;  %v3380_v45 = vmax.f32 %v2715_v18, 0.0 }
 0x272   : > { %v2710_v15 = vadd.f32 %v7250_v7, %v2709_v63  ;;  %v3378_v53 = vmax.f32 %v2707_v33, 0.0 }
 0x273   : > { %v3381_v58 = vmax.f32 %v2718_v41, 0.0  ;;  %5789 = vmatmul.mubr.bf16.gmra.mrb[188].mxu0 %v7184_v60 }
 0x274   : > { %v3379_v22 = vmax.f32 %v2710_v15, 0.0 }
 0x275   : > { %v7305_v38 = vpack.c.bf16 %v3381_v58, %v3380_v45 }
 0x276   : > { %v7307_v27 = vpack.c.bf16 %v3379_v22, %v3378_v53  ;;  %v5686_v49 = vpop.f32.mrb[84].mxu0 }
 0x277   : > { %v2731_v6 = vadd.f32 %v5686_v49, %v7250_v7  ;;  %v2722_v13 = vpop.f32.mrb[85].mxu0 }
 0x278   : > { %v2723_v56 = vadd.f32 %v7250_v7, %v2722_v13  ;;  %v5687_v48 = vpop.f32.mrb[86].mxu0 }
 0x279   : > { %v2734_v59 = vadd.f32 %v5687_v48, %v7250_v7  ;;  %v2725_v2 = vpop.f32.mrb[87].mxu0  ;;  %v3384_v9 = vmax.f32 %v2731_v6, 0.0 }
 0x27a   : > { %v2726_v4 = vadd.f32 %v7250_v7, %v2725_v2  ;;  %v3382_v28 = vmax.f32 %v2723_v56, 0.0 }
 0x27b   : > { %v3385_v60 = vmax.f32 %v2734_v59, 0.0 }
 0x27c   : > { %v3383_v31 = vmax.f32 %v2726_v4, 0.0 }
 0x27d   : > { %v7313_v40 = vpack.c.bf16 %v3385_v60, %v3384_v9 }
 0x27e   : > { %v7315_v42 = vpack.c.bf16 %v3383_v31, %v3382_v28  ;;  %v5690_v43 = vpop.f32.mrb[88].mxu0 }
 0x27f   : > { %v2747_v52 = vadd.f32 %v5690_v43, %v7250_v7  ;;  %v2738_v54 = vpop.f32.mrb[89].mxu0 }
 0x280   : > { %v2739_v55 = vadd.f32 %v7250_v7, %v2738_v54  ;;  %v5691_v1 = vpop.f32.mrb[90].mxu0 }
 0x281   : > { %v2750_v10 = vadd.f32 %v5691_v1, %v7250_v7  ;;  %v2741_v16 = vpop.f32.mrb[91].mxu0  ;;  %v3388_v35 = vmax.f32 %v2747_v52, 0.0 }
 0x282   : > { %v2742_v34 = vadd.f32 %v7250_v7, %v2741_v16  ;;  %v3386_v37 = vmax.f32 %v2739_v55, 0.0 }
 0x283   : > { %v3389_v36 = vmax.f32 %v2750_v10, 0.0 }
 0x284   : > { %v3387_v50 = vmax.f32 %v2742_v34, 0.0 }
 0x285   : > { %v7321_v11 = vpack.c.bf16 %v3389_v36, %v3388_v35 }
 0x286   : > { %v7323_v32 = vpack.c.bf16 %v3387_v50, %v3386_v37  ;;  %v5694_v44 = vpop.f32.mrb[92].mxu0 }
 0x287   : > { %v2763_v61 = vadd.f32 %v5694_v44, %v7250_v7  ;;  %v2754_v5 = vpop.f32.mrb[93].mxu0 }
 0x288   : > { %v2755_v47 = vadd.f32 %v7250_v7, %v2754_v5  ;;  %v5695_v14 = vpop.f32.mrb[94].mxu0 }
 0x289   : > { %v2766_v46 = vadd.f32 %v5695_v14, %v7250_v7  ;;  %v2757_v18 = vpop.f32.mrb[95].mxu0  ;;  %v3392_v33 = vmax.f32 %v2763_v61, 0.0 }
 0x28a   : > { %v2758_v57 = vadd.f32 %v7250_v7, %v2757_v18  ;;  %v3390_v41 = vmax.f32 %v2755_v47, 0.0 }
 0x28b   : > { %v3393_v29 = vmax.f32 %v2766_v46, 0.0 }
 0x28c   : > { %v3391_v63 = vmax.f32 %v2758_v57, 0.0 }
 0x28d   : > { %v7329_v15 = vpack.c.bf16 %v3393_v29, %v3392_v33 }
 0x28e   : > { %v7331_v45 = vpack.c.bf16 %v3391_v63, %v3390_v41  ;;  %v5698_v58 = vpop.f32.mrb[96].mxu0 }
 0x28f   : > { %v2779_v53 = vadd.f32 %v5698_v58, %v7250_v7  ;;  %v2770_v22 = vpop.f32.mrb[97].mxu0 }
 0x290   : > { %v2771_v49 = vadd.f32 %v7250_v7, %v2770_v22  ;;  %v5699_v6 = vpop.f32.mrb[98].mxu0 }
 0x291   : > { %v2782_v13 = vadd.f32 %v5699_v6, %v7250_v7  ;;  %v2773_v56 = vpop.f32.mrb[99].mxu0  ;;  %v3396_v59 = vmax.f32 %v2779_v53, 0.0 }
 0x292   : > { %v2774_v48 = vadd.f32 %v7250_v7, %v2773_v56  ;;  %v3394_v4 = vmax.f32 %v2771_v49, 0.0 }
 0x293   : > { %v3397_v2 = vmax.f32 %v2782_v13, 0.0 }
 0x294   : > { %v3395_v9 = vmax.f32 %v2774_v48, 0.0 }
 0x295   : > { %v7337_v60 = vpack.c.bf16 %v3397_v2, %v3396_v59 }
 0x296   : > { %v7339_v28 = vpack.c.bf16 %v3395_v9, %v3394_v4  ;;  %v5702_v31 = vpop.f32.mrb[100].mxu0 }
 0x297   : > { %v2795_v43 = vadd.f32 %v5702_v31, %v7250_v7  ;;  %v2786_v52 = vpop.f32.mrb[101].mxu0 }
 0x298   : > { %v2787_v54 = vadd.f32 %v7250_v7, %v2786_v52  ;;  %v5703_v55 = vpop.f32.mrb[102].mxu0 }
 0x299   : > { %v2798_v1 = vadd.f32 %v5703_v55, %v7250_v7  ;;  %v2789_v10 = vpop.f32.mrb[103].mxu0  ;;  %v3400_v34 = vmax.f32 %v2795_v43, 0.0 }
 0x29a   : > { %v2790_v16 = vadd.f32 %v7250_v7, %v2789_v10  ;;  %v3398_v36 = vmax.f32 %v2787_v54, 0.0 }
 0x29b   : > { %v3401_v35 = vmax.f32 %v2798_v1, 0.0 }
 0x29c   : > { %v3399_v37 = vmax.f32 %v2790_v16, 0.0 }
 0x29d   : > { %v7345_v50 = vpack.c.bf16 %v3401_v35, %v3400_v34 }
 0x29e   : > { %v7347_v44 = vpack.c.bf16 %v3399_v37, %v3398_v36  ;;  %v5706_v61 = vpop.f32.mrb[104].mxu0 }
 0x29f   : > { %v2811_v5 = vadd.f32 %v5706_v61, %v7250_v7  ;;  %v2802_v47 = vpop.f32.mrb[105].mxu0 }
 0x2a0   : > { %v2803_v14 = vadd.f32 %v7250_v7, %v2802_v47  ;;  %v5707_v46 = vpop.f32.mrb[106].mxu0 }
 0x2a1   : > { %v2814_v18 = vadd.f32 %v5707_v46, %v7250_v7  ;;  %v2805_v57 = vpop.f32.mrb[107].mxu0  ;;  %v3404_v29 = vmax.f32 %v2811_v5, 0.0 }
 0x2a2   : > { %v2806_v33 = vadd.f32 %v7250_v7, %v2805_v57  ;;  %v3402_v63 = vmax.f32 %v2803_v14, 0.0 }
 0x2a3   : > { %v3405_v41 = vmax.f32 %v2814_v18, 0.0 }
 0x2a4   : > { %v3403_v58 = vmax.f32 %v2806_v33, 0.0 }
 0x2a5   : > { %v7353_v53 = vpack.c.bf16 %v3405_v41, %v3404_v29 }
 0x2a6   : > { %v7355_v22 = vpack.c.bf16 %v3403_v58, %v3402_v63  ;;  %v5710_v49 = vpop.f32.mrb[108].mxu0 }
 0x2a7   : > { %v2827_v6 = vadd.f32 %v5710_v49, %v7250_v7  ;;  %v2818_v13 = vpop.f32.mrb[109].mxu0 }
 0x2a8   : > { %v2819_v56 = vadd.f32 %v7250_v7, %v2818_v13  ;;  %v5711_v48 = vpop.f32.mrb[110].mxu0 }
 0x2a9   : > { %v2830_v59 = vadd.f32 %v5711_v48, %v7250_v7  ;;  %v2821_v2 = vpop.f32.mrb[111].mxu0  ;;  %v3408_v9 = vmax.f32 %v2827_v6, 0.0 }
 0x2aa   : > { %v2822_v4 = vadd.f32 %v7250_v7, %v2821_v2  ;;  %v3406_v43 = vmax.f32 %v2819_v56, 0.0 }
 0x2ab   : > { %v3409_v31 = vmax.f32 %v2830_v59, 0.0 }
 0x2ac   : > { %v3407_v52 = vmax.f32 %v2822_v4, 0.0 }
 0x2ad   : > { %v7361_v54 = vpack.c.bf16 %v3409_v31, %v3408_v9 }
 0x2ae   : > { %v7363_v55 = vpack.c.bf16 %v3407_v52, %v3406_v43  ;;  %v5714_v1 = vpop.f32.mrb[112].mxu0 }
 0x2af   : > { %v2843_v10 = vadd.f32 %v5714_v1, %v7250_v7  ;;  %v2834_v16 = vpop.f32.mrb[113].mxu0 }
 0x2b0   : > { %v2835_v34 = vadd.f32 %v7250_v7, %v2834_v16  ;;  %v5715_v35 = vpop.f32.mrb[114].mxu0 }
 0x2b1   : > { %v2846_v36 = vadd.f32 %v5715_v35, %v7250_v7  ;;  %v2837_v37 = vpop.f32.mrb[115].mxu0  ;;  %v3412_v5 = vmax.f32 %v2843_v10, 0.0 }
 0x2b2   : > { %v2838_v61 = vadd.f32 %v7250_v7, %v2837_v37  ;;  %v3410_v14 = vmax.f32 %v2835_v34, 0.0 }
 0x2b3   : > { %v3413_v47 = vmax.f32 %v2846_v36, 0.0 }
 0x2b4   : > { %v3411_v46 = vmax.f32 %v2838_v61, 0.0 }
 0x2b5   : > { %v7369_v18 = vpack.c.bf16 %v3413_v47, %v3412_v5 }
 0x2b6   : > { %v7371_v57 = vpack.c.bf16 %v3411_v46, %v3410_v14  ;;  %v5718_v33 = vpop.f32.mrb[116].mxu0 }
 0x2b7   : > { %v2859_v29 = vadd.f32 %v5718_v33, %v7250_v7  ;;  %v2850_v41 = vpop.f32.mrb[117].mxu0 }
 0x2b8   : > { %v2851_v63 = vadd.f32 %v7250_v7, %v2850_v41  ;;  %v5719_v58 = vpop.f32.mrb[118].mxu0 }
 0x2b9   : > { %v2862_v49 = vadd.f32 %v5719_v58, %v7250_v7  ;;  %v2853_v6 = vpop.f32.mrb[119].mxu0  ;;  %v3416_v56 = vmax.f32 %v2859_v29, 0.0 }
 0x2ba   : > { %v2854_v13 = vadd.f32 %v7250_v7, %v2853_v6  ;;  %v3414_v59 = vmax.f32 %v2851_v63, 0.0 }
 0x2bb   : > { %v3417_v48 = vmax.f32 %v2862_v49, 0.0 }
 0x2bc   : > { %v3415_v2 = vmax.f32 %v2854_v13, 0.0 }
 0x2bd   : > { %v7377_v4 = vpack.c.bf16 %v3417_v48, %v3416_v56 }
 0x2be   : > { %v7379_v9 = vpack.c.bf16 %v3415_v2, %v3414_v59  ;;  %v5722_v31 = vpop.f32.mrb[120].mxu0 }
 0x2bf   : > { %v2875_v43 = vadd.f32 %v5722_v31, %v7250_v7  ;;  %v2866_v52 = vpop.f32.mrb[121].mxu0 }
 0x2c0   : > { %v2867_v1 = vadd.f32 %v7250_v7, %v2866_v52  ;;  %v5723_v10 = vpop.f32.mrb[122].mxu0 }
 0x2c1   : > { %v2878_v16 = vadd.f32 %v5723_v10, %v7250_v7  ;;  %v2869_v34 = vpop.f32.mrb[123].mxu0  ;;  %v3420_v36 = vmax.f32 %v2875_v43, 0.0 }
 0x2c2   : > { %v2870_v35 = vadd.f32 %v7250_v7, %v2869_v34  ;;  %v3418_v61 = vmax.f32 %v2867_v1, 0.0 }
 0x2c3   : > { %v3421_v37 = vmax.f32 %v2878_v16, 0.0 }
 0x2c4   : > { %v3419_v5 = vmax.f32 %v2870_v35, 0.0 }
 0x2c5   : > { %v7385_v47 = vpack.c.bf16 %v3421_v37, %v3420_v36 }
 0x2c6   : > { %v7387_v14 = vpack.c.bf16 %v3419_v5, %v3418_v61  ;;  %v5726_v46 = vpop.f32.mrb[124].mxu0 }
 0x2c7   : > { %v2891_v33 = vadd.f32 %v5726_v46, %v7250_v7  ;;  %v2882_v29 = vpop.f32.mrb[125].mxu0 }
 0x2c8   : > { %v2883_v41 = vadd.f32 %v7250_v7, %v2882_v29  ;;  %v5727_v63 = vpop.f32.mrb[126].mxu0 }
 0x2c9   : > { %v2894_v58 = vadd.f32 %v5727_v63, %v7250_v7  ;;  %v2885_v49 = vpop.f32.mrb[127].mxu0  ;;  %v3424_v13 = vmax.f32 %v2891_v33, 0.0 }
 0x2ca   : > { %v2886_v6 = vadd.f32 %v7250_v7, %v2885_v49  ;;  %v3422_v48 = vmax.f32 %v2883_v41, 0.0 }
 0x2cb   : > { %v3425_v56 = vmax.f32 %v2894_v58, 0.0 }
 0x2cc   : > { %v3423_v59 = vmax.f32 %v2886_v6, 0.0 }
 0x2cd   : > { %v7393_v2 = vpack.c.bf16 %v3425_v56, %v3424_v13 }
 0x2ce   : > { %v7395_v31 = vpack.c.bf16 %v3423_v59, %v3422_v48  ;;  %v5730_v43 = vpop.f32.mrb[128].mxu0 }
 0x2cf   : > { %v2907_v52 = vadd.f32 %v5730_v43, %v7250_v7  ;;  %v2898_v1 = vpop.f32.mrb[129].mxu0 }
 0x2d0   : > { %v2899_v10 = vadd.f32 %v7250_v7, %v2898_v1  ;;  %v5731_v16 = vpop.f32.mrb[130].mxu0 }
 0x2d1   : > { %v2910_v34 = vadd.f32 %v5731_v16, %v7250_v7  ;;  %v2901_v35 = vpop.f32.mrb[131].mxu0  ;;  %v3524_v37 = vmax.f32 %v2907_v52, 0.0 }
 0x2d2   : > { %v2902_v36 = vadd.f32 %v7250_v7, %v2901_v35  ;;  %v3522_v5 = vmax.f32 %v2899_v10, 0.0 }
 0x2d3   : > { %v3525_v61 = vmax.f32 %v2910_v34, 0.0 }
 0x2d4   : > { %v3523_v46 = vmax.f32 %v2902_v36, 0.0 }
 0x2d5   : > { %v3587_v33 = vpack.c.bf16 %v3525_v61, %v3524_v37 }
 0x2d6   : > { %v3586_v29 = vpack.c.bf16 %v3523_v46, %v3522_v5  ;;  %v5734_v41 = vpop.f32.mrb[132].mxu0 }
 0x2d7   : > { %v2923_v63 = vadd.f32 %v5734_v41, %v7250_v7  ;;  %v2914_v58 = vpop.f32.mrb[133].mxu0 }
 0x2d8   : > { %v2915_v49 = vadd.f32 %v7250_v7, %v2914_v58  ;;  %v5735_v6 = vpop.f32.mrb[134].mxu0  ;;  %5808 = vmatprep.mubr.bf16.mxu1 %v3586_v29 }
 0x2d9   : > { %v2926_v13 = vadd.f32 %v5735_v6, %v7250_v7  ;;  %v2917_v56 = vpop.f32.mrb[135].mxu0  ;;  %5809 = vmatmul.mubr.bf16.vlgmr.msra.gmra.mrb[64].mxu1 %v3587_v33  ;;  %v3528_v59 = vmax.f32 %v2923_v63, 0.0 }
 0x2da   : > { %v2918_v48 = vadd.f32 %v7250_v7, %v2917_v56  ;;  %5873 = vmatpush3.bf16.msra.mxu1 %v7150_v23  ;;  %v3526_v52 = vmax.f32 %v2915_v49, 0.0 }
 0x2db   : > { %v3529_v43 = vmax.f32 %v2926_v13, 0.0  ;;  %5874 = vmatprep.subr.bf16.mxu1 %v7181_v21 }
 0x2dc   : > { %v3527_v1 = vmax.f32 %v2918_v48, 0.0 }
 0x2dd   : > { %v3589_v10 = vpack.c.bf16 %v3529_v43, %v3528_v59 }
 0x2de   : > { %v3588_v16 = vpack.c.bf16 %v3527_v1, %v3526_v52  ;;  %v5738_v34 = vpop.f32.mrb[136].mxu0  ;;  %5875 = vmatpush3.bf16.msra.mxu1 %v7181_v21 }
 0x2df   : > { %v2939_v35 = vadd.f32 %v5738_v34, %v7250_v7  ;;  %v2930_v36 = vpop.f32.mrb[137].mxu0  ;;  %5876 = vmatprep.subr.bf16.mxu1 %v7195_v26 }
 0x2e0   : > { %v2931_v37 = vadd.f32 %v7250_v7, %v2930_v36  ;;  %v5739_v61 = vpop.f32.mrb[138].mxu0  ;;  %5812 = vmatprep.mubr.bf16.mxu1 %v3588_v16 }
 0x2e1   : > { %v2942_v23 = vadd.f32 %v5739_v61, %v7250_v7  ;;  %v2933_v5 = vpop.f32.mrb[139].mxu0  ;;  %5813 = vmatmul.mubr.bf16.gmra.mrb[68].mxu1 %v3589_v10  ;;  %v3532_v33 = vmax.f32 %v2939_v35, 0.0 }
 0x2e2   : > { %v2934_v46 = vadd.f32 %v7250_v7, %v2933_v5  ;;  %5877 = vmatpush3.bf16.msra.mxu1 %v7195_v26  ;;  %v3530_v21 = vmax.f32 %v2931_v37, 0.0 }
 0x2e3   : > { %v3533_v29 = vmax.f32 %v2942_v23, 0.0  ;;  %5878 = vmatprep.subr.bf16.mxu1 %v7206_v39 }
 0x2e4   : > { %v3531_v41 = vmax.f32 %v2934_v46, 0.0 }
 0x2e5   : > { %v3591_v63 = vpack.c.bf16 %v3533_v29, %v3532_v33 }
 0x2e6   : > { %v3590_v58 = vpack.c.bf16 %v3531_v41, %v3530_v21  ;;  %v5742_v49 = vpop.f32.mrb[140].mxu0  ;;  %5879 = vmatpush3.bf16.msra.mxu1 %v7206_v39 }
 0x2e7   : > { %v2955_v6 = vadd.f32 %v5742_v49, %v7250_v7  ;;  %v2946_v13 = vpop.f32.mrb[141].mxu0  ;;  %5880 = vmatprep.subr.bf16.mxu1 %v7217_v62 }
 0x2e8   : > { %v2947_v56 = vadd.f32 %v7250_v7, %v2946_v13  ;;  %v5743_v48 = vpop.f32.mrb[142].mxu0  ;;  %5816 = vmatprep.mubr.bf16.mxu1 %v3590_v58 }
 0x2e9   : > { %v2958_v26 = vadd.f32 %v5743_v48, %v7250_v7  ;;  %v2949_v59 = vpop.f32.mrb[143].mxu0  ;;  %5817 = vmatmul.mubr.bf16.gmra.mrb[72].mxu1 %v3591_v63  ;;  %v3536_v52 = vmax.f32 %v2955_v6, 0.0 }
 0x2ea   : > { %v2950_v43 = vadd.f32 %v7250_v7, %v2949_v59  ;;  %5881 = vmatpush3.bf16.msra.mxu1 %v7217_v62  ;;  %v3534_v39 = vmax.f32 %v2947_v56, 0.0 }
 0x2eb   : > { %v3537_v1 = vmax.f32 %v2958_v26, 0.0  ;;  %5882 = vmatprep.subr.bf16.mxu1 %v7228_v19 }
 0x2ec   : > { %v3535_v10 = vmax.f32 %v2950_v43, 0.0 }
 0x2ed   : > { %v3593_v16 = vpack.c.bf16 %v3537_v1, %v3536_v52 }
 0x2ee   : > { %v3592_v34 = vpack.c.bf16 %v3535_v10, %v3534_v39  ;;  %v5746_v35 = vpop.f32.mrb[144].mxu0  ;;  %5883 = vmatpush3.bf16.msra.mxu1 %v7228_v19 }
 0x2ef   : > { %v2971_v36 = vadd.f32 %v5746_v35, %v7250_v7  ;;  %v2962_v37 = vpop.f32.mrb[145].mxu0  ;;  %5884 = vmatprep.subr.bf16.mxu1 %v7239_v30 }
 0x2f0   : > { %v2963_v61 = vadd.f32 %v7250_v7, %v2962_v37  ;;  %v5747_v23 = vpop.f32.mrb[146].mxu0  ;;  %5820 = vmatprep.mubr.bf16.mxu1 %v3592_v34 }
 0x2f1   : > { %v2974_v62 = vadd.f32 %v5747_v23, %v7250_v7  ;;  %v2965_v5 = vpop.f32.mrb[147].mxu0  ;;  %5821 = vmatmul.mubr.bf16.gmra.mrb[76].mxu1 %v3593_v16  ;;  %v3540_v33 = vmax.f32 %v2971_v36, 0.0 }
 0x2f2   : > { %v2966_v46 = vadd.f32 %v7250_v7, %v2965_v5  ;;  %5885 = vmatpush3.bf16.msra.mxu1 %v7239_v30  ;;  %v3538_v19 = vmax.f32 %v2963_v61, 0.0 }
 0x2f3   : > { %v3541_v29 = vmax.f32 %v2974_v62, 0.0  ;;  %5886 = vmatprep.subr.bf16.mxu1 %v7255_v12 }
 0x2f4   : > { %v3539_v21 = vmax.f32 %v2966_v46, 0.0 }
 0x2f5   : > { %v3595_v41 = vpack.c.bf16 %v3541_v29, %v3540_v33 }
 0x2f6   : > { %v3594_v63 = vpack.c.bf16 %v3539_v21, %v3538_v19  ;;  %v5750_v58 = vpop.f32.mrb[148].mxu0  ;;  %5887 = vmatpush3.bf16.msra.mxu1 %v7255_v12 }
 0x2f7   : > { %v2987_v49 = vadd.f32 %v5750_v58, %v7250_v7  ;;  %v2978_v6 = vpop.f32.mrb[149].mxu0 }
 0x2f8   : > { %v2979_v13 = vadd.f32 %v7250_v7, %v2978_v6  ;;  %v5751_v56 = vpop.f32.mrb[150].mxu0  ;;  %5824 = vmatprep.mubr.bf16.mxu1 %v3594_v63 }
 0x2f9   : > { %v2990_v30 = vadd.f32 %v5751_v56, %v7250_v7  ;;  %v2981_v48 = vpop.f32.mrb[151].mxu0  ;;  %5825 = vmatmul.mubr.bf16.gmra.mrb[80].mxu1 %v3595_v41  ;;  %v3544_v59 = vmax.f32 %v2987_v49, 0.0 }
 0x2fa   : > { %v2982_v26 = vadd.f32 %v7250_v7, %v2981_v48  ;;  %v3542_v52 = vmax.f32 %v2979_v13, 0.0 }
 0x2fb   : > { %v3545_v43 = vmax.f32 %v2990_v30, 0.0 }
 0x2fc   : > { %v3543_v1 = vmax.f32 %v2982_v26, 0.0 }
 0x2fd   : > { %v3597_v39 = vpack.c.bf16 %v3545_v43, %v3544_v59 }
 0x2fe   : > { %v3596_v10 = vpack.c.bf16 %v3543_v1, %v3542_v52  ;;  %v5754_v12 = vpop.f32.mrb[152].mxu0 }
 0x2ff   : > { %v3003_v16 = vadd.f32 %v5754_v12, %v7250_v7  ;;  %v2994_v34 = vpop.f32.mrb[153].mxu0 }
 0x300   : > { %v2995_v35 = vadd.f32 %v7250_v7, %v2994_v34  ;;  %v5755_v36 = vpop.f32.mrb[154].mxu0  ;;  %5828 = vmatprep.mubr.bf16.mxu1 %v3596_v10 }
 0x301   : > { %v3006_v37 = vadd.f32 %v5755_v36, %v7250_v7  ;;  %v2997_v61 = vpop.f32.mrb[155].mxu0  ;;  %5829 = vmatmul.mubr.bf16.gmra.mrb[84].mxu1 %v3597_v39  ;;  %v3548_v62 = vmax.f32 %v3003_v16, 0.0 }
 0x302   : > { %v2998_v23 = vadd.f32 %v7250_v7, %v2997_v61  ;;  %v3546_v46 = vmax.f32 %v2995_v35, 0.0 }
 0x303   : > { %v3549_v5 = vmax.f32 %v3006_v37, 0.0 }
 0x304   : > { %v3547_v33 = vmax.f32 %v2998_v23, 0.0 }
 0x305   : > { %v3599_v29 = vpack.c.bf16 %v3549_v5, %v3548_v62 }
 0x306   : > { %v3598_v19 = vpack.c.bf16 %v3547_v33, %v3546_v46  ;;  %v5758_v21 = vpop.f32.mrb[156].mxu0 }
 0x307   : > { %v3019_v41 = vadd.f32 %v5758_v21, %v7250_v7  ;;  %v3010_v63 = vpop.f32.mrb[157].mxu0 }
 0x308   : > { %v3011_v58 = vadd.f32 %v7250_v7, %v3010_v63  ;;  %v5759_v49 = vpop.f32.mrb[158].mxu0  ;;  %5832 = vmatprep.mubr.bf16.mxu1 %v3598_v19 }
 0x309   : > { %v3022_v6 = vadd.f32 %v5759_v49, %v7250_v7  ;;  %v3013_v13 = vpop.f32.mrb[159].mxu0  ;;  %5833 = vmatmul.mubr.bf16.gmra.mrb[88].mxu1 %v3599_v29  ;;  %v3552_v30 = vmax.f32 %v3019_v41, 0.0 }
 0x30a   : > { %v3014_v56 = vadd.f32 %v7250_v7, %v3013_v13  ;;  %v3550_v26 = vmax.f32 %v3011_v58, 0.0 }
 0x30b   : > { %v3553_v48 = vmax.f32 %v3022_v6, 0.0 }
 0x30c   : > { %v3551_v59 = vmax.f32 %v3014_v56, 0.0 }
 0x30d   : > { %v3601_v43 = vpack.c.bf16 %v3553_v48, %v3552_v30 }
 0x30e   : > { %v3600_v52 = vpack.c.bf16 %v3551_v59, %v3550_v26  ;;  %v5762_v1 = vpop.f32.mrb[160].mxu0 }
 0x30f   : > { %v3035_v39 = vadd.f32 %v5762_v1, %v7250_v7  ;;  %v3026_v10 = vpop.f32.mrb[161].mxu0 }
 0x310   : > { %v3027_v12 = vadd.f32 %v7250_v7, %v3026_v10  ;;  %v5763_v16 = vpop.f32.mrb[162].mxu0  ;;  %5836 = vmatprep.mubr.bf16.mxu1 %v3600_v52 }
 0x311   : > { %v3038_v34 = vadd.f32 %v5763_v16, %v7250_v7  ;;  %v3029_v35 = vpop.f32.mrb[163].mxu0  ;;  %5837 = vmatmul.mubr.bf16.gmra.mrb[92].mxu1 %v3601_v43  ;;  %v3556_v37 = vmax.f32 %v3035_v39, 0.0 }
 0x312   : > { %v3030_v36 = vadd.f32 %v7250_v7, %v3029_v35  ;;  %v3554_v23 = vmax.f32 %v3027_v12, 0.0 }
 0x313   : > { %v3557_v61 = vmax.f32 %v3038_v34, 0.0 }
 0x314   : > { %v3555_v62 = vmax.f32 %v3030_v36, 0.0 }
 0x315   : > { %v3603_v5 = vpack.c.bf16 %v3557_v61, %v3556_v37 }
 0x316   : > { %v3602_v46 = vpack.c.bf16 %v3555_v62, %v3554_v23  ;;  %v5766_v33 = vpop.f32.mrb[164].mxu0 }
 0x317   : > { %v3051_v29 = vadd.f32 %v5766_v33, %v7250_v7  ;;  %v3042_v19 = vpop.f32.mrb[165].mxu0 }
 0x318   : > { %v3043_v21 = vadd.f32 %v7250_v7, %v3042_v19  ;;  %v5767_v41 = vpop.f32.mrb[166].mxu0  ;;  %5840 = vmatprep.mubr.bf16.mxu1 %v3602_v46 }
 0x319   : > { %v3054_v63 = vadd.f32 %v5767_v41, %v7250_v7  ;;  %v3045_v58 = vpop.f32.mrb[167].mxu0  ;;  %5841 = vmatmul.mubr.bf16.gmra.mrb[96].mxu1 %v3603_v5  ;;  %v3560_v6 = vmax.f32 %v3051_v29, 0.0 }
 0x31a   : > { %v3046_v49 = vadd.f32 %v7250_v7, %v3045_v58  ;;  %v3558_v56 = vmax.f32 %v3043_v21, 0.0 }
 0x31b   : > { %v3561_v13 = vmax.f32 %v3054_v63, 0.0 }
 0x31c   : > { %v3559_v30 = vmax.f32 %v3046_v49, 0.0 }
 0x31d   : > { %v3605_v48 = vpack.c.bf16 %v3561_v13, %v3560_v6 }
 0x31e   : > { %v3604_v26 = vpack.c.bf16 %v3559_v30, %v3558_v56  ;;  %v5770_v59 = vpop.f32.mrb[168].mxu0 }
 0x31f   : > { %v3067_v43 = vadd.f32 %v5770_v59, %v7250_v7  ;;  %v3058_v52 = vpop.f32.mrb[169].mxu0 }
 0x320   : > { %v3059_v1 = vadd.f32 %v7250_v7, %v3058_v52  ;;  %v5771_v39 = vpop.f32.mrb[170].mxu0  ;;  %5844 = vmatprep.mubr.bf16.mxu1 %v3604_v26 }
 0x321   : > { %v3070_v10 = vadd.f32 %v5771_v39, %v7250_v7  ;;  %v3061_v12 = vpop.f32.mrb[171].mxu0  ;;  %5845 = vmatmul.mubr.bf16.gmra.mrb[100].mxu1 %v3605_v48  ;;  %v3564_v34 = vmax.f32 %v3067_v43, 0.0 }
 0x322   : > { %v3062_v16 = vadd.f32 %v7250_v7, %v3061_v12  ;;  %v3562_v36 = vmax.f32 %v3059_v1, 0.0 }
 0x323   : > { %v3565_v35 = vmax.f32 %v3070_v10, 0.0 }
 0x324   : > { %v3563_v37 = vmax.f32 %v3062_v16, 0.0 }
 0x325   : > { %v3607_v61 = vpack.c.bf16 %v3565_v35, %v3564_v34 }
 0x326   : > { %v3606_v23 = vpack.c.bf16 %v3563_v37, %v3562_v36  ;;  %v5774_v62 = vpop.f32.mrb[172].mxu0 }
 0x327   : > { %v3083_v5 = vadd.f32 %v5774_v62, %v7250_v7  ;;  %v3074_v46 = vpop.f32.mrb[173].mxu0 }
 0x328   : > { %v3075_v33 = vadd.f32 %v7250_v7, %v3074_v46  ;;  %v5775_v29 = vpop.f32.mrb[174].mxu0  ;;  %5848 = vmatprep.mubr.bf16.mxu1 %v3606_v23 }
 0x329   : > { %v3086_v19 = vadd.f32 %v5775_v29, %v7250_v7  ;;  %v3077_v21 = vpop.f32.mrb[175].mxu0  ;;  %5849 = vmatmul.mubr.bf16.gmra.mrb[104].mxu1 %v3607_v61  ;;  %v3568_v63 = vmax.f32 %v3083_v5, 0.0 }
 0x32a   : > { %v3078_v41 = vadd.f32 %v7250_v7, %v3077_v21  ;;  %v3566_v49 = vmax.f32 %v3075_v33, 0.0 }
 0x32b   : > { %v3569_v58 = vmax.f32 %v3086_v19, 0.0 }
 0x32c   : > { %v3567_v6 = vmax.f32 %v3078_v41, 0.0 }
 0x32d   : > { %v3609_v13 = vpack.c.bf16 %v3569_v58, %v3568_v63 }
 0x32e   : > { %v3608_v56 = vpack.c.bf16 %v3567_v6, %v3566_v49  ;;  %v5778_v30 = vpop.f32.mrb[176].mxu0 }
 0x32f   : > { %v3099_v48 = vadd.f32 %v5778_v30, %v7250_v7  ;;  %v3090_v26 = vpop.f32.mrb[177].mxu0 }
 0x330   : > { %v3091_v59 = vadd.f32 %v7250_v7, %v3090_v26  ;;  %v5779_v43 = vpop.f32.mrb[178].mxu0  ;;  %5852 = vmatprep.mubr.bf16.mxu1 %v3608_v56 }
 0x331   : > { %v3102_v52 = vadd.f32 %v5779_v43, %v7250_v7  ;;  %v3093_v1 = vpop.f32.mrb[179].mxu0  ;;  %5853 = vmatmul.mubr.bf16.gmra.mrb[108].mxu1 %v3609_v13  ;;  %v3572_v10 = vmax.f32 %v3099_v48, 0.0 }
 0x332   : > { %v3094_v39 = vadd.f32 %v7250_v7, %v3093_v1  ;;  %v3570_v16 = vmax.f32 %v3091_v59, 0.0 }
 0x333   : > { %v3573_v12 = vmax.f32 %v3102_v52, 0.0 }
 0x334   : > { %v3571_v34 = vmax.f32 %v3094_v39, 0.0 }
 0x335   : > { %v3611_v35 = vpack.c.bf16 %v3573_v12, %v3572_v10 }
 0x336   : > { %v3610_v36 = vpack.c.bf16 %v3571_v34, %v3570_v16  ;;  %v5782_v37 = vpop.f32.mrb[180].mxu0 }
 0x337   : > { %v3115_v61 = vadd.f32 %v5782_v37, %v7250_v7  ;;  %v3106_v23 = vpop.f32.mrb[181].mxu0 }
 0x338   : > { %v3107_v62 = vadd.f32 %v7250_v7, %v3106_v23  ;;  %v5783_v5 = vpop.f32.mrb[182].mxu0  ;;  %5856 = vmatprep.mubr.bf16.mxu1 %v3610_v36 }
 0x339   : > { %v3118_v46 = vadd.f32 %v5783_v5, %v7250_v7  ;;  %v3109_v33 = vpop.f32.mrb[183].mxu0  ;;  %5857 = vmatmul.mubr.bf16.gmra.mrb[112].mxu1 %v3611_v35  ;;  %v3576_v19 = vmax.f32 %v3115_v61, 0.0 }
 0x33a   : > { %v3110_v29 = vadd.f32 %v7250_v7, %v3109_v33  ;;  %v3574_v41 = vmax.f32 %v3107_v62, 0.0 }
 0x33b   : > { %v3577_v21 = vmax.f32 %v3118_v46, 0.0 }
 0x33c   : > { %v3575_v63 = vmax.f32 %v3110_v29, 0.0 }
 0x33d   : > { %v3613_v58 = vpack.c.bf16 %v3577_v21, %v3576_v19 }
 0x33e   : > { %v3612_v49 = vpack.c.bf16 %v3575_v63, %v3574_v41  ;;  %v5786_v6 = vpop.f32.mrb[184].mxu0 }
 0x33f   : > { %v3131_v13 = vadd.f32 %v5786_v6, %v7250_v7  ;;  %v3122_v56 = vpop.f32.mrb[185].mxu0 }
 0x340   : > { %v3123_v30 = vadd.f32 %v7250_v7, %v3122_v56  ;;  %v5787_v48 = vpop.f32.mrb[186].mxu0  ;;  %5860 = vmatprep.mubr.bf16.mxu1 %v3612_v49 }
 0x341   : > { %v3134_v26 = vadd.f32 %v5787_v48, %v7250_v7  ;;  %v3125_v59 = vpop.f32.mrb[187].mxu0  ;;  %5861 = vmatmul.mubr.bf16.gmra.mrb[116].mxu1 %v3613_v58  ;;  %v3580_v52 = vmax.f32 %v3131_v13, 0.0 }
 0x342   : > { %v3126_v43 = vadd.f32 %v7250_v7, %v3125_v59  ;;  %v3578_v39 = vmax.f32 %v3123_v30, 0.0 }
 0x343   : > { %v3581_v1 = vmax.f32 %v3134_v26, 0.0 }
 0x344   : > { %v3579_v10 = vmax.f32 %v3126_v43, 0.0 }
 0x345   : > { %v3615_v12 = vpack.c.bf16 %v3581_v1, %v3580_v52 }
 0x346   : > { %v3614_v16 = vpack.c.bf16 %v3579_v10, %v3578_v39  ;;  %v5790_v34 = vpop.f32.mrb[188].mxu0 }
 0x347   : > { %v3147_v35 = vadd.f32 %v5790_v34, %v7250_v7  ;;  %v3138_v36 = vpop.f32.mrb[189].mxu0 }
 0x348   : > { %v3139_v37 = vadd.f32 %v7250_v7, %v3138_v36  ;;  %v5791_v61 = vpop.f32.mrb[190].mxu0  ;;  %5864 = vmatprep.mubr.bf16.mxu1 %v3614_v16 }
 0x349   : > { %v3150_v23 = vadd.f32 %v5791_v61, %v7250_v7  ;;  %v3141_v62 = vpop.f32.mrb[191].mxu0  ;;  %5865 = vmatmul.mubr.bf16.gmra.mrb[120].mxu1 %v3615_v12  ;;  %v3584_v46 = vmax.f32 %v3147_v35, 0.0 }
 0x34a   : > { %v3142_v5 = vadd.f32 %v7250_v7, %v3141_v62  ;;  %v3582_v29 = vmax.f32 %v3139_v37, 0.0  ;;  %v7512_v7 = vld [vmem:[%s7922_s8] ss:$0 sm:$0xff] }
 0x34b   : > { %v3585_v33 = vmax.f32 %v3150_v23, 0.0 }
 0x34c   : > { %v3583_v19 = vmax.f32 %v3142_v5, 0.0 }
 0x34d   : > { %v3617_v21 = vpack.c.bf16 %v3585_v33, %v3584_v46 }
 0x34e   : > { %v3616_v41 = vpack.c.bf16 %v3583_v19, %v3582_v29 }
 0x350   : > { %5868 = vmatprep.mubr.bf16.mxu1 %v3616_v41 }
 0x351   : > { %5869 = vmatmul.mubr.bf16.gmra.mrb[124].mxu1 %v3617_v21 }
 0x352   : > { %5888 = vmatprep.mubr.bf16.mxu1 %v7268_v3 }
 0x359   : > { %5889 = vmatmul.mubr.bf16.vlgmr.msra.gmra.mrb[64].mxu1 %v7266_v0 }
 0x35a   : > { %5892 = vmatprep.mubr.bf16.mxu1 %v7278_v25 }
 0x361   : > { %5893 = vmatmul.mubr.bf16.gmra.mrb[68].mxu1 %v7276_v24 }
 0x362   : > { %5896 = vmatprep.mubr.bf16.mxu1 %v7288_v20 }
 0x369   : > { %5897 = vmatmul.mubr.bf16.gmra.mrb[72].mxu1 %v7286_v17 }
 0x36a   : > { %5900 = vmatprep.mubr.bf16.mxu1 %v7298_v8 }
 0x371   : > { %5901 = vmatmul.mubr.bf16.gmra.mrb[76].mxu1 %v7296_v51 }
 0x372   : > { %5904 = vmatprep.mubr.bf16.mxu1 %v7307_v27 }
 0x379   : > { %5905 = vmatmul.mubr.bf16.gmra.mrb[80].mxu1 %v7305_v38 }
 0x37a   : > { %5908 = vmatprep.mubr.bf16.mxu1 %v7315_v42 }
 0x381   : > { %5909 = vmatmul.mubr.bf16.gmra.mrb[84].mxu1 %v7313_v40 }
 0x382   : > { %5912 = vmatprep.mubr.bf16.mxu1 %v7323_v32 }
 0x389   : > { %5913 = vmatmul.mubr.bf16.gmra.mrb[88].mxu1 %v7321_v11 }
 0x38a   : > { %5916 = vmatprep.mubr.bf16.mxu1 %v7331_v45 }
 0x391   : > { %5917 = vmatmul.mubr.bf16.gmra.mrb[92].mxu1 %v7329_v15 }
 0x392   : > { %5920 = vmatprep.mubr.bf16.mxu1 %v7339_v28 }
 0x399   : > { %5921 = vmatmul.mubr.bf16.gmra.mrb[96].mxu1 %v7337_v60 }
 0x39a   : > { %5924 = vmatprep.mubr.bf16.mxu1 %v7347_v44 }
 0x3a1   : > { %5925 = vmatmul.mubr.bf16.gmra.mrb[100].mxu1 %v7345_v50 }
 0x3a2   : > { %5928 = vmatprep.mubr.bf16.mxu1 %v7355_v22 }
 0x3a9   : > { %5929 = vmatmul.mubr.bf16.gmra.mrb[104].mxu1 %v7353_v53 }
 0x3aa   : > { %5932 = vmatprep.mubr.bf16.mxu1 %v7363_v55 }
 0x3b1   : > { %5933 = vmatmul.mubr.bf16.gmra.mrb[108].mxu1 %v7361_v54 }
 0x3b2   : > { %5936 = vmatprep.mubr.bf16.mxu1 %v7371_v57 }
 0x3b9   : > { %5937 = vmatmul.mubr.bf16.gmra.mrb[112].mxu1 %v7369_v18 }
 0x3ba   : > { %5940 = vmatprep.mubr.bf16.mxu1 %v7379_v9 }
 0x3c1   : > { %5941 = vmatmul.mubr.bf16.gmra.mrb[116].mxu1 %v7377_v4 }
 0x3c2   : > { %5944 = vmatprep.mubr.bf16.mxu1 %v7387_v14 }
 0x3c9   : > { %5945 = vmatmul.mubr.bf16.gmra.mrb[120].mxu1 %v7385_v47 }
 0x3ca   : > { %5948 = vmatprep.mubr.bf16.mxu1 %v7395_v31 }
 0x3d1   : > { %5949 = vmatmul.mubr.bf16.gmra.mrb[124].mxu1 %v7393_v2 }
 0x42c   : > { %v5890_v0 = vpop.f32.mrb[64].mxu1 }
 0x42d   : > { %v4246_v3 = vmul.f32 0.5, %v5890_v0  ;;  %v3989_v24 = vpop.f32.mrb[65].mxu1 }
 0x42e   : > { %v4244_v25 = vmul.f32 0.5, %v3989_v24  ;;  %v5891_v17 = vpop.f32.mrb[66].mxu1 }
 0x42f   : > { %v4316_v20 = vadd.f32 %v7512_v7, %v4246_v3  ;;  %v4247_v51 = vmul.f32 0.5, %v5891_v17  ;;  %v3992_v8 = vpop.f32.mrb[67].mxu1 }
 0x430   : > { %v4314_v38 = vadd.f32 %v7512_v7, %v4244_v25  ;;  %v4245_v27 = vmul.f32 0.5, %v3992_v8 }
 0x431   : > { %4381 = vst.msk [vmem:[%s7516_s30 + $0x10] sm:$0xff] %vm4378_vm1, %v4316_v20  ;;  %v4317_v40 = vadd.f32 %v7512_v7, %v4247_v51 }
 0x432   : > { %4379 = vst.msk [vmem:[%s7516_s30] sm:$0xff] %vm4378_vm1, %v4314_v38  ;;  %v4315_v42 = vadd.f32 %v7512_v7, %v4245_v27 }
 0x433   : > { %4382 = vst.msk [vmem:[%s7516_s30 + $0x18] sm:$0xff] %vm4378_vm1, %v4317_v40 }
 0x434   : > { %4380 = vst.msk [vmem:[%s7516_s30 + $0x8] sm:$0xff] %vm4378_vm1, %v4315_v42  ;;  %v5894_v11 = vpop.f32.mrb[68].mxu1 }
 0x435   : > { %v4250_v32 = vmul.f32 0.5, %v5894_v11  ;;  %v4005_v15 = vpop.f32.mrb[69].mxu1 }
 0x436   : > { %v4248_v45 = vmul.f32 0.5, %v4005_v15  ;;  %v5895_v60 = vpop.f32.mrb[70].mxu1 }
 0x437   : > { %v4320_v28 = vadd.f32 %v7512_v7, %v4250_v32  ;;  %v4251_v50 = vmul.f32 0.5, %v5895_v60  ;;  %v4008_v44 = vpop.f32.mrb[71].mxu1 }
 0x438   : > { %v4318_v53 = vadd.f32 %v7512_v7, %v4248_v45  ;;  %v4249_v22 = vmul.f32 0.5, %v4008_v44 }
 0x439   : > { %4385 = vst.msk [vmem:[%s7516_s30 + $0x30] sm:$0xff] %vm4378_vm1, %v4320_v28  ;;  %v4321_v54 = vadd.f32 %v7512_v7, %v4251_v50 }
 0x43a   : > { %4383 = vst.msk [vmem:[%s7516_s30 + $0x20] sm:$0xff] %vm4378_vm1, %v4318_v53  ;;  %v4319_v55 = vadd.f32 %v7512_v7, %v4249_v22 }
 0x43b   : > { %4386 = vst.msk [vmem:[%s7516_s30 + $0x38] sm:$0xff] %vm4378_vm1, %v4321_v54 }
 0x43c   : > { %4384 = vst.msk [vmem:[%s7516_s30 + $0x28] sm:$0xff] %vm4378_vm1, %v4319_v55  ;;  %v5898_v18 = vpop.f32.mrb[72].mxu1 }
 0x43d   : > { %v4254_v57 = vmul.f32 0.5, %v5898_v18  ;;  %v4021_v4 = vpop.f32.mrb[73].mxu1 }
 0x43e   : > { %v4252_v9 = vmul.f32 0.5, %v4021_v4  ;;  %v5899_v47 = vpop.f32.mrb[74].mxu1 }
 0x43f   : > { %v4324_v14 = vadd.f32 %v7512_v7, %v4254_v57  ;;  %v4255_v2 = vmul.f32 0.5, %v5899_v47  ;;  %v4024_v31 = vpop.f32.mrb[75].mxu1 }
 0x440   : > { %v4322_v63 = vadd.f32 %v7512_v7, %v4252_v9  ;;  %v4253_v58 = vmul.f32 0.5, %v4024_v31 }
 0x441   : > { %4389 = vst.msk [vmem:[%s7516_s30 + $0x50] sm:$0xff] %vm4378_vm1, %v4324_v14  ;;  %v4325_v49 = vadd.f32 %v7512_v7, %v4255_v2 }
 0x442   : > { %4387 = vst.msk [vmem:[%s7516_s30 + $0x40] sm:$0xff] %vm4378_vm1, %v4322_v63  ;;  %v4323_v6 = vadd.f32 %v7512_v7, %v4253_v58 }
 0x443   : > { %4390 = vst.msk [vmem:[%s7516_s30 + $0x58] sm:$0xff] %vm4378_vm1, %v4325_v49 }
 0x444   : > { %4388 = vst.msk [vmem:[%s7516_s30 + $0x48] sm:$0xff] %vm4378_vm1, %v4323_v6  ;;  %v5902_v13 = vpop.f32.mrb[76].mxu1 }
 0x445   : > { %v4258_v56 = vmul.f32 0.5, %v5902_v13  ;;  %v4037_v30 = vpop.f32.mrb[77].mxu1 }
 0x446   : > { %v4256_v48 = vmul.f32 0.5, %v4037_v30  ;;  %v5903_v26 = vpop.f32.mrb[78].mxu1 }
 0x447   : > { %v4328_v59 = vadd.f32 %v7512_v7, %v4258_v56  ;;  %v4259_v43 = vmul.f32 0.5, %v5903_v26  ;;  %v4040_v52 = vpop.f32.mrb[79].mxu1 }
 0x448   : > { %v4326_v1 = vadd.f32 %v7512_v7, %v4256_v48  ;;  %v4257_v39 = vmul.f32 0.5, %v4040_v52 }
 0x449   : > { %4393 = vst.msk [vmem:[%s7516_s30 + $0x70] sm:$0xff] %vm4378_vm1, %v4328_v59  ;;  %v4329_v10 = vadd.f32 %v7512_v7, %v4259_v43 }
 0x44a   : > { %4391 = vst.msk [vmem:[%s7516_s30 + $0x60] sm:$0xff] %vm4378_vm1, %v4326_v1  ;;  %v4327_v12 = vadd.f32 %v7512_v7, %v4257_v39 }
 0x44b   : > { %4394 = vst.msk [vmem:[%s7516_s30 + $0x78] sm:$0xff] %vm4378_vm1, %v4329_v10 }
 0x44c   : > { %4392 = vst.msk [vmem:[%s7516_s30 + $0x68] sm:$0xff] %vm4378_vm1, %v4327_v12  ;;  %v5906_v16 = vpop.f32.mrb[80].mxu1 }
 0x44d   : > { %v4262_v34 = vmul.f32 0.5, %v5906_v16  ;;  %v4053_v35 = vpop.f32.mrb[81].mxu1 }
 0x44e   : > { %v4260_v36 = vmul.f32 0.5, %v4053_v35  ;;  %v5907_v37 = vpop.f32.mrb[82].mxu1 }
 0x44f   : > { %v4332_v61 = vadd.f32 %v7512_v7, %v4262_v34  ;;  %v4263_v23 = vmul.f32 0.5, %v5907_v37  ;;  %v4056_v62 = vpop.f32.mrb[83].mxu1 }
 0x450   : > { %v4330_v5 = vadd.f32 %v7512_v7, %v4260_v36  ;;  %v4261_v46 = vmul.f32 0.5, %v4056_v62 }
 0x451   : > { %4397 = vst.msk [vmem:[%s7516_s30 + $0x90] sm:$0xff] %vm4378_vm1, %v4332_v61  ;;  %v4333_v33 = vadd.f32 %v7512_v7, %v4263_v23 }
 0x452   : > { %4395 = vst.msk [vmem:[%s7516_s30 + $0x80] sm:$0xff] %vm4378_vm1, %v4330_v5  ;;  %v4331_v29 = vadd.f32 %v7512_v7, %v4261_v46 }
 0x453   : > { %4398 = vst.msk [vmem:[%s7516_s30 + $0x98] sm:$0xff] %vm4378_vm1, %v4333_v33 }
 0x454   : > { %4396 = vst.msk [vmem:[%s7516_s30 + $0x88] sm:$0xff] %vm4378_vm1, %v4331_v29  ;;  %v5910_v19 = vpop.f32.mrb[84].mxu1 }
 0x455   : > { %v4266_v21 = vmul.f32 0.5, %v5910_v19  ;;  %v4069_v41 = vpop.f32.mrb[85].mxu1 }
 0x456   : > { %v4264_v0 = vmul.f32 0.5, %v4069_v41  ;;  %v5911_v3 = vpop.f32.mrb[86].mxu1 }
 0x457   : > { %v4336_v24 = vadd.f32 %v7512_v7, %v4266_v21  ;;  %v4267_v25 = vmul.f32 0.5, %v5911_v3  ;;  %v4072_v17 = vpop.f32.mrb[87].mxu1 }
 0x458   : > { %v4334_v20 = vadd.f32 %v7512_v7, %v4264_v0  ;;  %v4265_v51 = vmul.f32 0.5, %v4072_v17 }
 0x459   : > { %4401 = vst.msk [vmem:[%s7516_s30 + $0xb0] sm:$0xff] %vm4378_vm1, %v4336_v24  ;;  %v4337_v8 = vadd.f32 %v7512_v7, %v4267_v25 }
 0x45a   : > { %4399 = vst.msk [vmem:[%s7516_s30 + $0xa0] sm:$0xff] %vm4378_vm1, %v4334_v20  ;;  %v4335_v38 = vadd.f32 %v7512_v7, %v4265_v51 }
 0x45b   : > { %4402 = vst.msk [vmem:[%s7516_s30 + $0xb8] sm:$0xff] %vm4378_vm1, %v4337_v8 }
 0x45c   : > { %4400 = vst.msk [vmem:[%s7516_s30 + $0xa8] sm:$0xff] %vm4378_vm1, %v4335_v38  ;;  %v5914_v27 = vpop.f32.mrb[88].mxu1 }
 0x45d   : > { %v4270_v40 = vmul.f32 0.5, %v5914_v27  ;;  %v4085_v42 = vpop.f32.mrb[89].mxu1 }
 0x45e   : > { %v4268_v11 = vmul.f32 0.5, %v4085_v42  ;;  %v5915_v32 = vpop.f32.mrb[90].mxu1 }
 0x45f   : > { %v4340_v15 = vadd.f32 %v7512_v7, %v4270_v40  ;;  %v4271_v45 = vmul.f32 0.5, %v5915_v32  ;;  %v4088_v60 = vpop.f32.mrb[91].mxu1 }
 0x460   : > { %v4338_v28 = vadd.f32 %v7512_v7, %v4268_v11  ;;  %v4269_v50 = vmul.f32 0.5, %v4088_v60 }
 0x461   : > { %4405 = vst.msk [vmem:[%s7516_s30 + $0xd0] sm:$0xff] %vm4378_vm1, %v4340_v15  ;;  %v4341_v44 = vadd.f32 %v7512_v7, %v4271_v45 }
 0x462   : > { %4403 = vst.msk [vmem:[%s7516_s30 + $0xc0] sm:$0xff] %vm4378_vm1, %v4338_v28  ;;  %v4339_v53 = vadd.f32 %v7512_v7, %v4269_v50 }
 0x463   : > { %4406 = vst.msk [vmem:[%s7516_s30 + $0xd8] sm:$0xff] %vm4378_vm1, %v4341_v44 }
 0x464   : > { %4404 = vst.msk [vmem:[%s7516_s30 + $0xc8] sm:$0xff] %vm4378_vm1, %v4339_v53  ;;  %v5918_v22 = vpop.f32.mrb[92].mxu1 }
 0x465   : > { %v4274_v54 = vmul.f32 0.5, %v5918_v22  ;;  %v4101_v55 = vpop.f32.mrb[93].mxu1 }
 0x466   : > { %v4272_v18 = vmul.f32 0.5, %v4101_v55  ;;  %v5919_v57 = vpop.f32.mrb[94].mxu1 }
 0x467   : > { %v4344_v4 = vadd.f32 %v7512_v7, %v4274_v54  ;;  %v4275_v9 = vmul.f32 0.5, %v5919_v57  ;;  %v4104_v47 = vpop.f32.mrb[95].mxu1 }
 0x468   : > { %v4342_v14 = vadd.f32 %v7512_v7, %v4272_v18  ;;  %v4273_v2 = vmul.f32 0.5, %v4104_v47 }
 0x469   : > { %4409 = vst.msk [vmem:[%s7516_s30 + $0xf0] sm:$0xff] %vm4378_vm1, %v4344_v4  ;;  %v4345_v31 = vadd.f32 %v7512_v7, %v4275_v9 }
 0x46a   : > { %4407 = vst.msk [vmem:[%s7516_s30 + $0xe0] sm:$0xff] %vm4378_vm1, %v4342_v14  ;;  %v4343_v63 = vadd.f32 %v7512_v7, %v4273_v2 }
 0x46b   : > { %4410 = vst.msk [vmem:[%s7516_s30 + $0xf8] sm:$0xff] %vm4378_vm1, %v4345_v31 }
 0x46c   : > { %4408 = vst.msk [vmem:[%s7516_s30 + $0xe8] sm:$0xff] %vm4378_vm1, %v4343_v63  ;;  %v5922_v58 = vpop.f32.mrb[96].mxu1 }
 0x46d   : > { %v4278_v49 = vmul.f32 0.5, %v5922_v58  ;;  %v4117_v6 = vpop.f32.mrb[97].mxu1 }
 0x46e   : > { %v4276_v13 = vmul.f32 0.5, %v4117_v6  ;;  %v5923_v56 = vpop.f32.mrb[98].mxu1 }
 0x46f   : > { %v4348_v30 = vadd.f32 %v7512_v7, %v4278_v49  ;;  %v4279_v48 = vmul.f32 0.5, %v5923_v56  ;;  %v4120_v26 = vpop.f32.mrb[99].mxu1 }
 0x470   : > { %v4346_v59 = vadd.f32 %v7512_v7, %v4276_v13  ;;  %v4277_v43 = vmul.f32 0.5, %v4120_v26 }
 0x471   : > { %4413 = vst.msk [vmem:[%s7516_s30 + $0x110] sm:$0xff] %vm4378_vm1, %v4348_v30  ;;  %v4349_v52 = vadd.f32 %v7512_v7, %v4279_v48 }
 0x472   : > { %4411 = vst.msk [vmem:[%s7516_s30 + $0x100] sm:$0xff] %vm4378_vm1, %v4346_v59  ;;  %v4347_v1 = vadd.f32 %v7512_v7, %v4277_v43 }
 0x473   : > { %4414 = vst.msk [vmem:[%s7516_s30 + $0x118] sm:$0xff] %vm4378_vm1, %v4349_v52 }
 0x474   : > { %4412 = vst.msk [vmem:[%s7516_s30 + $0x108] sm:$0xff] %vm4378_vm1, %v4347_v1  ;;  %v5926_v39 = vpop.f32.mrb[100].mxu1 }
 0x475   : > { %v4282_v10 = vmul.f32 0.5, %v5926_v39  ;;  %v4133_v12 = vpop.f32.mrb[101].mxu1 }
 0x476   : > { %v4280_v16 = vmul.f32 0.5, %v4133_v12  ;;  %v5927_v34 = vpop.f32.mrb[102].mxu1 }
 0x477   : > { %v4352_v35 = vadd.f32 %v7512_v7, %v4282_v10  ;;  %v4283_v36 = vmul.f32 0.5, %v5927_v34  ;;  %v4136_v37 = vpop.f32.mrb[103].mxu1 }
 0x478   : > { %v4350_v61 = vadd.f32 %v7512_v7, %v4280_v16  ;;  %v4281_v23 = vmul.f32 0.5, %v4136_v37 }
 0x479   : > { %4417 = vst.msk [vmem:[%s7516_s30 + $0x130] sm:$0xff] %vm4378_vm1, %v4352_v35  ;;  %v4353_v62 = vadd.f32 %v7512_v7, %v4283_v36 }
 0x47a   : > { %4415 = vst.msk [vmem:[%s7516_s30 + $0x120] sm:$0xff] %vm4378_vm1, %v4350_v61  ;;  %v4351_v5 = vadd.f32 %v7512_v7, %v4281_v23 }
 0x47b   : > { %4418 = vst.msk [vmem:[%s7516_s30 + $0x138] sm:$0xff] %vm4378_vm1, %v4353_v62 }
 0x47c   : > { %4416 = vst.msk [vmem:[%s7516_s30 + $0x128] sm:$0xff] %vm4378_vm1, %v4351_v5  ;;  %v5930_v46 = vpop.f32.mrb[104].mxu1 }
 0x47d   : > { %v4286_v33 = vmul.f32 0.5, %v5930_v46  ;;  %v4149_v29 = vpop.f32.mrb[105].mxu1 }
 0x47e   : > { %v4284_v19 = vmul.f32 0.5, %v4149_v29  ;;  %v5931_v21 = vpop.f32.mrb[106].mxu1 }
 0x47f   : > { %v4356_v41 = vadd.f32 %v7512_v7, %v4286_v33  ;;  %v4287_v0 = vmul.f32 0.5, %v5931_v21  ;;  %v4152_v3 = vpop.f32.mrb[107].mxu1 }
 0x480   : > { %v4354_v24 = vadd.f32 %v7512_v7, %v4284_v19  ;;  %v4285_v25 = vmul.f32 0.5, %v4152_v3 }
 0x481   : > { %4421 = vst.msk [vmem:[%s7516_s30 + $0x150] sm:$0xff] %vm4378_vm1, %v4356_v41  ;;  %v4357_v17 = vadd.f32 %v7512_v7, %v4287_v0 }
 0x482   : > { %4419 = vst.msk [vmem:[%s7516_s30 + $0x140] sm:$0xff] %vm4378_vm1, %v4354_v24  ;;  %v4355_v20 = vadd.f32 %v7512_v7, %v4285_v25 }
 0x483   : > { %4422 = vst.msk [vmem:[%s7516_s30 + $0x158] sm:$0xff] %vm4378_vm1, %v4357_v17 }
 0x484   : > { %4420 = vst.msk [vmem:[%s7516_s30 + $0x148] sm:$0xff] %vm4378_vm1, %v4355_v20  ;;  %v5934_v51 = vpop.f32.mrb[108].mxu1 }
 0x485   : > { %v4290_v8 = vmul.f32 0.5, %v5934_v51  ;;  %v4165_v38 = vpop.f32.mrb[109].mxu1 }
 0x486   : > { %v4288_v27 = vmul.f32 0.5, %v4165_v38  ;;  %v5935_v40 = vpop.f32.mrb[110].mxu1 }
 0x487   : > { %v4360_v42 = vadd.f32 %v7512_v7, %v4290_v8  ;;  %v4291_v11 = vmul.f32 0.5, %v5935_v40  ;;  %v4168_v32 = vpop.f32.mrb[111].mxu1 }
 0x488   : > { %v4358_v15 = vadd.f32 %v7512_v7, %v4288_v27  ;;  %v4289_v45 = vmul.f32 0.5, %v4168_v32 }
 0x489   : > { %4425 = vst.msk [vmem:[%s7516_s30 + $0x170] sm:$0xff] %vm4378_vm1, %v4360_v42  ;;  %v4361_v60 = vadd.f32 %v7512_v7, %v4291_v11 }
 0x48a   : > { %4423 = vst.msk [vmem:[%s7516_s30 + $0x160] sm:$0xff] %vm4378_vm1, %v4358_v15  ;;  %v4359_v28 = vadd.f32 %v7512_v7, %v4289_v45 }
 0x48b   : > { %4426 = vst.msk [vmem:[%s7516_s30 + $0x178] sm:$0xff] %vm4378_vm1, %v4361_v60 }
 0x48c   : > { %4424 = vst.msk [vmem:[%s7516_s30 + $0x168] sm:$0xff] %vm4378_vm1, %v4359_v28  ;;  %v5938_v50 = vpop.f32.mrb[112].mxu1 }
 0x48d   : > { %v4294_v44 = vmul.f32 0.5, %v5938_v50  ;;  %v4181_v53 = vpop.f32.mrb[113].mxu1 }
 0x48e   : > { %v4292_v22 = vmul.f32 0.5, %v4181_v53  ;;  %v5939_v54 = vpop.f32.mrb[114].mxu1 }
 0x48f   : > { %v4364_v55 = vadd.f32 %v7512_v7, %v4294_v44  ;;  %v4295_v18 = vmul.f32 0.5, %v5939_v54  ;;  %v4184_v57 = vpop.f32.mrb[115].mxu1 }
 0x490   : > { %v4362_v4 = vadd.f32 %v7512_v7, %v4292_v22  ;;  %v4293_v9 = vmul.f32 0.5, %v4184_v57 }
 0x491   : > { %4429 = vst.msk [vmem:[%s7516_s30 + $0x190] sm:$0xff] %vm4378_vm1, %v4364_v55  ;;  %v4365_v47 = vadd.f32 %v7512_v7, %v4295_v18 }
 0x492   : > { %4427 = vst.msk [vmem:[%s7516_s30 + $0x180] sm:$0xff] %vm4378_vm1, %v4362_v4  ;;  %v4363_v14 = vadd.f32 %v7512_v7, %v4293_v9 }
 0x493   : > { %4430 = vst.msk [vmem:[%s7516_s30 + $0x198] sm:$0xff] %vm4378_vm1, %v4365_v47 }
 0x494   : > { %4428 = vst.msk [vmem:[%s7516_s30 + $0x188] sm:$0xff] %vm4378_vm1, %v4363_v14  ;;  %v5942_v2 = vpop.f32.mrb[116].mxu1 }
 0x495   : > { %v4298_v31 = vmul.f32 0.5, %v5942_v2  ;;  %v4197_v63 = vpop.f32.mrb[117].mxu1 }
 0x496   : > { %v4296_v58 = vmul.f32 0.5, %v4197_v63  ;;  %v5943_v49 = vpop.f32.mrb[118].mxu1 }
 0x497   : > { %v4368_v6 = vadd.f32 %v7512_v7, %v4298_v31  ;;  %v4299_v13 = vmul.f32 0.5, %v5943_v49  ;;  %v4200_v56 = vpop.f32.mrb[119].mxu1 }
 0x498   : > { %v4366_v30 = vadd.f32 %v7512_v7, %v4296_v58  ;;  %v4297_v48 = vmul.f32 0.5, %v4200_v56 }
 0x499   : > { %4433 = vst.msk [vmem:[%s7516_s30 + $0x1b0] sm:$0xff] %vm4378_vm1, %v4368_v6  ;;  %v4369_v26 = vadd.f32 %v7512_v7, %v4299_v13 }
 0x49a   : > { %4431 = vst.msk [vmem:[%s7516_s30 + $0x1a0] sm:$0xff] %vm4378_vm1, %v4366_v30  ;;  %v4367_v59 = vadd.f32 %v7512_v7, %v4297_v48 }
 0x49b   : > { %4434 = vst.msk [vmem:[%s7516_s30 + $0x1b8] sm:$0xff] %vm4378_vm1, %v4369_v26 }
 0x49c   : > { %4432 = vst.msk [vmem:[%s7516_s30 + $0x1a8] sm:$0xff] %vm4378_vm1, %v4367_v59  ;;  %v5946_v43 = vpop.f32.mrb[120].mxu1 }
 0x49d   : > { %v4302_v52 = vmul.f32 0.5, %v5946_v43  ;;  %v4213_v1 = vpop.f32.mrb[121].mxu1 }
 0x49e   : > { %v4300_v39 = vmul.f32 0.5, %v4213_v1  ;;  %v5947_v10 = vpop.f32.mrb[122].mxu1 }
 0x49f   : > { %v4372_v12 = vadd.f32 %v7512_v7, %v4302_v52  ;;  %v4303_v16 = vmul.f32 0.5, %v5947_v10  ;;  %v4216_v34 = vpop.f32.mrb[123].mxu1 }
 0x4a0   : > { %v4370_v35 = vadd.f32 %v7512_v7, %v4300_v39  ;;  %v4301_v36 = vmul.f32 0.5, %v4216_v34 }
 0x4a1   : > { %4437 = vst.msk [vmem:[%s7516_s30 + $0x1d0] sm:$0xff] %vm4378_vm1, %v4372_v12  ;;  %v4373_v37 = vadd.f32 %v7512_v7, %v4303_v16 }
 0x4a2   : > { %4435 = vst.msk [vmem:[%s7516_s30 + $0x1c0] sm:$0xff] %vm4378_vm1, %v4370_v35  ;;  %v4371_v61 = vadd.f32 %v7512_v7, %v4301_v36 }
 0x4a3   : > { %4438 = vst.msk [vmem:[%s7516_s30 + $0x1d8] sm:$0xff] %vm4378_vm1, %v4373_v37 }
 0x4a4   : > { %4436 = vst.msk [vmem:[%s7516_s30 + $0x1c8] sm:$0xff] %vm4378_vm1, %v4371_v61  ;;  %v5950_v23 = vpop.f32.mrb[124].mxu1 }
 0x4a5   : > { %v4306_v62 = vmul.f32 0.5, %v5950_v23  ;;  %v4229_v5 = vpop.f32.mrb[125].mxu1 }
 0x4a6   : > { %v4304_v46 = vmul.f32 0.5, %v4229_v5  ;;  %v5951_v33 = vpop.f32.mrb[126].mxu1  ;;  %4449 = sbr.rel (!%p6413_p4) target bundleno = 1269 (0x4f5), region = 60 }
 0x4a7   : > { %v4376_v29 = vadd.f32 %v7512_v7, %v4306_v62  ;;  %v4307_v19 = vmul.f32 0.5, %v5951_v33  ;;  %v4232_v21 = vpop.f32.mrb[127].mxu1 }
 0x4a8   : > { %v4374_v41 = vadd.f32 %v7512_v7, %v4304_v46  ;;  %v4305_v0 = vmul.f32 0.5, %v4232_v21 }
 0x4a9   : > { %4441 = vst.msk [vmem:[%s7516_s30 + $0x1f0] sm:$0xff] %vm4378_vm1, %v4376_v29  ;;  %v4377_v3 = vadd.f32 %v7512_v7, %v4307_v19 }
 0x4aa   : > { %4439 = vst.msk [vmem:[%s7516_s30 + $0x1e0] sm:$0xff] %vm4378_vm1, %v4374_v41  ;;  %v4375_v24 = vadd.f32 %v7512_v7, %v4305_v0 }
 0x4ab   : > { %4442 = vst.msk [vmem:[%s7516_s30 + $0x1f8] sm:$0xff] %vm4378_vm1, %v4377_v3 }
 0x4ac   : > { %4440 = vst.msk [vmem:[%s7516_s30 + $0x1e8] sm:$0xff] %vm4378_vm1, %v4375_v24 }
 0x4ad   : > { %s7961_s29 = smov (!%p4452_p8, %s4451_s29), 64 }
 0x4ae   : > { %s5082_s19 = sshll.u32 %s7961_s29, 7 }
 0x4af   : > { %p5085_p9 = scmp.eq.s32.totalorder %s5082_s19, 0 }
 0x4b0   : > { %s7721_s21 = sshrl.u32 (!%p5085_p9), %s7961_s29, 6 }
 0x4b1   : > { %4460 = sbr.rel (%p5085_p9) target bundleno = 1269 (0x4f5), region = 64  ;;  %p5086_p10 = scmp.le.s32.totalorder (!%p5085_p9), %s7721_s21, 0 }
 0x4b8   : > { %4872 = sbr.rel (%p5086_p10) target bundleno = 1248 (0x4e0), region = 143  ;;  %s7952_s12 = smov (!%p5086_p10), %s7715_s18 }
 0x4b9   : > { %s7953_s17 = smov (!%p5086_p10), %s7516_s30  ;;  %s7730_s20 = smov (!%p5086_p10), 0  }
 0x4ba   : > { %s7732_s22 = smov (!%p5086_p10), 0  }
 0x4bf LB: >> { %v4648_v7 = vld [vmem:[%s6312_s17] sm:$0xff]  ;;  %v4650_v25 = vld [vmem:[%s6312_s17 + $0x8] sm:$0xff]  ;;  %v4652_v17 = vld [vmem:[%s6312_s17 + $0x10] sm:$0xff]  ;;  %s4776_s23 = sadd.s32 1, %s6316_s20  ;;  %s4642_s22 = sadd.s32 1, %s6320_s22   ;;  %s6320_s22 = sphi %s7732_s22, %s4642_s22   ;;  %s6316_s20 = sphi %s7730_s20, %s7956_s20   ;;  %s6312_s17 = sphi %s7953_s17, %s7955_s17   ;;  %s6308_s12 = sphi %s7952_s12, %s7954_s12  }
 0x4c0   : >> { %4649 = vst [vmem:[%s6308_s12] sm:$0xff] %v4648_v7  ;;  %4651 = vst [vmem:[%s6308_s12 + $0x8] sm:$0xff] %v4650_v25  ;;  %v4654_v20 = vld [vmem:[%s6312_s17 + $0x18] sm:$0xff]  ;;  %v4656_v51 = vld [vmem:[%s6312_s17 + $0x20] sm:$0xff]  ;;  %p4777_p11 = scmp.ge.s32.totalorder %s4776_s23, %s7721_s21  ;;  %p4641_p12 = scmp.ge.s32.totalorder %s4642_s22, %s7721_s21 }
 0x4c1   : >> { %4653 = vst [vmem:[%s6308_s12 + $0x10] sm:$0xff] %v4652_v17  ;;  %v4658_v8 = vld [vmem:[%s6312_s17 + $0x28] sm:$0xff]  ;;  %4655 = vst [vmem:[%s6308_s12 + $0x18] sm:$0xff] %v4654_v20  ;;  %v4660_v38 = vld [vmem:[%s6312_s17 + $0x30] sm:$0xff] }
 0x4c2   : >> { %4657 = vst [vmem:[%s6308_s12 + $0x20] sm:$0xff] %v4656_v51  ;;  %4659 = vst [vmem:[%s6308_s12 + $0x28] sm:$0xff] %v4658_v8  ;;  %v4662_v27 = vld [vmem:[%s6312_s17 + $0x38] sm:$0xff]  ;;  %v4664_v40 = vld [vmem:[%s6312_s17 + $0x40] sm:$0xff]  ;;  %s7963_s23 = smov (%p4777_p11, %s4776_s23), 0 }
 0x4c3   : >> { %4661 = vst [vmem:[%s6308_s12 + $0x30] sm:$0xff] %v4660_v38  ;;  %4663 = vst [vmem:[%s6308_s12 + $0x38] sm:$0xff] %v4662_v27  ;;  %v4666_v42 = vld [vmem:[%s6312_s17 + $0x48] sm:$0xff]  ;;  %v4668_v11 = vld [vmem:[%s6312_s17 + $0x50] sm:$0xff]  ;;  %s5087_s24 = sshll.u32 %s7963_s23, 9  ;;  %s7956_s20 = smov %s7963_s23 }
 0x4c4   : >> { %4665 = vst [vmem:[%s6308_s12 + $0x40] sm:$0xff] %v4664_v40  ;;  %v4670_v32 = vld [vmem:[%s6312_s17 + $0x58] sm:$0xff]  ;;  %4667 = vst [vmem:[%s6308_s12 + $0x48] sm:$0xff] %v4666_v42  ;;  %v4672_v15 = vld [vmem:[%s6312_s17 + $0x60] sm:$0xff]  ;;  %s7788_s25 = scalar_lea.vmem %s7516_s30, %s5087_s24 [#allocation3]   ;;  %s7791_s26 = scalar_lea.vmem %s7715_s18, %s5087_s24  }
 0x4c5   : >> { %4669 = vst [vmem:[%s6308_s12 + $0x50] sm:$0xff] %v4668_v11  ;;  %4671 = vst [vmem:[%s6308_s12 + $0x58] sm:$0xff] %v4670_v32  ;;  %v4674_v45 = vld [vmem:[%s6312_s17 + $0x68] sm:$0xff]  ;;  %v4676_v60 = vld [vmem:[%s6312_s17 + $0x70] sm:$0xff] }
 0x4c6   : >> { %4673 = vst [vmem:[%s6308_s12 + $0x60] sm:$0xff] %v4672_v15  ;;  %4675 = vst [vmem:[%s6308_s12 + $0x68] sm:$0xff] %v4674_v45  ;;  %v4678_v28 = vld [vmem:[%s6312_s17 + $0x78] sm:$0xff]  ;;  %v4680_v50 = vld [vmem:[%s6312_s17 + $0x80] sm:$0xff] }
 0x4c7   : >> { %4677 = vst [vmem:[%s6308_s12 + $0x70] sm:$0xff] %v4676_v60  ;;  %v4682_v44 = vld [vmem:[%s6312_s17 + $0x88] sm:$0xff]  ;;  %4679 = vst [vmem:[%s6308_s12 + $0x78] sm:$0xff] %v4678_v28  ;;  %v4684_v53 = vld [vmem:[%s6312_s17 + $0x90] sm:$0xff] }
 0x4c8   : >> { %4681 = vst [vmem:[%s6308_s12 + $0x80] sm:$0xff] %v4680_v50  ;;  %4683 = vst [vmem:[%s6308_s12 + $0x88] sm:$0xff] %v4682_v44  ;;  %v4686_v22 = vld [vmem:[%s6312_s17 + $0x98] sm:$0xff]  ;;  %v4688_v54 = vld [vmem:[%s6312_s17 + $0xa0] sm:$0xff] }
 0x4c9   : >> { %4685 = vst [vmem:[%s6308_s12 + $0x90] sm:$0xff] %v4684_v53  ;;  %4687 = vst [vmem:[%s6308_s12 + $0x98] sm:$0xff] %v4686_v22  ;;  %v4690_v55 = vld [vmem:[%s6312_s17 + $0xa8] sm:$0xff]  ;;  %v4692_v18 = vld [vmem:[%s6312_s17 + $0xb0] sm:$0xff] }
 0x4ca   : >> { %4689 = vst [vmem:[%s6308_s12 + $0xa0] sm:$0xff] %v4688_v54  ;;  %v4694_v57 = vld [vmem:[%s6312_s17 + $0xb8] sm:$0xff]  ;;  %4691 = vst [vmem:[%s6308_s12 + $0xa8] sm:$0xff] %v4690_v55  ;;  %v4696_v4 = vld [vmem:[%s6312_s17 + $0xc0] sm:$0xff] }
 0x4cb   : >> { %4693 = vst [vmem:[%s6308_s12 + $0xb0] sm:$0xff] %v4692_v18  ;;  %4695 = vst [vmem:[%s6308_s12 + $0xb8] sm:$0xff] %v4694_v57  ;;  %v4698_v9 = vld [vmem:[%s6312_s17 + $0xc8] sm:$0xff]  ;;  %v4700_v47 = vld [vmem:[%s6312_s17 + $0xd0] sm:$0xff] }
 0x4cc   : >> { %4697 = vst [vmem:[%s6308_s12 + $0xc0] sm:$0xff] %v4696_v4  ;;  %4699 = vst [vmem:[%s6308_s12 + $0xc8] sm:$0xff] %v4698_v9  ;;  %v4702_v14 = vld [vmem:[%s6312_s17 + $0xd8] sm:$0xff]  ;;  %v4704_v2 = vld [vmem:[%s6312_s17 + $0xe0] sm:$0xff] }
 0x4cd   : >> { %4701 = vst [vmem:[%s6308_s12 + $0xd0] sm:$0xff] %v4700_v47  ;;  %v4706_v31 = vld [vmem:[%s6312_s17 + $0xe8] sm:$0xff]  ;;  %4703 = vst [vmem:[%s6308_s12 + $0xd8] sm:$0xff] %v4702_v14  ;;  %v4708_v63 = vld [vmem:[%s6312_s17 + $0xf0] sm:$0xff] }
 0x4ce   : >> { %4705 = vst [vmem:[%s6308_s12 + $0xe0] sm:$0xff] %v4704_v2  ;;  %4707 = vst [vmem:[%s6308_s12 + $0xe8] sm:$0xff] %v4706_v31  ;;  %v4710_v58 = vld [vmem:[%s6312_s17 + $0xf8] sm:$0xff]  ;;  %v4712_v49 = vld [vmem:[%s6312_s17 + $0x100] sm:$0xff] }
 0x4cf   : >> { %4709 = vst [vmem:[%s6308_s12 + $0xf0] sm:$0xff] %v4708_v63  ;;  %4711 = vst [vmem:[%s6308_s12 + $0xf8] sm:$0xff] %v4710_v58  ;;  %v4714_v6 = vld [vmem:[%s6312_s17 + $0x108] sm:$0xff]  ;;  %v4716_v13 = vld [vmem:[%s6312_s17 + $0x110] sm:$0xff] }
 0x4d0   : >> { %4713 = vst [vmem:[%s6308_s12 + $0x100] sm:$0xff] %v4712_v49  ;;  %v4718_v56 = vld [vmem:[%s6312_s17 + $0x118] sm:$0xff]  ;;  %4715 = vst [vmem:[%s6308_s12 + $0x108] sm:$0xff] %v4714_v6  ;;  %v4720_v30 = vld [vmem:[%s6312_s17 + $0x120] sm:$0xff] }
 0x4d1   : >> { %4717 = vst [vmem:[%s6308_s12 + $0x110] sm:$0xff] %v4716_v13  ;;  %4719 = vst [vmem:[%s6308_s12 + $0x118] sm:$0xff] %v4718_v56  ;;  %v4722_v48 = vld [vmem:[%s6312_s17 + $0x128] sm:$0xff]  ;;  %v4724_v26 = vld [vmem:[%s6312_s17 + $0x130] sm:$0xff] }
 0x4d2   : >> { %4721 = vst [vmem:[%s6308_s12 + $0x120] sm:$0xff] %v4720_v30  ;;  %4723 = vst [vmem:[%s6308_s12 + $0x128] sm:$0xff] %v4722_v48  ;;  %v4726_v59 = vld [vmem:[%s6312_s17 + $0x138] sm:$0xff]  ;;  %v4728_v43 = vld [vmem:[%s6312_s17 + $0x140] sm:$0xff] }
 0x4d3   : >> { %4725 = vst [vmem:[%s6308_s12 + $0x130] sm:$0xff] %v4724_v26  ;;  %v4730_v52 = vld [vmem:[%s6312_s17 + $0x148] sm:$0xff]  ;;  %4727 = vst [vmem:[%s6308_s12 + $0x138] sm:$0xff] %v4726_v59  ;;  %v4732_v1 = vld [vmem:[%s6312_s17 + $0x150] sm:$0xff] }
 0x4d4   : >> { %4729 = vst [vmem:[%s6308_s12 + $0x140] sm:$0xff] %v4728_v43  ;;  %4731 = vst [vmem:[%s6308_s12 + $0x148] sm:$0xff] %v4730_v52  ;;  %v4734_v39 = vld [vmem:[%s6312_s17 + $0x158] sm:$0xff]  ;;  %v4736_v10 = vld [vmem:[%s6312_s17 + $0x160] sm:$0xff] }
 0x4d5   : >> { %4733 = vst [vmem:[%s6308_s12 + $0x150] sm:$0xff] %v4732_v1  ;;  %4735 = vst [vmem:[%s6308_s12 + $0x158] sm:$0xff] %v4734_v39  ;;  %v4738_v12 = vld [vmem:[%s6312_s17 + $0x168] sm:$0xff]  ;;  %v4740_v16 = vld [vmem:[%s6312_s17 + $0x170] sm:$0xff] }
 0x4d6   : >> { %4737 = vst [vmem:[%s6308_s12 + $0x160] sm:$0xff] %v4736_v10  ;;  %v4742_v34 = vld [vmem:[%s6312_s17 + $0x178] sm:$0xff]  ;;  %4739 = vst [vmem:[%s6308_s12 + $0x168] sm:$0xff] %v4738_v12  ;;  %v4744_v35 = vld [vmem:[%s6312_s17 + $0x180] sm:$0xff] }
 0x4d7   : >> { %4741 = vst [vmem:[%s6308_s12 + $0x170] sm:$0xff] %v4740_v16  ;;  %4743 = vst [vmem:[%s6308_s12 + $0x178] sm:$0xff] %v4742_v34  ;;  %v4746_v36 = vld [vmem:[%s6312_s17 + $0x188] sm:$0xff]  ;;  %v4748_v37 = vld [vmem:[%s6312_s17 + $0x190] sm:$0xff] }
 0x4d8   : >> { %4745 = vst [vmem:[%s6308_s12 + $0x180] sm:$0xff] %v4744_v35  ;;  %4747 = vst [vmem:[%s6308_s12 + $0x188] sm:$0xff] %v4746_v36  ;;  %v4750_v61 = vld [vmem:[%s6312_s17 + $0x198] sm:$0xff]  ;;  %v4752_v23 = vld [vmem:[%s6312_s17 + $0x1a0] sm:$0xff] }
 0x4d9   : >> { %4749 = vst [vmem:[%s6308_s12 + $0x190] sm:$0xff] %v4748_v37  ;;  %v4754_v62 = vld [vmem:[%s6312_s17 + $0x1a8] sm:$0xff]  ;;  %4751 = vst [vmem:[%s6308_s12 + $0x198] sm:$0xff] %v4750_v61  ;;  %v4756_v5 = vld [vmem:[%s6312_s17 + $0x1b0] sm:$0xff]  ;;  %4644 = sbr.rel (!%p4641_p12) target bundleno = 1215 (0x4bf), region = 149 }
 0x4da   : >> { %4753 = vst [vmem:[%s6308_s12 + $0x1a0] sm:$0xff] %v4752_v23  ;;  %4755 = vst [vmem:[%s6308_s12 + $0x1a8] sm:$0xff] %v4754_v62  ;;  %v4758_v46 = vld [vmem:[%s6312_s17 + $0x1b8] sm:$0xff]  ;;  %v4760_v33 = vld [vmem:[%s6312_s17 + $0x1c0] sm:$0xff] }
 0x4db   : >> { %4757 = vst [vmem:[%s6308_s12 + $0x1b0] sm:$0xff] %v4756_v5  ;;  %4759 = vst [vmem:[%s6308_s12 + $0x1b8] sm:$0xff] %v4758_v46  ;;  %v4762_v29 = vld [vmem:[%s6312_s17 + $0x1c8] sm:$0xff]  ;;  %v4764_v19 = vld [vmem:[%s6312_s17 + $0x1d0] sm:$0xff] }
 0x4dc   : >> { %4761 = vst [vmem:[%s6308_s12 + $0x1c0] sm:$0xff] %v4760_v33  ;;  %v4766_v21 = vld [vmem:[%s6312_s17 + $0x1d8] sm:$0xff]  ;;  %4763 = vst [vmem:[%s6308_s12 + $0x1c8] sm:$0xff] %v4762_v29  ;;  %v4768_v41 = vld [vmem:[%s6312_s17 + $0x1e0] sm:$0xff] }
 0x4dd   : >> { %4765 = vst [vmem:[%s6308_s12 + $0x1d0] sm:$0xff] %v4764_v19  ;;  %4767 = vst [vmem:[%s6308_s12 + $0x1d8] sm:$0xff] %v4766_v21  ;;  %v4770_v0 = vld [vmem:[%s6312_s17 + $0x1e8] sm:$0xff]  ;;  %v4772_v3 = vld [vmem:[%s6312_s17 + $0x1f0] sm:$0xff] }
 0x4de   : >> { %4769 = vst [vmem:[%s6308_s12 + $0x1e0] sm:$0xff] %v4768_v41  ;;  %4771 = vst [vmem:[%s6308_s12 + $0x1e8] sm:$0xff] %v4770_v0  ;;  %v4774_v24 = vld [vmem:[%s6312_s17 + $0x1f8] sm:$0xff]  ;;  %s7955_s17 = smov %s7788_s25 }
 0x4df   : >> { %4773 = vst [vmem:[%s6308_s12 + $0x1f0] sm:$0xff] %v4772_v3  ;;  %4775 = vst [vmem:[%s6308_s12 + $0x1f8] sm:$0xff] %v4774_v24  ;;  %s7954_s12 = smov %s7791_s26 }
 0x4e0 PF: > { %s7896_s27 = sand.u32 63, %s7961_s29   ;;  %s5098_s28 = sshll.u32 %s7721_s21, 9 }
 0x4e1   : > { %s4787_s11 = scalar_lea.vmem %s7516_s30, %s5098_s28 [#allocation3]   ;;  %s4789_s14 = scalar_lea.vmem %s7715_s18, %s5098_s28  }
 0x4e2   : > { %p5092_p13 = scmp.le.s32.totalorder %s7896_s27, 0 }
 0x4e3   : > { %s6322_s15 = smov (!%p5092_p13), %s4789_s14   ;;  %s6326_s19 = smov (!%p5092_p13), %s4787_s11  }
 0x4e4   : > { %4886 = sbr.rel (%p5092_p13) target bundleno = 1269 (0x4f5), region = 154  ;;  %s6330_s24 = smov (!%p5092_p13), 0  }
 0x4e5   : > { %s6334_s23 = smov (!%p5092_p13), 0  }
 0x4eb LB: >> { %v4799_v7 = vld [vmem:[%s6328_s19] sm:$0xff]  ;;  %s4801_s29 = sadd.s32 1, %s6332_s24  ;;  %s4793_s23 = sadd.s32 1, %s6336_s23   ;;  %s6336_s23 = sphi %s6334_s23, %s4793_s23   ;;  %s6332_s24 = sphi %s6330_s24, %s6331_s24   ;;  %s6328_s19 = sphi %s6326_s19, %s4806_s19   ;;  %s6324_s15 = sphi %s6322_s15, %s4807_s15  }
 0x4ec   : >> { %4800 = vst [vmem:[%s6324_s15] sm:$0xff] %v4799_v7  ;;  %p4802_p0 = scmp.ge.s32.totalorder %s4801_s29, %s7896_s27  ;;  %p4792_p1 = scmp.ge.s32.totalorder %s4793_s23, %s7896_s27 }
 0x4ee   : >> { %s7965_s29 = smov (%p4802_p0, %s4801_s29), 0  ;;  %4795 = sbr.rel (!%p4792_p1) target bundleno = 1259 (0x4eb), region = 160 }
 0x4ef   : >> { %s5093_s30 = sshll.u32 %s7965_s29, 3  ;;  %s6331_s24 = smov %s7965_s29  }
 0x4f0   : >> { %s4806_s19 = scalar_lea.vmem %s4787_s11, %s5093_s30 [#allocation3]   ;;  %s4807_s15 = scalar_lea.vmem %s4789_s14, %s5093_s30  }
 0x4f5 PF: > { %p16_p2 = scmp.ge.s32.totalorder %s6403_s13, 4   ;;  %s7957_s30 = smov %s6300_s10 }
 0x4f6   : > { %s7958_s10 = smov %s6411_s16  ;;  %s7959_s11 = smov %s6403_s13 }
 0x4f7   :  { %18 = sbr.rel (!%p16_p2) target bundleno = 2 (0x2), region = 171 }

</bundles_post_ra>
